<compile_context>
chip_gen: v7x
topology: tpu7x:2x2x1
jax: 0.10.0
libtpu: 0.0.40
codegen_flags: <defaults>
</compile_context>

<pallas_src>
import functools

import numpy as np
import jax
import jax.numpy as jnp
from jax import lax
from jax.experimental import pallas as pl
from jax.experimental.pallas import tpu as pltpu

BN_EPS = 1e-5
LRELU_SLOPE = 0.2
_TM_MAX = 512   # row tile: large enough to approach the HBM roofline
_LANE = 128


def _round_up(x, m):
    return (x + m - 1) // m * m


def _choose_row_tile(m):
    """Row tile TM and padded row count Mp with TM | Mp and TM % 8 == 0."""
    if m >= _TM_MAX:
        return _TM_MAX, _round_up(m, _TM_MAX)
    mp = _round_up(m, 8)
    return mp, mp


# --------------------------- Pallas kernels ---------------------------------


def _conv_act_kernel(a_ref, b_ref, o_ref, *, slope, do_act):
    # (TM, Kp) @ (Kp, Np) on the MXU (bf16 in, f32 accumulate), optional
    # LeakyReLU, cast to the output dtype on the single store.
    y = jnp.dot(a_ref[...], b_ref[...], preferred_element_type=jnp.float32)
    if do_act:
        y = jnp.maximum(y, slope * y)
    o_ref[...] = y.astype(o_ref.dtype)


def _conv_bn_act_kernel(a_ref, b_ref, g_ref, beta_ref, o_ref,
                        conv_sc, sum_sc, sq_sc, *, slope, m_rows):
    """Fused Conv(matmul) -> BatchNorm(batch stats) -> LeakyReLU.

    grid = (2, n_tiles): phase 0 computes conv tiles into VMEM scratch and
    accumulates per-channel sum / sum-of-squares; phase 1 re-derives
    scale/shift from the stats and writes the normalized+activated tiles.

    Correctness invariant: padded rows of the patch matrix are exactly zero,
    so they contribute nothing to the sums; the divisor is the true M.
    """
    ph = pl.program_id(0)
    i = pl.program_id(1)

    @pl.when(jnp.logical_and(ph == 0, i == 0))
    def _():
        sum_sc[...] = jnp.zeros_like(sum_sc)
        sq_sc[...] = jnp.zeros_like(sq_sc)

    @pl.when(ph == 0)
    def _():
        y = jnp.dot(a_ref[...], b_ref[...], preferred_element_type=jnp.float32)
        conv_sc[i] = y
        sum_sc[...] += jnp.sum(y, axis=0, keepdims=True)
        sq_sc[...] += jnp.sum(y * y, axis=0, keepdims=True)
        # Placeholder store (overwritten by phase 1) keeps the automatic
        # write-back of this output block deterministic.
        o_ref[...] = y.astype(o_ref.dtype)

    @pl.when(ph == 1)
    def _():
        inv_m = 1.0 / m_rows
        mean = sum_sc[...] * inv_m
        var = jnp.maximum(sq_sc[...] * inv_m - mean * mean, 0.0)  # clamp f32 cancellation
        scale = g_ref[...] * lax.rsqrt(var + BN_EPS)
        shift = beta_ref[...] - mean * scale
        y = conv_sc[i] * scale + shift            # f32 math; bf16 only on store
        o_ref[...] = jnp.maximum(y, slope * y).astype(o_ref.dtype)


# --------------------------- Pallas wrappers ---------------------------------


def conv_act_pallas(a_p, b_p, do_act, tm, out_dtype):
    mp, kp = a_p.shape
    np_ = b_p.shape[1]
    kern = functools.partial(_conv_act_kernel, slope=LRELU_SLOPE, do_act=do_act)
    return pl.pallas_call(
        kern,
        out_shape=jax.ShapeDtypeStruct((mp, np_), out_dtype),
        grid=(mp // tm,),
        in_specs=[pl.BlockSpec((tm, kp), lambda i: (i, 0)),
                  pl.BlockSpec((kp, np_), lambda i: (0, 0))],
        out_specs=pl.BlockSpec((tm, np_), lambda i: (i, 0)),
        compiler_params=pltpu.CompilerParams(
            dimension_semantics=("parallel",)),
    )(a_p, b_p)


def conv_bn_act_pallas(a_p, b_p, g_pad, beta_pad, m_rows, tm, out_dtype):
    mp, kp = a_p.shape
    np_ = b_p.shape[1]
    n_tiles = mp // tm
    kern = functools.partial(_conv_bn_act_kernel,
                             slope=LRELU_SLOPE, m_rows=float(m_rows))
    return pl.pallas_call(
        kern,
        out_shape=jax.ShapeDtypeStruct((mp, np_), out_dtype),
        grid=(2, n_tiles),
        in_specs=[
            # Patches are only needed in phase 0; pin phase 1 to block 0 so the
            # pipeline skips redundant re-fetches.
            pl.BlockSpec((tm, kp), lambda ph, i: ((1 - ph) * i, 0)),
            pl.BlockSpec((kp, np_), lambda ph, i: (0, 0)),
            pl.BlockSpec((1, np_), lambda ph, i: (0, 0)),
            pl.BlockSpec((1, np_), lambda ph, i: (0, 0)),
        ],
        out_specs=pl.BlockSpec((tm, np_), lambda ph, i: (i, 0)),
        scratch_shapes=[pltpu.VMEM((n_tiles, tm, np_), jnp.float32),
                        pltpu.VMEM((1, np_), jnp.float32),
                        pltpu.VMEM((1, np_), jnp.float32)],
        # Stats accumulation makes both grid axes reductions (single TC).
        # TODO(synk): on v7x at much larger M, add a config switch that splits
        # the matmul ("parallel" across 2 TCs) from a small stats kernel.
        compiler_params=pltpu.CompilerParams(
            dimension_semantics=("arbitrary", "arbitrary")),
    )(a_p, b_p, g_pad, beta_pad)


# --------------------------- layer glue --------------------------------------


def _im2col(x, k, stride, pad):
    """x: (N, H, W, C) -> patches (N*Ho*Wo, k*k*C) in (kh, kw, Cin) order."""
    # TODO(synk): at realistic sizes, avoid materializing the k*k-expanded patch
    # matrix in HBM (add a (kh,kw) reduction grid axis indexing strided slices).
    N, H, W, C = x.shape
    xp = jnp.pad(x, ((0, 0), (pad, pad), (pad, pad), (0, 0)))
    Ho = (H + 2 * pad - k) // stride + 1
    Wo = (W + 2 * pad - k) // stride + 1
    cols = []
    for i in range(k):
        for j in range(k):
            cols.append(lax.slice(
                xp, (0, i, j, 0),
                (N, i + stride * (Ho - 1) + 1, j + stride * (Wo - 1) + 1, C),
                (1, stride, stride, 1)))
    patches = jnp.concatenate(cols, axis=-1)            # (N, Ho, Wo, k*k*C)
    return patches.reshape(N * Ho * Wo, k * k * C), Ho, Wo


def _conv_block(x, P, L):
    N = x.shape[0]
    cout = L["cout"]
    patches, Ho, Wo = _im2col(x, L["k"], L["s"], L["p"])
    M, K = patches.shape
    tm, mp = _choose_row_tile(M)
    kp, np_ = P["wmat"].shape
    # Row/lane padding is zero -> BN statistics over padded rows stay exact.
    a_p = jnp.pad(patches, ((0, mp - M), (0, kp - K))).astype(jnp.bfloat16)
    # Inter-layer activations stored in bf16 (halves HBM traffic); logits f32.
    out_dtype = jnp.bfloat16 if (L["bn"] or L["act"]) else jnp.float32
    if L["bn"]:
        out_p = conv_bn_act_pallas(a_p, P["wmat"], P["gamma"], P["beta"],
                                   M, tm, out_dtype)
    else:
        out_p = conv_act_pallas(a_p, P["wmat"], L["act"], tm, out_dtype)
    return out_p[:M, :cout].reshape(N, Ho, Wo, cout)


def make_layer_cfg(nc, ndf):
    return [
        dict(cin=nc,       cout=ndf,       k=4, s=2, p=1, bn=False, act=True),
        dict(cin=ndf,      cout=ndf * 2,   k=6, s=2, p=2, bn=True,  act=True),
        dict(cin=ndf * 2,  cout=ndf * 4,   k=6, s=2, p=2, bn=True,  act=True),
        dict(cin=ndf * 4,  cout=ndf * 8,   k=6, s=2, p=2, bn=True,  act=True),
        dict(cin=ndf * 8,  cout=ndf * 10,  k=6, s=2, p=2, bn=True,  act=True),
        dict(cin=ndf * 10, cout=1,         k=4, s=1, p=0, bn=False, act=False),
    ]


def init_params(key, cfg):
    # Deterministic synthetic init: conv weights ~ N(0, 0.02), BN gamma=1, beta=0.
    params = []
    for L in cfg:
        key, sub = jax.random.split(key)
        w = 0.02 * jax.random.normal(
            sub, (L["cout"], L["cin"], L["k"], L["k"]), jnp.float32)
        params.append(dict(w=w,
                           gamma=jnp.ones((L["cout"],), jnp.float32),
                           beta=jnp.zeros((L["cout"],), jnp.float32)))
    return params


def prepare_params(params, cfg):
    """Hoist static work (weight transpose/reshape/pad, bf16 cast, gamma/beta
    padding) out of the forward path."""
    prepped = []
    for L, P in zip(cfg, params):
        k, cin, cout = L["k"], L["cin"], L["cout"]
        kk = k * k * cin
        kp = _round_up(kk, _LANE)
        np_ = _round_up(cout, _LANE)
        # PyTorch OIHW -> (kh, kw, Cin, Cout) -> (k*k*Cin, Cout); matches the
        # (kh, kw, C) patch ordering of _im2col.
        wmat = jnp.transpose(P["w"], (2, 3, 1, 0)).reshape(kk, cout)
        wmat = jnp.pad(wmat, ((0, kp - kk), (0, np_ - cout))).astype(jnp.bfloat16)
        g = jnp.pad(P["gamma"], (0, np_ - cout)).reshape(1, np_)
        b = jnp.pad(P["beta"], (0, np_ - cout)).reshape(1, np_)
        prepped.append(dict(wmat=wmat, gamma=g, beta=b))
    return prepped


def discriminator_forward(x_nchw, prepped, cfg):
    h = jnp.transpose(x_nchw, (0, 2, 3, 1)).astype(jnp.bfloat16)  # NCHW -> NHWC
    for L, P in zip(cfg, prepped):
        h = _conv_block(h, P, L)
    return jnp.transpose(h, (0, 3, 1, 2)).astype(jnp.float32)     # -> NCHW


# --------------------------- pure-JAX reference -------------------------------


def reference_forward(x_nchw, params, cfg):
    h = x_nchw.astype(jnp.float32)
    for L, P in zip(cfg, params):
        h = lax.conv_general_dilated(
            h, P["w"], (L["s"], L["s"]),
            [(L["p"], L["p"]), (L["p"], L["p"])],
            dimension_numbers=("NCHW", "OIHW", "NCHW"))
        if L["bn"]:
            mean = jnp.mean(h, axis=(0, 2, 3), keepdims=True)
            var = jnp.mean((h - mean) ** 2, axis=(0, 2, 3), keepdims=True)
            g = P["gamma"].reshape(1, -1, 1, 1)
            b = P["beta"].reshape(1, -1, 1, 1)
            h = g * (h - mean) * lax.rsqrt(var + BN_EPS) + b
        if L["act"]:
            h = jnp.where(h >= 0, h, LRELU_SLOPE * h)
    return h


if __name__ == "__main__":
    # Small channel counts; spatial must be 128 so the six strided convs reach
    # the 4x4 map required by the final 4x4 valid conv (128->64->32->16->8->4->1).
    ngpu, ndf, nc = 1, 4, 3
    N, S = 2, 128

    key = jax.random.PRNGKey(0)
    kx, kparam = jax.random.split(key)
    x = jax.random.normal(kx, (N, nc, S, S), jnp.float32)

    cfg = make_layer_cfg(nc, ndf)
    params = init_params(kparam, cfg)
    prepped = prepare_params(params, cfg)

    fwd = jax.jit(functools.partial(discriminator_forward, cfg=cfg))
    out = jax.block_until_ready(fwd(x, prepped))
    assert out.shape == (N, 1, 1, 1), out.shape

    ref = jax.block_until_ready(reference_forward(x, params, cfg))
    # bf16 MXU inputs / inter-layer activations (f32 accumulation and BN math)
    # vs. the all-f32 reference -> loosened tolerance.
    np.testing.assert_allclose(np.asarray(out), np.asarray(ref),
                               rtol=1e-1, atol=5e-2)
    print("KERNEL_OK")
</pallas_src>

<mosaic_0001>
module attributes {stable_mosaic.version = 11 : i64} {
  func.func @_conv_act_kernel(%arg0: i32, %arg1: memref<512x128xbf16, #tpu.memory_space<vmem>>, %arg2: memref<128x128xbf16, #tpu.memory_space<vmem>>, %arg3: memref<512x128xbf16, #tpu.memory_space<vmem>>) attributes {dimension_semantics = [#tpu.dimension_semantics<parallel>], iteration_bounds = array<i64: 16>, scalar_prefetch = 0 : i64, scratch_operands = 0 : i64, tpu.core_type = #tpu.core_type<tc>, window_params = [{transform_indices = @transform_0, window_bounds = array<i64: 512, 128>}, {pipeline_mode = #tpu.pipeline_mode<synchronous>, transform_indices = @transform_1, window_bounds = array<i64: 128, 128>}, {transform_indices = @transform_2, window_bounds = array<i64: 512, 128>}]} {
    %c0 = arith.constant 0 : index
    %c0_0 = arith.constant 0 : index
    %0 = vector.load %arg1[%c0, %c0_0] : memref<512x128xbf16, #tpu.memory_space<vmem>>, vector<512x128xbf16>
    %c0_1 = arith.constant 0 : index
    %c0_2 = arith.constant 0 : index
    %1 = vector.load %arg2[%c0_1, %c0_2] : memref<128x128xbf16, #tpu.memory_space<vmem>>, vector<128x128xbf16>
    %cst = arith.constant dense<0.000000e+00> : vector<512x128xf32>
    %2 = tpu.matmul %0, %1, %cst {dimension_numbers = #tpu.dot_dimension_numbers<[1], [0], [0], [1], [0, 0, 1, 1], [], []>} : vector<512x128xbf16>, vector<128x128xbf16>, vector<512x128xf32> -> vector<512x128xf32>
    %cst_3 = arith.constant 2.000000e-01 : f32
    %3 = vector.broadcast %cst_3 : f32 to vector<512x128xf32>
    %4 = arith.mulf %3, %2 : vector<512x128xf32>
    %5 = arith.maximumf %2, %4 : vector<512x128xf32>
    %6 = arith.truncf %5 : vector<512x128xf32> to vector<512x128xbf16>
    %c0_4 = arith.constant 0 : index
    %c0_5 = arith.constant 0 : index
    %7 = vector.load %arg3[%c0_4, %c0_5] : memref<512x128xbf16, #tpu.memory_space<vmem>>, vector<512x128xbf16>
    tpu.vector_store %arg3[%c0_4, %c0_5], %6 {strides = array<i32>} : memref<512x128xbf16, #tpu.memory_space<vmem>>, vector<512x128xbf16>,
    return
  }
  func.func @transform_0(%arg0: i32) -> (i32, i32) {
    %c0_i32 = arith.constant 0 : i32
    %c0_i32_0 = arith.constant 0 : i32
    return %arg0, %c0_i32 : i32, i32
  }
  func.func @transform_1(%arg0: i32) -> (i32, i32) {
    %c0_i32 = arith.constant 0 : i32
    %c0_i32_0 = arith.constant 0 : i32
    %c0_i32_1 = arith.constant 0 : i32
    return %c0_i32, %c0_i32_0 : i32, i32
  }
  func.func @transform_2(%arg0: i32) -> (i32, i32) {
    %c0_i32 = arith.constant 0 : i32
    %c0_i32_0 = arith.constant 0 : i32
    return %arg0, %c0_i32 : i32, i32
  }
}

module attributes {stable_mosaic.version = 11 : i64} {
  func.func @_conv_bn_act_kernel(%arg0: i32, %arg1: i32, %arg2: memref<512x256xbf16, #tpu.memory_space<vmem>>, %arg3: memref<256x128xbf16, #tpu.memory_space<vmem>>, %arg4: memref<1x128xf32, #tpu.memory_space<vmem>>, %arg5: memref<1x128xf32, #tpu.memory_space<vmem>>, %arg6: memref<512x128xbf16, #tpu.memory_space<vmem>>, %arg7: memref<4x512x128xf32, #tpu.memory_space<vmem>>, %arg8: memref<1x128xf32, #tpu.memory_space<vmem>>, %arg9: memref<1x128xf32, #tpu.memory_space<vmem>>) attributes {dimension_semantics = [#tpu.dimension_semantics<arbitrary>, #tpu.dimension_semantics<arbitrary>], iteration_bounds = array<i64: 2, 4>, scalar_prefetch = 0 : i64, scratch_operands = 3 : i64, tpu.core_type = #tpu.core_type<tc>, window_params = [{transform_indices = @transform_0, window_bounds = array<i64: 512, 256>}, {pipeline_mode = #tpu.pipeline_mode<synchronous>, transform_indices = @transform_1, window_bounds = array<i64: 256, 128>}, {pipeline_mode = #tpu.pipeline_mode<synchronous>, transform_indices = @transform_2, window_bounds = array<i64: 1, 128>}, {pipeline_mode = #tpu.pipeline_mode<synchronous>, transform_indices = @transform_3, window_bounds = array<i64: 1, 128>}, {transform_indices = @transform_4, window_bounds = array<i64: 512, 128>}]} {
    %c0_i32 = arith.constant 0 : i32
    %0 = arith.cmpi eq, %arg0, %c0_i32 : i32
    %c0_i32_0 = arith.constant 0 : i32
    %1 = arith.cmpi eq, %arg1, %c0_i32_0 : i32
    %2 = arith.andi %0, %1 : i1
    %3 = arith.extui %2 : i1 to i32
    %c0_i32_1 = arith.constant 0 : i32
    %4 = arith.cmpi ne, %3, %c0_i32_1 : i32
    scf.if %4 {
      %cst = arith.constant 0.000000e+00 : f32
      %11 = vector.broadcast %cst : f32 to vector<1x128xf32>
      %c0 = arith.constant 0 : index
      %c0_5 = arith.constant 0 : index
      %12 = vector.load %arg8[%c0, %c0_5] : memref<1x128xf32, #tpu.memory_space<vmem>>, vector<1x128xf32>
      tpu.vector_store %arg8[%c0, %c0_5], %11 {strides = array<i32>} : memref<1x128xf32, #tpu.memory_space<vmem>>, vector<1x128xf32>,
      %cst_6 = arith.constant 0.000000e+00 : f32
      %13 = vector.broadcast %cst_6 : f32 to vector<1x128xf32>
      %c0_7 = arith.constant 0 : index
      %c0_8 = arith.constant 0 : index
      %14 = vector.load %arg9[%c0_7, %c0_8] : memref<1x128xf32, #tpu.memory_space<vmem>>, vector<1x128xf32>
      tpu.vector_store %arg9[%c0_7, %c0_8], %13 {strides = array<i32>} : memref<1x128xf32, #tpu.memory_space<vmem>>, vector<1x128xf32>,
    } else {
    }
    %c0_i32_2 = arith.constant 0 : i32
    %5 = arith.cmpi eq, %arg0, %c0_i32_2 : i32
    %6 = arith.extui %5 : i1 to i32
    %c0_i32_3 = arith.constant 0 : i32
    %7 = arith.cmpi ne, %6, %c0_i32_3 : i32
    scf.if %7 {
      %c0 = arith.constant 0 : index
      %c0_5 = arith.constant 0 : index
      %11 = vector.load %arg2[%c0, %c0_5] : memref<512x256xbf16, #tpu.memory_space<vmem>>, vector<512x256xbf16>
      %c0_6 = arith.constant 0 : index
      %c0_7 = arith.constant 0 : index
      %12 = vector.load %arg3[%c0_6, %c0_7] : memref<256x128xbf16, #tpu.memory_space<vmem>>, vector<256x128xbf16>
      %cst = arith.constant dense<0.000000e+00> : vector<512x128xf32>
      %13 = tpu.matmul %11, %12, %cst {dimension_numbers = #tpu.dot_dimension_numbers<[1], [0], [0], [1], [0, 0, 1, 1], [], []>} : vector<512x256xbf16>, vector<256x128xbf16>, vector<512x128xf32> -> vector<512x128xf32>
      %14 = arith.index_cast %arg1 : i32 to index
      %c0_8 = arith.constant 0 : index
      %c0_9 = arith.constant 0 : index
      %15 = vector.load %arg7[%14, %c0_8, %c0_9] : memref<4x512x128xf32, #tpu.memory_space<vmem>>, vector<1x512x128xf32>
      %16 = vector.shape_cast %15 : vector<1x512x128xf32> to vector<512x128xf32>
      %17 = vector.shape_cast %13 : vector<512x128xf32> to vector<1x512x128xf32>
      tpu.vector_store %arg7[%14, %c0_8, %c0_9], %17 {strides = array<i32>} : memref<4x512x128xf32, #tpu.memory_space<vmem>>, vector<1x512x128xf32>,
      %c0_10 = arith.constant 0 : index
      %c0_11 = arith.constant 0 : index
      %18 = vector.load %arg8[%c0_10, %c0_11] : memref<1x128xf32, #tpu.memory_space<vmem>>, vector<1x128xf32>
      %cst_12 = arith.constant dense<0.000000e+00> : vector<128xf32>
      %19 = vector.multi_reduction <add>, %13, %cst_12 [0] : vector<512x128xf32> to vector<128xf32>
      %20 = vector.shape_cast %19 : vector<128xf32> to vector<1x128xf32>
      %21 = arith.addf %18, %20 : vector<1x128xf32>
      %c0_13 = arith.constant 0 : index
      %c0_14 = arith.constant 0 : index
      %22 = vector.load %arg8[%c0_13, %c0_14] : memref<1x128xf32, #tpu.memory_space<vmem>>, vector<1x128xf32>
      tpu.vector_store %arg8[%c0_13, %c0_14], %21 {strides = array<i32>} : memref<1x128xf32, #tpu.memory_space<vmem>>, vector<1x128xf32>,
      %c0_15 = arith.constant 0 : index
      %c0_16 = arith.constant 0 : index
      %23 = vector.load %arg9[%c0_15, %c0_16] : memref<1x128xf32, #tpu.memory_space<vmem>>, vector<1x128xf32>
      %24 = arith.mulf %13, %13 : vector<512x128xf32>
      %cst_17 = arith.constant dense<0.000000e+00> : vector<128xf32>
      %25 = vector.multi_reduction <add>, %24, %cst_17 [0] : vector<512x128xf32> to vector<128xf32>
      %26 = vector.shape_cast %25 : vector<128xf32> to vector<1x128xf32>
      %27 = arith.addf %23, %26 : vector<1x128xf32>
      %c0_18 = arith.constant 0 : index
      %c0_19 = arith.constant 0 : index
      %28 = vector.load %arg9[%c0_18, %c0_19] : memref<1x128xf32, #tpu.memory_space<vmem>>, vector<1x128xf32>
      tpu.vector_store %arg9[%c0_18, %c0_19], %27 {strides = array<i32>} : memref<1x128xf32, #tpu.memory_space<vmem>>, vector<1x128xf32>,
      %29 = arith.truncf %13 : vector<512x128xf32> to vector<512x128xbf16>
      %c0_20 = arith.constant 0 : index
      %c0_21 = arith.constant 0 : index
      %30 = vector.load %arg6[%c0_20, %c0_21] : memref<512x128xbf16, #tpu.memory_space<vmem>>, vector<512x128xbf16>
      tpu.vector_store %arg6[%c0_20, %c0_21], %29 {strides = array<i32>} : memref<512x128xbf16, #tpu.memory_space<vmem>>, vector<512x128xbf16>,
    } else {
    }
    %c1_i32 = arith.constant 1 : i32
    %8 = arith.cmpi eq, %arg0, %c1_i32 : i32
    %9 = arith.extui %8 : i1 to i32
    %c0_i32_4 = arith.constant 0 : i32
    %10 = arith.cmpi ne, %9, %c0_i32_4 : i32
    scf.if %10 {
      %c0 = arith.constant 0 : index
      %c0_5 = arith.constant 0 : index
      %11 = vector.load %arg8[%c0, %c0_5] : memref<1x128xf32, #tpu.memory_space<vmem>>, vector<1x128xf32>
      %cst = arith.constant 4.8828125E-4 : f32
      %12 = vector.broadcast %cst : f32 to vector<1x128xf32>
      %13 = arith.mulf %11, %12 : vector<1x128xf32>
      %c0_6 = arith.constant 0 : index
      %c0_7 = arith.constant 0 : index
      %14 = vector.load %arg9[%c0_6, %c0_7] : memref<1x128xf32, #tpu.memory_space<vmem>>, vector<1x128xf32>
      %cst_8 = arith.constant 4.8828125E-4 : f32
      %15 = vector.broadcast %cst_8 : f32 to vector<1x128xf32>
      %16 = arith.mulf %14, %15 : vector<1x128xf32>
      %17 = arith.mulf %13, %13 : vector<1x128xf32>
      %18 = arith.subf %16, %17 : vector<1x128xf32>
      %cst_9 = arith.constant 0.000000e+00 : f32
      %19 = vector.broadcast %cst_9 : f32 to vector<1x128xf32>
      %20 = arith.maximumf %18, %19 : vector<1x128xf32>
      %c0_10 = arith.constant 0 : index
      %c0_11 = arith.constant 0 : index
      %21 = vector.load %arg4[%c0_10, %c0_11] : memref<1x128xf32, #tpu.memory_space<vmem>>, vector<1x128xf32>
      %cst_12 = arith.constant 9.99999974E-6 : f32
      %22 = vector.broadcast %cst_12 : f32 to vector<1x128xf32>
      %23 = arith.addf %20, %22 : vector<1x128xf32>
      %24 = math.rsqrt %23 : vector<1x128xf32>
      %25 = arith.mulf %21, %24 : vector<1x128xf32>
      %c0_13 = arith.constant 0 : index
      %c0_14 = arith.constant 0 : index
      %26 = vector.load %arg5[%c0_13, %c0_14] : memref<1x128xf32, #tpu.memory_space<vmem>>, vector<1x128xf32>
      %27 = arith.mulf %13, %25 : vector<1x128xf32>
      %28 = arith.subf %26, %27 : vector<1x128xf32>
      %29 = arith.index_cast %arg1 : i32 to index
      %c0_15 = arith.constant 0 : index
      %c0_16 = arith.constant 0 : index
      %30 = vector.load %arg7[%29, %c0_15, %c0_16] : memref<4x512x128xf32, #tpu.memory_space<vmem>>, vector<1x512x128xf32>
      %31 = vector.shape_cast %30 : vector<1x512x128xf32> to vector<512x128xf32>
      %32 = vector.broadcast %25 : vector<1x128xf32> to vector<512x128xf32>
      %33 = arith.mulf %31, %32 : vector<512x128xf32>
      %34 = vector.broadcast %28 : vector<1x128xf32> to vector<512x128xf32>
      %35 = arith.addf %33, %34 : vector<512x128xf32>
      %cst_17 = arith.constant 2.000000e-01 : f32
      %36 = vector.broadcast %cst_17 : f32 to vector<512x128xf32>
      %37 = arith.mulf %36, %35 : vector<512x128xf32>
      %38 = arith.maximumf %35, %37 : vector<512x128xf32>
      %39 = arith.truncf %38 : vector<512x128xf32> to vector<512x128xbf16>
      %c0_18 = arith.constant 0 : index
      %c0_19 = arith.constant 0 : index
      %40 = vector.load %arg6[%c0_18, %c0_19] : memref<512x128xbf16, #tpu.memory_space<vmem>>, vector<512x128xbf16>
      tpu.vector_store %arg6[%c0_18, %c0_19], %39 {strides = array<i32>} : memref<512x128xbf16, #tpu.memory_space<vmem>>, vector<512x128xbf16>,
    } else {
    }
    return
  }
  func.func @transform_0(%arg0: i32, %arg1: i32) -> (i32, i32) {
    %c1_i32 = arith.constant 1 : i32
    %0 = arith.subi %c1_i32, %arg0 : i32
    %1 = arith.muli %0, %arg1 : i32
    %c0_i32 = arith.constant 0 : i32
    %c0_i32_0 = arith.constant 0 : i32
    return %1, %c0_i32 : i32, i32
  }
  func.func @transform_1(%arg0: i32, %arg1: i32) -> (i32, i32) {
    %c0_i32 = arith.constant 0 : i32
    %c0_i32_0 = arith.constant 0 : i32
    %c0_i32_1 = arith.constant 0 : i32
    return %c0_i32, %c0_i32_0 : i32, i32
  }
  func.func @transform_2(%arg0: i32, %arg1: i32) -> (i32, i32) {
    %c0_i32 = arith.constant 0 : i32
    %c0_i32_0 = arith.constant 0 : i32
    %c0_i32_1 = arith.constant 0 : i32
    return %c0_i32, %c0_i32_0 : i32, i32
  }
  func.func @transform_3(%arg0: i32, %arg1: i32) -> (i32, i32) {
    %c0_i32 = arith.constant 0 : i32
    %c0_i32_0 = arith.constant 0 : i32
    %c0_i32_1 = arith.constant 0 : i32
    return %c0_i32, %c0_i32_0 : i32, i32
  }
  func.func @transform_4(%arg0: i32, %arg1: i32) -> (i32, i32) {
    %c0_i32 = arith.constant 0 : i32
    %c0_i32_0 = arith.constant 0 : i32
    return %arg1, %c0_i32 : i32, i32
  }
}

module attributes {stable_mosaic.version = 11 : i64} {
  func.func @_conv_bn_act_kernel(%arg0: i32, %arg1: i32, %arg2: memref<512x384xbf16, #tpu.memory_space<vmem>>, %arg3: memref<384x128xbf16, #tpu.memory_space<vmem>>, %arg4: memref<1x128xf32, #tpu.memory_space<vmem>>, %arg5: memref<1x128xf32, #tpu.memory_space<vmem>>, %arg6: memref<512x128xbf16, #tpu.memory_space<vmem>>, %arg7: memref<1x512x128xf32, #tpu.memory_space<vmem>>, %arg8: memref<1x128xf32, #tpu.memory_space<vmem>>, %arg9: memref<1x128xf32, #tpu.memory_space<vmem>>) attributes {dimension_semantics = [#tpu.dimension_semantics<arbitrary>, #tpu.dimension_semantics<arbitrary>], iteration_bounds = array<i64: 2, 1>, scalar_prefetch = 0 : i64, scratch_operands = 3 : i64, tpu.core_type = #tpu.core_type<tc>, window_params = [{transform_indices = @transform_0, window_bounds = array<i64: 512, 384>}, {pipeline_mode = #tpu.pipeline_mode<synchronous>, transform_indices = @transform_1, window_bounds = array<i64: 384, 128>}, {pipeline_mode = #tpu.pipeline_mode<synchronous>, transform_indices = @transform_2, window_bounds = array<i64: 1, 128>}, {pipeline_mode = #tpu.pipeline_mode<synchronous>, transform_indices = @transform_3, window_bounds = array<i64: 1, 128>}, {transform_indices = @transform_4, window_bounds = array<i64: 512, 128>}]} {
    %c0_i32 = arith.constant 0 : i32
    %0 = arith.cmpi eq, %arg0, %c0_i32 : i32
    %c0_i32_0 = arith.constant 0 : i32
    %1 = arith.cmpi eq, %arg1, %c0_i32_0 : i32
    %2 = arith.andi %0, %1 : i1
    %3 = arith.extui %2 : i1 to i32
    %c0_i32_1 = arith.constant 0 : i32
    %4 = arith.cmpi ne, %3, %c0_i32_1 : i32
    scf.if %4 {
      %cst = arith.constant 0.000000e+00 : f32
      %11 = vector.broadcast %cst : f32 to vector<1x128xf32>
      %c0 = arith.constant 0 : index
      %c0_5 = arith.constant 0 : index
      %12 = vector.load %arg8[%c0, %c0_5] : memref<1x128xf32, #tpu.memory_space<vmem>>, vector<1x128xf32>
      tpu.vector_store %arg8[%c0, %c0_5], %11 {strides = array<i32>} : memref<1x128xf32, #tpu.memory_space<vmem>>, vector<1x128xf32>,
      %cst_6 = arith.constant 0.000000e+00 : f32
      %13 = vector.broadcast %cst_6 : f32 to vector<1x128xf32>
      %c0_7 = arith.constant 0 : index
      %c0_8 = arith.constant 0 : index
      %14 = vector.load %arg9[%c0_7, %c0_8] : memref<1x128xf32, #tpu.memory_space<vmem>>, vector<1x128xf32>
      tpu.vector_store %arg9[%c0_7, %c0_8], %13 {strides = array<i32>} : memref<1x128xf32, #tpu.memory_space<vmem>>, vector<1x128xf32>,
    } else {
    }
    %c0_i32_2 = arith.constant 0 : i32
    %5 = arith.cmpi eq, %arg0, %c0_i32_2 : i32
    %6 = arith.extui %5 : i1 to i32
    %c0_i32_3 = arith.constant 0 : i32
    %7 = arith.cmpi ne, %6, %c0_i32_3 : i32
    scf.if %7 {
      %c0 = arith.constant 0 : index
      %c0_5 = arith.constant 0 : index
      %11 = vector.load %arg2[%c0, %c0_5] : memref<512x384xbf16, #tpu.memory_space<vmem>>, vector<512x384xbf16>
      %c0_6 = arith.constant 0 : index
      %c0_7 = arith.constant 0 : index
      %12 = vector.load %arg3[%c0_6, %c0_7] : memref<384x128xbf16, #tpu.memory_space<vmem>>, vector<384x128xbf16>
      %cst = arith.constant dense<0.000000e+00> : vector<512x128xf32>
      %13 = tpu.matmul %11, %12, %cst {dimension_numbers = #tpu.dot_dimension_numbers<[1], [0], [0], [1], [0, 0, 1, 1], [], []>} : vector<512x384xbf16>, vector<384x128xbf16>, vector<512x128xf32> -> vector<512x128xf32>
      %14 = arith.index_cast %arg1 : i32 to index
      %c0_8 = arith.constant 0 : index
      %c0_9 = arith.constant 0 : index
      %15 = vector.load %arg7[%14, %c0_8, %c0_9] : memref<1x512x128xf32, #tpu.memory_space<vmem>>, vector<1x512x128xf32>
      %16 = vector.shape_cast %15 : vector<1x512x128xf32> to vector<512x128xf32>
      %17 = vector.shape_cast %13 : vector<512x128xf32> to vector<1x512x128xf32>
      tpu.vector_store %arg7[%14, %c0_8, %c0_9], %17 {strides = array<i32>} : memref<1x512x128xf32, #tpu.memory_space<vmem>>, vector<1x512x128xf32>,
      %c0_10 = arith.constant 0 : index
      %c0_11 = arith.constant 0 : index
      %18 = vector.load %arg8[%c0_10, %c0_11] : memref<1x128xf32, #tpu.memory_space<vmem>>, vector<1x128xf32>
      %cst_12 = arith.constant dense<0.000000e+00> : vector<128xf32>
      %19 = vector.multi_reduction <add>, %13, %cst_12 [0] : vector<512x128xf32> to vector<128xf32>
      %20 = vector.shape_cast %19 : vector<128xf32> to vector<1x128xf32>
      %21 = arith.addf %18, %20 : vector<1x128xf32>
      %c0_13 = arith.constant 0 : index
      %c0_14 = arith.constant 0 : index
      %22 = vector.load %arg8[%c0_13, %c0_14] : memref<1x128xf32, #tpu.memory_space<vmem>>, vector<1x128xf32>
      tpu.vector_store %arg8[%c0_13, %c0_14], %21 {strides = array<i32>} : memref<1x128xf32, #tpu.memory_space<vmem>>, vector<1x128xf32>,
      %c0_15 = arith.constant 0 : index
      %c0_16 = arith.constant 0 : index
      %23 = vector.load %arg9[%c0_15, %c0_16] : memref<1x128xf32, #tpu.memory_space<vmem>>, vector<1x128xf32>
      %24 = arith.mulf %13, %13 : vector<512x128xf32>
      %cst_17 = arith.constant dense<0.000000e+00> : vector<128xf32>
      %25 = vector.multi_reduction <add>, %24, %cst_17 [0] : vector<512x128xf32> to vector<128xf32>
      %26 = vector.shape_cast %25 : vector<128xf32> to vector<1x128xf32>
      %27 = arith.addf %23, %26 : vector<1x128xf32>
      %c0_18 = arith.constant 0 : index
      %c0_19 = arith.constant 0 : index
      %28 = vector.load %arg9[%c0_18, %c0_19] : memref<1x128xf32, #tpu.memory_space<vmem>>, vector<1x128xf32>
      tpu.vector_store %arg9[%c0_18, %c0_19], %27 {strides = array<i32>} : memref<1x128xf32, #tpu.memory_space<vmem>>, vector<1x128xf32>,
      %29 = arith.truncf %13 : vector<512x128xf32> to vector<512x128xbf16>
      %c0_20 = arith.constant 0 : index
      %c0_21 = arith.constant 0 : index
      %30 = vector.load %arg6[%c0_20, %c0_21] : memref<512x128xbf16, #tpu.memory_space<vmem>>, vector<512x128xbf16>
      tpu.vector_store %arg6[%c0_20, %c0_21], %29 {strides = array<i32>} : memref<512x128xbf16, #tpu.memory_space<vmem>>, vector<512x128xbf16>,
    } else {
    }
    %c1_i32 = arith.constant 1 : i32
    %8 = arith.cmpi eq, %arg0, %c1_i32 : i32
    %9 = arith.extui %8 : i1 to i32
    %c0_i32_4 = arith.constant 0 : i32
    %10 = arith.cmpi ne, %9, %c0_i32_4 : i32
    scf.if %10 {
      %c0 = arith.constant 0 : index
      %c0_5 = arith.constant 0 : index
      %11 = vector.load %arg8[%c0, %c0_5] : memref<1x128xf32, #tpu.memory_space<vmem>>, vector<1x128xf32>
      %cst = arith.constant 0.001953125 : f32
      %12 = vector.broadcast %cst : f32 to vector<1x128xf32>
      %13 = arith.mulf %11, %12 : vector<1x128xf32>
      %c0_6 = arith.constant 0 : index
      %c0_7 = arith.constant 0 : index
      %14 = vector.load %arg9[%c0_6, %c0_7] : memref<1x128xf32, #tpu.memory_space<vmem>>, vector<1x128xf32>
      %cst_8 = arith.constant 0.001953125 : f32
      %15 = vector.broadcast %cst_8 : f32 to vector<1x128xf32>
      %16 = arith.mulf %14, %15 : vector<1x128xf32>
      %17 = arith.mulf %13, %13 : vector<1x128xf32>
      %18 = arith.subf %16, %17 : vector<1x128xf32>
      %cst_9 = arith.constant 0.000000e+00 : f32
      %19 = vector.broadcast %cst_9 : f32 to vector<1x128xf32>
      %20 = arith.maximumf %18, %19 : vector<1x128xf32>
      %c0_10 = arith.constant 0 : index
      %c0_11 = arith.constant 0 : index
      %21 = vector.load %arg4[%c0_10, %c0_11] : memref<1x128xf32, #tpu.memory_space<vmem>>, vector<1x128xf32>
      %cst_12 = arith.constant 9.99999974E-6 : f32
      %22 = vector.broadcast %cst_12 : f32 to vector<1x128xf32>
      %23 = arith.addf %20, %22 : vector<1x128xf32>
      %24 = math.rsqrt %23 : vector<1x128xf32>
      %25 = arith.mulf %21, %24 : vector<1x128xf32>
      %c0_13 = arith.constant 0 : index
      %c0_14 = arith.constant 0 : index
      %26 = vector.load %arg5[%c0_13, %c0_14] : memref<1x128xf32, #tpu.memory_space<vmem>>, vector<1x128xf32>
      %27 = arith.mulf %13, %25 : vector<1x128xf32>
      %28 = arith.subf %26, %27 : vector<1x128xf32>
      %29 = arith.index_cast %arg1 : i32 to index
      %c0_15 = arith.constant 0 : index
      %c0_16 = arith.constant 0 : index
      %30 = vector.load %arg7[%29, %c0_15, %c0_16] : memref<1x512x128xf32, #tpu.memory_space<vmem>>, vector<1x512x128xf32>
      %31 = vector.shape_cast %30 : vector<1x512x128xf32> to vector<512x128xf32>
      %32 = vector.broadcast %25 : vector<1x128xf32> to vector<512x128xf32>
      %33 = arith.mulf %31, %32 : vector<512x128xf32>
      %34 = vector.broadcast %28 : vector<1x128xf32> to vector<512x128xf32>
      %35 = arith.addf %33, %34 : vector<512x128xf32>
      %cst_17 = arith.constant 2.000000e-01 : f32
      %36 = vector.broadcast %cst_17 : f32 to vector<512x128xf32>
      %37 = arith.mulf %36, %35 : vector<512x128xf32>
      %38 = arith.maximumf %35, %37 : vector<512x128xf32>
      %39 = arith.truncf %38 : vector<512x128xf32> to vector<512x128xbf16>
      %c0_18 = arith.constant 0 : index
      %c0_19 = arith.constant 0 : index
      %40 = vector.load %arg6[%c0_18, %c0_19] : memref<512x128xbf16, #tpu.memory_space<vmem>>, vector<512x128xbf16>
      tpu.vector_store %arg6[%c0_18, %c0_19], %39 {strides = array<i32>} : memref<512x128xbf16, #tpu.memory_space<vmem>>, vector<512x128xbf16>,
    } else {
    }
    return
  }
  func.func @transform_0(%arg0: i32, %arg1: i32) -> (i32, i32) {
    %c1_i32 = arith.constant 1 : i32
    %0 = arith.subi %c1_i32, %arg0 : i32
    %1 = arith.muli %0, %arg1 : i32
    %c0_i32 = arith.constant 0 : i32
    %c0_i32_0 = arith.constant 0 : i32
    return %1, %c0_i32 : i32, i32
  }
  func.func @transform_1(%arg0: i32, %arg1: i32) -> (i32, i32) {
    %c0_i32 = arith.constant 0 : i32
    %c0_i32_0 = arith.constant 0 : i32
    %c0_i32_1 = arith.constant 0 : i32
    return %c0_i32, %c0_i32_0 : i32, i32
  }
  func.func @transform_2(%arg0: i32, %arg1: i32) -> (i32, i32) {
    %c0_i32 = arith.constant 0 : i32
    %c0_i32_0 = arith.constant 0 : i32
    %c0_i32_1 = arith.constant 0 : i32
    return %c0_i32, %c0_i32_0 : i32, i32
  }
  func.func @transform_3(%arg0: i32, %arg1: i32) -> (i32, i32) {
    %c0_i32 = arith.constant 0 : i32
    %c0_i32_0 = arith.constant 0 : i32
    %c0_i32_1 = arith.constant 0 : i32
    return %c0_i32, %c0_i32_0 : i32, i32
  }
  func.func @transform_4(%arg0: i32, %arg1: i32) -> (i32, i32) {
    %c0_i32 = arith.constant 0 : i32
    %c0_i32_0 = arith.constant 0 : i32
    return %arg1, %c0_i32 : i32, i32
  }
}

module attributes {stable_mosaic.version = 11 : i64} {
  func.func @_conv_bn_act_kernel(%arg0: i32, %arg1: i32, %arg2: memref<128x640xbf16, #tpu.memory_space<vmem>>, %arg3: memref<640x128xbf16, #tpu.memory_space<vmem>>, %arg4: memref<1x128xf32, #tpu.memory_space<vmem>>, %arg5: memref<1x128xf32, #tpu.memory_space<vmem>>, %arg6: memref<128x128xbf16, #tpu.memory_space<vmem>>, %arg7: memref<1x128x128xf32, #tpu.memory_space<vmem>>, %arg8: memref<1x128xf32, #tpu.memory_space<vmem>>, %arg9: memref<1x128xf32, #tpu.memory_space<vmem>>) attributes {dimension_semantics = [#tpu.dimension_semantics<arbitrary>, #tpu.dimension_semantics<arbitrary>], iteration_bounds = array<i64: 2, 1>, scalar_prefetch = 0 : i64, scratch_operands = 3 : i64, tpu.core_type = #tpu.core_type<tc>, window_params = [{transform_indices = @transform_0, window_bounds = array<i64: 128, 640>}, {pipeline_mode = #tpu.pipeline_mode<synchronous>, transform_indices = @transform_1, window_bounds = array<i64: 640, 128>}, {pipeline_mode = #tpu.pipeline_mode<synchronous>, transform_indices = @transform_2, window_bounds = array<i64: 1, 128>}, {pipeline_mode = #tpu.pipeline_mode<synchronous>, transform_indices = @transform_3, window_bounds = array<i64: 1, 128>}, {transform_indices = @transform_4, window_bounds = array<i64: 128, 128>}]} {
    %c0_i32 = arith.constant 0 : i32
    %0 = arith.cmpi eq, %arg0, %c0_i32 : i32
    %c0_i32_0 = arith.constant 0 : i32
    %1 = arith.cmpi eq, %arg1, %c0_i32_0 : i32
    %2 = arith.andi %0, %1 : i1
    %3 = arith.extui %2 : i1 to i32
    %c0_i32_1 = arith.constant 0 : i32
    %4 = arith.cmpi ne, %3, %c0_i32_1 : i32
    scf.if %4 {
      %cst = arith.constant 0.000000e+00 : f32
      %11 = vector.broadcast %cst : f32 to vector<1x128xf32>
      %c0 = arith.constant 0 : index
      %c0_5 = arith.constant 0 : index
      %12 = vector.load %arg8[%c0, %c0_5] : memref<1x128xf32, #tpu.memory_space<vmem>>, vector<1x128xf32>
      tpu.vector_store %arg8[%c0, %c0_5], %11 {strides = array<i32>} : memref<1x128xf32, #tpu.memory_space<vmem>>, vector<1x128xf32>,
      %cst_6 = arith.constant 0.000000e+00 : f32
      %13 = vector.broadcast %cst_6 : f32 to vector<1x128xf32>
      %c0_7 = arith.constant 0 : index
      %c0_8 = arith.constant 0 : index
      %14 = vector.load %arg9[%c0_7, %c0_8] : memref<1x128xf32, #tpu.memory_space<vmem>>, vector<1x128xf32>
      tpu.vector_store %arg9[%c0_7, %c0_8], %13 {strides = array<i32>} : memref<1x128xf32, #tpu.memory_space<vmem>>, vector<1x128xf32>,
    } else {
    }
    %c0_i32_2 = arith.constant 0 : i32
    %5 = arith.cmpi eq, %arg0, %c0_i32_2 : i32
    %6 = arith.extui %5 : i1 to i32
    %c0_i32_3 = arith.constant 0 : i32
    %7 = arith.cmpi ne, %6, %c0_i32_3 : i32
    scf.if %7 {
      %c0 = arith.constant 0 : index
      %c0_5 = arith.constant 0 : index
      %11 = vector.load %arg2[%c0, %c0_5] : memref<128x640xbf16, #tpu.memory_space<vmem>>, vector<128x640xbf16>
      %c0_6 = arith.constant 0 : index
      %c0_7 = arith.constant 0 : index
      %12 = vector.load %arg3[%c0_6, %c0_7] : memref<640x128xbf16, #tpu.memory_space<vmem>>, vector<640x128xbf16>
      %cst = arith.constant dense<0.000000e+00> : vector<128x128xf32>
      %13 = tpu.matmul %11, %12, %cst {dimension_numbers = #tpu.dot_dimension_numbers<[1], [0], [0], [1], [0, 0, 1, 1], [], []>} : vector<128x640xbf16>, vector<640x128xbf16>, vector<128x128xf32> -> vector<128x128xf32>
      %14 = arith.index_cast %arg1 : i32 to index
      %c0_8 = arith.constant 0 : index
      %c0_9 = arith.constant 0 : index
      %15 = vector.load %arg7[%14, %c0_8, %c0_9] : memref<1x128x128xf32, #tpu.memory_space<vmem>>, vector<1x128x128xf32>
      %16 = vector.shape_cast %15 : vector<1x128x128xf32> to vector<128x128xf32>
      %17 = vector.shape_cast %13 : vector<128x128xf32> to vector<1x128x128xf32>
      tpu.vector_store %arg7[%14, %c0_8, %c0_9], %17 {strides = array<i32>} : memref<1x128x128xf32, #tpu.memory_space<vmem>>, vector<1x128x128xf32>,
      %c0_10 = arith.constant 0 : index
      %c0_11 = arith.constant 0 : index
      %18 = vector.load %arg8[%c0_10, %c0_11] : memref<1x128xf32, #tpu.memory_space<vmem>>, vector<1x128xf32>
      %cst_12 = arith.constant dense<0.000000e+00> : vector<128xf32>
      %19 = vector.multi_reduction <add>, %13, %cst_12 [0] : vector<128x128xf32> to vector<128xf32>
      %20 = vector.shape_cast %19 : vector<128xf32> to vector<1x128xf32>
      %21 = arith.addf %18, %20 : vector<1x128xf32>
      %c0_13 = arith.constant 0 : index
      %c0_14 = arith.constant 0 : index
      %22 = vector.load %arg8[%c0_13, %c0_14] : memref<1x128xf32, #tpu.memory_space<vmem>>, vector<1x128xf32>
      tpu.vector_store %arg8[%c0_13, %c0_14], %21 {strides = array<i32>} : memref<1x128xf32, #tpu.memory_space<vmem>>, vector<1x128xf32>,
      %c0_15 = arith.constant 0 : index
      %c0_16 = arith.constant 0 : index
      %23 = vector.load %arg9[%c0_15, %c0_16] : memref<1x128xf32, #tpu.memory_space<vmem>>, vector<1x128xf32>
      %24 = arith.mulf %13, %13 : vector<128x128xf32>
      %cst_17 = arith.constant dense<0.000000e+00> : vector<128xf32>
      %25 = vector.multi_reduction <add>, %24, %cst_17 [0] : vector<128x128xf32> to vector<128xf32>
      %26 = vector.shape_cast %25 : vector<128xf32> to vector<1x128xf32>
      %27 = arith.addf %23, %26 : vector<1x128xf32>
      %c0_18 = arith.constant 0 : index
      %c0_19 = arith.constant 0 : index
      %28 = vector.load %arg9[%c0_18, %c0_19] : memref<1x128xf32, #tpu.memory_space<vmem>>, vector<1x128xf32>
      tpu.vector_store %arg9[%c0_18, %c0_19], %27 {strides = array<i32>} : memref<1x128xf32, #tpu.memory_space<vmem>>, vector<1x128xf32>,
      %29 = arith.truncf %13 : vector<128x128xf32> to vector<128x128xbf16>
      %c0_20 = arith.constant 0 : index
      %c0_21 = arith.constant 0 : index
      %30 = vector.load %arg6[%c0_20, %c0_21] : memref<128x128xbf16, #tpu.memory_space<vmem>>, vector<128x128xbf16>
      tpu.vector_store %arg6[%c0_20, %c0_21], %29 {strides = array<i32>} : memref<128x128xbf16, #tpu.memory_space<vmem>>, vector<128x128xbf16>,
    } else {
    }
    %c1_i32 = arith.constant 1 : i32
    %8 = arith.cmpi eq, %arg0, %c1_i32 : i32
    %9 = arith.extui %8 : i1 to i32
    %c0_i32_4 = arith.constant 0 : i32
    %10 = arith.cmpi ne, %9, %c0_i32_4 : i32
    scf.if %10 {
      %c0 = arith.constant 0 : index
      %c0_5 = arith.constant 0 : index
      %11 = vector.load %arg8[%c0, %c0_5] : memref<1x128xf32, #tpu.memory_space<vmem>>, vector<1x128xf32>
      %cst = arith.constant 7.812500e-03 : f32
      %12 = vector.broadcast %cst : f32 to vector<1x128xf32>
      %13 = arith.mulf %11, %12 : vector<1x128xf32>
      %c0_6 = arith.constant 0 : index
      %c0_7 = arith.constant 0 : index
      %14 = vector.load %arg9[%c0_6, %c0_7] : memref<1x128xf32, #tpu.memory_space<vmem>>, vector<1x128xf32>
      %cst_8 = arith.constant 7.812500e-03 : f32
      %15 = vector.broadcast %cst_8 : f32 to vector<1x128xf32>
      %16 = arith.mulf %14, %15 : vector<1x128xf32>
      %17 = arith.mulf %13, %13 : vector<1x128xf32>
      %18 = arith.subf %16, %17 : vector<1x128xf32>
      %cst_9 = arith.constant 0.000000e+00 : f32
      %19 = vector.broadcast %cst_9 : f32 to vector<1x128xf32>
      %20 = arith.maximumf %18, %19 : vector<1x128xf32>
      %c0_10 = arith.constant 0 : index
      %c0_11 = arith.constant 0 : index
      %21 = vector.load %arg4[%c0_10, %c0_11] : memref<1x128xf32, #tpu.memory_space<vmem>>, vector<1x128xf32>
      %cst_12 = arith.constant 9.99999974E-6 : f32
      %22 = vector.broadcast %cst_12 : f32 to vector<1x128xf32>
      %23 = arith.addf %20, %22 : vector<1x128xf32>
      %24 = math.rsqrt %23 : vector<1x128xf32>
      %25 = arith.mulf %21, %24 : vector<1x128xf32>
      %c0_13 = arith.constant 0 : index
      %c0_14 = arith.constant 0 : index
      %26 = vector.load %arg5[%c0_13, %c0_14] : memref<1x128xf32, #tpu.memory_space<vmem>>, vector<1x128xf32>
      %27 = arith.mulf %13, %25 : vector<1x128xf32>
      %28 = arith.subf %26, %27 : vector<1x128xf32>
      %29 = arith.index_cast %arg1 : i32 to index
      %c0_15 = arith.constant 0 : index
      %c0_16 = arith.constant 0 : index
      %30 = vector.load %arg7[%29, %c0_15, %c0_16] : memref<1x128x128xf32, #tpu.memory_space<vmem>>, vector<1x128x128xf32>
      %31 = vector.shape_cast %30 : vector<1x128x128xf32> to vector<128x128xf32>
      %32 = vector.broadcast %25 : vector<1x128xf32> to vector<128x128xf32>
      %33 = arith.mulf %31, %32 : vector<128x128xf32>
      %34 = vector.broadcast %28 : vector<1x128xf32> to vector<128x128xf32>
      %35 = arith.addf %33, %34 : vector<128x128xf32>
      %cst_17 = arith.constant 2.000000e-01 : f32
      %36 = vector.broadcast %cst_17 : f32 to vector<128x128xf32>
      %37 = arith.mulf %36, %35 : vector<128x128xf32>
      %38 = arith.maximumf %35, %37 : vector<128x128xf32>
      %39 = arith.truncf %38 : vector<128x128xf32> to vector<128x128xbf16>
      %c0_18 = arith.constant 0 : index
      %c0_19 = arith.constant 0 : index
      %40 = vector.load %arg6[%c0_18, %c0_19] : memref<128x128xbf16, #tpu.memory_space<vmem>>, vector<128x128xbf16>
      tpu.vector_store %arg6[%c0_18, %c0_19], %39 {strides = array<i32>} : memref<128x128xbf16, #tpu.memory_space<vmem>>, vector<128x128xbf16>,
    } else {
    }
    return
  }
  func.func @transform_0(%arg0: i32, %arg1: i32) -> (i32, i32) {
    %c1_i32 = arith.constant 1 : i32
    %0 = arith.subi %c1_i32, %arg0 : i32
    %1 = arith.muli %0, %arg1 : i32
    %c0_i32 = arith.constant 0 : i32
    %c0_i32_0 = arith.constant 0 : i32
    return %1, %c0_i32 : i32, i32
  }
  func.func @transform_1(%arg0: i32, %arg1: i32) -> (i32, i32) {
    %c0_i32 = arith.constant 0 : i32
    %c0_i32_0 = arith.constant 0 : i32
    %c0_i32_1 = arith.constant 0 : i32
    return %c0_i32, %c0_i32_0 : i32, i32
  }
  func.func @transform_2(%arg0: i32, %arg1: i32) -> (i32, i32) {
    %c0_i32 = arith.constant 0 : i32
    %c0_i32_0 = arith.constant 0 : i32
    %c0_i32_1 = arith.constant 0 : i32
    return %c0_i32, %c0_i32_0 : i32, i32
  }
  func.func @transform_3(%arg0: i32, %arg1: i32) -> (i32, i32) {
    %c0_i32 = arith.constant 0 : i32
    %c0_i32_0 = arith.constant 0 : i32
    %c0_i32_1 = arith.constant 0 : i32
    return %c0_i32, %c0_i32_0 : i32, i32
  }
  func.func @transform_4(%arg0: i32, %arg1: i32) -> (i32, i32) {
    %c0_i32 = arith.constant 0 : i32
    %c0_i32_0 = arith.constant 0 : i32
    return %arg1, %c0_i32 : i32, i32
  }
}

module attributes {stable_mosaic.version = 11 : i64} {
  func.func @_conv_bn_act_kernel(%arg0: i32, %arg1: i32, %arg2: memref<32x1152xbf16, #tpu.memory_space<vmem>>, %arg3: memref<1152x128xbf16, #tpu.memory_space<vmem>>, %arg4: memref<1x128xf32, #tpu.memory_space<vmem>>, %arg5: memref<1x128xf32, #tpu.memory_space<vmem>>, %arg6: memref<32x128xbf16, #tpu.memory_space<vmem>>, %arg7: memref<1x32x128xf32, #tpu.memory_space<vmem>>, %arg8: memref<1x128xf32, #tpu.memory_space<vmem>>, %arg9: memref<1x128xf32, #tpu.memory_space<vmem>>) attributes {dimension_semantics = [#tpu.dimension_semantics<arbitrary>, #tpu.dimension_semantics<arbitrary>], iteration_bounds = array<i64: 2, 1>, scalar_prefetch = 0 : i64, scratch_operands = 3 : i64, tpu.core_type = #tpu.core_type<tc>, window_params = [{transform_indices = @transform_0, window_bounds = array<i64: 32, 1152>}, {pipeline_mode = #tpu.pipeline_mode<synchronous>, transform_indices = @transform_1, window_bounds = array<i64: 1152, 128>}, {pipeline_mode = #tpu.pipeline_mode<synchronous>, transform_indices = @transform_2, window_bounds = array<i64: 1, 128>}, {pipeline_mode = #tpu.pipeline_mode<synchronous>, transform_indices = @transform_3, window_bounds = array<i64: 1, 128>}, {transform_indices = @transform_4, window_bounds = array<i64: 32, 128>}]} {
    %c0_i32 = arith.constant 0 : i32
    %0 = arith.cmpi eq, %arg0, %c0_i32 : i32
    %c0_i32_0 = arith.constant 0 : i32
    %1 = arith.cmpi eq, %arg1, %c0_i32_0 : i32
    %2 = arith.andi %0, %1 : i1
    %3 = arith.extui %2 : i1 to i32
    %c0_i32_1 = arith.constant 0 : i32
    %4 = arith.cmpi ne, %3, %c0_i32_1 : i32
    scf.if %4 {
      %cst = arith.constant 0.000000e+00 : f32
      %11 = vector.broadcast %cst : f32 to vector<1x128xf32>
      %c0 = arith.constant 0 : index
      %c0_5 = arith.constant 0 : index
      %12 = vector.load %arg8[%c0, %c0_5] : memref<1x128xf32, #tpu.memory_space<vmem>>, vector<1x128xf32>
      tpu.vector_store %arg8[%c0, %c0_5], %11 {strides = array<i32>} : memref<1x128xf32, #tpu.memory_space<vmem>>, vector<1x128xf32>,
      %cst_6 = arith.constant 0.000000e+00 : f32
      %13 = vector.broadcast %cst_6 : f32 to vector<1x128xf32>
      %c0_7 = arith.constant 0 : index
      %c0_8 = arith.constant 0 : index
      %14 = vector.load %arg9[%c0_7, %c0_8] : memref<1x128xf32, #tpu.memory_space<vmem>>, vector<1x128xf32>
      tpu.vector_store %arg9[%c0_7, %c0_8], %13 {strides = array<i32>} : memref<1x128xf32, #tpu.memory_space<vmem>>, vector<1x128xf32>,
    } else {
    }
    %c0_i32_2 = arith.constant 0 : i32
    %5 = arith.cmpi eq, %arg0, %c0_i32_2 : i32
    %6 = arith.extui %5 : i1 to i32
    %c0_i32_3 = arith.constant 0 : i32
    %7 = arith.cmpi ne, %6, %c0_i32_3 : i32
    scf.if %7 {
      %c0 = arith.constant 0 : index
      %c0_5 = arith.constant 0 : index
      %11 = vector.load %arg2[%c0, %c0_5] : memref<32x1152xbf16, #tpu.memory_space<vmem>>, vector<32x1152xbf16>
      %c0_6 = arith.constant 0 : index
      %c0_7 = arith.constant 0 : index
      %12 = vector.load %arg3[%c0_6, %c0_7] : memref<1152x128xbf16, #tpu.memory_space<vmem>>, vector<1152x128xbf16>
      %cst = arith.constant dense<0.000000e+00> : vector<32x128xf32>
      %13 = tpu.matmul %11, %12, %cst {dimension_numbers = #tpu.dot_dimension_numbers<[1], [0], [0], [1], [0, 0, 1, 1], [], []>} : vector<32x1152xbf16>, vector<1152x128xbf16>, vector<32x128xf32> -> vector<32x128xf32>
      %14 = arith.index_cast %arg1 : i32 to index
      %c0_8 = arith.constant 0 : index
      %c0_9 = arith.constant 0 : index
      %15 = vector.load %arg7[%14, %c0_8, %c0_9] : memref<1x32x128xf32, #tpu.memory_space<vmem>>, vector<1x32x128xf32>
      %16 = vector.shape_cast %15 : vector<1x32x128xf32> to vector<32x128xf32>
      %17 = vector.shape_cast %13 : vector<32x128xf32> to vector<1x32x128xf32>
      tpu.vector_store %arg7[%14, %c0_8, %c0_9], %17 {strides = array<i32>} : memref<1x32x128xf32, #tpu.memory_space<vmem>>, vector<1x32x128xf32>,
      %c0_10 = arith.constant 0 : index
      %c0_11 = arith.constant 0 : index
      %18 = vector.load %arg8[%c0_10, %c0_11] : memref<1x128xf32, #tpu.memory_space<vmem>>, vector<1x128xf32>
      %cst_12 = arith.constant dense<0.000000e+00> : vector<128xf32>
      %19 = vector.multi_reduction <add>, %13, %cst_12 [0] : vector<32x128xf32> to vector<128xf32>
      %20 = vector.shape_cast %19 : vector<128xf32> to vector<1x128xf32>
      %21 = arith.addf %18, %20 : vector<1x128xf32>
      %c0_13 = arith.constant 0 : index
      %c0_14 = arith.constant 0 : index
      %22 = vector.load %arg8[%c0_13, %c0_14] : memref<1x128xf32, #tpu.memory_space<vmem>>, vector<1x128xf32>
      tpu.vector_store %arg8[%c0_13, %c0_14], %21 {strides = array<i32>} : memref<1x128xf32, #tpu.memory_space<vmem>>, vector<1x128xf32>,
      %c0_15 = arith.constant 0 : index
      %c0_16 = arith.constant 0 : index
      %23 = vector.load %arg9[%c0_15, %c0_16] : memref<1x128xf32, #tpu.memory_space<vmem>>, vector<1x128xf32>
      %24 = arith.mulf %13, %13 : vector<32x128xf32>
      %cst_17 = arith.constant dense<0.000000e+00> : vector<128xf32>
      %25 = vector.multi_reduction <add>, %24, %cst_17 [0] : vector<32x128xf32> to vector<128xf32>
      %26 = vector.shape_cast %25 : vector<128xf32> to vector<1x128xf32>
      %27 = arith.addf %23, %26 : vector<1x128xf32>
      %c0_18 = arith.constant 0 : index
      %c0_19 = arith.constant 0 : index
      %28 = vector.load %arg9[%c0_18, %c0_19] : memref<1x128xf32, #tpu.memory_space<vmem>>, vector<1x128xf32>
      tpu.vector_store %arg9[%c0_18, %c0_19], %27 {strides = array<i32>} : memref<1x128xf32, #tpu.memory_space<vmem>>, vector<1x128xf32>,
      %29 = arith.truncf %13 : vector<32x128xf32> to vector<32x128xbf16>
      %c0_20 = arith.constant 0 : index
      %c0_21 = arith.constant 0 : index
      %30 = vector.load %arg6[%c0_20, %c0_21] : memref<32x128xbf16, #tpu.memory_space<vmem>>, vector<32x128xbf16>
      tpu.vector_store %arg6[%c0_20, %c0_21], %29 {strides = array<i32>} : memref<32x128xbf16, #tpu.memory_space<vmem>>, vector<32x128xbf16>,
    } else {
    }
    %c1_i32 = arith.constant 1 : i32
    %8 = arith.cmpi eq, %arg0, %c1_i32 : i32
    %9 = arith.extui %8 : i1 to i32
    %c0_i32_4 = arith.constant 0 : i32
    %10 = arith.cmpi ne, %9, %c0_i32_4 : i32
    scf.if %10 {
      %c0 = arith.constant 0 : index
      %c0_5 = arith.constant 0 : index
      %11 = vector.load %arg8[%c0, %c0_5] : memref<1x128xf32, #tpu.memory_space<vmem>>, vector<1x128xf32>
      %cst = arith.constant 3.125000e-02 : f32
      %12 = vector.broadcast %cst : f32 to vector<1x128xf32>
      %13 = arith.mulf %11, %12 : vector<1x128xf32>
      %c0_6 = arith.constant 0 : index
      %c0_7 = arith.constant 0 : index
      %14 = vector.load %arg9[%c0_6, %c0_7] : memref<1x128xf32, #tpu.memory_space<vmem>>, vector<1x128xf32>
      %cst_8 = arith.constant 3.125000e-02 : f32
      %15 = vector.broadcast %cst_8 : f32 to vector<1x128xf32>
      %16 = arith.mulf %14, %15 : vector<1x128xf32>
      %17 = arith.mulf %13, %13 : vector<1x128xf32>
      %18 = arith.subf %16, %17 : vector<1x128xf32>
      %cst_9 = arith.constant 0.000000e+00 : f32
      %19 = vector.broadcast %cst_9 : f32 to vector<1x128xf32>
      %20 = arith.maximumf %18, %19 : vector<1x128xf32>
      %c0_10 = arith.constant 0 : index
      %c0_11 = arith.constant 0 : index
      %21 = vector.load %arg4[%c0_10, %c0_11] : memref<1x128xf32, #tpu.memory_space<vmem>>, vector<1x128xf32>
      %cst_12 = arith.constant 9.99999974E-6 : f32
      %22 = vector.broadcast %cst_12 : f32 to vector<1x128xf32>
      %23 = arith.addf %20, %22 : vector<1x128xf32>
      %24 = math.rsqrt %23 : vector<1x128xf32>
      %25 = arith.mulf %21, %24 : vector<1x128xf32>
      %c0_13 = arith.constant 0 : index
      %c0_14 = arith.constant 0 : index
      %26 = vector.load %arg5[%c0_13, %c0_14] : memref<1x128xf32, #tpu.memory_space<vmem>>, vector<1x128xf32>
      %27 = arith.mulf %13, %25 : vector<1x128xf32>
      %28 = arith.subf %26, %27 : vector<1x128xf32>
      %29 = arith.index_cast %arg1 : i32 to index
      %c0_15 = arith.constant 0 : index
      %c0_16 = arith.constant 0 : index
      %30 = vector.load %arg7[%29, %c0_15, %c0_16] : memref<1x32x128xf32, #tpu.memory_space<vmem>>, vector<1x32x128xf32>
      %31 = vector.shape_cast %30 : vector<1x32x128xf32> to vector<32x128xf32>
      %32 = vector.broadcast %25 : vector<1x128xf32> to vector<32x128xf32>
      %33 = arith.mulf %31, %32 : vector<32x128xf32>
      %34 = vector.broadcast %28 : vector<1x128xf32> to vector<32x128xf32>
      %35 = arith.addf %33, %34 : vector<32x128xf32>
      %cst_17 = arith.constant 2.000000e-01 : f32
      %36 = vector.broadcast %cst_17 : f32 to vector<32x128xf32>
      %37 = arith.mulf %36, %35 : vector<32x128xf32>
      %38 = arith.maximumf %35, %37 : vector<32x128xf32>
      %39 = arith.truncf %38 : vector<32x128xf32> to vector<32x128xbf16>
      %c0_18 = arith.constant 0 : index
      %c0_19 = arith.constant 0 : index
      %40 = vector.load %arg6[%c0_18, %c0_19] : memref<32x128xbf16, #tpu.memory_space<vmem>>, vector<32x128xbf16>
      tpu.vector_store %arg6[%c0_18, %c0_19], %39 {strides = array<i32>} : memref<32x128xbf16, #tpu.memory_space<vmem>>, vector<32x128xbf16>,
    } else {
    }
    return
  }
  func.func @transform_0(%arg0: i32, %arg1: i32) -> (i32, i32) {
    %c1_i32 = arith.constant 1 : i32
    %0 = arith.subi %c1_i32, %arg0 : i32
    %1 = arith.muli %0, %arg1 : i32
    %c0_i32 = arith.constant 0 : i32
    %c0_i32_0 = arith.constant 0 : i32
    return %1, %c0_i32 : i32, i32
  }
  func.func @transform_1(%arg0: i32, %arg1: i32) -> (i32, i32) {
    %c0_i32 = arith.constant 0 : i32
    %c0_i32_0 = arith.constant 0 : i32
    %c0_i32_1 = arith.constant 0 : i32
    return %c0_i32, %c0_i32_0 : i32, i32
  }
  func.func @transform_2(%arg0: i32, %arg1: i32) -> (i32, i32) {
    %c0_i32 = arith.constant 0 : i32
    %c0_i32_0 = arith.constant 0 : i32
    %c0_i32_1 = arith.constant 0 : i32
    return %c0_i32, %c0_i32_0 : i32, i32
  }
  func.func @transform_3(%arg0: i32, %arg1: i32) -> (i32, i32) {
    %c0_i32 = arith.constant 0 : i32
    %c0_i32_0 = arith.constant 0 : i32
    %c0_i32_1 = arith.constant 0 : i32
    return %c0_i32, %c0_i32_0 : i32, i32
  }
  func.func @transform_4(%arg0: i32, %arg1: i32) -> (i32, i32) {
    %c0_i32 = arith.constant 0 : i32
    %c0_i32_0 = arith.constant 0 : i32
    return %arg1, %c0_i32 : i32, i32
  }
}

module attributes {stable_mosaic.version = 11 : i64} {
  func.func @_conv_act_kernel(%arg0: i32, %arg1: memref<8x640xbf16, #tpu.memory_space<vmem>>, %arg2: memref<640x128xbf16, #tpu.memory_space<vmem>>, %arg3: memref<8x128xf32, #tpu.memory_space<vmem>>) attributes {dimension_semantics = [#tpu.dimension_semantics<parallel>], iteration_bounds = array<i64: 1>, scalar_prefetch = 0 : i64, scratch_operands = 0 : i64, tpu.core_type = #tpu.core_type<tc>, window_params = [{transform_indices = @transform_0, window_bounds = array<i64: 8, 640>}, {pipeline_mode = #tpu.pipeline_mode<synchronous>, transform_indices = @transform_1, window_bounds = array<i64: 640, 128>}, {transform_indices = @transform_2, window_bounds = array<i64: 8, 128>}]} {
    %c0 = arith.constant 0 : index
    %c0_0 = arith.constant 0 : index
    %0 = vector.load %arg1[%c0, %c0_0] : memref<8x640xbf16, #tpu.memory_space<vmem>>, vector<8x640xbf16>
    %c0_1 = arith.constant 0 : index
    %c0_2 = arith.constant 0 : index
    %1 = vector.load %arg2[%c0_1, %c0_2] : memref<640x128xbf16, #tpu.memory_space<vmem>>, vector<640x128xbf16>
    %cst = arith.constant dense<0.000000e+00> : vector<8x128xf32>
    %2 = tpu.matmul %0, %1, %cst {dimension_numbers = #tpu.dot_dimension_numbers<[1], [0], [0], [1], [0, 0, 1, 1], [], []>} : vector<8x640xbf16>, vector<640x128xbf16>, vector<8x128xf32> -> vector<8x128xf32>
    %c0_3 = arith.constant 0 : index
    %c0_4 = arith.constant 0 : index
    %3 = vector.load %arg3[%c0_3, %c0_4] : memref<8x128xf32, #tpu.memory_space<vmem>>, vector<8x128xf32>
    tpu.vector_store %arg3[%c0_3, %c0_4], %2 {strides = array<i32>} : memref<8x128xf32, #tpu.memory_space<vmem>>, vector<8x128xf32>,
    return
  }
  func.func @transform_0(%arg0: i32) -> (i32, i32) {
    %c0_i32 = arith.constant 0 : i32
    %c0_i32_0 = arith.constant 0 : i32
    return %arg0, %c0_i32 : i32, i32
  }
  func.func @transform_1(%arg0: i32) -> (i32, i32) {
    %c0_i32 = arith.constant 0 : i32
    %c0_i32_0 = arith.constant 0 : i32
    %c0_i32_1 = arith.constant 0 : i32
    return %c0_i32, %c0_i32_0 : i32, i32
  }
  func.func @transform_2(%arg0: i32) -> (i32, i32) {
    %c0_i32 = arith.constant 0 : i32
    %c0_i32_0 = arith.constant 0 : i32
    return %arg0, %c0_i32 : i32, i32
  }
}

</mosaic_0001>

<bundles_post_ra>
// kernel: discriminator_forward.6
= control target key start
LH: loop header
LB: loop body
LE: loop exit
PB: predicated region body
PF: predicated region fallthrough
CT: control target
= control target key end

     0   :  { %s1838_s9 = smov 0   ;;  %s1954_s0 = inlined_call_operand.vmem [shape: bf16[8192,128], index: 0, kind: input, shape index: {}]   ;;  %s1955_s1 = inlined_call_operand.vmem [shape: bf16[128,128], index: 1, kind: input, shape index: {}]   ;;  %s1956_s2 = inlined_call_operand.vmem [shape: bf16[8192,128], index: 2, kind: output, shape index: {}]  }
   0x1 LB: > { %s1261_s10 = sadd.s32 4294967295, %s1821_s9   ;;  %p1265_p0 = scmp.ge.s32.totalorder %s1821_s9, 1  ;;  %s1821_s9 = sphi %s1838_s9, %s12_s9  }
   0x2   : > { %p113_p1 = scmp.lt.s32.totalorder %s1821_s9, 17 }
   0x4   : > { %p114_p2 = pnand %p1265_p0, %p113_p1 }
   0x5   : > { %v1775_v0 = vld [vmem:[%s1955_s1] sm:$0xff] (!%p114_p2)   ;;  %s1266_s13 = sshll.u32 (!%p114_p2), %s1261_s10, 6  ;;  %v1776_v1 = vld [vmem:[%s1955_s1 + $0x8] sm:$0xff] (!%p114_p2)   ;;  %v1777_v2 = vld [vmem:[%s1955_s1 + $0x10] sm:$0xff] (!%p114_p2)  }
   0x6   : > { %117 = sbr.rel (%p114_p2) target bundleno = 317 (0x13d), region = 28  ;;  %p136_p3 = scmp.lt.s32.totalorder (!%p114_p2), %s1266_s13, 1023  ;;  %1671 = vmatprep.subr.bf16.mxu0 (!%p114_p2), %v1775_v0  ;;  %1751 = vmatprep.subr.bf16.mxu1 (!%p114_p2), %v1775_v0  ;;  %v1778_v3 = vld [vmem:[%s1955_s1 + $0x18] sm:$0xff] (!%p114_p2)   ;;  %v1779_v6 = vld [vmem:[%s1955_s1 + $0x20] sm:$0xff] (!%p114_p2)   ;;  %v1780_v7 = vld [vmem:[%s1955_s1 + $0x28] sm:$0xff] (!%p114_p2)  }
   0x7   : > { %1672 = vmatpush3.bf16.msra.mxu0 (!%p114_p2), %v1775_v0  ;;  %1759 = vmatpush3.bf16.msra.mxu1 (!%p114_p2), %v1775_v0  ;;  %v1781_v8 = vld [vmem:[%s1955_s1 + $0x30] sm:$0xff] (!%p114_p2)   ;;  %v1782_v9 = vld [vmem:[%s1955_s1 + $0x38] sm:$0xff] (!%p114_p2)  }
   0x8   : > { %1673 = vmatprep.subr.bf16.mxu0 (!%p114_p2), %v1776_v1  ;;  %1752 = vmatprep.subr.bf16.mxu1 (!%p114_p2), %v1776_v1 }
   0xb   : > { %1674 = vmatpush3.bf16.msra.mxu0 (!%p114_p2), %v1776_v1  ;;  %1760 = vmatpush3.bf16.msra.mxu1 (!%p114_p2), %v1776_v1 }
   0xc   : > { %1675 = vmatprep.subr.bf16.mxu0 (!%p114_p2), %v1777_v2  ;;  %1753 = vmatprep.subr.bf16.mxu1 (!%p114_p2), %v1777_v2 }
   0xd   : > { %s1958_s13 = smov (!%p136_p3, %s1266_s13), 1023 }
   0xe   : > { %s1267_s18 = sshll.u32 %s1958_s13, 2 }
   0xf   : > { %s1863_s21 = scalar_lea.vmem %s1954_s0, %s1267_s18  ;;  %1676 = vmatpush3.bf16.msra.mxu0 %v1777_v2  ;;  %1761 = vmatpush3.bf16.msra.mxu1 %v1777_v2  ;;  %s1917_s6 = scalar_lea.vmem %s1956_s2, %s1267_s18 }
  0x10   : > { %v1783_v4 = vld [vmem:[%s1863_s21] sm:$0xff]   ;;  %1677 = vmatprep.subr.bf16.mxu0 %v1778_v3  ;;  %1754 = vmatprep.subr.bf16.mxu1 %v1778_v3  ;;  %v1785_v10 = vld [vmem:[%s1863_s21 + $0x8] sm:$0xff]   ;;  %v1787_v12 = vld [vmem:[%s1863_s21 + $0x10] sm:$0xff]  }
  0x11   : > { %v1784_v5 = vld [vmem:[%s1863_s21 + $0x80] sm:$0xff]   ;;  %1687 = vmatprep.mubr.bf16.mxu0 %v1783_v4  ;;  %v1786_v11 = vld [vmem:[%s1863_s21 + $0x88] sm:$0xff]   ;;  %v1788_v13 = vld [vmem:[%s1863_s21 + $0x90] sm:$0xff]  }
  0x12   : > { %1719 = vmatprep.mubr.bf16.mxu1 %v1784_v5  ;;  %v1789_v14 = vld [vmem:[%s1863_s21 + $0x18] sm:$0xff]   ;;  %v1791_v16 = vld [vmem:[%s1863_s21 + $0x20] sm:$0xff]   ;;  %v1793_v18 = vld [vmem:[%s1863_s21 + $0x28] sm:$0xff]  }
  0x13   : > { %1678 = vmatpush3.bf16.msra.mxu0 %v1778_v3  ;;  %1762 = vmatpush3.bf16.msra.mxu1 %v1778_v3  ;;  %v1790_v15 = vld [vmem:[%s1863_s21 + $0x98] sm:$0xff]   ;;  %v1792_v17 = vld [vmem:[%s1863_s21 + $0xa0] sm:$0xff]   ;;  %v1794_v19 = vld [vmem:[%s1863_s21 + $0xa8] sm:$0xff]  }
  0x14   : > { %1679 = vmatprep.subr.bf16.mxu0 %v1779_v6  ;;  %1755 = vmatprep.subr.bf16.mxu1 %v1779_v6  ;;  %v1795_v20 = vld [vmem:[%s1863_s21 + $0x30] sm:$0xff]   ;;  %v1797_v22 = vld [vmem:[%s1863_s21 + $0x38] sm:$0xff]   ;;  %v1799_v24 = vld [vmem:[%s1863_s21 + $0x40] sm:$0xff]  }
  0x15   : > { %v1796_v21 = vld [vmem:[%s1863_s21 + $0xb0] sm:$0xff]   ;;  %v1798_v23 = vld [vmem:[%s1863_s21 + $0xb8] sm:$0xff]   ;;  %v1800_v25 = vld [vmem:[%s1863_s21 + $0xc0] sm:$0xff]  }
  0x16   : > { %v1801_v26 = vld [vmem:[%s1863_s21 + $0x48] sm:$0xff]   ;;  %v1803_v28 = vld [vmem:[%s1863_s21 + $0x50] sm:$0xff]   ;;  %v1805_v30 = vld [vmem:[%s1863_s21 + $0x58] sm:$0xff]  }
  0x17   : > { %1680 = vmatpush3.bf16.msra.mxu0 %v1779_v6  ;;  %1763 = vmatpush3.bf16.msra.mxu1 %v1779_v6  ;;  %v1802_v27 = vld [vmem:[%s1863_s21 + $0xc8] sm:$0xff]   ;;  %v1804_v29 = vld [vmem:[%s1863_s21 + $0xd0] sm:$0xff]   ;;  %v1806_v31 = vld [vmem:[%s1863_s21 + $0xd8] sm:$0xff]  }
  0x18   : > { %1681 = vmatprep.subr.bf16.mxu0 %v1780_v7  ;;  %1756 = vmatprep.subr.bf16.mxu1 %v1780_v7  ;;  %v1807_v32 = vld [vmem:[%s1863_s21 + $0x60] sm:$0xff]   ;;  %v1809_v34 = vld [vmem:[%s1863_s21 + $0x68] sm:$0xff]   ;;  %v1811_v36 = vld [vmem:[%s1863_s21 + $0x70] sm:$0xff]  }
  0x19   : > { %v1808_v33 = vld [vmem:[%s1863_s21 + $0xe0] sm:$0xff]   ;;  %v1810_v35 = vld [vmem:[%s1863_s21 + $0xe8] sm:$0xff]   ;;  %v1812_v37 = vld [vmem:[%s1863_s21 + $0xf0] sm:$0xff]  }
  0x1a   : > { %v1813_v38 = vld [vmem:[%s1863_s21 + $0x78] sm:$0xff]  }
  0x1b   : > { %1682 = vmatpush3.bf16.msra.mxu0 %v1780_v7  ;;  %1764 = vmatpush3.bf16.msra.mxu1 %v1780_v7  ;;  %v1814_v39 = vld [vmem:[%s1863_s21 + $0xf8] sm:$0xff]  }
  0x1c   : > { %1683 = vmatprep.subr.bf16.mxu0 %v1781_v8  ;;  %1757 = vmatprep.subr.bf16.mxu1 %v1781_v8 }
  0x1f   : > { %1684 = vmatpush3.bf16.msra.mxu0 %v1781_v8  ;;  %1765 = vmatpush3.bf16.msra.mxu1 %v1781_v8 }
  0x20   : > { %1685 = vmatprep.subr.bf16.mxu0 %v1782_v9  ;;  %1758 = vmatprep.subr.bf16.mxu1 %v1782_v9 }
  0x23   : > { %1686 = vmatpush3.bf16.msra.mxu0 %v1782_v9  ;;  %1766 = vmatpush3.bf16.msra.mxu1 %v1782_v9 }
  0x26   : > { %1688 = vmatmul.mubr.bf16.vlgmr.msra.gmra.mrb[0].mxu0 %v1785_v10  ;;  %1720 = vmatmul.mubr.bf16.vlgmr.msra.gmra.mrb[0].mxu1 %v1786_v11 }
  0x27   : > { %1691 = vmatprep.mubr.bf16.mxu0 %v1787_v12  ;;  %1723 = vmatprep.mubr.bf16.mxu1 %v1788_v13 }
  0x2e   : > { %1692 = vmatmul.mubr.bf16.gmra.mrb[4].mxu0 %v1789_v14  ;;  %1724 = vmatmul.mubr.bf16.gmra.mrb[4].mxu1 %v1790_v15 }
  0x2f   : > { %1695 = vmatprep.mubr.bf16.mxu0 %v1791_v16  ;;  %1727 = vmatprep.mubr.bf16.mxu1 %v1792_v17 }
  0x36   : > { %1696 = vmatmul.mubr.bf16.gmra.mrb[8].mxu0 %v1793_v18  ;;  %1728 = vmatmul.mubr.bf16.gmra.mrb[8].mxu1 %v1794_v19 }
  0x37   : > { %1699 = vmatprep.mubr.bf16.mxu0 %v1795_v20  ;;  %1731 = vmatprep.mubr.bf16.mxu1 %v1796_v21 }
  0x3e   : > { %1700 = vmatmul.mubr.bf16.gmra.mrb[12].mxu0 %v1797_v22  ;;  %1732 = vmatmul.mubr.bf16.gmra.mrb[12].mxu1 %v1798_v23 }
  0x3f   : > { %1703 = vmatprep.mubr.bf16.mxu0 %v1799_v24  ;;  %1735 = vmatprep.mubr.bf16.mxu1 %v1800_v25 }
  0x46   : > { %1704 = vmatmul.mubr.bf16.gmra.mrb[16].mxu0 %v1801_v26  ;;  %1736 = vmatmul.mubr.bf16.gmra.mrb[16].mxu1 %v1802_v27 }
  0x47   : > { %1707 = vmatprep.mubr.bf16.mxu0 %v1803_v28  ;;  %1739 = vmatprep.mubr.bf16.mxu1 %v1804_v29 }
  0x4e   : > { %1708 = vmatmul.mubr.bf16.gmra.mrb[20].mxu0 %v1805_v30  ;;  %1740 = vmatmul.mubr.bf16.gmra.mrb[20].mxu1 %v1806_v31 }
  0x4f   : > { %1711 = vmatprep.mubr.bf16.mxu0 %v1807_v32  ;;  %1743 = vmatprep.mubr.bf16.mxu1 %v1808_v33 }
  0x56   : > { %1712 = vmatmul.mubr.bf16.gmra.mrb[24].mxu0 %v1809_v34  ;;  %1744 = vmatmul.mubr.bf16.gmra.mrb[24].mxu1 %v1810_v35 }
  0x57   : > { %1715 = vmatprep.mubr.bf16.mxu0 %v1811_v36  ;;  %1747 = vmatprep.mubr.bf16.mxu1 %v1812_v37 }
  0x5e   : > { %1716 = vmatmul.mubr.bf16.gmra.mrb[28].mxu0 %v1813_v38  ;;  %1748 = vmatmul.mubr.bf16.gmra.mrb[28].mxu1 %v1814_v39 }
  0xf9   : > { %v1689_v40 = vpop.f32.mrb[0].mxu0  ;;  %v1721_v41 = vpop.f32.mrb[0].mxu1 }
  0xfa   : > { %v759_v42 = vmul.f32 0.2, %v1689_v40  ;;  %v791_v43 = vmul.f32 0.2, %v1721_v41  ;;  %v502_v44 = vpop.f32.mrb[1].mxu0  ;;  %v630_v45 = vpop.f32.mrb[1].mxu1 }
  0xfb   : > { %v757_v46 = vmul.f32 0.2, %v502_v44  ;;  %v789_v47 = vmul.f32 0.2, %v630_v45  ;;  %v1690_v48 = vpop.f32.mrb[2].mxu0  ;;  %v1722_v49 = vpop.f32.mrb[2].mxu1 }
  0xfc   : > { %v760_v50 = vmul.f32 0.2, %v1690_v48  ;;  %v792_v51 = vmul.f32 0.2, %v1722_v49  ;;  %v505_v52 = vpop.f32.mrb[3].mxu0  ;;  %v633_v53 = vpop.f32.mrb[3].mxu1  ;;  %v823_v56 = vmax.f32 %v1689_v40, %v759_v42  ;;  %v855_v57 = vmax.f32 %v1721_v41, %v791_v43 }
  0xfd   : > { %v758_v54 = vmul.f32 0.2, %v505_v52  ;;  %v790_v55 = vmul.f32 0.2, %v633_v53  ;;  %v821_v60 = vmax.f32 %v502_v44, %v757_v46  ;;  %v853_v61 = vmax.f32 %v630_v45, %v789_v47 }
  0xfe   : > { %v824_v58 = vmax.f32 %v1690_v48, %v760_v50  ;;  %v856_v59 = vmax.f32 %v1722_v49, %v792_v51 }
  0xff   : > { %v822_v62 = vmax.f32 %v505_v52, %v758_v54  ;;  %v854_v63 = vmax.f32 %v633_v53, %v790_v55 }
 0x100   : > { %v1448_v0 = vpack.c.bf16 %v824_v58, %v823_v56  ;;  %v1528_v1 = vpack.c.bf16 %v856_v59, %v855_v57 }
 0x101   : > { %v1443_v2 = vpack.c.bf16 %v822_v62, %v821_v60  ;;  %v1523_v3 = vpack.c.bf16 %v854_v63, %v853_v61  ;;  %v1693_v4 = vpop.f32.mrb[4].mxu0  ;;  %v1725_v5 = vpop.f32.mrb[4].mxu1 }
 0x102   : > { %1600 = vst [vmem:[%s1917_s6 + $0x8] sm:$0xff] %v1448_v0   ;;  %1616 = vst [vmem:[%s1917_s6 + $0x88] sm:$0xff] %v1528_v1   ;;  %v763_v6 = vmul.f32 0.2, %v1693_v4  ;;  %v795_v7 = vmul.f32 0.2, %v1725_v5 }
 0x103   : > { %v518_v8 = vpop.f32.mrb[5].mxu0  ;;  %v646_v9 = vpop.f32.mrb[5].mxu1  ;;  %1444 = vst [vmem:[%s1917_s6] sm:$0xff] %v1443_v2   ;;  %1615 = vst [vmem:[%s1917_s6 + $0x80] sm:$0xff] %v1523_v3  }
 0x104   : > { %v761_v10 = vmul.f32 0.2, %v518_v8  ;;  %v793_v11 = vmul.f32 0.2, %v646_v9  ;;  %v1694_v12 = vpop.f32.mrb[6].mxu0  ;;  %v1726_v13 = vpop.f32.mrb[6].mxu1  ;;  %v827_v20 = vmax.f32 %v1693_v4, %v763_v6  ;;  %v859_v21 = vmax.f32 %v1725_v5, %v795_v7 }
 0x105   : > { %v764_v14 = vmul.f32 0.2, %v1694_v12  ;;  %v796_v15 = vmul.f32 0.2, %v1726_v13  ;;  %v521_v16 = vpop.f32.mrb[7].mxu0  ;;  %v649_v17 = vpop.f32.mrb[7].mxu1 }
 0x106   : > { %v762_v18 = vmul.f32 0.2, %v521_v16  ;;  %v794_v19 = vmul.f32 0.2, %v649_v17  ;;  %v825_v24 = vmax.f32 %v518_v8, %v761_v10  ;;  %v857_v25 = vmax.f32 %v646_v9, %v793_v11 }
 0x107   : > { %v828_v22 = vmax.f32 %v1694_v12, %v764_v14  ;;  %v860_v23 = vmax.f32 %v1726_v13, %v796_v15 }
 0x108   : > { %v826_v26 = vmax.f32 %v521_v16, %v762_v18  ;;  %v858_v27 = vmax.f32 %v649_v17, %v794_v19 }
 0x109   : > { %v1458_v28 = vpack.c.bf16 %v828_v22, %v827_v20  ;;  %v1538_v29 = vpack.c.bf16 %v860_v23, %v859_v21  ;;  %v1697_v32 = vpop.f32.mrb[8].mxu0  ;;  %v1729_v33 = vpop.f32.mrb[8].mxu1 }
 0x10a   : > { %v1453_v30 = vpack.c.bf16 %v826_v26, %v825_v24  ;;  %v1533_v31 = vpack.c.bf16 %v858_v27, %v857_v25  ;;  %v767_v34 = vmul.f32 0.2, %v1697_v32  ;;  %v799_v35 = vmul.f32 0.2, %v1729_v33  ;;  %v534_v36 = vpop.f32.mrb[9].mxu0  ;;  %v662_v37 = vpop.f32.mrb[9].mxu1 }
 0x10b   : > { %1602 = vst [vmem:[%s1917_s6 + $0x18] sm:$0xff] %v1458_v28   ;;  %1618 = vst [vmem:[%s1917_s6 + $0x98] sm:$0xff] %v1538_v29   ;;  %v765_v38 = vmul.f32 0.2, %v534_v36  ;;  %v797_v39 = vmul.f32 0.2, %v662_v37 }
 0x10c   : > { %1601 = vst [vmem:[%s1917_s6 + $0x10] sm:$0xff] %v1453_v30   ;;  %1617 = vst [vmem:[%s1917_s6 + $0x90] sm:$0xff] %v1533_v31   ;;  %v1698_v40 = vpop.f32.mrb[10].mxu0  ;;  %v1730_v41 = vpop.f32.mrb[10].mxu1  ;;  %v831_v48 = vmax.f32 %v1697_v32, %v767_v34  ;;  %v863_v49 = vmax.f32 %v1729_v33, %v799_v35 }
 0x10d   : > { %v768_v42 = vmul.f32 0.2, %v1698_v40  ;;  %v800_v43 = vmul.f32 0.2, %v1730_v41  ;;  %v537_v44 = vpop.f32.mrb[11].mxu0  ;;  %v665_v45 = vpop.f32.mrb[11].mxu1  ;;  %v829_v52 = vmax.f32 %v534_v36, %v765_v38  ;;  %v861_v53 = vmax.f32 %v662_v37, %v797_v39 }
 0x10e   : > { %v766_v46 = vmul.f32 0.2, %v537_v44  ;;  %v798_v47 = vmul.f32 0.2, %v665_v45 }
 0x10f   : > { %v832_v50 = vmax.f32 %v1698_v40, %v768_v42  ;;  %v864_v51 = vmax.f32 %v1730_v41, %v800_v43 }
 0x110   : > { %v830_v54 = vmax.f32 %v537_v44, %v766_v46  ;;  %v862_v55 = vmax.f32 %v665_v45, %v798_v47 }
 0x111   : > { %v1468_v56 = vpack.c.bf16 %v832_v50, %v831_v48  ;;  %v1548_v57 = vpack.c.bf16 %v864_v51, %v863_v49  ;;  %v1701_v60 = vpop.f32.mrb[12].mxu0  ;;  %v1733_v61 = vpop.f32.mrb[12].mxu1 }
 0x112   : > { %v1463_v58 = vpack.c.bf16 %v830_v54, %v829_v52  ;;  %v1543_v59 = vpack.c.bf16 %v862_v55, %v861_v53  ;;  %v771_v62 = vmul.f32 0.2, %v1701_v60  ;;  %v803_v63 = vmul.f32 0.2, %v1733_v61  ;;  %v550_v0 = vpop.f32.mrb[13].mxu0  ;;  %v678_v1 = vpop.f32.mrb[13].mxu1 }
 0x113   : > { %1604 = vst [vmem:[%s1917_s6 + $0x28] sm:$0xff] %v1468_v56   ;;  %1620 = vst [vmem:[%s1917_s6 + $0xa8] sm:$0xff] %v1548_v57   ;;  %v769_v2 = vmul.f32 0.2, %v550_v0  ;;  %v801_v3 = vmul.f32 0.2, %v678_v1 }
 0x114   : > { %1603 = vst [vmem:[%s1917_s6 + $0x20] sm:$0xff] %v1463_v58   ;;  %1619 = vst [vmem:[%s1917_s6 + $0xa0] sm:$0xff] %v1543_v59   ;;  %v1702_v4 = vpop.f32.mrb[14].mxu0  ;;  %v1734_v5 = vpop.f32.mrb[14].mxu1  ;;  %v835_v12 = vmax.f32 %v1701_v60, %v771_v62  ;;  %v867_v13 = vmax.f32 %v1733_v61, %v803_v63 }
 0x115   : > { %v772_v6 = vmul.f32 0.2, %v1702_v4  ;;  %v804_v7 = vmul.f32 0.2, %v1734_v5  ;;  %v553_v8 = vpop.f32.mrb[15].mxu0  ;;  %v681_v9 = vpop.f32.mrb[15].mxu1  ;;  %v833_v16 = vmax.f32 %v550_v0, %v769_v2  ;;  %v865_v17 = vmax.f32 %v678_v1, %v801_v3 }
 0x116   : > { %v770_v10 = vmul.f32 0.2, %v553_v8  ;;  %v802_v11 = vmul.f32 0.2, %v681_v9 }
 0x117   : > { %v836_v14 = vmax.f32 %v1702_v4, %v772_v6  ;;  %v868_v15 = vmax.f32 %v1734_v5, %v804_v7 }
 0x118   : > { %v834_v18 = vmax.f32 %v553_v8, %v770_v10  ;;  %v866_v19 = vmax.f32 %v681_v9, %v802_v11 }
 0x119   : > { %v1478_v20 = vpack.c.bf16 %v836_v14, %v835_v12  ;;  %v1558_v21 = vpack.c.bf16 %v868_v15, %v867_v13  ;;  %v1705_v24 = vpop.f32.mrb[16].mxu0  ;;  %v1737_v25 = vpop.f32.mrb[16].mxu1 }
 0x11a   : > { %v1473_v22 = vpack.c.bf16 %v834_v18, %v833_v16  ;;  %v1553_v23 = vpack.c.bf16 %v866_v19, %v865_v17  ;;  %v775_v26 = vmul.f32 0.2, %v1705_v24  ;;  %v807_v27 = vmul.f32 0.2, %v1737_v25  ;;  %v566_v28 = vpop.f32.mrb[17].mxu0  ;;  %v694_v29 = vpop.f32.mrb[17].mxu1 }
 0x11b   : > { %1606 = vst [vmem:[%s1917_s6 + $0x38] sm:$0xff] %v1478_v20   ;;  %1622 = vst [vmem:[%s1917_s6 + $0xb8] sm:$0xff] %v1558_v21   ;;  %v773_v30 = vmul.f32 0.2, %v566_v28  ;;  %v805_v31 = vmul.f32 0.2, %v694_v29 }
 0x11c   : > { %1605 = vst [vmem:[%s1917_s6 + $0x30] sm:$0xff] %v1473_v22   ;;  %1621 = vst [vmem:[%s1917_s6 + $0xb0] sm:$0xff] %v1553_v23   ;;  %v1706_v32 = vpop.f32.mrb[18].mxu0  ;;  %v1738_v33 = vpop.f32.mrb[18].mxu1  ;;  %v839_v40 = vmax.f32 %v1705_v24, %v775_v26  ;;  %v871_v41 = vmax.f32 %v1737_v25, %v807_v27 }
 0x11d   : > { %v776_v34 = vmul.f32 0.2, %v1706_v32  ;;  %v808_v35 = vmul.f32 0.2, %v1738_v33  ;;  %v569_v36 = vpop.f32.mrb[19].mxu0  ;;  %v697_v37 = vpop.f32.mrb[19].mxu1  ;;  %v837_v44 = vmax.f32 %v566_v28, %v773_v30  ;;  %v869_v45 = vmax.f32 %v694_v29, %v805_v31 }
 0x11e   : > { %v774_v38 = vmul.f32 0.2, %v569_v36  ;;  %v806_v39 = vmul.f32 0.2, %v697_v37 }
 0x11f   : > { %v840_v42 = vmax.f32 %v1706_v32, %v776_v34  ;;  %v872_v43 = vmax.f32 %v1738_v33, %v808_v35 }
 0x120   : > { %v838_v46 = vmax.f32 %v569_v36, %v774_v38  ;;  %v870_v47 = vmax.f32 %v697_v37, %v806_v39 }
 0x121   : > { %v1488_v48 = vpack.c.bf16 %v840_v42, %v839_v40  ;;  %v1568_v49 = vpack.c.bf16 %v872_v43, %v871_v41  ;;  %v1709_v52 = vpop.f32.mrb[20].mxu0  ;;  %v1741_v53 = vpop.f32.mrb[20].mxu1 }
 0x122   : > { %v1483_v50 = vpack.c.bf16 %v838_v46, %v837_v44  ;;  %v1563_v51 = vpack.c.bf16 %v870_v47, %v869_v45  ;;  %v779_v54 = vmul.f32 0.2, %v1709_v52  ;;  %v811_v55 = vmul.f32 0.2, %v1741_v53  ;;  %v582_v56 = vpop.f32.mrb[21].mxu0  ;;  %v710_v57 = vpop.f32.mrb[21].mxu1 }
 0x123   : > { %1608 = vst [vmem:[%s1917_s6 + $0x48] sm:$0xff] %v1488_v48   ;;  %1624 = vst [vmem:[%s1917_s6 + $0xc8] sm:$0xff] %v1568_v49   ;;  %v777_v58 = vmul.f32 0.2, %v582_v56  ;;  %v809_v59 = vmul.f32 0.2, %v710_v57 }
 0x124   : > { %1607 = vst [vmem:[%s1917_s6 + $0x40] sm:$0xff] %v1483_v50   ;;  %1623 = vst [vmem:[%s1917_s6 + $0xc0] sm:$0xff] %v1563_v51   ;;  %v1710_v60 = vpop.f32.mrb[22].mxu0  ;;  %v1742_v61 = vpop.f32.mrb[22].mxu1  ;;  %v843_v4 = vmax.f32 %v1709_v52, %v779_v54  ;;  %v875_v5 = vmax.f32 %v1741_v53, %v811_v55 }
 0x125   : > { %v780_v62 = vmul.f32 0.2, %v1710_v60  ;;  %v812_v63 = vmul.f32 0.2, %v1742_v61  ;;  %v585_v0 = vpop.f32.mrb[23].mxu0  ;;  %v713_v1 = vpop.f32.mrb[23].mxu1  ;;  %v841_v8 = vmax.f32 %v582_v56, %v777_v58  ;;  %v873_v9 = vmax.f32 %v710_v57, %v809_v59 }
 0x126   : > { %v778_v2 = vmul.f32 0.2, %v585_v0  ;;  %v810_v3 = vmul.f32 0.2, %v713_v1 }
 0x127   : > { %v844_v6 = vmax.f32 %v1710_v60, %v780_v62  ;;  %v876_v7 = vmax.f32 %v1742_v61, %v812_v63 }
 0x128   : > { %v842_v10 = vmax.f32 %v585_v0, %v778_v2  ;;  %v874_v11 = vmax.f32 %v713_v1, %v810_v3 }
 0x129   : > { %v1498_v12 = vpack.c.bf16 %v844_v6, %v843_v4  ;;  %v1578_v13 = vpack.c.bf16 %v876_v7, %v875_v5  ;;  %v1713_v16 = vpop.f32.mrb[24].mxu0  ;;  %v1745_v17 = vpop.f32.mrb[24].mxu1 }
 0x12a   : > { %v1493_v14 = vpack.c.bf16 %v842_v10, %v841_v8  ;;  %v1573_v15 = vpack.c.bf16 %v874_v11, %v873_v9  ;;  %v783_v18 = vmul.f32 0.2, %v1713_v16  ;;  %v815_v19 = vmul.f32 0.2, %v1745_v17  ;;  %v598_v20 = vpop.f32.mrb[25].mxu0  ;;  %v726_v21 = vpop.f32.mrb[25].mxu1 }
 0x12b   : > { %1610 = vst [vmem:[%s1917_s6 + $0x58] sm:$0xff] %v1498_v12   ;;  %1626 = vst [vmem:[%s1917_s6 + $0xd8] sm:$0xff] %v1578_v13   ;;  %v781_v22 = vmul.f32 0.2, %v598_v20  ;;  %v813_v23 = vmul.f32 0.2, %v726_v21 }
 0x12c   : > { %1609 = vst [vmem:[%s1917_s6 + $0x50] sm:$0xff] %v1493_v14   ;;  %1625 = vst [vmem:[%s1917_s6 + $0xd0] sm:$0xff] %v1573_v15   ;;  %v1714_v24 = vpop.f32.mrb[26].mxu0  ;;  %v1746_v25 = vpop.f32.mrb[26].mxu1  ;;  %v847_v32 = vmax.f32 %v1713_v16, %v783_v18  ;;  %v879_v33 = vmax.f32 %v1745_v17, %v815_v19 }
 0x12d   : > { %v784_v26 = vmul.f32 0.2, %v1714_v24  ;;  %v816_v27 = vmul.f32 0.2, %v1746_v25  ;;  %v601_v28 = vpop.f32.mrb[27].mxu0  ;;  %v729_v29 = vpop.f32.mrb[27].mxu1  ;;  %v845_v36 = vmax.f32 %v598_v20, %v781_v22  ;;  %v877_v37 = vmax.f32 %v726_v21, %v813_v23 }
 0x12e   : > { %v782_v30 = vmul.f32 0.2, %v601_v28  ;;  %v814_v31 = vmul.f32 0.2, %v729_v29 }
 0x12f   : > { %v848_v34 = vmax.f32 %v1714_v24, %v784_v26  ;;  %v880_v35 = vmax.f32 %v1746_v25, %v816_v27 }
 0x130   : > { %v846_v38 = vmax.f32 %v601_v28, %v782_v30  ;;  %v878_v39 = vmax.f32 %v729_v29, %v814_v31 }
 0x131   : > { %v1508_v40 = vpack.c.bf16 %v848_v34, %v847_v32  ;;  %v1588_v41 = vpack.c.bf16 %v880_v35, %v879_v33  ;;  %v1717_v44 = vpop.f32.mrb[28].mxu0  ;;  %v1749_v45 = vpop.f32.mrb[28].mxu1 }
 0x132   : > { %v1503_v42 = vpack.c.bf16 %v846_v38, %v845_v36  ;;  %v1583_v43 = vpack.c.bf16 %v878_v39, %v877_v37  ;;  %v787_v46 = vmul.f32 0.2, %v1717_v44  ;;  %v819_v47 = vmul.f32 0.2, %v1749_v45  ;;  %v614_v48 = vpop.f32.mrb[29].mxu0  ;;  %v742_v49 = vpop.f32.mrb[29].mxu1 }
 0x133   : > { %1612 = vst [vmem:[%s1917_s6 + $0x68] sm:$0xff] %v1508_v40   ;;  %1628 = vst [vmem:[%s1917_s6 + $0xe8] sm:$0xff] %v1588_v41   ;;  %v785_v50 = vmul.f32 0.2, %v614_v48  ;;  %v817_v51 = vmul.f32 0.2, %v742_v49 }
 0x134   : > { %1611 = vst [vmem:[%s1917_s6 + $0x60] sm:$0xff] %v1503_v42   ;;  %1627 = vst [vmem:[%s1917_s6 + $0xe0] sm:$0xff] %v1583_v43   ;;  %v1718_v52 = vpop.f32.mrb[30].mxu0  ;;  %v1750_v53 = vpop.f32.mrb[30].mxu1  ;;  %v851_v60 = vmax.f32 %v1717_v44, %v787_v46  ;;  %v883_v61 = vmax.f32 %v1749_v45, %v819_v47 }
 0x135   : > { %v788_v54 = vmul.f32 0.2, %v1718_v52  ;;  %v820_v55 = vmul.f32 0.2, %v1750_v53  ;;  %v617_v56 = vpop.f32.mrb[31].mxu0  ;;  %v745_v57 = vpop.f32.mrb[31].mxu1  ;;  %v849_v0 = vmax.f32 %v614_v48, %v785_v50  ;;  %v881_v1 = vmax.f32 %v742_v49, %v817_v51 }
 0x136   : > { %v786_v58 = vmul.f32 0.2, %v617_v56  ;;  %v818_v59 = vmul.f32 0.2, %v745_v57 }
 0x137   : > { %v852_v62 = vmax.f32 %v1718_v52, %v788_v54  ;;  %v884_v63 = vmax.f32 %v1750_v53, %v820_v55 }
 0x138   : > { %v850_v2 = vmax.f32 %v617_v56, %v786_v58  ;;  %v882_v3 = vmax.f32 %v745_v57, %v818_v59 }
 0x139   : > { %v1518_v4 = vpack.c.bf16 %v852_v62, %v851_v60  ;;  %v1598_v5 = vpack.c.bf16 %v884_v63, %v883_v61 }
 0x13a   : > { %v1513_v6 = vpack.c.bf16 %v850_v2, %v849_v0  ;;  %v1593_v7 = vpack.c.bf16 %v882_v3, %v881_v1 }
 0x13b   : > { %1614 = vst [vmem:[%s1917_s6 + $0x78] sm:$0xff] %v1518_v4   ;;  %1630 = vst [vmem:[%s1917_s6 + $0xf8] sm:$0xff] %v1598_v5  }
 0x13c   : > { %1613 = vst [vmem:[%s1917_s6 + $0x70] sm:$0xff] %v1513_v6   ;;  %1629 = vst [vmem:[%s1917_s6 + $0xf0] sm:$0xff] %v1593_v7  }
 0x13d PF: > { %s12_s9 = sadd.s32 1, %s1821_s9  }
 0x13e   : > { %p9_p4 = scmp.ge.s32.totalorder %s12_s9, 18  }
 0x140   :  { %11 = sbr.rel (!%p9_p4) target bundleno = 1 (0x1), region = 58 }

// kernel: discriminator_forward.7
= control target key start
LH: loop header
LB: loop body
LE: loop exit
PB: predicated region body
PF: predicated region fallthrough
CT: control target
= control target key end

     0   :  { %s3371_s15 = smov 0   ;;  %s3373_s16 = smov 0   ;;  %s4141_s0 = inlined_call_operand.vmem [shape: bf16[2048,256], index: 0, kind: input, shape index: {}]   ;;  %s4142_s1 = inlined_call_operand.vmem [shape: bf16[256,128], index: 1, kind: input, shape index: {}]   ;;  %s4143_s2 = inlined_call_operand.vmem [shape: f32[1,128], index: 2, kind: input, shape index: {}]   ;;  %s4144_s3 = inlined_call_operand.vmem [shape: f32[1,128], index: 3, kind: input, shape index: {}]   ;;  %s4145_s4 = inlined_call_operand.vmem [shape: bf16[2048,128], index: 4, kind: output, shape index: {}]  }
   0x1   :  { %s3375_s17 = smov 0   ;;  %s3377_s18 = smov 0  }
   0x2   :  { %s3379_s19 = smov 0  }
   0x3 LB: > { %s23_s20 = sadd.s32 1, %s3334_s17  ;;  %s26_s21 = sadd.s32 1, %s3338_s18  ;;  %s3342_s19 = sphi %s3379_s19, %s14_s19   ;;  %s3338_s18 = sphi %s3377_s18, %s4149_s18   ;;  %s3334_s17 = sphi %s3375_s17, %s4148_s17   ;;  %s3330_s16 = sphi %s3373_s16, %s4147_s16   ;;  %s3326_s15 = sphi %s3371_s15, %s4146_s15  }
   0x4   : > { %p24_p0 = scmp.ge.s32.totalorder %s23_s20, 4  ;;  %p2385_p1 = scmp.ge.s32.totalorder %s3342_s19, 1 }
   0x5   : > { %p184_p2 = scmp.lt.s32.totalorder %s3342_s19, 9 }
   0x6   : > { %s4151_s20 = smov (%p24_p0, %s23_s20), 0  ;;  %s4153_s21 = smov (!%p24_p0, %s26_s21), %s3338_s18 }
   0x7   : > { %p185_p3 = pnand %p2385_p1, %p184_p2  ;;  %p28_p4 = scmp.ge.s32.totalorder %s4153_s21, 2 }
   0x8   : > { %s213_s22 = ssub.s32 (!%p185_p3), 1, %s3330_s16  ;;  %s2389_s23 = sshll.u32 (!%p185_p3), %s3326_s15, 6 }
   0x9   : > { %s4155_s21 = smov (%p28_p4, %s4153_s21), 0  ;;  %188 = sbr.rel (%p185_p3) target bundleno = 618 (0x26a), region = 36 }
   0xa   : > { %s214_s24 = smul.u32 (!%p185_p3), %s3326_s15, %s213_s22  ;;  %p225_p5 = scmp.lt.s32.totalorder (!%p185_p3), %s2389_s23, 255 }
   0xb   : > { %p231_p6 = scmp.eq.s32.totalorder (!%p185_p3), %s3330_s16, 0  ;;  %p232_p7 = scmp.eq.s32.totalorder (!%p185_p3), %s3326_s15, 0 }
   0xc   : > { %s2386_s25 = sshll.u32 (!%p185_p3), %s214_s24, 6 }
   0xd   : > { %p216_p8 = scmp.lt.s32.totalorder (!%p185_p3), %s2386_s25, 255  ;;  %p233_p9 = pnand (!%p185_p3), %p232_p7, %p231_p6 }
  0x10   : > { %s4157_s23 = smov (!%p225_p5, %s2389_s23), 255  ;;  %s4159_s25 = smov (!%p216_p8, %s2386_s25), 255 }
  0x11   : > { %s2390_s26 = sshll.u32 %s4157_s23, 2  ;;  %s2605_s27 = sshll.u32 %s4159_s25, 3  ;;  %v3344_v0 = vmov (!%p233_p9), 0.0  }
  0x12   : > { %s3413_s30 = scalar_lea.vmem %s4145_s4, %s2390_s26  ;;  %s3418_s7 = scalar_lea.vmem %s4141_s0, %s2605_s27  ;;  %237 = vst [vmem:[#allocation3] sm:$0x1] (!%p233_p9), %v3344_v0  ;;  %238 = vst [vmem:[#allocation4] sm:$0x1] (!%p233_p9), %v3344_v0 }
  0x13   : > { %236 = sbr.rel (%p233_p9) target bundleno = 26 (0x1a), region = 40 }
  0x1a PF: > { %p2391_p10 = scmp.ne.s32.totalorder %s3330_s16, 0 }
  0x1b   : > { %v3190_v1 = vld [vmem:[%s4142_s1] sm:$0xff] (!%p2391_p10)   ;;  %v3345_v2 = vmov (!%p2391_p10), 0   ;;  %v3191_v3 = vld [vmem:[%s4142_s1 + $0x8] sm:$0xff] (!%p2391_p10)   ;;  %v3192_v4 = vld [vmem:[%s4142_s1 + $0x10] sm:$0xff] (!%p2391_p10)   ;;  %s2472_s5 = sshll.u32 (!%p2391_p10), %s3326_s15, 9 }
  0x1c   : > { %241 = sbr.rel (%p2391_p10) target bundleno = 509 (0x1fd), region = 44  ;;  %754 = vmatprep.subr.bf16.mxu0 (!%p2391_p10), %v3345_v2  ;;  %3116 = vmatprep.subr.bf16.mxu1 (!%p2391_p10), %v3345_v2  ;;  %v3193_v5 = vld [vmem:[%s4142_s1 + $0x18] sm:$0xff] (!%p2391_p10)   ;;  %v3194_v6 = vld [vmem:[%s4142_s1 + $0x20] sm:$0xff] (!%p2391_p10)   ;;  %v3195_v8 = vld [vmem:[%s4142_s1 + $0x28] sm:$0xff] (!%p2391_p10)   ;;  %s3568_s6 = scalar_lea.vmem (!%p2391_p10), [#allocation2], %s2472_s5 }
  0x1d   : > { %755 = vmatpush1.bf16.msra.mxu0 (!%p2391_p10), %v3190_v1  ;;  %3132 = vmatpush1.bf16.msra.mxu1 (!%p2391_p10), %v3190_v1  ;;  %v3208_v7 = vld [vmem:[%s3418_s7 + $0x4] ss:$8 sps:$4 sm:$0xff] (!%p2391_p10)   ;;  %v3196_v9 = vld [vmem:[%s4142_s1 + $0x30] sm:$0xff] (!%p2391_p10)   ;;  %v3197_v10 = vld [vmem:[%s4142_s1 + $0x38] sm:$0xff] (!%p2391_p10)  }
  0x1e   : > { %756 = vmatprep.subr.bf16.mxu0 (!%p2391_p10), %v3345_v2  ;;  %3117 = vmatprep.subr.bf16.mxu1 (!%p2391_p10), %v3345_v2  ;;  %v3232_v11 = vld [vmem:[%s3418_s7 + $0x104] ss:$8 sps:$4 sm:$0xff] (!%p2391_p10)   ;;  %v3200_v14 = vld [vmem:[%s4142_s1 + $0x50] sm:$0xff] (!%p2391_p10)   ;;  %v3201_v15 = vld [vmem:[%s4142_s1 + $0x58] sm:$0xff] (!%p2391_p10)  }
  0x1f   : > { %786 = vmatprep.mubr.bf16.mxu0 (!%p2391_p10), %v3208_v7  ;;  %914 = vmatprep.mubr.bf16.mxu1 (!%p2391_p10), %v3232_v11  ;;  %v3198_v12 = vld [vmem:[%s4142_s1 + $0x40] sm:$0xff] (!%p2391_p10)   ;;  %v3199_v13 = vld [vmem:[%s4142_s1 + $0x48] sm:$0xff] (!%p2391_p10)   ;;  %v3204_v18 = vld [vmem:[%s4142_s1 + $0x70] sm:$0xff] (!%p2391_p10)  }
  0x20   : > { %v3202_v16 = vld [vmem:[%s4142_s1 + $0x60] sm:$0xff] (!%p2391_p10)   ;;  %v3203_v17 = vld [vmem:[%s4142_s1 + $0x68] sm:$0xff] (!%p2391_p10)   ;;  %v3205_v19 = vld [vmem:[%s4142_s1 + $0x78] sm:$0xff] (!%p2391_p10)  }
  0x21   : > { %757 = vmatpush1.bf16.msra.mxu0 (!%p2391_p10), %v3191_v3  ;;  %3133 = vmatpush1.bf16.msra.mxu1 (!%p2391_p10), %v3191_v3  ;;  %v3206_v20 = vld [vmem:[%s3418_s7] ss:$8 sps:$4 sm:$0xff] (!%p2391_p10)   ;;  %v3209_v22 = vld [vmem:[%s3418_s7 + $0x14] ss:$8 sps:$4 sm:$0xff] (!%p2391_p10)   ;;  %v3211_v24 = vld [vmem:[%s3418_s7 + $0x10] ss:$8 sps:$4 sm:$0xff] (!%p2391_p10)  }
  0x22   : > { %758 = vmatprep.subr.bf16.mxu0 (!%p2391_p10), %v3345_v2  ;;  %3118 = vmatprep.subr.bf16.mxu1 (!%p2391_p10), %v3345_v2  ;;  %v3230_v21 = vld [vmem:[%s3418_s7 + $0x100] ss:$8 sps:$4 sm:$0xff] (!%p2391_p10)   ;;  %v3236_v23 = vld [vmem:[%s3418_s7 + $0x114] ss:$8 sps:$4 sm:$0xff] (!%p2391_p10)   ;;  %v3238_v25 = vld [vmem:[%s3418_s7 + $0x110] ss:$8 sps:$4 sm:$0xff] (!%p2391_p10)  }
  0x23   : > { %v3212_v26 = vld [vmem:[%s3418_s7 + $0x24] ss:$8 sps:$4 sm:$0xff]   ;;  %v3214_v28 = vld [vmem:[%s3418_s7 + $0x20] ss:$8 sps:$4 sm:$0xff]   ;;  %v3215_v30 = vld [vmem:[%s3418_s7 + $0x34] ss:$8 sps:$4 sm:$0xff]  }
  0x24   : > { %v3242_v27 = vld [vmem:[%s3418_s7 + $0x124] ss:$8 sps:$4 sm:$0xff]   ;;  %v3244_v29 = vld [vmem:[%s3418_s7 + $0x120] ss:$8 sps:$4 sm:$0xff]   ;;  %v3248_v31 = vld [vmem:[%s3418_s7 + $0x134] ss:$8 sps:$4 sm:$0xff]  }
  0x25   : > { %759 = vmatpush1.bf16.msra.mxu0 %v3192_v4  ;;  %3134 = vmatpush1.bf16.msra.mxu1 %v3192_v4  ;;  %v3217_v32 = vld [vmem:[%s3418_s7 + $0x30] ss:$8 sps:$4 sm:$0xff]   ;;  %v3218_v34 = vld [vmem:[%s3418_s7 + $0x44] ss:$8 sps:$4 sm:$0xff]   ;;  %v3220_v36 = vld [vmem:[%s3418_s7 + $0x40] ss:$8 sps:$4 sm:$0xff]  }
  0x26   : > { %760 = vmatprep.subr.bf16.mxu0 %v3345_v2  ;;  %3119 = vmatprep.subr.bf16.mxu1 %v3345_v2  ;;  %v3250_v33 = vld [vmem:[%s3418_s7 + $0x130] ss:$8 sps:$4 sm:$0xff]   ;;  %v3254_v35 = vld [vmem:[%s3418_s7 + $0x144] ss:$8 sps:$4 sm:$0xff]   ;;  %v3256_v37 = vld [vmem:[%s3418_s7 + $0x140] ss:$8 sps:$4 sm:$0xff]  }
  0x27   : > { %v3221_v38 = vld [vmem:[%s3418_s7 + $0x54] ss:$8 sps:$4 sm:$0xff]   ;;  %v3223_v40 = vld [vmem:[%s3418_s7 + $0x50] ss:$8 sps:$4 sm:$0xff]   ;;  %v3224_v42 = vld [vmem:[%s3418_s7 + $0x64] ss:$8 sps:$4 sm:$0xff]  }
  0x28   : > { %v3260_v39 = vld [vmem:[%s3418_s7 + $0x154] ss:$8 sps:$4 sm:$0xff]   ;;  %v3262_v41 = vld [vmem:[%s3418_s7 + $0x150] ss:$8 sps:$4 sm:$0xff]   ;;  %v3266_v43 = vld [vmem:[%s3418_s7 + $0x164] ss:$8 sps:$4 sm:$0xff]  }
  0x29   : > { %761 = vmatpush1.bf16.msra.mxu0 %v3193_v5  ;;  %3135 = vmatpush1.bf16.msra.mxu1 %v3193_v5  ;;  %v3226_v44 = vld [vmem:[%s3418_s7 + $0x60] ss:$8 sps:$4 sm:$0xff]   ;;  %v3227_v46 = vld [vmem:[%s3418_s7 + $0x74] ss:$8 sps:$4 sm:$0xff]   ;;  %v3229_v48 = vld [vmem:[%s3418_s7 + $0x70] ss:$8 sps:$4 sm:$0xff]  }
  0x2a   : > { %762 = vmatprep.subr.bf16.mxu0 %v3345_v2  ;;  %3120 = vmatprep.subr.bf16.mxu1 %v3345_v2  ;;  %v3268_v45 = vld [vmem:[%s3418_s7 + $0x160] ss:$8 sps:$4 sm:$0xff]   ;;  %v3272_v47 = vld [vmem:[%s3418_s7 + $0x174] ss:$8 sps:$4 sm:$0xff]   ;;  %v3274_v49 = vld [vmem:[%s3418_s7 + $0x170] ss:$8 sps:$4 sm:$0xff]  }
  0x2b   : > { %v3233_v50 = vld [vmem:[%s3418_s7 + $0x84] ss:$8 sps:$4 sm:$0xff]   ;;  %v3235_v52 = vld [vmem:[%s3418_s7 + $0x80] ss:$8 sps:$4 sm:$0xff]   ;;  %v3239_v54 = vld [vmem:[%s3418_s7 + $0x94] ss:$8 sps:$4 sm:$0xff]  }
  0x2c   : > { %v3278_v51 = vld [vmem:[%s3418_s7 + $0x184] ss:$8 sps:$4 sm:$0xff]   ;;  %v3280_v53 = vld [vmem:[%s3418_s7 + $0x180] ss:$8 sps:$4 sm:$0xff]   ;;  %v3281_v55 = vld [vmem:[%s3418_s7 + $0x194] ss:$8 sps:$4 sm:$0xff]  }
  0x2d   : > { %763 = vmatpush1.bf16.msra.mxu0 %v3194_v6  ;;  %3136 = vmatpush1.bf16.msra.mxu1 %v3194_v6  ;;  %v3241_v56 = vld [vmem:[%s3418_s7 + $0x90] ss:$8 sps:$4 sm:$0xff]   ;;  %v3245_v58 = vld [vmem:[%s3418_s7 + $0xa4] ss:$8 sps:$4 sm:$0xff]   ;;  %v3247_v60 = vld [vmem:[%s3418_s7 + $0xa0] ss:$8 sps:$4 sm:$0xff]  }
  0x2e   : > { %764 = vmatprep.subr.bf16.mxu0 %v3345_v2  ;;  %3121 = vmatprep.subr.bf16.mxu1 %v3345_v2  ;;  %v3283_v57 = vld [vmem:[%s3418_s7 + $0x190] ss:$8 sps:$4 sm:$0xff]   ;;  %v3284_v59 = vld [vmem:[%s3418_s7 + $0x1a4] ss:$8 sps:$4 sm:$0xff]   ;;  %v3286_v61 = vld [vmem:[%s3418_s7 + $0x1a0] ss:$8 sps:$4 sm:$0xff]  }
  0x2f   : > { %v3251_v62 = vld [vmem:[%s3418_s7 + $0xb4] ss:$8 sps:$4 sm:$0xff]   ;;  %v3253_v0 = vld [vmem:[%s3418_s7 + $0xb0] ss:$8 sps:$4 sm:$0xff]   ;;  %v3290_v3 = vld [vmem:[%s3418_s7 + $0x1c4] ss:$8 sps:$4 sm:$0xff]  }
  0x30   : > { %v3287_v63 = vld [vmem:[%s3418_s7 + $0x1b4] ss:$8 sps:$4 sm:$0xff]   ;;  %v3289_v1 = vld [vmem:[%s3418_s7 + $0x1b0] ss:$8 sps:$4 sm:$0xff]   ;;  %v3259_v4 = vld [vmem:[%s3418_s7 + $0xc0] ss:$8 sps:$4 sm:$0xff]  }
  0x31   : > { %765 = vmatpush1.bf16.msra.mxu0 %v3195_v8  ;;  %3137 = vmatpush1.bf16.msra.mxu1 %v3195_v8  ;;  %v3292_v5 = vld [vmem:[%s3418_s7 + $0x1c0] ss:$8 sps:$4 sm:$0xff]   ;;  %v3263_v6 = vld [vmem:[%s3418_s7 + $0xd4] ss:$8 sps:$4 sm:$0xff]   ;;  %v3265_v8 = vld [vmem:[%s3418_s7 + $0xd0] ss:$8 sps:$4 sm:$0xff]  }
  0x32   : > { %766 = vmatprep.subr.bf16.mxu0 %v3345_v2  ;;  %3122 = vmatprep.subr.bf16.mxu1 %v3345_v2  ;;  %v3293_v7 = vld [vmem:[%s3418_s7 + $0x1d4] ss:$8 sps:$4 sm:$0xff]   ;;  %v3296_v11 = vld [vmem:[%s3418_s7 + $0x1e4] ss:$8 sps:$4 sm:$0xff]  }
  0x35   : > { %767 = vmatpush1.bf16.msra.mxu0 %v3196_v9  ;;  %3138 = vmatpush1.bf16.msra.mxu1 %v3196_v9  ;;  %v3295_v9 = vld [vmem:[%s3418_s7 + $0x1d0] ss:$8 sps:$4 sm:$0xff]  }
  0x36   : > { %768 = vmatprep.subr.bf16.mxu0 %v3345_v2  ;;  %3123 = vmatprep.subr.bf16.mxu1 %v3345_v2 }
  0x39   : > { %769 = vmatpush1.bf16.msra.mxu0 %v3197_v10  ;;  %3139 = vmatpush1.bf16.msra.mxu1 %v3197_v10  ;;  %v3269_v10 = vld [vmem:[%s3418_s7 + $0xe4] ss:$8 sps:$4 sm:$0xff]  }
  0x3a   : > { %770 = vmatprep.subr.bf16.mxu0 %v3345_v2  ;;  %3124 = vmatprep.subr.bf16.mxu1 %v3345_v2 }
  0x3d   : > { %771 = vmatpush1.bf16.msra.mxu0 %v3198_v12  ;;  %3140 = vmatpush1.bf16.msra.mxu1 %v3198_v12  ;;  %v3271_v12 = vld [vmem:[%s3418_s7 + $0xe0] ss:$8 sps:$4 sm:$0xff]  }
  0x3e   : > { %772 = vmatprep.subr.bf16.mxu0 %v3345_v2  ;;  %3125 = vmatprep.subr.bf16.mxu1 %v3345_v2 }
  0x41   : > { %773 = vmatpush1.bf16.msra.mxu0 %v3199_v13  ;;  %3141 = vmatpush1.bf16.msra.mxu1 %v3199_v13  ;;  %v3298_v13 = vld [vmem:[%s3418_s7 + $0x1e0] ss:$8 sps:$4 sm:$0xff]  }
  0x42   : > { %774 = vmatprep.subr.bf16.mxu0 %v3345_v2  ;;  %3126 = vmatprep.subr.bf16.mxu1 %v3345_v2 }
  0x45   : > { %775 = vmatpush1.bf16.msra.mxu0 %v3200_v14  ;;  %3142 = vmatpush1.bf16.msra.mxu1 %v3200_v14  ;;  %v3275_v14 = vld [vmem:[%s3418_s7 + $0xf4] ss:$8 sps:$4 sm:$0xff]  }
  0x46   : > { %776 = vmatprep.subr.bf16.mxu0 %v3345_v2  ;;  %3127 = vmatprep.subr.bf16.mxu1 %v3345_v2 }
  0x49   : > { %777 = vmatpush1.bf16.msra.mxu0 %v3201_v15  ;;  %3143 = vmatpush1.bf16.msra.mxu1 %v3201_v15  ;;  %v3299_v15 = vld [vmem:[%s3418_s7 + $0x1f4] ss:$8 sps:$4 sm:$0xff]  }
  0x4a   : > { %778 = vmatprep.subr.bf16.mxu0 %v3345_v2  ;;  %3128 = vmatprep.subr.bf16.mxu1 %v3345_v2 }
  0x4d   : > { %779 = vmatpush1.bf16.msra.mxu0 %v3202_v16  ;;  %3144 = vmatpush1.bf16.msra.mxu1 %v3202_v16  ;;  %v3277_v16 = vld [vmem:[%s3418_s7 + $0xf0] ss:$8 sps:$4 sm:$0xff]  }
  0x4e   : > { %780 = vmatprep.subr.bf16.mxu0 %v3345_v2  ;;  %3129 = vmatprep.subr.bf16.mxu1 %v3345_v2 }
  0x51   : > { %781 = vmatpush1.bf16.msra.mxu0 %v3203_v17  ;;  %3145 = vmatpush1.bf16.msra.mxu1 %v3203_v17  ;;  %v3301_v17 = vld [vmem:[%s3418_s7 + $0x1f0] ss:$8 sps:$4 sm:$0xff]  }
  0x52   : > { %782 = vmatprep.subr.bf16.mxu0 %v3345_v2  ;;  %3130 = vmatprep.subr.bf16.mxu1 %v3345_v2 }
  0x55   : > { %783 = vmatpush1.bf16.msra.mxu0 %v3204_v18  ;;  %3146 = vmatpush1.bf16.msra.mxu1 %v3204_v18 }
  0x56   : > { %784 = vmatprep.subr.bf16.mxu0 %v3345_v2  ;;  %3131 = vmatprep.subr.bf16.mxu1 %v3345_v2  ;;  %v3257_v2 = vld [vmem:[%s3418_s7 + $0xc4] ss:$8 sps:$4 sm:$0xff]  }
  0x59   : > { %785 = vmatpush1.bf16.msra.mxu0 %v3205_v19  ;;  %3147 = vmatpush1.bf16.msra.mxu1 %v3205_v19 }
  0x5c   : > { %787 = vmatmul.mubr.bf16.vlgmr.msra.gmra.mrb[0].mxu0 %v3206_v20  ;;  %915 = vmatmul.mubr.bf16.vlgmr.msra.gmra.mrb[0].mxu1 %v3230_v21 }
  0x5d   : > { %794 = vmatprep.mubr.bf16.mxu0 %v3209_v22  ;;  %922 = vmatprep.mubr.bf16.mxu1 %v3236_v23 }
  0x64   : > { %795 = vmatmul.mubr.bf16.gmra.mrb[4].mxu0 %v3211_v24  ;;  %923 = vmatmul.mubr.bf16.gmra.mrb[4].mxu1 %v3238_v25 }
  0x65   : > { %802 = vmatprep.mubr.bf16.mxu0 %v3212_v26  ;;  %930 = vmatprep.mubr.bf16.mxu1 %v3242_v27 }
  0x6c   : > { %803 = vmatmul.mubr.bf16.gmra.mrb[8].mxu0 %v3214_v28  ;;  %931 = vmatmul.mubr.bf16.gmra.mrb[8].mxu1 %v3244_v29 }
  0x6d   : > { %810 = vmatprep.mubr.bf16.mxu0 %v3215_v30  ;;  %938 = vmatprep.mubr.bf16.mxu1 %v3248_v31 }
  0x74   : > { %811 = vmatmul.mubr.bf16.gmra.mrb[12].mxu0 %v3217_v32  ;;  %939 = vmatmul.mubr.bf16.gmra.mrb[12].mxu1 %v3250_v33 }
  0x75   : > { %818 = vmatprep.mubr.bf16.mxu0 %v3218_v34  ;;  %946 = vmatprep.mubr.bf16.mxu1 %v3254_v35 }
  0x7c   : > { %819 = vmatmul.mubr.bf16.gmra.mrb[16].mxu0 %v3220_v36  ;;  %947 = vmatmul.mubr.bf16.gmra.mrb[16].mxu1 %v3256_v37 }
  0x7d   : > { %826 = vmatprep.mubr.bf16.mxu0 %v3221_v38  ;;  %954 = vmatprep.mubr.bf16.mxu1 %v3260_v39 }
  0x84   : > { %827 = vmatmul.mubr.bf16.gmra.mrb[20].mxu0 %v3223_v40  ;;  %955 = vmatmul.mubr.bf16.gmra.mrb[20].mxu1 %v3262_v41 }
  0x85   : > { %834 = vmatprep.mubr.bf16.mxu0 %v3224_v42  ;;  %962 = vmatprep.mubr.bf16.mxu1 %v3266_v43 }
  0x8c   : > { %835 = vmatmul.mubr.bf16.gmra.mrb[24].mxu0 %v3226_v44  ;;  %963 = vmatmul.mubr.bf16.gmra.mrb[24].mxu1 %v3268_v45 }
  0x8d   : > { %842 = vmatprep.mubr.bf16.mxu0 %v3227_v46  ;;  %970 = vmatprep.mubr.bf16.mxu1 %v3272_v47 }
  0x94   : > { %843 = vmatmul.mubr.bf16.gmra.mrb[28].mxu0 %v3229_v48  ;;  %971 = vmatmul.mubr.bf16.gmra.mrb[28].mxu1 %v3274_v49 }
  0x95   : > { %850 = vmatprep.mubr.bf16.mxu0 %v3233_v50  ;;  %978 = vmatprep.mubr.bf16.mxu1 %v3278_v51 }
  0x9c   : > { %851 = vmatmul.mubr.bf16.gmra.mrb[32].mxu0 %v3235_v52  ;;  %979 = vmatmul.mubr.bf16.gmra.mrb[32].mxu1 %v3280_v53 }
  0x9d   : > { %858 = vmatprep.mubr.bf16.mxu0 %v3239_v54  ;;  %986 = vmatprep.mubr.bf16.mxu1 %v3281_v55 }
  0xa4   : > { %859 = vmatmul.mubr.bf16.gmra.mrb[36].mxu0 %v3241_v56  ;;  %987 = vmatmul.mubr.bf16.gmra.mrb[36].mxu1 %v3283_v57 }
  0xa5   : > { %866 = vmatprep.mubr.bf16.mxu0 %v3245_v58  ;;  %994 = vmatprep.mubr.bf16.mxu1 %v3284_v59 }
  0xac   : > { %867 = vmatmul.mubr.bf16.gmra.mrb[40].mxu0 %v3247_v60  ;;  %995 = vmatmul.mubr.bf16.gmra.mrb[40].mxu1 %v3286_v61 }
  0xad   : > { %874 = vmatprep.mubr.bf16.mxu0 %v3251_v62  ;;  %1002 = vmatprep.mubr.bf16.mxu1 %v3287_v63 }
  0xb4   : > { %875 = vmatmul.mubr.bf16.gmra.mrb[44].mxu0 %v3253_v0  ;;  %1003 = vmatmul.mubr.bf16.gmra.mrb[44].mxu1 %v3289_v1 }
  0xb5   : > { %882 = vmatprep.mubr.bf16.mxu0 %v3257_v2  ;;  %1010 = vmatprep.mubr.bf16.mxu1 %v3290_v3 }
  0xbc   : > { %883 = vmatmul.mubr.bf16.gmra.mrb[48].mxu0 %v3259_v4  ;;  %1011 = vmatmul.mubr.bf16.gmra.mrb[48].mxu1 %v3292_v5 }
  0xbd   : > { %890 = vmatprep.mubr.bf16.mxu0 %v3263_v6  ;;  %1018 = vmatprep.mubr.bf16.mxu1 %v3293_v7 }
  0xc4   : > { %891 = vmatmul.mubr.bf16.gmra.mrb[52].mxu0 %v3265_v8  ;;  %1019 = vmatmul.mubr.bf16.gmra.mrb[52].mxu1 %v3295_v9 }
  0xc5   : > { %898 = vmatprep.mubr.bf16.mxu0 %v3269_v10  ;;  %1026 = vmatprep.mubr.bf16.mxu1 %v3296_v11 }
  0xcc   : > { %899 = vmatmul.mubr.bf16.gmra.mrb[56].mxu0 %v3271_v12  ;;  %1027 = vmatmul.mubr.bf16.gmra.mrb[56].mxu1 %v3298_v13 }
  0xcd   : > { %906 = vmatprep.mubr.bf16.mxu0 %v3275_v14  ;;  %1034 = vmatprep.mubr.bf16.mxu1 %v3299_v15 }
  0xd4   : > { %907 = vmatmul.mubr.bf16.gmra.mrb[60].mxu0 %v3277_v16  ;;  %1035 = vmatmul.mubr.bf16.gmra.mrb[60].mxu1 %v3301_v17 }
 0x12f   : > { %v788_v18 = vpop.f32.mrb[0].mxu0  ;;  %v3566_v19 = vpop.f32.mrb[0].mxu1 }
 0x130   : > { %1045 = vst [vmem:[%s3568_s6] sm:$0xff] %v788_v18  ;;  %v790_v20 = vpop.f32.mrb[1].mxu0  ;;  %1077 = vst [vmem:[%s3568_s6 + $0x100] sm:$0xff] %v3566_v19  ;;  %v918_v21 = vpop.f32.mrb[1].mxu1  ;;  %v1182_v24 = vmul.f32 %v788_v18, %v788_v18 }
 0x131   : > { %v791_v22 = vpop.f32.mrb[2].mxu0  ;;  %v3573_v23 = vpop.f32.mrb[2].mxu1 }
 0x132   : > { %1046 = vst [vmem:[%s3568_s6 + $0x8] sm:$0xff] %v791_v22  ;;  %v1110_v25 = vadd.f32 %v791_v22, %v788_v18  ;;  %v1183_v26 = vmul.f32 %v791_v22, %v791_v22  ;;  %v2737_v27 = vpack.c.bf16 %v791_v22, %v788_v18  ;;  %v793_v28 = vpop.f32.mrb[3].mxu0  ;;  %1078 = vst [vmem:[%s3568_s6 + $0x108] sm:$0xff] %v3573_v23  ;;  %v921_v29 = vpop.f32.mrb[3].mxu1 }
 0x133   : > { %v2817_v30 = vpack.c.bf16 %v3573_v23, %v3566_v19 }
 0x134   : > { %v1246_v31 = vadd.f32 %v1183_v26, %v1182_v24  ;;  %2738 = vst [vmem:[%s3413_s30] sm:$0xff] %v2737_v27  }
 0x135   : > { %3069 = vst [vmem:[%s3413_s30 + $0x80] sm:$0xff] %v2817_v30  }
 0x137   : > { %v796_v32 = vpop.f32.mrb[4].mxu0  ;;  %v3582_v33 = vpop.f32.mrb[4].mxu1 }
 0x138   : > { %1047 = vst [vmem:[%s3568_s6 + $0x10] sm:$0xff] %v796_v32  ;;  %v1111_v34 = vadd.f32 %v1110_v25, %v796_v32  ;;  %v1184_v35 = vmul.f32 %v796_v32, %v796_v32  ;;  %v798_v36 = vpop.f32.mrb[5].mxu0  ;;  %1079 = vst [vmem:[%s3568_s6 + $0x110] sm:$0xff] %v3582_v33  ;;  %v926_v37 = vpop.f32.mrb[5].mxu1 }
 0x139   : > { %v799_v38 = vpop.f32.mrb[6].mxu0  ;;  %v3587_v39 = vpop.f32.mrb[6].mxu1 }
 0x13a   : > { %v1247_v40 = vadd.f32 %v1246_v31, %v1184_v35  ;;  %1048 = vst [vmem:[%s3568_s6 + $0x18] sm:$0xff] %v799_v38  ;;  %v1112_v41 = vadd.f32 %v1111_v34, %v799_v38  ;;  %v1185_v42 = vmul.f32 %v799_v38, %v799_v38  ;;  %v2742_v43 = vpack.c.bf16 %v799_v38, %v796_v32  ;;  %v801_v44 = vpop.f32.mrb[7].mxu0  ;;  %v929_v45 = vpop.f32.mrb[7].mxu1 }
 0x13b   : > { %1080 = vst [vmem:[%s3568_s6 + $0x118] sm:$0xff] %v3587_v39  ;;  %v2822_v46 = vpack.c.bf16 %v3587_v39, %v3582_v33 }
 0x13c   : > { %v1248_v47 = vadd.f32 %v1247_v40, %v1185_v42  ;;  %3054 = vst [vmem:[%s3413_s30 + $0x8] sm:$0xff] %v2742_v43  }
 0x13d   : > { %3070 = vst [vmem:[%s3413_s30 + $0x88] sm:$0xff] %v2822_v46  }
 0x13f   : > { %v804_v48 = vpop.f32.mrb[8].mxu0  ;;  %v3596_v49 = vpop.f32.mrb[8].mxu1 }
 0x140   : > { %1049 = vst [vmem:[%s3568_s6 + $0x20] sm:$0xff] %v804_v48  ;;  %v1113_v50 = vadd.f32 %v1112_v41, %v804_v48  ;;  %v1186_v51 = vmul.f32 %v804_v48, %v804_v48  ;;  %v806_v52 = vpop.f32.mrb[9].mxu0  ;;  %1081 = vst [vmem:[%s3568_s6 + $0x120] sm:$0xff] %v3596_v49  ;;  %v934_v53 = vpop.f32.mrb[9].mxu1 }
 0x141   : > { %v807_v54 = vpop.f32.mrb[10].mxu0  ;;  %v3601_v55 = vpop.f32.mrb[10].mxu1 }
 0x142   : > { %v1249_v56 = vadd.f32 %v1248_v47, %v1186_v51  ;;  %1050 = vst [vmem:[%s3568_s6 + $0x28] sm:$0xff] %v807_v54  ;;  %v1114_v57 = vadd.f32 %v1113_v50, %v807_v54  ;;  %v1187_v58 = vmul.f32 %v807_v54, %v807_v54  ;;  %v2747_v59 = vpack.c.bf16 %v807_v54, %v804_v48  ;;  %v809_v60 = vpop.f32.mrb[11].mxu0  ;;  %v937_v61 = vpop.f32.mrb[11].mxu1 }
 0x143   : > { %1082 = vst [vmem:[%s3568_s6 + $0x128] sm:$0xff] %v3601_v55  ;;  %v2827_v62 = vpack.c.bf16 %v3601_v55, %v3596_v49 }
 0x144   : > { %v1250_v63 = vadd.f32 %v1249_v56, %v1187_v58  ;;  %3055 = vst [vmem:[%s3413_s30 + $0x10] sm:$0xff] %v2747_v59  }
 0x145   : > { %3071 = vst [vmem:[%s3413_s30 + $0x90] sm:$0xff] %v2827_v62  }
 0x147   : > { %v812_v0 = vpop.f32.mrb[12].mxu0  ;;  %v3610_v1 = vpop.f32.mrb[12].mxu1 }
 0x148   : > { %1051 = vst [vmem:[%s3568_s6 + $0x30] sm:$0xff] %v812_v0  ;;  %v1115_v2 = vadd.f32 %v1114_v57, %v812_v0  ;;  %v1188_v3 = vmul.f32 %v812_v0, %v812_v0  ;;  %v814_v4 = vpop.f32.mrb[13].mxu0  ;;  %1083 = vst [vmem:[%s3568_s6 + $0x130] sm:$0xff] %v3610_v1  ;;  %v942_v5 = vpop.f32.mrb[13].mxu1 }
 0x149   : > { %v815_v6 = vpop.f32.mrb[14].mxu0  ;;  %v3615_v7 = vpop.f32.mrb[14].mxu1 }
 0x14a   : > { %v1251_v8 = vadd.f32 %v1250_v63, %v1188_v3  ;;  %1052 = vst [vmem:[%s3568_s6 + $0x38] sm:$0xff] %v815_v6  ;;  %v1116_v9 = vadd.f32 %v1115_v2, %v815_v6  ;;  %v1189_v10 = vmul.f32 %v815_v6, %v815_v6  ;;  %v2752_v11 = vpack.c.bf16 %v815_v6, %v812_v0  ;;  %v817_v12 = vpop.f32.mrb[15].mxu0  ;;  %v945_v13 = vpop.f32.mrb[15].mxu1 }
 0x14b   : > { %1084 = vst [vmem:[%s3568_s6 + $0x138] sm:$0xff] %v3615_v7  ;;  %v2832_v14 = vpack.c.bf16 %v3615_v7, %v3610_v1 }
 0x14c   : > { %v1252_v15 = vadd.f32 %v1251_v8, %v1189_v10  ;;  %3056 = vst [vmem:[%s3413_s30 + $0x18] sm:$0xff] %v2752_v11  }
 0x14d   : > { %3072 = vst [vmem:[%s3413_s30 + $0x98] sm:$0xff] %v2832_v14  }
 0x14f   : > { %v820_v16 = vpop.f32.mrb[16].mxu0  ;;  %v3624_v17 = vpop.f32.mrb[16].mxu1 }
 0x150   : > { %1053 = vst [vmem:[%s3568_s6 + $0x40] sm:$0xff] %v820_v16  ;;  %v1117_v18 = vadd.f32 %v1116_v9, %v820_v16  ;;  %v1190_v20 = vmul.f32 %v820_v16, %v820_v16  ;;  %v822_v21 = vpop.f32.mrb[17].mxu0  ;;  %1085 = vst [vmem:[%s3568_s6 + $0x140] sm:$0xff] %v3624_v17  ;;  %v950_v22 = vpop.f32.mrb[17].mxu1 }
 0x151   : > { %v823_v24 = vpop.f32.mrb[18].mxu0  ;;  %v3629_v25 = vpop.f32.mrb[18].mxu1 }
 0x152   : > { %v1253_v26 = vadd.f32 %v1252_v15, %v1190_v20  ;;  %1054 = vst [vmem:[%s3568_s6 + $0x48] sm:$0xff] %v823_v24  ;;  %v1118_v27 = vadd.f32 %v1117_v18, %v823_v24  ;;  %v1191_v28 = vmul.f32 %v823_v24, %v823_v24  ;;  %v2757_v29 = vpack.c.bf16 %v823_v24, %v820_v16  ;;  %v825_v30 = vpop.f32.mrb[19].mxu0  ;;  %v953_v31 = vpop.f32.mrb[19].mxu1 }
 0x153   : > { %1086 = vst [vmem:[%s3568_s6 + $0x148] sm:$0xff] %v3629_v25  ;;  %v2837_v32 = vpack.c.bf16 %v3629_v25, %v3624_v17 }
 0x154   : > { %v1254_v34 = vadd.f32 %v1253_v26, %v1191_v28  ;;  %3057 = vst [vmem:[%s3413_s30 + $0x20] sm:$0xff] %v2757_v29  }
 0x155   : > { %3073 = vst [vmem:[%s3413_s30 + $0xa0] sm:$0xff] %v2837_v32  }
 0x157   : > { %v828_v35 = vpop.f32.mrb[20].mxu0  ;;  %v3638_v36 = vpop.f32.mrb[20].mxu1 }
 0x158   : > { %1055 = vst [vmem:[%s3568_s6 + $0x50] sm:$0xff] %v828_v35  ;;  %v1119_v37 = vadd.f32 %v1118_v27, %v828_v35  ;;  %v1192_v38 = vmul.f32 %v828_v35, %v828_v35  ;;  %v830_v40 = vpop.f32.mrb[21].mxu0  ;;  %1087 = vst [vmem:[%s3568_s6 + $0x150] sm:$0xff] %v3638_v36  ;;  %v958_v41 = vpop.f32.mrb[21].mxu1 }
 0x159   : > { %v831_v42 = vpop.f32.mrb[22].mxu0  ;;  %v3643_v43 = vpop.f32.mrb[22].mxu1 }
 0x15a   : > { %v1255_v44 = vadd.f32 %v1254_v34, %v1192_v38  ;;  %1056 = vst [vmem:[%s3568_s6 + $0x58] sm:$0xff] %v831_v42  ;;  %v1120_v45 = vadd.f32 %v1119_v37, %v831_v42  ;;  %v1193_v46 = vmul.f32 %v831_v42, %v831_v42  ;;  %v2762_v47 = vpack.c.bf16 %v831_v42, %v828_v35  ;;  %v833_v48 = vpop.f32.mrb[23].mxu0  ;;  %v961_v50 = vpop.f32.mrb[23].mxu1 }
 0x15b   : > { %1088 = vst [vmem:[%s3568_s6 + $0x158] sm:$0xff] %v3643_v43  ;;  %v2842_v51 = vpack.c.bf16 %v3643_v43, %v3638_v36 }
 0x15c   : > { %v1256_v52 = vadd.f32 %v1255_v44, %v1193_v46  ;;  %3058 = vst [vmem:[%s3413_s30 + $0x28] sm:$0xff] %v2762_v47  }
 0x15d   : > { %3074 = vst [vmem:[%s3413_s30 + $0xa8] sm:$0xff] %v2842_v51  }
 0x15f   : > { %v836_v53 = vpop.f32.mrb[24].mxu0  ;;  %v3652_v54 = vpop.f32.mrb[24].mxu1 }
 0x160   : > { %1057 = vst [vmem:[%s3568_s6 + $0x60] sm:$0xff] %v836_v53  ;;  %v1121_v56 = vadd.f32 %v1120_v45, %v836_v53  ;;  %v1194_v57 = vmul.f32 %v836_v53, %v836_v53  ;;  %v838_v58 = vpop.f32.mrb[25].mxu0  ;;  %1089 = vst [vmem:[%s3568_s6 + $0x160] sm:$0xff] %v3652_v54  ;;  %v966_v59 = vpop.f32.mrb[25].mxu1 }
 0x161   : > { %v839_v60 = vpop.f32.mrb[26].mxu0  ;;  %v3657_v61 = vpop.f32.mrb[26].mxu1 }
 0x162   : > { %v1257_v62 = vadd.f32 %v1256_v52, %v1194_v57  ;;  %1058 = vst [vmem:[%s3568_s6 + $0x68] sm:$0xff] %v839_v60  ;;  %v1122_v63 = vadd.f32 %v1121_v56, %v839_v60  ;;  %v1195_v0 = vmul.f32 %v839_v60, %v839_v60  ;;  %v2767_v2 = vpack.c.bf16 %v839_v60, %v836_v53  ;;  %v841_v3 = vpop.f32.mrb[27].mxu0  ;;  %v969_v4 = vpop.f32.mrb[27].mxu1 }
 0x163   : > { %1090 = vst [vmem:[%s3568_s6 + $0x168] sm:$0xff] %v3657_v61  ;;  %v2847_v5 = vpack.c.bf16 %v3657_v61, %v3652_v54 }
 0x164   : > { %v1258_v6 = vadd.f32 %v1257_v62, %v1195_v0  ;;  %3059 = vst [vmem:[%s3413_s30 + $0x30] sm:$0xff] %v2767_v2  }
 0x165   : > { %3075 = vst [vmem:[%s3413_s30 + $0xb0] sm:$0xff] %v2847_v5  }
 0x167   : > { %v844_v8 = vpop.f32.mrb[28].mxu0  ;;  %v3666_v9 = vpop.f32.mrb[28].mxu1 }
 0x168   : > { %1059 = vst [vmem:[%s3568_s6 + $0x70] sm:$0xff] %v844_v8  ;;  %v1123_v10 = vadd.f32 %v1122_v63, %v844_v8  ;;  %v1196_v11 = vmul.f32 %v844_v8, %v844_v8  ;;  %v846_v12 = vpop.f32.mrb[29].mxu0  ;;  %1091 = vst [vmem:[%s3568_s6 + $0x170] sm:$0xff] %v3666_v9  ;;  %v974_v13 = vpop.f32.mrb[29].mxu1 }
 0x169   : > { %v847_v14 = vpop.f32.mrb[30].mxu0  ;;  %v3671_v15 = vpop.f32.mrb[30].mxu1 }
 0x16a   : > { %v1259_v16 = vadd.f32 %v1258_v6, %v1196_v11  ;;  %1060 = vst [vmem:[%s3568_s6 + $0x78] sm:$0xff] %v847_v14  ;;  %v1124_v18 = vadd.f32 %v1123_v10, %v847_v14  ;;  %v1197_v20 = vmul.f32 %v847_v14, %v847_v14  ;;  %v2772_v21 = vpack.c.bf16 %v847_v14, %v844_v8  ;;  %v849_v22 = vpop.f32.mrb[31].mxu0  ;;  %v977_v24 = vpop.f32.mrb[31].mxu1 }
 0x16b   : > { %1092 = vst [vmem:[%s3568_s6 + $0x178] sm:$0xff] %v3671_v15  ;;  %v2852_v26 = vpack.c.bf16 %v3671_v15, %v3666_v9 }
 0x16c   : > { %v1260_v27 = vadd.f32 %v1259_v16, %v1197_v20  ;;  %3060 = vst [vmem:[%s3413_s30 + $0x38] sm:$0xff] %v2772_v21  }
 0x16d   : > { %3076 = vst [vmem:[%s3413_s30 + $0xb8] sm:$0xff] %v2852_v26  }
 0x16f   : > { %v852_v28 = vpop.f32.mrb[32].mxu0  ;;  %v3680_v29 = vpop.f32.mrb[32].mxu1 }
 0x170   : > { %1061 = vst [vmem:[%s3568_s6 + $0x80] sm:$0xff] %v852_v28  ;;  %v1125_v30 = vadd.f32 %v1124_v18, %v852_v28  ;;  %v1198_v31 = vmul.f32 %v852_v28, %v852_v28  ;;  %v854_v32 = vpop.f32.mrb[33].mxu0  ;;  %1093 = vst [vmem:[%s3568_s6 + $0x180] sm:$0xff] %v3680_v29  ;;  %v982_v34 = vpop.f32.mrb[33].mxu1 }
 0x171   : > { %v855_v35 = vpop.f32.mrb[34].mxu0  ;;  %v3685_v37 = vpop.f32.mrb[34].mxu1 }
 0x172   : > { %v1261_v38 = vadd.f32 %v1260_v27, %v1198_v31  ;;  %1062 = vst [vmem:[%s3568_s6 + $0x88] sm:$0xff] %v855_v35  ;;  %v1126_v40 = vadd.f32 %v1125_v30, %v855_v35  ;;  %v1199_v41 = vmul.f32 %v855_v35, %v855_v35  ;;  %v2777_v42 = vpack.c.bf16 %v855_v35, %v852_v28  ;;  %v857_v44 = vpop.f32.mrb[35].mxu0  ;;  %v985_v45 = vpop.f32.mrb[35].mxu1 }
 0x173   : > { %1094 = vst [vmem:[%s3568_s6 + $0x188] sm:$0xff] %v3685_v37  ;;  %v2857_v46 = vpack.c.bf16 %v3685_v37, %v3680_v29 }
 0x174   : > { %v1262_v47 = vadd.f32 %v1261_v38, %v1199_v41  ;;  %3061 = vst [vmem:[%s3413_s30 + $0x40] sm:$0xff] %v2777_v42  }
 0x175   : > { %3077 = vst [vmem:[%s3413_s30 + $0xc0] sm:$0xff] %v2857_v46  }
 0x177   : > { %v860_v48 = vpop.f32.mrb[36].mxu0  ;;  %v3694_v50 = vpop.f32.mrb[36].mxu1 }
 0x178   : > { %1063 = vst [vmem:[%s3568_s6 + $0x90] sm:$0xff] %v860_v48  ;;  %v1127_v51 = vadd.f32 %v1126_v40, %v860_v48  ;;  %v1200_v52 = vmul.f32 %v860_v48, %v860_v48  ;;  %v862_v53 = vpop.f32.mrb[37].mxu0  ;;  %1095 = vst [vmem:[%s3568_s6 + $0x190] sm:$0xff] %v3694_v50  ;;  %v990_v56 = vpop.f32.mrb[37].mxu1 }
 0x179   : > { %v863_v57 = vpop.f32.mrb[38].mxu0  ;;  %v3699_v58 = vpop.f32.mrb[38].mxu1 }
 0x17a   : > { %v1263_v59 = vadd.f32 %v1262_v47, %v1200_v52  ;;  %1064 = vst [vmem:[%s3568_s6 + $0x98] sm:$0xff] %v863_v57  ;;  %v1128_v60 = vadd.f32 %v1127_v51, %v863_v57  ;;  %v1201_v62 = vmul.f32 %v863_v57, %v863_v57  ;;  %v2782_v63 = vpack.c.bf16 %v863_v57, %v860_v48  ;;  %v865_v0 = vpop.f32.mrb[39].mxu0  ;;  %v993_v2 = vpop.f32.mrb[39].mxu1 }
 0x17b   : > { %1096 = vst [vmem:[%s3568_s6 + $0x198] sm:$0xff] %v3699_v58  ;;  %v2862_v3 = vpack.c.bf16 %v3699_v58, %v3694_v50 }
 0x17c   : > { %v1264_v4 = vadd.f32 %v1263_v59, %v1201_v62  ;;  %3062 = vst [vmem:[%s3413_s30 + $0x48] sm:$0xff] %v2782_v63  }
 0x17d   : > { %3078 = vst [vmem:[%s3413_s30 + $0xc8] sm:$0xff] %v2862_v3  }
 0x17f   : > { %v868_v5 = vpop.f32.mrb[40].mxu0  ;;  %v3708_v6 = vpop.f32.mrb[40].mxu1 }
 0x180   : > { %1065 = vst [vmem:[%s3568_s6 + $0xa0] sm:$0xff] %v868_v5  ;;  %v1129_v8 = vadd.f32 %v1128_v60, %v868_v5  ;;  %v1202_v10 = vmul.f32 %v868_v5, %v868_v5  ;;  %v870_v11 = vpop.f32.mrb[41].mxu0  ;;  %1097 = vst [vmem:[%s3568_s6 + $0x1a0] sm:$0xff] %v3708_v6  ;;  %v998_v12 = vpop.f32.mrb[41].mxu1 }
 0x181   : > { %v871_v13 = vpop.f32.mrb[42].mxu0  ;;  %v3713_v14 = vpop.f32.mrb[42].mxu1 }
 0x182   : > { %v1265_v16 = vadd.f32 %v1264_v4, %v1202_v10  ;;  %1066 = vst [vmem:[%s3568_s6 + $0xa8] sm:$0xff] %v871_v13  ;;  %v1130_v18 = vadd.f32 %v1129_v8, %v871_v13  ;;  %v1203_v20 = vmul.f32 %v871_v13, %v871_v13  ;;  %v2787_v21 = vpack.c.bf16 %v871_v13, %v868_v5  ;;  %v873_v22 = vpop.f32.mrb[43].mxu0  ;;  %v1001_v24 = vpop.f32.mrb[43].mxu1 }
 0x183   : > { %1098 = vst [vmem:[%s3568_s6 + $0x1a8] sm:$0xff] %v3713_v14  ;;  %v2867_v26 = vpack.c.bf16 %v3713_v14, %v3708_v6 }
 0x184   : > { %v1266_v27 = vadd.f32 %v1265_v16, %v1203_v20  ;;  %3063 = vst [vmem:[%s3413_s30 + $0x50] sm:$0xff] %v2787_v21  }
 0x185   : > { %3079 = vst [vmem:[%s3413_s30 + $0xd0] sm:$0xff] %v2867_v26  }
 0x187   : > { %v876_v28 = vpop.f32.mrb[44].mxu0  ;;  %v3722_v30 = vpop.f32.mrb[44].mxu1 }
 0x188   : > { %1067 = vst [vmem:[%s3568_s6 + $0xb0] sm:$0xff] %v876_v28  ;;  %v1131_v31 = vadd.f32 %v1130_v18, %v876_v28  ;;  %v1204_v32 = vmul.f32 %v876_v28, %v876_v28  ;;  %v878_v34 = vpop.f32.mrb[45].mxu0  ;;  %1099 = vst [vmem:[%s3568_s6 + $0x1b0] sm:$0xff] %v3722_v30  ;;  %v1006_v35 = vpop.f32.mrb[45].mxu1 }
 0x189   : > { %v879_v38 = vpop.f32.mrb[46].mxu0  ;;  %v3727_v40 = vpop.f32.mrb[46].mxu1 }
 0x18a   : > { %v1267_v41 = vadd.f32 %v1266_v27, %v1204_v32  ;;  %1068 = vst [vmem:[%s3568_s6 + $0xb8] sm:$0xff] %v879_v38  ;;  %v1132_v42 = vadd.f32 %v1131_v31, %v879_v38  ;;  %v1205_v44 = vmul.f32 %v879_v38, %v879_v38  ;;  %v2792_v45 = vpack.c.bf16 %v879_v38, %v876_v28  ;;  %v881_v46 = vpop.f32.mrb[47].mxu0  ;;  %v1009_v47 = vpop.f32.mrb[47].mxu1 }
 0x18b   : > { %1100 = vst [vmem:[%s3568_s6 + $0x1b8] sm:$0xff] %v3727_v40  ;;  %v2872_v48 = vpack.c.bf16 %v3727_v40, %v3722_v30 }
 0x18c   : > { %v1268_v51 = vadd.f32 %v1267_v41, %v1205_v44  ;;  %3064 = vst [vmem:[%s3413_s30 + $0x58] sm:$0xff] %v2792_v45  }
 0x18d   : > { %3080 = vst [vmem:[%s3413_s30 + $0xd8] sm:$0xff] %v2872_v48  }
 0x18f   : > { %v884_v52 = vpop.f32.mrb[48].mxu0  ;;  %v3736_v53 = vpop.f32.mrb[48].mxu1 }
 0x190   : > { %1069 = vst [vmem:[%s3568_s6 + $0xc0] sm:$0xff] %v884_v52  ;;  %v1133_v56 = vadd.f32 %v1132_v42, %v884_v52  ;;  %v1206_v57 = vmul.f32 %v884_v52, %v884_v52  ;;  %v886_v59 = vpop.f32.mrb[49].mxu0  ;;  %1101 = vst [vmem:[%s3568_s6 + $0x1c0] sm:$0xff] %v3736_v53  ;;  %v1014_v60 = vpop.f32.mrb[49].mxu1 }
 0x191   : > { %v887_v62 = vpop.f32.mrb[50].mxu0  ;;  %v3741_v63 = vpop.f32.mrb[50].mxu1 }
 0x192   : > { %v1269_v0 = vadd.f32 %v1268_v51, %v1206_v57  ;;  %1070 = vst [vmem:[%s3568_s6 + $0xc8] sm:$0xff] %v887_v62  ;;  %v1134_v2 = vadd.f32 %v1133_v56, %v887_v62  ;;  %v1207_v3 = vmul.f32 %v887_v62, %v887_v62  ;;  %v2797_v4 = vpack.c.bf16 %v887_v62, %v884_v52  ;;  %v889_v5 = vpop.f32.mrb[51].mxu0  ;;  %v1017_v8 = vpop.f32.mrb[51].mxu1 }
 0x193   : > { %1102 = vst [vmem:[%s3568_s6 + $0x1c8] sm:$0xff] %v3741_v63  ;;  %v2877_v10 = vpack.c.bf16 %v3741_v63, %v3736_v53 }
 0x194   : > { %v1270_v11 = vadd.f32 %v1269_v0, %v1207_v3  ;;  %3065 = vst [vmem:[%s3413_s30 + $0x60] sm:$0xff] %v2797_v4  }
 0x195   : > { %3081 = vst [vmem:[%s3413_s30 + $0xe0] sm:$0xff] %v2877_v10  }
 0x197   : > { %v892_v12 = vpop.f32.mrb[52].mxu0  ;;  %v3750_v13 = vpop.f32.mrb[52].mxu1 }
 0x198   : > { %1071 = vst [vmem:[%s3568_s6 + $0xd0] sm:$0xff] %v892_v12  ;;  %v1135_v16 = vadd.f32 %v1134_v2, %v892_v12  ;;  %v1208_v18 = vmul.f32 %v892_v12, %v892_v12  ;;  %v894_v20 = vpop.f32.mrb[53].mxu0  ;;  %1103 = vst [vmem:[%s3568_s6 + $0x1d0] sm:$0xff] %v3750_v13  ;;  %v1022_v21 = vpop.f32.mrb[53].mxu1 }
 0x199   : > { %v895_v22 = vpop.f32.mrb[54].mxu0  ;;  %v3755_v24 = vpop.f32.mrb[54].mxu1 }
 0x19a   : > { %v1271_v26 = vadd.f32 %v1270_v11, %v1208_v18  ;;  %1072 = vst [vmem:[%s3568_s6 + $0xd8] sm:$0xff] %v895_v22  ;;  %v1136_v27 = vadd.f32 %v1135_v16, %v895_v22  ;;  %v1209_v28 = vmul.f32 %v895_v22, %v895_v22  ;;  %v2802_v31 = vpack.c.bf16 %v895_v22, %v892_v12  ;;  %v897_v32 = vpop.f32.mrb[55].mxu0  ;;  %v1025_v34 = vpop.f32.mrb[55].mxu1 }
 0x19b   : > { %1104 = vst [vmem:[%s3568_s6 + $0x1d8] sm:$0xff] %v3755_v24  ;;  %v2882_v35 = vpack.c.bf16 %v3755_v24, %v3750_v13 }
 0x19c   : > { %v1272_v38 = vadd.f32 %v1271_v26, %v1209_v28  ;;  %3066 = vst [vmem:[%s3413_s30 + $0x68] sm:$0xff] %v2802_v31   ;;  %v1214_v31 = vmul.f32 %v3566_v19, %v3566_v19 }
 0x19d   : > { %3082 = vst [vmem:[%s3413_s30 + $0xe8] sm:$0xff] %v2882_v35   ;;  %v1215_v35 = vmul.f32 %v3573_v23, %v3573_v23 }
 0x19f   : > { %v900_v41 = vpop.f32.mrb[56].mxu0  ;;  %v3764_v42 = vpop.f32.mrb[56].mxu1 }
 0x1a0   : > { %1073 = vst [vmem:[%s3568_s6 + $0xe0] sm:$0xff] %v900_v41  ;;  %v1137_v44 = vadd.f32 %v1136_v27, %v900_v41  ;;  %v1210_v45 = vmul.f32 %v900_v41, %v900_v41  ;;  %v902_v46 = vpop.f32.mrb[57].mxu0  ;;  %1105 = vst [vmem:[%s3568_s6 + $0x1e0] sm:$0xff] %v3764_v42  ;;  %v1030_v47 = vpop.f32.mrb[57].mxu1 }
 0x1a1   : > { %v903_v48 = vpop.f32.mrb[58].mxu0  ;;  %v3769_v51 = vpop.f32.mrb[58].mxu1  ;;  %v1217_v47 = vmul.f32 %v3587_v39, %v3587_v39 }
 0x1a2   : > { %v1273_v52 = vadd.f32 %v1272_v38, %v1210_v45  ;;  %1074 = vst [vmem:[%s3568_s6 + $0xe8] sm:$0xff] %v903_v48  ;;  %v1138_v56 = vadd.f32 %v1137_v44, %v903_v48  ;;  %v1211_v57 = vmul.f32 %v903_v48, %v903_v48  ;;  %v2807_v59 = vpack.c.bf16 %v903_v48, %v900_v41  ;;  %v905_v60 = vpop.f32.mrb[59].mxu0  ;;  %v1033_v62 = vpop.f32.mrb[59].mxu1 }
 0x1a3   : > { %1106 = vst [vmem:[%s3568_s6 + $0x1e8] sm:$0xff] %v3769_v51  ;;  %v2887_v0 = vpack.c.bf16 %v3769_v51, %v3764_v42  ;;  %v1216_v44 = vmul.f32 %v3582_v33, %v3582_v33 }
 0x1a4   : > { %v1274_v2 = vadd.f32 %v1273_v52, %v1211_v57  ;;  %3067 = vst [vmem:[%s3413_s30 + $0x70] sm:$0xff] %v2807_v59   ;;  %v1218_v52 = vmul.f32 %v3596_v49, %v3596_v49 }
 0x1a5   : > { %3083 = vst [vmem:[%s3413_s30 + $0xf0] sm:$0xff] %v2887_v0  }
 0x1a7   : > { %v908_v3 = vpop.f32.mrb[60].mxu0  ;;  %v3778_v4 = vpop.f32.mrb[60].mxu1 }
 0x1a8   : > { %1075 = vst [vmem:[%s3568_s6 + $0xf0] sm:$0xff] %v908_v3  ;;  %v1139_v5 = vadd.f32 %v1138_v56, %v908_v3  ;;  %v1212_v8 = vmul.f32 %v908_v3, %v908_v3  ;;  %v910_v10 = vpop.f32.mrb[61].mxu0  ;;  %1107 = vst [vmem:[%s3568_s6 + $0x1f0] sm:$0xff] %v3778_v4  ;;  %v1038_v11 = vpop.f32.mrb[61].mxu1 }
 0x1a9   : > { %v911_v12 = vpop.f32.mrb[62].mxu0  ;;  %v3783_v16 = vpop.f32.mrb[62].mxu1 }
 0x1aa   : > { %v1275_v18 = vadd.f32 %v1274_v2, %v1212_v8  ;;  %1076 = vst [vmem:[%s3568_s6 + $0xf8] sm:$0xff] %v911_v12  ;;  %v1140_v20 = vadd.f32 %v1139_v5, %v911_v12  ;;  %v1213_v21 = vmul.f32 %v911_v12, %v911_v12  ;;  %v2812_v22 = vpack.c.bf16 %v911_v12, %v908_v3  ;;  %v913_v26 = vpop.f32.mrb[63].mxu0  ;;  %v1041_v27 = vpop.f32.mrb[63].mxu1 }
 0x1ab   : > { %1108 = vst [vmem:[%s3568_s6 + $0x1f8] sm:$0xff] %v3783_v16  ;;  %v2892_v28 = vpack.c.bf16 %v3783_v16, %v3778_v4 }
 0x1ac   : > { %v1141_v32 = vadd.f32 %v1140_v20, %v3566_v19  ;;  %v1276_v34 = vadd.f32 %v1275_v18, %v1213_v21  ;;  %3068 = vst [vmem:[%s3413_s30 + $0x78] sm:$0xff] %v2812_v22  }
 0x1ad   : > { %3084 = vst [vmem:[%s3413_s30 + $0xf8] sm:$0xff] %v2892_v28  }
 0x1ae   : > { %v1142_v38 = vadd.f32 %v1141_v32, %v3573_v23  ;;  %v1277_v41 = vadd.f32 %v1276_v34, %v1214_v31  ;;  %v1219_v23 = vmul.f32 %v3601_v55, %v3601_v55 }
 0x1b0   : > { %v1143_v45 = vadd.f32 %v1142_v38, %v3582_v33  ;;  %v1278_v46 = vadd.f32 %v1277_v41, %v1215_v35  ;;  %v1220_v33 = vmul.f32 %v3610_v1, %v3610_v1  ;;  %v1230_v38 = vmul.f32 %v3680_v29, %v3680_v29 }
 0x1b2   : > { %v1144_v19 = vadd.f32 %v1143_v45, %v3587_v39  ;;  %v1279_v48 = vadd.f32 %v1278_v46, %v1216_v44  ;;  %v1221_v39 = vmul.f32 %v3615_v7, %v3615_v7  ;;  %v1231_v45 = vmul.f32 %v3685_v37, %v3685_v37 }
 0x1b4   : > { %v1145_v56 = vadd.f32 %v1144_v19, %v3596_v49  ;;  %v1280_v57 = vadd.f32 %v1279_v48, %v1217_v47  ;;  %v1222_v49 = vmul.f32 %v3624_v17, %v3624_v17  ;;  %v1232_v47 = vmul.f32 %v3694_v50, %v3694_v50 }
 0x1b5   : > { %v1233_v48 = vmul.f32 %v3699_v58, %v3699_v58 }
 0x1b6   : > { %v1146_v59 = vadd.f32 %v1145_v56, %v3601_v55  ;;  %v1281_v60 = vadd.f32 %v1280_v57, %v1218_v52  ;;  %v1223_v55 = vmul.f32 %v3629_v25, %v3629_v25  ;;  %v1234_v56 = vmul.f32 %v3708_v6, %v3708_v6 }
 0x1b8   : > { %v1147_v62 = vadd.f32 %v1146_v59, %v3610_v1  ;;  %v1282_v0 = vadd.f32 %v1281_v60, %v1219_v23  ;;  %v1224_v1 = vmul.f32 %v3638_v36, %v3638_v36  ;;  %v1235_v23 = vmul.f32 %v3713_v14, %v3713_v14 }
 0x1b9   : > { %v1236_v60 = vmul.f32 %v3722_v30, %v3722_v30 }
 0x1ba   : > { %v1148_v2 = vadd.f32 %v1147_v62, %v3615_v7  ;;  %v1283_v3 = vadd.f32 %v1282_v0, %v1220_v33  ;;  %v1225_v7 = vmul.f32 %v3643_v43, %v3643_v43  ;;  %v1237_v62 = vmul.f32 %v3727_v40, %v3727_v40 }
 0x1bc   : > { %v1284_v5 = vadd.f32 %v1283_v3, %v1221_v39  ;;  %v1149_v8 = vadd.f32 %v1148_v2, %v3624_v17  ;;  %v1226_v17 = vmul.f32 %v3652_v54, %v3652_v54  ;;  %v1238_v39 = vmul.f32 %v3736_v53, %v3736_v53 }
 0x1bd   : > { %v1239_v3 = vmul.f32 %v3741_v63, %v3741_v63 }
 0x1be   : > { %v1150_v10 = vadd.f32 %v1149_v8, %v3629_v25  ;;  %v1285_v11 = vadd.f32 %v1284_v5, %v1222_v49  ;;  %v1227_v25 = vmul.f32 %v3657_v61, %v3657_v61  ;;  %v1240_v5 = vmul.f32 %v3750_v13, %v3750_v13 }
 0x1c0   : > { %v1151_v12 = vadd.f32 %v1150_v10, %v3638_v36  ;;  %v1286_v18 = vadd.f32 %v1285_v11, %v1223_v55  ;;  %v1228_v36 = vmul.f32 %v3666_v9, %v3666_v9  ;;  %v1241_v55 = vmul.f32 %v3755_v24, %v3755_v24 }
 0x1c1   : > { %v1242_v11 = vmul.f32 %v3764_v42, %v3764_v42 }
 0x1c2   : > { %v1152_v20 = vadd.f32 %v1151_v12, %v3643_v43  ;;  %v1287_v21 = vadd.f32 %v1286_v18, %v1224_v1  ;;  %v1229_v43 = vmul.f32 %v3671_v15, %v3671_v15  ;;  %v1243_v12 = vmul.f32 %v3769_v51, %v3769_v51 }
 0x1c4   : > { %v1153_v22 = vadd.f32 %v1152_v20, %v3652_v54  ;;  %v1288_v26 = vadd.f32 %v1287_v21, %v1225_v7  ;;  %v1245_v21 = vmul.f32 %v3783_v16, %v3783_v16 }
 0x1c6   : > { %v1154_v27 = vadd.f32 %v1153_v22, %v3657_v61  ;;  %v1289_v28 = vadd.f32 %v1288_v26, %v1226_v17 }
 0x1c8   : > { %v1155_v31 = vadd.f32 %v1154_v27, %v3666_v9  ;;  %v1290_v32 = vadd.f32 %v1289_v28, %v1227_v25 }
 0x1ca   : > { %v1156_v34 = vadd.f32 %v1155_v31, %v3671_v15  ;;  %v1291_v35 = vadd.f32 %v1290_v32, %v1228_v36  ;;  %v1109_v32 = vld [vmem:[#allocation3] sm:$0x1] }
 0x1cc   : > { %v1157_v54 = vadd.f32 %v1156_v34, %v3680_v29  ;;  %v1292_v41 = vadd.f32 %v1291_v35, %v1229_v43 }
 0x1ce   : > { %v1293_v61 = vadd.f32 %v1292_v41, %v1230_v38  ;;  %v1158_v44 = vadd.f32 %v1157_v54, %v3685_v37 }
 0x1d0   : > { %v1294_v9 = vadd.f32 %v1293_v61, %v1231_v45  ;;  %v1159_v46 = vadd.f32 %v1158_v44, %v3694_v50 }
 0x1d2   : > { %v1295_v15 = vadd.f32 %v1294_v9, %v1232_v47  ;;  %v1160_v19 = vadd.f32 %v1159_v46, %v3699_v58 }
 0x1d4   : > { %v1296_v29 = vadd.f32 %v1295_v15, %v1233_v48  ;;  %v1161_v52 = vadd.f32 %v1160_v19, %v3708_v6 }
 0x1d6   : > { %v1297_v57 = vadd.f32 %v1296_v29, %v1234_v56  ;;  %v1162_v37 = vadd.f32 %v1161_v52, %v3713_v14 }
 0x1d8   : > { %v1298_v59 = vadd.f32 %v1297_v57, %v1235_v23  ;;  %v1163_v50 = vadd.f32 %v1162_v37, %v3722_v30 }
 0x1da   : > { %v1299_v33 = vadd.f32 %v1298_v59, %v1236_v60  ;;  %v1164_v58 = vadd.f32 %v1163_v50, %v3727_v40 }
 0x1dc   : > { %v1300_v0 = vadd.f32 %v1299_v33, %v1237_v62  ;;  %v1165_v6 = vadd.f32 %v1164_v58, %v3736_v53 }
 0x1de   : > { %v1301_v2 = vadd.f32 %v1300_v0, %v1238_v39  ;;  %v1166_v14 = vadd.f32 %v1165_v6, %v3741_v63 }
 0x1e0   : > { %v1302_v49 = vadd.f32 %v1301_v2, %v1239_v3  ;;  %v1167_v30 = vadd.f32 %v1166_v14, %v3750_v13  ;;  %v1244_v13 = vmul.f32 %v3778_v4, %v3778_v4 }
 0x1e2   : > { %v1303_v8 = vadd.f32 %v1302_v49, %v1240_v5  ;;  %v1168_v40 = vadd.f32 %v1167_v30, %v3755_v24 }
 0x1e4   : > { %v1304_v10 = vadd.f32 %v1303_v8, %v1241_v55  ;;  %v1169_v53 = vadd.f32 %v1168_v40, %v3764_v42 }
 0x1e6   : > { %v1305_v1 = vadd.f32 %v1304_v10, %v1242_v11  ;;  %v1170_v63 = vadd.f32 %v1169_v53, %v3769_v51 }
 0x1e8   : > { %v1306_v18 = vadd.f32 %v1305_v1, %v1243_v12  ;;  %v1171_v7 = vadd.f32 %v1170_v63, %v3778_v4  ;;  %v1181_v4 = vld [vmem:[#allocation4] sm:$0x1] }
 0x1ea   : > { %v1307_v20 = vadd.f32 %v1306_v18, %v1244_v13  ;;  %v1172_v24 = vadd.f32 %v1171_v7, %v3783_v16 }
 0x1ec   : > { %v1173_v17 = vrot.slane %v1172_v24, 4  ;;  %v1308_v42 = vadd.f32 %v1307_v20, %v1245_v21 }
 0x1ee   : > { %v1174_v22 = vadd.f32 %v1173_v17, %v1172_v24  ;;  %v1309_v26 = vrot.slane %v1308_v42, 4 }
 0x1f0   : > { %v1175_v25 = vrot.slane %v1174_v22, 2  ;;  %v1310_v27 = vadd.f32 %v1309_v26, %v1308_v42 }
 0x1f2   : > { %v1176_v28 = vadd.f32 %v1175_v25, %v1174_v22  ;;  %v1311_v51 = vrot.slane %v1310_v27, 2 }
 0x1f4   : > { %v1177_v36 = vrot.slane %v1176_v28, 1  ;;  %v1312_v31 = vadd.f32 %v1311_v51, %v1310_v27 }
 0x1f6   : > { %v1178_v43 = vadd.f32 %v1177_v36, %v1176_v28  ;;  %v1313_v34 = vrot.slane %v1312_v31, 1 }
 0x1f8   : > { %v1179_v35 = vadd.f32 %v1178_v43, %v1109_v32  ;;  %v1314_v54 = vadd.f32 %v1313_v34, %v1312_v31 }
 0x1fa   : > { %1180 = vst [vmem:[#allocation3] sm:$0x1] %v1179_v35  ;;  %v1315_v38 = vadd.f32 %v1314_v54, %v1181_v4 }
 0x1fc   : > { %1316 = vst [vmem:[#allocation4] sm:$0x1] %v1315_v38 }
 0x1fd PF: > { %p2537_p11 = scmp.ne.s32.totalorder %s3330_s16, 1 }
 0x1fe   : > { %v1722_v15 = vlaneseq (!%p2537_p11)  ;;  %s2538_s7 = sshll.u32 (!%p2537_p11), %s3326_s15, 9  ;;  %v1648_v48 = vld [vmem:[%s4143_s2] sm:$0x1] (!%p2537_p11) }
 0x1ff   : > { %1640 = sbr.rel (%p2537_p11) target bundleno = 618 (0x26a), region = 48  ;;  %v1652_v57 = vld [vmem:[%s4144_s3] sm:$0x1] (!%p2537_p11)  ;;  %s3896_s11 = scalar_lea.vmem (!%p2537_p11), [#allocation2], %s2538_s7 }
 0x200   : > { %v1723_v19 = vshrl.u32 (!%p2537_p11), %v1722_v15, 7  ;;  %v1657_v37 = vld [vmem:[%s3896_s11] sm:$0xff] (!%p2537_p11)  ;;  %v1658_v23 = vld [vmem:[%s3896_s11 + $0x8] sm:$0xff] (!%p2537_p11)  ;;  %v1659_v59 = vld [vmem:[%s3896_s11 + $0x10] sm:$0xff] (!%p2537_p11) }
 0x201   : > { %v1641_v16 = vld [vmem:[#allocation3] sm:$0x1] (!%p2537_p11)  ;;  %v1660_v50 = vld [vmem:[%s3896_s11 + $0x18] sm:$0xff] (!%p2537_p11)  ;;  %v1662_v62 = vld [vmem:[%s3896_s11 + $0x28] sm:$0xff] (!%p2537_p11) }
 0x202   : > { %v1642_v61 = vmul.f32 (!%p2537_p11), 0.00048828125, %v1641_v16  ;;  %v1724_v29 = vsub.s32 (!%p2537_p11), 0, %v1723_v19  ;;  %v1661_v60 = vld [vmem:[%s3896_s11 + $0x20] sm:$0xff] (!%p2537_p11)  ;;  %v1663_v0 = vld [vmem:[%s3896_s11 + $0x30] sm:$0xff] (!%p2537_p11)  ;;  %v1664_v6 = vld [vmem:[%s3896_s11 + $0x38] sm:$0xff] (!%p2537_p11) }
 0x203   : > { %v1643_v41 = vld [vmem:[#allocation4] sm:$0x1] (!%p2537_p11)  ;;  %v1666_v2 = vld [vmem:[%s3896_s11 + $0x48] sm:$0xff] (!%p2537_p11)  ;;  %v1667_v14 = vld [vmem:[%s3896_s11 + $0x50] sm:$0xff] (!%p2537_p11) }
 0x204   : > { %v1644_v44 = vmul.f32 (!%p2537_p11), 0.00048828125, %v1643_v41  ;;  %v1645_v45 = vmul.f32 (!%p2537_p11), %v1642_v61, %v1642_v61  ;;  %v1665_v39 = vld [vmem:[%s3896_s11 + $0x40] sm:$0xff] (!%p2537_p11)  ;;  %v1668_v8 = vld [vmem:[%s3896_s11 + $0x58] sm:$0xff] (!%p2537_p11)  ;;  %v1670_v55 = vld [vmem:[%s3896_s11 + $0x68] sm:$0xff] (!%p2537_p11) }
 0x205   : > { %v1669_v40 = vld [vmem:[%s3896_s11 + $0x60] sm:$0xff] (!%p2537_p11) }
 0x206   : > { %v1646_v9 = vsub.f32 %v1644_v44, %v1645_v45 }
 0x208   : > { %v1647_v46 = vmax.f32 %v1646_v9, 0.0 }
 0x20a   : > { %v1649_v47 = vadd.f32 1e-05, %v1647_v46 }
 0x20c   : > { %3302 = vrsqrt.f32 %v1649_v47 }
 0x216   : > { %v3303_v52 = vpop.eup %3302 }
 0x217   : > { %v1651_v56 = vmul.f32 %v3303_v52, %v1648_v48 }
 0x219   : > { %v1653_v33 = vmul.f32 %v1651_v56, %v1642_v61  ;;  %v3903_v58 = vrot.slane %v1651_v56, %v1724_v29 }
 0x21b   : > { %v1654_v3 = vsub.f32 %v1652_v57, %v1653_v33  ;;  %v1727_v49 = vmul.f32 %v3903_v58, %v1657_v37  ;;  %v1728_v30 = vmul.f32 %v3903_v58, %v1658_v23  ;;  %v1729_v5 = vmul.f32 %v3903_v58, %v1659_v59  ;;  %v1672_v23 = vld [vmem:[%s3896_s11 + $0x78] sm:$0xff] }
 0x21c   : > { %v1730_v10 = vmul.f32 %v3903_v58, %v1660_v50  ;;  %v1731_v53 = vmul.f32 %v3903_v58, %v1661_v60  ;;  %v1732_v11 = vmul.f32 %v3903_v58, %v1662_v62  ;;  %v1733_v1 = vmul.f32 %v3903_v58, %v1663_v0  ;;  %v1673_v62 = vld [vmem:[%s3896_s11 + $0x80] sm:$0xff] }
 0x21d   : > { %v3921_v63 = vrot.slane %v1654_v3, %v1724_v29  ;;  %v1734_v12 = vmul.f32 %v3903_v58, %v1664_v6  ;;  %v1735_v13 = vmul.f32 %v3903_v58, %v1665_v39  ;;  %v1736_v18 = vmul.f32 %v3903_v58, %v1666_v2  ;;  %v1671_v29 = vld [vmem:[%s3896_s11 + $0x70] sm:$0xff] }
 0x21e   : > { %v1737_v7 = vmul.f32 %v3903_v58, %v1667_v14  ;;  %v1738_v20 = vmul.f32 %v3903_v58, %v1668_v8  ;;  %v1739_v24 = vmul.f32 %v3903_v58, %v1669_v40  ;;  %v1740_v21 = vmul.f32 %v3903_v58, %v1670_v55  ;;  %v1674_v14 = vld [vmem:[%s3896_s11 + $0x88] sm:$0xff]  ;;  %v1675_v8 = vld [vmem:[%s3896_s11 + $0x90] sm:$0xff] }
 0x21f   : > { %v1797_v17 = vadd.f32 %v3921_v63, %v1727_v49  ;;  %v1798_v42 = vadd.f32 %v3921_v63, %v1728_v30  ;;  %v1799_v22 = vadd.f32 %v3921_v63, %v1729_v5  ;;  %v1800_v26 = vadd.f32 %v3921_v63, %v1730_v10 }
 0x220   : > { %v1801_v25 = vadd.f32 %v3921_v63, %v1731_v53  ;;  %v1802_v27 = vadd.f32 %v3921_v63, %v1732_v11  ;;  %v1803_v28 = vadd.f32 %v3921_v63, %v1733_v1  ;;  %v1804_v51 = vadd.f32 %v3921_v63, %v1734_v12  ;;  %v1676_v11 = vld [vmem:[%s3896_s11 + $0x98] sm:$0xff] }
 0x221   : > { %v1861_v36 = vmul.f32 0.2, %v1797_v17  ;;  %v1862_v31 = vmul.f32 0.2, %v1798_v42  ;;  %v1863_v32 = vmul.f32 0.2, %v1799_v22  ;;  %v1805_v43 = vadd.f32 %v3921_v63, %v1735_v13 }
 0x222   : > { %v1864_v34 = vmul.f32 0.2, %v1800_v26  ;;  %v1865_v4 = vmul.f32 0.2, %v1801_v25  ;;  %v1866_v35 = vmul.f32 0.2, %v1802_v27  ;;  %v1806_v54 = vadd.f32 %v3921_v63, %v1736_v18 }
 0x223   : > { %v1925_v38 = vmax.f32 %v1797_v17, %v1861_v36  ;;  %v1926_v16 = vmax.f32 %v1798_v42, %v1862_v31  ;;  %v1927_v41 = vmax.f32 %v1799_v22, %v1863_v32  ;;  %v1867_v61 = vmul.f32 0.2, %v1803_v28  ;;  %v1677_v17 = vld [vmem:[%s3896_s11 + $0xa0] sm:$0xff] }
 0x224   : > { %v1928_v44 = vmax.f32 %v1800_v26, %v1864_v34  ;;  %v1929_v45 = vmax.f32 %v1801_v25, %v1865_v4  ;;  %v1930_v9 = vmax.f32 %v1802_v27, %v1866_v35  ;;  %v1868_v46 = vmul.f32 0.2, %v1804_v51  ;;  %v1678_v27 = vld [vmem:[%s3896_s11 + $0xa8] sm:$0xff] }
 0x225   : > { %v2897_v47 = vpack.c.bf16 %v1926_v16, %v1925_v38  ;;  %v1931_v15 = vmax.f32 %v1803_v28, %v1867_v61  ;;  %v1869_v19 = vmul.f32 0.2, %v1805_v43  ;;  %v1870_v48 = vmul.f32 0.2, %v1806_v54  ;;  %v1679_v28 = vld [vmem:[%s3896_s11 + $0xb0] sm:$0xff] }
 0x226   : > { %v2902_v52 = vpack.c.bf16 %v1928_v44, %v1927_v41  ;;  %v2907_v56 = vpack.c.bf16 %v1930_v9, %v1929_v45  ;;  %v1932_v57 = vmax.f32 %v1804_v51, %v1868_v46  ;;  %v1807_v37 = vadd.f32 %v3921_v63, %v1737_v7  ;;  %v1681_v44 = vld [vmem:[%s3896_s11 + $0xc0] sm:$0xff] }
 0x227   : > { %2898 = vst [vmem:[%s3413_s30] sm:$0xff] %v2897_v47   ;;  %v1933_v59 = vmax.f32 %v1805_v43, %v1869_v19  ;;  %v1934_v50 = vmax.f32 %v1806_v54, %v1870_v48  ;;  %v1808_v60 = vadd.f32 %v3921_v63, %v1738_v20  ;;  %v1809_v33 = vadd.f32 %v3921_v63, %v1739_v24  ;;  %v1680_v54 = vld [vmem:[%s3896_s11 + $0xb8] sm:$0xff] }
 0x228   : > { %3085 = vst [vmem:[%s3413_s30 + $0x8] sm:$0xff] %v2902_v52   ;;  %3086 = vst [vmem:[%s3413_s30 + $0x10] sm:$0xff] %v2907_v56   ;;  %v2912_v0 = vpack.c.bf16 %v1932_v57, %v1931_v15  ;;  %v1871_v6 = vmul.f32 0.2, %v1807_v37  ;;  %v1810_v39 = vadd.f32 %v3921_v63, %v1740_v21  ;;  %v1741_v2 = vmul.f32 %v3903_v58, %v1671_v29  ;;  %v1682_v15 = vld [vmem:[%s3896_s11 + $0xc8] sm:$0xff]  ;;  %v1683_v56 = vld [vmem:[%s3896_s11 + $0xd0] sm:$0xff] }
 0x229   : > { %v2917_v3 = vpack.c.bf16 %v1934_v50, %v1933_v59  ;;  %v1872_v49 = vmul.f32 0.2, %v1808_v60  ;;  %v1873_v30 = vmul.f32 0.2, %v1809_v33  ;;  %v1742_v5 = vmul.f32 %v3903_v58, %v1672_v23 }
 0x22a   : > { %3087 = vst [vmem:[%s3413_s30 + $0x18] sm:$0xff] %v2912_v0   ;;  %v1935_v40 = vmax.f32 %v1807_v37, %v1871_v6  ;;  %v1874_v55 = vmul.f32 0.2, %v1810_v39  ;;  %v1811_v10 = vadd.f32 %v3921_v63, %v1741_v2  ;;  %v1743_v53 = vmul.f32 %v3903_v58, %v1673_v62  ;;  %v1684_v0 = vld [vmem:[%s3896_s11 + $0xd8] sm:$0xff]  ;;  %v1685_v6 = vld [vmem:[%s3896_s11 + $0xe0] sm:$0xff] }
 0x22b   : > { %3088 = vst [vmem:[%s3413_s30 + $0x20] sm:$0xff] %v2917_v3   ;;  %v1936_v1 = vmax.f32 %v1808_v60, %v1872_v49  ;;  %v1937_v12 = vmax.f32 %v1809_v33, %v1873_v30  ;;  %v1812_v13 = vadd.f32 %v3921_v63, %v1742_v5  ;;  %v1744_v18 = vmul.f32 %v3903_v58, %v1674_v14  ;;  %v1686_v49 = vld [vmem:[%s3896_s11 + $0xe8] sm:$0xff] }
 0x22c   : > { %v1938_v7 = vmax.f32 %v1810_v39, %v1874_v55  ;;  %v1875_v20 = vmul.f32 0.2, %v1811_v10  ;;  %v1813_v24 = vadd.f32 %v3921_v63, %v1743_v53  ;;  %v1745_v21 = vmul.f32 %v3903_v58, %v1675_v8 }
 0x22d   : > { %v2922_v42 = vpack.c.bf16 %v1936_v1, %v1935_v40  ;;  %v1876_v22 = vmul.f32 0.2, %v1812_v13  ;;  %v1814_v26 = vadd.f32 %v3921_v63, %v1744_v18  ;;  %v1746_v25 = vmul.f32 %v3903_v58, %v1676_v11  ;;  %v1687_v1 = vld [vmem:[%s3896_s11 + $0xf0] sm:$0xff] }
 0x22e   : > { %v2927_v51 = vpack.c.bf16 %v1938_v7, %v1937_v12  ;;  %v1939_v36 = vmax.f32 %v1811_v10, %v1875_v20  ;;  %v1877_v31 = vmul.f32 0.2, %v1813_v24  ;;  %v1815_v32 = vadd.f32 %v3921_v63, %v1745_v21  ;;  %v1688_v20 = vld [vmem:[%s3896_s11 + $0xf8] sm:$0xff] }
 0x22f   : > { %3089 = vst [vmem:[%s3413_s30 + $0x28] sm:$0xff] %v2922_v42   ;;  %v1940_v43 = vmax.f32 %v1812_v13, %v1876_v22  ;;  %v1878_v34 = vmul.f32 0.2, %v1814_v26  ;;  %v1816_v4 = vadd.f32 %v3921_v63, %v1746_v25  ;;  %v1747_v35 = vmul.f32 %v3903_v58, %v1677_v17  ;;  %v1689_v22 = vld [vmem:[%s3896_s11 + $0x100] sm:$0xff] }
 0x230   : > { %3090 = vst [vmem:[%s3413_s30 + $0x30] sm:$0xff] %v2927_v51   ;;  %v1941_v38 = vmax.f32 %v1813_v24, %v1877_v31  ;;  %v1879_v16 = vmul.f32 0.2, %v1815_v32  ;;  %v1748_v41 = vmul.f32 %v3903_v58, %v1678_v27  ;;  %v1749_v61 = vmul.f32 %v3903_v58, %v1679_v28  ;;  %v1690_v51 = vld [vmem:[%s3896_s11 + $0x108] sm:$0xff] }
 0x231   : > { %v2932_v45 = vpack.c.bf16 %v1940_v43, %v1939_v36  ;;  %v1942_v9 = vmax.f32 %v1814_v26, %v1878_v34  ;;  %v1880_v46 = vmul.f32 0.2, %v1816_v4  ;;  %v1817_v47 = vadd.f32 %v3921_v63, %v1747_v35  ;;  %v1691_v34 = vld [vmem:[%s3896_s11 + $0x110] sm:$0xff] }
 0x232   : > { %v1943_v19 = vmax.f32 %v1815_v32, %v1879_v16  ;;  %v1818_v48 = vadd.f32 %v3921_v63, %v1748_v41  ;;  %v1750_v29 = vmul.f32 %v3903_v58, %v1680_v54  ;;  %v1819_v52 = vadd.f32 %v3921_v63, %v1749_v61  ;;  %v1692_v16 = vld [vmem:[%s3896_s11 + $0x118] sm:$0xff] }
 0x233   : > { %3091 = vst [vmem:[%s3413_s30 + $0x38] sm:$0xff] %v2932_v45   ;;  %v2937_v57 = vpack.c.bf16 %v1942_v9, %v1941_v38  ;;  %v1944_v37 = vmax.f32 %v1816_v4, %v1880_v46  ;;  %v1881_v23 = vmul.f32 0.2, %v1817_v47  ;;  %v1751_v59 = vmul.f32 %v3903_v58, %v1681_v44 }
 0x234   : > { %v1882_v50 = vmul.f32 0.2, %v1818_v48  ;;  %v1820_v60 = vadd.f32 %v3921_v63, %v1750_v29  ;;  %v1883_v33 = vmul.f32 0.2, %v1819_v52  ;;  %v1752_v62 = vmul.f32 %v3903_v58, %v1682_v15 }
 0x235   : > { %3092 = vst [vmem:[%s3413_s30 + $0x40] sm:$0xff] %v2937_v57   ;;  %v2942_v39 = vpack.c.bf16 %v1944_v37, %v1943_v19  ;;  %v1945_v2 = vmax.f32 %v1817_v47, %v1881_v23  ;;  %v1821_v14 = vadd.f32 %v3921_v63, %v1751_v59  ;;  %v1753_v3 = vmul.f32 %v3903_v58, %v1683_v56  ;;  %v1693_v19 = vld [vmem:[%s3896_s11 + $0x120] sm:$0xff]  ;;  %v1694_v57 = vld [vmem:[%s3896_s11 + $0x128] sm:$0xff]  ;;  %v1695_v37 = vld [vmem:[%s3896_s11 + $0x130] sm:$0xff] }
 0x236   : > { %v1946_v30 = vmax.f32 %v1818_v48, %v1882_v50  ;;  %v1884_v5 = vmul.f32 0.2, %v1820_v60  ;;  %v1947_v8 = vmax.f32 %v1819_v52, %v1883_v33  ;;  %v1822_v40 = vadd.f32 %v3921_v63, %v1752_v62 }
 0x237   : > { %3093 = vst [vmem:[%s3413_s30 + $0x48] sm:$0xff] %v2942_v39   ;;  %v1885_v55 = vmul.f32 0.2, %v1821_v14  ;;  %v1754_v10 = vmul.f32 %v3903_v58, %v1684_v0  ;;  %v1823_v53 = vadd.f32 %v3921_v63, %v1753_v3  ;;  %v1755_v11 = vmul.f32 %v3903_v58, %v1685_v6  ;;  %v1696_v39 = vld [vmem:[%s3896_s11 + $0x138] sm:$0xff] }
 0x238   : > { %v2947_v12 = vpack.c.bf16 %v1946_v30, %v1945_v2  ;;  %v1948_v13 = vmax.f32 %v1820_v60, %v1884_v5  ;;  %v1886_v18 = vmul.f32 0.2, %v1822_v40  ;;  %v1756_v7 = vmul.f32 %v3903_v58, %v1686_v49  ;;  %v1697_v30 = vld [vmem:[%s3896_s11 + $0x140] sm:$0xff] }
 0x239   : > { %v1949_v24 = vmax.f32 %v1821_v14, %v1885_v55  ;;  %v1824_v21 = vadd.f32 %v3921_v63, %v1754_v10  ;;  %v1887_v17 = vmul.f32 0.2, %v1823_v53  ;;  %v1825_v42 = vadd.f32 %v3921_v63, %v1755_v11  ;;  %v1698_v10 = vld [vmem:[%s3896_s11 + $0x148] sm:$0xff] }
 0x23a   : > { %3094 = vst [vmem:[%s3413_s30 + $0x50] sm:$0xff] %v2947_v12   ;;  %v2952_v26 = vpack.c.bf16 %v1948_v13, %v1947_v8  ;;  %v1950_v25 = vmax.f32 %v1822_v40, %v1886_v18  ;;  %v1826_v27 = vadd.f32 %v3921_v63, %v1756_v7  ;;  %v1757_v28 = vmul.f32 %v3903_v58, %v1687_v1  ;;  %v1699_v13 = vld [vmem:[%s3896_s11 + $0x150] sm:$0xff] }
 0x23b   : > { %v1888_v36 = vmul.f32 0.2, %v1824_v21  ;;  %v1951_v31 = vmax.f32 %v1823_v53, %v1887_v17  ;;  %v1889_v32 = vmul.f32 0.2, %v1825_v42  ;;  %v1758_v43 = vmul.f32 %v3903_v58, %v1688_v20 }
 0x23c   : > { %3095 = vst [vmem:[%s3413_s30 + $0x58] sm:$0xff] %v2952_v26   ;;  %v2957_v4 = vpack.c.bf16 %v1950_v25, %v1949_v24  ;;  %v1890_v35 = vmul.f32 0.2, %v1826_v27  ;;  %v1827_v54 = vadd.f32 %v3921_v63, %v1757_v28  ;;  %v1759_v38 = vmul.f32 %v3903_v58, %v1689_v22  ;;  %v1700_v26 = vld [vmem:[%s3896_s11 + $0x158] sm:$0xff]  ;;  %v1701_v25 = vld [vmem:[%s3896_s11 + $0x160] sm:$0xff] }
 0x23d   : > { %v1952_v41 = vmax.f32 %v1824_v21, %v1888_v36  ;;  %v1953_v61 = vmax.f32 %v1825_v42, %v1889_v32  ;;  %v1828_v44 = vadd.f32 %v3921_v63, %v1758_v43  ;;  %v1760_v45 = vmul.f32 %v3903_v58, %v1690_v51 }
 0x23e   : > { %3096 = vst [vmem:[%s3413_s30 + $0x60] sm:$0xff] %v2957_v4   ;;  %v1954_v9 = vmax.f32 %v1826_v27, %v1890_v35  ;;  %v1891_v46 = vmul.f32 0.2, %v1827_v54  ;;  %v1829_v47 = vadd.f32 %v3921_v63, %v1759_v38  ;;  %v1761_v15 = vmul.f32 %v3903_v58, %v1691_v34 }
 0x23f   : > { %v2962_v48 = vpack.c.bf16 %v1952_v41, %v1951_v31  ;;  %v1892_v29 = vmul.f32 0.2, %v1828_v44  ;;  %v1830_v52 = vadd.f32 %v3921_v63, %v1760_v45  ;;  %v1762_v56 = vmul.f32 %v3903_v58, %v1692_v16  ;;  %v1702_v31 = vld [vmem:[%s3896_s11 + $0x168] sm:$0xff]  ;;  %v1703_v41 = vld [vmem:[%s3896_s11 + $0x170] sm:$0xff] }
 0x240   : > { %v2967_v23 = vpack.c.bf16 %v1954_v9, %v1953_v61  ;;  %v1955_v59 = vmax.f32 %v1827_v54, %v1891_v46  ;;  %v1893_v50 = vmul.f32 0.2, %v1829_v47  ;;  %v1831_v60 = vadd.f32 %v3921_v63, %v1761_v15  ;;  %v1704_v46 = vld [vmem:[%s3896_s11 + $0x178] sm:$0xff] }
 0x241   : > { %3097 = vst [vmem:[%s3413_s30 + $0x68] sm:$0xff] %v2962_v48   ;;  %v1956_v33 = vmax.f32 %v1828_v44, %v1892_v29  ;;  %v1894_v62 = vmul.f32 0.2, %v1830_v52  ;;  %v1832_v0 = vadd.f32 %v3921_v63, %v1762_v56  ;;  %v1763_v6 = vmul.f32 %v3903_v58, %v1693_v19  ;;  %v1705_v29 = vld [vmem:[%s3896_s11 + $0x180] sm:$0xff] }
 0x242   : > { %3098 = vst [vmem:[%s3413_s30 + $0x70] sm:$0xff] %v2967_v23   ;;  %v1957_v2 = vmax.f32 %v1829_v47, %v1893_v50  ;;  %v1895_v14 = vmul.f32 0.2, %v1831_v60  ;;  %v1764_v3 = vmul.f32 %v3903_v58, %v1694_v57  ;;  %v1765_v49 = vmul.f32 %v3903_v58, %v1695_v37  ;;  %v1706_v23 = vld [vmem:[%s3896_s11 + $0x188] sm:$0xff] }
 0x243   : > { %v2972_v5 = vpack.c.bf16 %v1956_v33, %v1955_v59  ;;  %v1958_v8 = vmax.f32 %v1830_v52, %v1894_v62  ;;  %v1896_v40 = vmul.f32 0.2, %v1832_v0  ;;  %v1833_v55 = vadd.f32 %v3921_v63, %v1763_v6  ;;  %v1707_v62 = vld [vmem:[%s3896_s11 + $0x190] sm:$0xff] }
 0x244   : > { %v1959_v53 = vmax.f32 %v1831_v60, %v1895_v14  ;;  %v1834_v11 = vadd.f32 %v3921_v63, %v1764_v3  ;;  %v1766_v1 = vmul.f32 %v3903_v58, %v1696_v39  ;;  %v1835_v12 = vadd.f32 %v3921_v63, %v1765_v49  ;;  %v1708_v14 = vld [vmem:[%s3896_s11 + $0x198] sm:$0xff] }
 0x245   : > { %3099 = vst [vmem:[%s3413_s30 + $0x78] sm:$0xff] %v2972_v5   ;;  %v2977_v18 = vpack.c.bf16 %v1958_v8, %v1957_v2  ;;  %v1960_v7 = vmax.f32 %v1832_v0, %v1896_v40  ;;  %v1897_v20 = vmul.f32 0.2, %v1833_v55  ;;  %v1767_v24 = vmul.f32 %v3903_v58, %v1697_v30 }
 0x246   : > { %v1898_v21 = vmul.f32 0.2, %v1834_v11  ;;  %v1836_v17 = vadd.f32 %v3921_v63, %v1766_v1  ;;  %v1899_v42 = vmul.f32 0.2, %v1835_v12  ;;  %v1768_v22 = vmul.f32 %v3903_v58, %v1698_v10 }
 0x247   : > { %3100 = vst [vmem:[%s3413_s30 + $0x80] sm:$0xff] %v2977_v18   ;;  %v2982_v27 = vpack.c.bf16 %v1960_v7, %v1959_v53  ;;  %v1961_v28 = vmax.f32 %v1833_v55, %v1897_v20  ;;  %v1837_v51 = vadd.f32 %v3921_v63, %v1767_v24  ;;  %v1769_v36 = vmul.f32 %v3903_v58, %v1699_v13  ;;  %v1709_v53 = vld [vmem:[%s3896_s11 + $0x1a0] sm:$0xff]  ;;  %v1710_v18 = vld [vmem:[%s3896_s11 + $0x1a8] sm:$0xff]  ;;  %v1711_v7 = vld [vmem:[%s3896_s11 + $0x1b0] sm:$0xff] }
 0x248   : > { %v1962_v32 = vmax.f32 %v1834_v11, %v1898_v21  ;;  %v1900_v43 = vmul.f32 0.2, %v1836_v17  ;;  %v1963_v34 = vmax.f32 %v1835_v12, %v1899_v42  ;;  %v1838_v4 = vadd.f32 %v3921_v63, %v1768_v22 }
 0x249   : > { %3101 = vst [vmem:[%s3413_s30 + $0x88] sm:$0xff] %v2982_v27   ;;  %v1901_v35 = vmul.f32 0.2, %v1837_v51  ;;  %v1770_v54 = vmul.f32 %v3903_v58, %v1700_v26  ;;  %v1839_v38 = vadd.f32 %v3921_v63, %v1769_v36  ;;  %v1771_v16 = vmul.f32 %v3903_v58, %v1701_v25  ;;  %v1712_v27 = vld [vmem:[%s3896_s11 + $0x1b8] sm:$0xff] }
 0x24a   : > { %v2987_v61 = vpack.c.bf16 %v1962_v32, %v1961_v28  ;;  %v1964_v44 = vmax.f32 %v1836_v17, %v1900_v43  ;;  %v1902_v45 = vmul.f32 0.2, %v1838_v4  ;;  %v1772_v9 = vmul.f32 %v3903_v58, %v1702_v31  ;;  %v1713_v32 = vld [vmem:[%s3896_s11 + $0x1c0] sm:$0xff] }
 0x24b   : > { %v1965_v47 = vmax.f32 %v1837_v51, %v1901_v35  ;;  %v1840_v15 = vadd.f32 %v3921_v63, %v1770_v54  ;;  %v1903_v19 = vmul.f32 0.2, %v1839_v38  ;;  %v1841_v48 = vadd.f32 %v3921_v63, %v1771_v16  ;;  %v1714_v54 = vld [vmem:[%s3896_s11 + $0x1c8] sm:$0xff] }
 0x24c   : > { %3102 = vst [vmem:[%s3413_s30 + $0x90] sm:$0xff] %v2987_v61   ;;  %v2992_v52 = vpack.c.bf16 %v1964_v44, %v1963_v34  ;;  %v1966_v56 = vmax.f32 %v1838_v4, %v1902_v45  ;;  %v1842_v57 = vadd.f32 %v3921_v63, %v1772_v9  ;;  %v1773_v37 = vmul.f32 %v3903_v58, %v1703_v41  ;;  %v1715_v44 = vld [vmem:[%s3896_s11 + $0x1d0] sm:$0xff] }
 0x24d   : > { %v1904_v59 = vmul.f32 0.2, %v1840_v15  ;;  %v1967_v50 = vmax.f32 %v1839_v38, %v1903_v19  ;;  %v1905_v60 = vmul.f32 0.2, %v1841_v48  ;;  %v1774_v33 = vmul.f32 %v3903_v58, %v1704_v46 }
 0x24e   : > { %3103 = vst [vmem:[%s3413_s30 + $0x98] sm:$0xff] %v2992_v52   ;;  %v2997_v0 = vpack.c.bf16 %v1966_v56, %v1965_v47  ;;  %v1906_v6 = vmul.f32 0.2, %v1842_v57  ;;  %v1843_v39 = vadd.f32 %v3921_v63, %v1773_v37  ;;  %v1775_v2 = vmul.f32 %v3903_v58, %v1705_v29  ;;  %v1716_v52 = vld [vmem:[%s3896_s11 + $0x1d8] sm:$0xff]  ;;  %v1717_v56 = vld [vmem:[%s3896_s11 + $0x1e0] sm:$0xff] }
 0x24f   : > { %v1968_v3 = vmax.f32 %v1840_v15, %v1904_v59  ;;  %v1969_v49 = vmax.f32 %v1841_v48, %v1905_v60  ;;  %v1844_v30 = vadd.f32 %v3921_v63, %v1774_v33  ;;  %v1776_v5 = vmul.f32 %v3903_v58, %v1706_v23 }
 0x250   : > { %3104 = vst [vmem:[%s3413_s30 + $0xa0] sm:$0xff] %v2997_v0   ;;  %v1970_v8 = vmax.f32 %v1842_v57, %v1906_v6  ;;  %v1907_v40 = vmul.f32 0.2, %v1843_v39  ;;  %v1845_v55 = vadd.f32 %v3921_v63, %v1775_v2  ;;  %v1777_v10 = vmul.f32 %v3903_v58, %v1707_v62 }
 0x251   : > { %v3002_v11 = vpack.c.bf16 %v1968_v3, %v1967_v50  ;;  %v1908_v1 = vmul.f32 0.2, %v1844_v30  ;;  %v1846_v12 = vadd.f32 %v3921_v63, %v1776_v5  ;;  %v1778_v13 = vmul.f32 %v3903_v58, %v1708_v14  ;;  %v1718_v50 = vld [vmem:[%s3896_s11 + $0x1e8] sm:$0xff]  ;;  %v1719_v3 = vld [vmem:[%s3896_s11 + $0x1f0] sm:$0xff] }
 0x252   : > { %v3007_v20 = vpack.c.bf16 %v1970_v8, %v1969_v49  ;;  %v1971_v24 = vmax.f32 %v1843_v39, %v1907_v40  ;;  %v1909_v21 = vmul.f32 0.2, %v1845_v55  ;;  %v1847_v17 = vadd.f32 %v3921_v63, %v1777_v10  ;;  %v1720_v40 = vld [vmem:[%s3896_s11 + $0x1f8] sm:$0xff] }
 0x253   : > { %3105 = vst [vmem:[%s3413_s30 + $0xa8] sm:$0xff] %v3002_v11   ;;  %v1972_v42 = vmax.f32 %v1844_v30, %v1908_v1  ;;  %v1910_v22 = vmul.f32 0.2, %v1846_v12  ;;  %v1848_v26 = vadd.f32 %v3921_v63, %v1778_v13  ;;  %v1779_v25 = vmul.f32 %v3903_v58, %v1709_v53 }
 0x254   : > { %3106 = vst [vmem:[%s3413_s30 + $0xb0] sm:$0xff] %v3007_v20   ;;  %v1973_v28 = vmax.f32 %v1845_v55, %v1909_v21  ;;  %v1911_v51 = vmul.f32 0.2, %v1847_v17  ;;  %v1780_v36 = vmul.f32 %v3903_v58, %v1710_v18  ;;  %v1781_v31 = vmul.f32 %v3903_v58, %v1711_v7 }
 0x255   : > { %v3012_v43 = vpack.c.bf16 %v1972_v42, %v1971_v24  ;;  %v1974_v34 = vmax.f32 %v1846_v12, %v1910_v22  ;;  %v1912_v4 = vmul.f32 0.2, %v1848_v26  ;;  %v1849_v35 = vadd.f32 %v3921_v63, %v1779_v25 }
 0x256   : > { %v1975_v38 = vmax.f32 %v1847_v17, %v1911_v51  ;;  %v1850_v16 = vadd.f32 %v3921_v63, %v1780_v36  ;;  %v1782_v41 = vmul.f32 %v3903_v58, %v1712_v27  ;;  %v1851_v61 = vadd.f32 %v3921_v63, %v1781_v31 }
 0x257   : > { %3107 = vst [vmem:[%s3413_s30 + $0xb8] sm:$0xff] %v3012_v43   ;;  %v3017_v45 = vpack.c.bf16 %v1974_v34, %v1973_v28  ;;  %v1976_v9 = vmax.f32 %v1848_v26, %v1912_v4  ;;  %v1913_v46 = vmul.f32 0.2, %v1849_v35  ;;  %v1783_v47 = vmul.f32 %v3903_v58, %v1713_v32 }
 0x258   : > { %v1914_v15 = vmul.f32 0.2, %v1850_v16  ;;  %v1852_v19 = vadd.f32 %v3921_v63, %v1782_v41  ;;  %v1915_v48 = vmul.f32 0.2, %v1851_v61  ;;  %v1784_v29 = vmul.f32 %v3903_v58, %v1714_v54 }
 0x259   : > { %3108 = vst [vmem:[%s3413_s30 + $0xc0] sm:$0xff] %v3017_v45   ;;  %v3022_v57 = vpack.c.bf16 %v1976_v9, %v1975_v38  ;;  %v1977_v37 = vmax.f32 %v1849_v35, %v1913_v46  ;;  %v1853_v23 = vadd.f32 %v3921_v63, %v1783_v47  ;;  %v1785_v59 = vmul.f32 %v3903_v58, %v1715_v44 }
 0x25a   : > { %v1978_v60 = vmax.f32 %v1850_v16, %v1914_v15  ;;  %v1916_v33 = vmul.f32 0.2, %v1852_v19  ;;  %v1979_v62 = vmax.f32 %v1851_v61, %v1915_v48  ;;  %v1854_v0 = vadd.f32 %v3921_v63, %v1784_v29 }
 0x25b   : > { %3109 = vst [vmem:[%s3413_s30 + $0xc8] sm:$0xff] %v3022_v57   ;;  %v1917_v6 = vmul.f32 0.2, %v1853_v23  ;;  %v1786_v39 = vmul.f32 %v3903_v58, %v1716_v52  ;;  %v1855_v2 = vadd.f32 %v3921_v63, %v1785_v59  ;;  %v1787_v14 = vmul.f32 %v3903_v58, %v1717_v56 }
 0x25c   : > { %v3027_v49 = vpack.c.bf16 %v1978_v60, %v1977_v37  ;;  %v1980_v30 = vmax.f32 %v1852_v19, %v1916_v33  ;;  %v1918_v5 = vmul.f32 0.2, %v1854_v0  ;;  %v1788_v8 = vmul.f32 %v3903_v58, %v1718_v50 }
 0x25d   : > { %v1981_v55 = vmax.f32 %v1853_v23, %v1917_v6  ;;  %v1856_v10 = vadd.f32 %v3921_v63, %v1786_v39  ;;  %v1919_v53 = vmul.f32 0.2, %v1855_v2  ;;  %v1857_v11 = vadd.f32 %v3921_v63, %v1787_v14 }
 0x25e   : > { %3110 = vst [vmem:[%s3413_s30 + $0xd0] sm:$0xff] %v3027_v49   ;;  %v3032_v1 = vpack.c.bf16 %v1980_v30, %v1979_v62  ;;  %v1982_v12 = vmax.f32 %v1854_v0, %v1918_v5  ;;  %v1858_v13 = vadd.f32 %v3921_v63, %v1788_v8  ;;  %v1789_v18 = vmul.f32 %v3903_v58, %v1719_v3 }
 0x25f   : > { %v1920_v7 = vmul.f32 0.2, %v1856_v10  ;;  %v1983_v20 = vmax.f32 %v1855_v2, %v1919_v53  ;;  %v1921_v24 = vmul.f32 0.2, %v1857_v11  ;;  %v1790_v21 = vmul.f32 %v3903_v58, %v1720_v40 }
 0x260   : > { %3111 = vst [vmem:[%s3413_s30 + $0xd8] sm:$0xff] %v3032_v1   ;;  %v3037_v17 = vpack.c.bf16 %v1982_v12, %v1981_v55  ;;  %v1922_v42 = vmul.f32 0.2, %v1858_v13  ;;  %v1859_v22 = vadd.f32 %v3921_v63, %v1789_v18 }
 0x261   : > { %v1984_v26 = vmax.f32 %v1856_v10, %v1920_v7  ;;  %v1985_v25 = vmax.f32 %v1857_v11, %v1921_v24  ;;  %v1860_v27 = vadd.f32 %v3921_v63, %v1790_v21 }
 0x262   : > { %3112 = vst [vmem:[%s3413_s30 + $0xe0] sm:$0xff] %v3037_v17   ;;  %v1986_v28 = vmax.f32 %v1858_v13, %v1922_v42  ;;  %v1923_v51 = vmul.f32 0.2, %v1859_v22 }
 0x263   : > { %v3042_v36 = vpack.c.bf16 %v1984_v26, %v1983_v20  ;;  %v1924_v31 = vmul.f32 0.2, %v1860_v27 }
 0x264   : > { %v3047_v32 = vpack.c.bf16 %v1986_v28, %v1985_v25  ;;  %v1987_v43 = vmax.f32 %v1859_v22, %v1923_v51 }
 0x265   : > { %3113 = vst [vmem:[%s3413_s30 + $0xe8] sm:$0xff] %v3042_v36   ;;  %v1988_v58 = vmax.f32 %v1860_v27, %v1924_v31 }
 0x266   : > { %3114 = vst [vmem:[%s3413_s30 + $0xf0] sm:$0xff] %v3047_v32  }
 0x267   : > { %v3052_v34 = vpack.c.bf16 %v1988_v58, %v1987_v43 }
 0x269   : > { %3115 = vst [vmem:[%s3413_s30 + $0xf8] sm:$0xff] %v3052_v34  }
 0x26a PF: > { %s14_s19 = sadd.s32 1, %s3342_s19   ;;  %s4146_s15 = smov %s3334_s17 }
 0x26b   : > { %p11_p12 = scmp.ge.s32.totalorder %s14_s19, 10   ;;  %s4147_s16 = smov %s3338_s18 }
 0x26c   : > { %s4148_s17 = smov %s4151_s20  ;;  %s4149_s18 = smov %s4155_s21 }
 0x26d   :  { %13 = sbr.rel (!%p11_p12) target bundleno = 3 (0x3), region = 80 }

// kernel: discriminator_forward.8
= control target key start
LH: loop header
LB: loop body
LE: loop exit
PB: predicated region body
PF: predicated region fallthrough
CT: control target
= control target key end

     0   :  { %s4138_s15 = smov 0   ;;  %s4140_s16 = smov 0   ;;  %s5121_s0 = inlined_call_operand.vmem [shape: bf16[512,384], index: 0, kind: input, shape index: {}]   ;;  %s5122_s1 = inlined_call_operand.vmem [shape: bf16[384,128], index: 1, kind: input, shape index: {}]   ;;  %s5123_s2 = inlined_call_operand.vmem [shape: f32[1,128], index: 2, kind: input, shape index: {}]   ;;  %s5124_s3 = inlined_call_operand.vmem [shape: f32[1,128], index: 3, kind: input, shape index: {}]   ;;  %s5125_s4 = inlined_call_operand.vmem [shape: bf16[512,128], index: 4, kind: output, shape index: {}]  }
   0x1   :  { %s4142_s17 = smov 0  }
   0x2 LB: > { %s26_s18 = sadd.s32 1, %s4105_s16  ;;  %p2988_p0 = scmp.ge.s32.totalorder %s4109_s17, 1  ;;  %s4109_s17 = sphi %s4142_s17, %s14_s17   ;;  %s4105_s16 = sphi %s4140_s16, %s5127_s16   ;;  %s4101_s15 = sphi %s4138_s15, %s5126_s15  }
   0x3   : > { %p28_p1 = scmp.ge.s32.totalorder %s26_s18, 2  ;;  %p184_p2 = scmp.lt.s32.totalorder %s4109_s17, 3 }
   0x5   : > { %s5129_s18 = smov (%p28_p1, %s26_s18), 0  ;;  %p185_p3 = pnand %p2988_p0, %p184_p2 }
   0x6   : > { %p231_p4 = scmp.eq.s32.totalorder (!%p185_p3), %s4101_s15, 0 }
   0x7   : > { %188 = sbr.rel (%p185_p3) target bundleno = 647 (0x287), region = 36 }
   0xe   : > { %236 = sbr.rel (!%p231_p4) target bundleno = 21 (0x15), region = 40  ;;  %v4111_v0 = vmov (%p231_p4), 0.0  }
   0xf   : > { %237 = vst [vmem:[#allocation3] sm:$0x1] (%p231_p4), %v4111_v0  ;;  %238 = vst [vmem:[#allocation4] sm:$0x1] (%p231_p4), %v4111_v0 }
  0x15 PF: > { %p2990_p5 = scmp.ne.s32.totalorder %s4101_s15, 0 }
  0x16   : > { %v3933_v1 = vld [vmem:[%s5122_s1] sm:$0xff] (!%p2990_p5)   ;;  %v4112_v2 = vmov (!%p2990_p5), 0   ;;  %v3934_v3 = vld [vmem:[%s5122_s1 + $0x8] sm:$0xff] (!%p2990_p5)   ;;  %v3935_v4 = vld [vmem:[%s5122_s1 + $0x10] sm:$0xff] (!%p2990_p5)  }
  0x17   : > { %241 = sbr.rel (%p2990_p5) target bundleno = 538 (0x21a), region = 44  ;;  %1074 = vmatprep.subr.bf16.mxu0 (!%p2990_p5), %v4112_v2  ;;  %3875 = vmatprep.subr.bf16.mxu1 (!%p2990_p5), %v4112_v2  ;;  %v3936_v5 = vld [vmem:[%s5122_s1 + $0x18] sm:$0xff] (!%p2990_p5)   ;;  %v3937_v6 = vld [vmem:[%s5122_s1 + $0x20] sm:$0xff] (!%p2990_p5)   ;;  %v3938_v8 = vld [vmem:[%s5122_s1 + $0x28] sm:$0xff] (!%p2990_p5)  }
  0x18   : > { %1075 = vmatpush1.bf16.msra.mxu0 (!%p2990_p5), %v3933_v1  ;;  %3891 = vmatpush1.bf16.msra.mxu1 (!%p2990_p5), %v3933_v1  ;;  %v3951_v7 = vld [vmem:[%s5121_s0 + $0x4] ss:$12 sps:$4 sm:$0xff] (!%p2990_p5)   ;;  %v3940_v11 = vld [vmem:[%s5122_s1 + $0x38] sm:$0xff] (!%p2990_p5)   ;;  %v3942_v13 = vld [vmem:[%s5122_s1 + $0x48] sm:$0xff] (!%p2990_p5)  }
  0x19   : > { %1076 = vmatprep.subr.bf16.mxu0 (!%p2990_p5), %v4112_v2  ;;  %3876 = vmatprep.subr.bf16.mxu1 (!%p2990_p5), %v4112_v2  ;;  %v3954_v9 = vld [vmem:[%s5121_s0 + $0x244] ss:$12 sps:$4 sm:$0xff] (!%p2990_p5)   ;;  %v3944_v15 = vld [vmem:[%s5122_s1 + $0x58] sm:$0xff] (!%p2990_p5)   ;;  %v3946_v17 = vld [vmem:[%s5122_s1 + $0x68] sm:$0xff] (!%p2990_p5)  }
  0x1a   : > { %1106 = vmatprep.mubr.bf16.mxu0 (!%p2990_p5), %v3951_v7  ;;  %1298 = vmatprep.mubr.bf16.mxu1 (!%p2990_p5), %v3954_v9  ;;  %v3939_v10 = vld [vmem:[%s5122_s1 + $0x30] sm:$0xff] (!%p2990_p5)   ;;  %v3941_v12 = vld [vmem:[%s5122_s1 + $0x40] sm:$0xff] (!%p2990_p5)   ;;  %v3948_v19 = vld [vmem:[%s5122_s1 + $0x78] sm:$0xff] (!%p2990_p5)  }
  0x1b   : > { %v3943_v14 = vld [vmem:[%s5122_s1 + $0x50] sm:$0xff] (!%p2990_p5)   ;;  %v3945_v16 = vld [vmem:[%s5122_s1 + $0x60] sm:$0xff] (!%p2990_p5)   ;;  %v3955_v23 = vld [vmem:[%s5121_s0 + $0x1c] ss:$12 sps:$4 sm:$0xff] (!%p2990_p5)  }
  0x1c   : > { %1077 = vmatpush1.bf16.msra.mxu0 (!%p2990_p5), %v3934_v3  ;;  %3892 = vmatpush1.bf16.msra.mxu1 (!%p2990_p5), %v3934_v3  ;;  %v3947_v18 = vld [vmem:[%s5122_s1 + $0x70] sm:$0xff] (!%p2990_p5)   ;;  %v3973_v20 = vld [vmem:[%s5122_s1 + $0x80] sm:$0xff] (!%p2990_p5)   ;;  %v3957_v24 = vld [vmem:[%s5121_s0 + $0x25c] ss:$12 sps:$4 sm:$0xff] (!%p2990_p5)  }
  0x1d   : > { %1078 = vmatprep.subr.bf16.mxu0 (!%p2990_p5), %v4112_v2  ;;  %3877 = vmatprep.subr.bf16.mxu1 (!%p2990_p5), %v4112_v2  ;;  %v3949_v21 = vld [vmem:[%s5121_s0] ss:$12 sps:$4 sm:$0xff] (!%p2990_p5)   ;;  %v3959_v26 = vld [vmem:[%s5121_s0 + $0x18] ss:$12 sps:$4 sm:$0xff] (!%p2990_p5)   ;;  %v3987_v27 = vld [vmem:[%s5122_s1 + $0x90] sm:$0xff] (!%p2990_p5)  }
  0x1e   : > { %v3952_v22 = vld [vmem:[%s5121_s0 + $0x240] ss:$12 sps:$4 sm:$0xff]   ;;  %v3960_v28 = vld [vmem:[%s5121_s0 + $0x258] ss:$12 sps:$4 sm:$0xff]   ;;  %v3965_v32 = vld [vmem:[%s5121_s0 + $0x30] ss:$12 sps:$4 sm:$0xff]  }
  0x1f   : > { %v3980_v25 = vld [vmem:[%s5122_s1 + $0x88] sm:$0xff]   ;;  %v3961_v29 = vld [vmem:[%s5121_s0 + $0x34] ss:$12 sps:$4 sm:$0xff]   ;;  %v3988_v31 = vld [vmem:[%s5122_s1 + $0x98] sm:$0xff]  }
  0x20   : > { %1079 = vmatpush1.bf16.msra.mxu0 %v3935_v4  ;;  %3893 = vmatpush1.bf16.msra.mxu1 %v3935_v4  ;;  %v3963_v30 = vld [vmem:[%s5121_s0 + $0x274] ss:$12 sps:$4 sm:$0xff]   ;;  %v3966_v34 = vld [vmem:[%s5121_s0 + $0x270] ss:$12 sps:$4 sm:$0xff]   ;;  %v3967_v35 = vld [vmem:[%s5121_s0 + $0x4c] ss:$12 sps:$4 sm:$0xff]  }
  0x21   : > { %1080 = vmatprep.subr.bf16.mxu0 %v4112_v2  ;;  %3878 = vmatprep.subr.bf16.mxu1 %v4112_v2  ;;  %v3995_v33 = vld [vmem:[%s5122_s1 + $0xa0] sm:$0xff]   ;;  %v3969_v36 = vld [vmem:[%s5121_s0 + $0x28c] ss:$12 sps:$4 sm:$0xff]   ;;  %v3971_v38 = vld [vmem:[%s5121_s0 + $0x48] ss:$12 sps:$4 sm:$0xff]  }
  0x22   : > { %v3996_v37 = vld [vmem:[%s5122_s1 + $0xa8] sm:$0xff]   ;;  %v3974_v40 = vld [vmem:[%s5121_s0 + $0x64] ss:$12 sps:$4 sm:$0xff]   ;;  %v4004_v43 = vld [vmem:[%s5122_s1 + $0xb8] sm:$0xff]  }
  0x23   : > { %v3972_v39 = vld [vmem:[%s5121_s0 + $0x288] ss:$12 sps:$4 sm:$0xff]   ;;  %v3976_v41 = vld [vmem:[%s5121_s0 + $0x2a4] ss:$12 sps:$4 sm:$0xff]   ;;  %v3978_v44 = vld [vmem:[%s5121_s0 + $0x60] ss:$12 sps:$4 sm:$0xff]  }
  0x24   : > { %1081 = vmatpush1.bf16.msra.mxu0 %v3936_v5  ;;  %3894 = vmatpush1.bf16.msra.mxu1 %v3936_v5  ;;  %v4003_v42 = vld [vmem:[%s5122_s1 + $0xb0] sm:$0xff]   ;;  %v3979_v45 = vld [vmem:[%s5121_s0 + $0x2a0] ss:$12 sps:$4 sm:$0xff]   ;;  %v3981_v46 = vld [vmem:[%s5121_s0 + $0x7c] ss:$12 sps:$4 sm:$0xff]  }
  0x25   : > { %1082 = vmatprep.subr.bf16.mxu0 %v4112_v2  ;;  %3879 = vmatprep.subr.bf16.mxu1 %v4112_v2  ;;  %v3983_v47 = vld [vmem:[%s5121_s0 + $0x2bc] ss:$12 sps:$4 sm:$0xff]   ;;  %v3985_v48 = vld [vmem:[%s5121_s0 + $0x78] ss:$12 sps:$4 sm:$0xff]   ;;  %v3989_v50 = vld [vmem:[%s5121_s0 + $0x94] ss:$12 sps:$4 sm:$0xff]  }
  0x26   : > { %v3986_v49 = vld [vmem:[%s5121_s0 + $0x2b8] ss:$12 sps:$4 sm:$0xff]   ;;  %v3991_v51 = vld [vmem:[%s5121_s0 + $0x2d4] ss:$12 sps:$4 sm:$0xff]   ;;  %v3993_v52 = vld [vmem:[%s5121_s0 + $0x90] ss:$12 sps:$4 sm:$0xff]  }
  0x27   : > { %v3994_v53 = vld [vmem:[%s5121_s0 + $0x2d0] ss:$12 sps:$4 sm:$0xff]   ;;  %v3997_v54 = vld [vmem:[%s5121_s0 + $0xac] ss:$12 sps:$4 sm:$0xff]   ;;  %v4001_v56 = vld [vmem:[%s5121_s0 + $0xa8] ss:$12 sps:$4 sm:$0xff]  }
  0x28   : > { %1083 = vmatpush1.bf16.msra.mxu0 %v3937_v6  ;;  %3895 = vmatpush1.bf16.msra.mxu1 %v3937_v6  ;;  %v3999_v55 = vld [vmem:[%s5121_s0 + $0x2ec] ss:$12 sps:$4 sm:$0xff]   ;;  %v4002_v57 = vld [vmem:[%s5121_s0 + $0x2e8] ss:$12 sps:$4 sm:$0xff]   ;;  %v4005_v58 = vld [vmem:[%s5121_s0 + $0xc4] ss:$12 sps:$4 sm:$0xff]  }
  0x29   : > { %1084 = vmatprep.subr.bf16.mxu0 %v4112_v2  ;;  %3880 = vmatprep.subr.bf16.mxu1 %v4112_v2  ;;  %v4007_v59 = vld [vmem:[%s5121_s0 + $0x8] ss:$12 sps:$4 sm:$0xff]   ;;  %v4008_v60 = vld [vmem:[%s5121_s0 + $0xc0] ss:$12 sps:$4 sm:$0xff]   ;;  %v4012_v63 = vld [vmem:[%s5121_s0 + $0x38] ss:$12 sps:$4 sm:$0xff]  }
  0x2a   : > { %v4009_v61 = vld [vmem:[%s5121_s0 + $0x20] ss:$12 sps:$4 sm:$0xff]   ;;  %v4010_v62 = vld [vmem:[%s5121_s0 + $0xdc] ss:$12 sps:$4 sm:$0xff]   ;;  %v4013_v0 = vld [vmem:[%s5121_s0 + $0xd8] ss:$12 sps:$4 sm:$0xff]  }
  0x2b   : > { %v4014_v1 = vld [vmem:[%s5121_s0 + $0x50] ss:$12 sps:$4 sm:$0xff]   ;;  %v4017_v3 = vld [vmem:[%s5121_s0 + $0x68] ss:$12 sps:$4 sm:$0xff]   ;;  %v4019_v5 = vld [vmem:[%s5121_s0 + $0x80] ss:$12 sps:$4 sm:$0xff]  }
  0x2c   : > { %1085 = vmatpush1.bf16.msra.mxu0 %v3938_v8  ;;  %3896 = vmatpush1.bf16.msra.mxu1 %v3938_v8  ;;  %v4018_v4 = vld [vmem:[%s5121_s0 + $0xf0] ss:$12 sps:$4 sm:$0xff]   ;;  %v4020_v6 = vld [vmem:[%s5121_s0 + $0x10c] ss:$12 sps:$4 sm:$0xff]   ;;  %v4023_v8 = vld [vmem:[%s5121_s0 + $0x108] ss:$12 sps:$4 sm:$0xff]  }
  0x2d   : > { %1086 = vmatprep.subr.bf16.mxu0 %v4112_v2  ;;  %3881 = vmatprep.subr.bf16.mxu1 %v4112_v2  ;;  %v4022_v7 = vld [vmem:[%s5121_s0 + $0x98] ss:$12 sps:$4 sm:$0xff]   ;;  %v4024_v9 = vld [vmem:[%s5121_s0 + $0xb0] ss:$12 sps:$4 sm:$0xff]  }
  0x30   : > { %1087 = vmatpush1.bf16.msra.mxu0 %v3939_v10  ;;  %3897 = vmatpush1.bf16.msra.mxu1 %v3939_v10  ;;  %v4025_v10 = vld [vmem:[%s5121_s0 + $0x124] ss:$12 sps:$4 sm:$0xff]  }
  0x31   : > { %1088 = vmatprep.subr.bf16.mxu0 %v4112_v2  ;;  %3882 = vmatprep.subr.bf16.mxu1 %v4112_v2 }
  0x34   : > { %1089 = vmatpush1.bf16.msra.mxu0 %v3940_v11  ;;  %3898 = vmatpush1.bf16.msra.mxu1 %v3940_v11  ;;  %v4027_v11 = vld [vmem:[%s5121_s0 + $0xc8] ss:$12 sps:$4 sm:$0xff]  }
  0x35   : > { %1090 = vmatprep.subr.bf16.mxu0 %v4112_v2  ;;  %3883 = vmatprep.subr.bf16.mxu1 %v4112_v2 }
  0x38   : > { %1091 = vmatpush1.bf16.msra.mxu0 %v3941_v12  ;;  %3899 = vmatpush1.bf16.msra.mxu1 %v3941_v12  ;;  %v4028_v12 = vld [vmem:[%s5121_s0 + $0x120] ss:$12 sps:$4 sm:$0xff]  }
  0x39   : > { %1092 = vmatprep.subr.bf16.mxu0 %v4112_v2  ;;  %3884 = vmatprep.subr.bf16.mxu1 %v4112_v2 }
  0x3c   : > { %1093 = vmatpush1.bf16.msra.mxu0 %v3942_v13  ;;  %3900 = vmatpush1.bf16.msra.mxu1 %v3942_v13  ;;  %v4029_v13 = vld [vmem:[%s5121_s0 + $0xe0] ss:$12 sps:$4 sm:$0xff]  }
  0x3d   : > { %1094 = vmatprep.subr.bf16.mxu0 %v4112_v2  ;;  %3885 = vmatprep.subr.bf16.mxu1 %v4112_v2 }
  0x40   : > { %1095 = vmatpush1.bf16.msra.mxu0 %v3943_v14  ;;  %3901 = vmatpush1.bf16.msra.mxu1 %v3943_v14  ;;  %v4030_v14 = vld [vmem:[%s5121_s0 + $0x13c] ss:$12 sps:$4 sm:$0xff]  }
  0x41   : > { %1096 = vmatprep.subr.bf16.mxu0 %v4112_v2  ;;  %3886 = vmatprep.subr.bf16.mxu1 %v4112_v2 }
  0x44   : > { %1097 = vmatpush1.bf16.msra.mxu0 %v3944_v15  ;;  %3902 = vmatpush1.bf16.msra.mxu1 %v3944_v15  ;;  %v4032_v15 = vld [vmem:[%s5121_s0 + $0xf8] ss:$12 sps:$4 sm:$0xff]  }
  0x45   : > { %1098 = vmatprep.subr.bf16.mxu0 %v4112_v2  ;;  %3887 = vmatprep.subr.bf16.mxu1 %v4112_v2 }
  0x48   : > { %1099 = vmatpush1.bf16.msra.mxu0 %v3945_v16  ;;  %3903 = vmatpush1.bf16.msra.mxu1 %v3945_v16  ;;  %v4033_v16 = vld [vmem:[%s5121_s0 + $0x138] ss:$12 sps:$4 sm:$0xff]  }
  0x49   : > { %1100 = vmatprep.subr.bf16.mxu0 %v4112_v2  ;;  %3888 = vmatprep.subr.bf16.mxu1 %v4112_v2 }
  0x4c   : > { %1101 = vmatpush1.bf16.msra.mxu0 %v3946_v17  ;;  %3904 = vmatpush1.bf16.msra.mxu1 %v3946_v17  ;;  %v4034_v17 = vld [vmem:[%s5121_s0 + $0x110] ss:$12 sps:$4 sm:$0xff]  }
  0x4d   : > { %1102 = vmatprep.subr.bf16.mxu0 %v4112_v2  ;;  %3889 = vmatprep.subr.bf16.mxu1 %v4112_v2 }
  0x50   : > { %1103 = vmatpush1.bf16.msra.mxu0 %v3947_v18  ;;  %3905 = vmatpush1.bf16.msra.mxu1 %v3947_v18  ;;  %v4035_v18 = vld [vmem:[%s5121_s0 + $0x154] ss:$12 sps:$4 sm:$0xff]  }
  0x51   : > { %1104 = vmatprep.subr.bf16.mxu0 %v4112_v2  ;;  %3890 = vmatprep.subr.bf16.mxu1 %v4112_v2  ;;  %v4015_v2 = vld [vmem:[%s5121_s0 + $0xf4] ss:$12 sps:$4 sm:$0xff]  }
  0x54   : > { %1105 = vmatpush1.bf16.msra.mxu0 %v3948_v19  ;;  %3906 = vmatpush1.bf16.msra.mxu1 %v3948_v19  ;;  %v4037_v19 = vld [vmem:[%s5121_s0 + $0x128] ss:$12 sps:$4 sm:$0xff]  }
  0x55   : > { %3795 = vmatprep.subr.bf16.mxu1 %v3973_v20 }
  0x57   : > { %1107 = vmatmul.mubr.bf16.vlgmr.msra.gmra.mrb[0].mxu0 %v3949_v21  ;;  %1299 = vmatmul.mubr.bf16.vlgmr.msra.gmra.mrb[0].mxu1 %v3952_v22  ;;  %v4039_v21 = vld [vmem:[%s5121_s0 + $0x140] ss:$12 sps:$4 sm:$0xff]  }
  0x58   : > { %1114 = vmatprep.mubr.bf16.mxu0 %v3955_v23  ;;  %1306 = vmatprep.mubr.bf16.mxu1 %v3957_v24  ;;  %v4040_v22 = vld [vmem:[%s5121_s0 + $0x16c] ss:$12 sps:$4 sm:$0xff]   ;;  %v4043_v24 = vld [vmem:[%s5121_s0 + $0x168] ss:$12 sps:$4 sm:$0xff]  }
  0x59   : > { %3796 = vmatpush3.bf16.msra.mxu1 %v3973_v20  ;;  %v4038_v20 = vld [vmem:[%s5121_s0 + $0x150] ss:$12 sps:$4 sm:$0xff]   ;;  %v4042_v23 = vld [vmem:[%s5121_s0 + $0x158] ss:$12 sps:$4 sm:$0xff]  }
  0x5a   : > { %3797 = vmatprep.subr.bf16.mxu1 %v3980_v25 }
  0x5d   : > { %3798 = vmatpush3.bf16.msra.mxu1 %v3980_v25  ;;  %v4044_v25 = vld [vmem:[%s5121_s0 + $0x170] ss:$12 sps:$4 sm:$0xff]  }
  0x5e   : > { %3799 = vmatprep.subr.bf16.mxu1 %v3987_v27 }
  0x5f   : > { %1115 = vmatmul.mubr.bf16.gmra.mrb[4].mxu0 %v3959_v26  ;;  %1307 = vmatmul.mubr.bf16.gmra.mrb[4].mxu1 %v3960_v28  ;;  %v4045_v26 = vld [vmem:[%s5121_s0 + $0x184] ss:$12 sps:$4 sm:$0xff]   ;;  %v4048_v28 = vld [vmem:[%s5121_s0 + $0x180] ss:$12 sps:$4 sm:$0xff]  }
  0x60   : > { %1122 = vmatprep.mubr.bf16.mxu0 %v3961_v29  ;;  %1314 = vmatprep.mubr.bf16.mxu1 %v3963_v30  ;;  %v4049_v29 = vld [vmem:[%s5121_s0 + $0x1a0] ss:$12 sps:$4 sm:$0xff]   ;;  %v4050_v30 = vld [vmem:[%s5121_s0 + $0x19c] ss:$12 sps:$4 sm:$0xff]  }
  0x61   : > { %3800 = vmatpush3.bf16.msra.mxu1 %v3987_v27  ;;  %v4047_v27 = vld [vmem:[%s5121_s0 + $0x188] ss:$12 sps:$4 sm:$0xff]  }
  0x62   : > { %3801 = vmatprep.subr.bf16.mxu1 %v3988_v31 }
  0x65   : > { %3802 = vmatpush3.bf16.msra.mxu1 %v3988_v31  ;;  %v4052_v31 = vld [vmem:[%s5121_s0 + $0x1b8] ss:$12 sps:$4 sm:$0xff]  }
  0x66   : > { %3803 = vmatprep.subr.bf16.mxu1 %v3995_v33 }
  0x67   : > { %1123 = vmatmul.mubr.bf16.gmra.mrb[8].mxu0 %v3965_v32  ;;  %1315 = vmatmul.mubr.bf16.gmra.mrb[8].mxu1 %v3966_v34  ;;  %v4053_v32 = vld [vmem:[%s5121_s0 + $0x198] ss:$12 sps:$4 sm:$0xff]   ;;  %v4055_v34 = vld [vmem:[%s5121_s0 + $0x1b4] ss:$12 sps:$4 sm:$0xff]  }
  0x68   : > { %1130 = vmatprep.mubr.bf16.mxu0 %v3967_v35  ;;  %1322 = vmatprep.mubr.bf16.mxu1 %v3969_v36  ;;  %v4057_v35 = vld [vmem:[%s5121_s0 + $0x1e8] ss:$12 sps:$4 sm:$0xff]   ;;  %v4058_v36 = vld [vmem:[%s5121_s0 + $0x1b0] ss:$12 sps:$4 sm:$0xff]  }
  0x69   : > { %3804 = vmatpush3.bf16.msra.mxu1 %v3995_v33  ;;  %v4054_v33 = vld [vmem:[%s5121_s0 + $0x1d0] ss:$12 sps:$4 sm:$0xff]  }
  0x6a   : > { %3805 = vmatprep.subr.bf16.mxu1 %v3996_v37 }
  0x6d   : > { %3806 = vmatpush3.bf16.msra.mxu1 %v3996_v37  ;;  %v4059_v37 = vld [vmem:[%s5121_s0 + $0x200] ss:$12 sps:$4 sm:$0xff]  }
  0x6e   : > { %3807 = vmatprep.subr.bf16.mxu1 %v4003_v42 }
  0x6f   : > { %1131 = vmatmul.mubr.bf16.gmra.mrb[12].mxu0 %v3971_v38  ;;  %1323 = vmatmul.mubr.bf16.gmra.mrb[12].mxu1 %v3972_v39  ;;  %v4060_v38 = vld [vmem:[%s5121_s0 + $0x1cc] ss:$12 sps:$4 sm:$0xff]  }
  0x70   : > { %1138 = vmatprep.mubr.bf16.mxu0 %v3974_v40  ;;  %1330 = vmatprep.mubr.bf16.mxu1 %v3976_v41  ;;  %v4062_v39 = vld [vmem:[%s5121_s0 + $0x218] ss:$12 sps:$4 sm:$0xff]   ;;  %v4063_v40 = vld [vmem:[%s5121_s0 + $0x1c8] ss:$12 sps:$4 sm:$0xff]   ;;  %v4064_v41 = vld [vmem:[%s5121_s0 + $0x230] ss:$12 sps:$4 sm:$0xff]  }
  0x71   : > { %3808 = vmatpush3.bf16.msra.mxu1 %v4003_v42  ;;  %v4065_v42 = vld [vmem:[%s5121_s0 + $0x1e4] ss:$12 sps:$4 sm:$0xff]  }
  0x72   : > { %3809 = vmatprep.subr.bf16.mxu1 %v4004_v43 }
  0x75   : > { %3810 = vmatpush3.bf16.msra.mxu1 %v4004_v43  ;;  %v4067_v43 = vld [vmem:[%s5121_s0 + $0x248] ss:$12 sps:$4 sm:$0xff]  }
  0x77   : > { %1139 = vmatmul.mubr.bf16.gmra.mrb[16].mxu0 %v3978_v44  ;;  %1331 = vmatmul.mubr.bf16.gmra.mrb[16].mxu1 %v3979_v45  ;;  %v4068_v44 = vld [vmem:[%s5121_s0 + $0x1e0] ss:$12 sps:$4 sm:$0xff]  }
  0x78   : > { %1146 = vmatprep.mubr.bf16.mxu0 %v3981_v46  ;;  %1338 = vmatprep.mubr.bf16.mxu1 %v3983_v47  ;;  %v4069_v45 = vld [vmem:[%s5121_s0 + $0x260] ss:$12 sps:$4 sm:$0xff]   ;;  %v4070_v46 = vld [vmem:[%s5121_s0 + $0x1fc] ss:$12 sps:$4 sm:$0xff]   ;;  %v4072_v47 = vld [vmem:[%s5121_s0 + $0x278] ss:$12 sps:$4 sm:$0xff]  }
  0x7f   : > { %1147 = vmatmul.mubr.bf16.gmra.mrb[20].mxu0 %v3985_v48  ;;  %1339 = vmatmul.mubr.bf16.gmra.mrb[20].mxu1 %v3986_v49  ;;  %v4073_v48 = vld [vmem:[%s5121_s0 + $0x1f8] ss:$12 sps:$4 sm:$0xff]   ;;  %v4074_v49 = vld [vmem:[%s5121_s0 + $0x290] ss:$12 sps:$4 sm:$0xff]  }
  0x80   : > { %1154 = vmatprep.mubr.bf16.mxu0 %v3989_v50  ;;  %1346 = vmatprep.mubr.bf16.mxu1 %v3991_v51  ;;  %v4075_v50 = vld [vmem:[%s5121_s0 + $0x214] ss:$12 sps:$4 sm:$0xff]  }
  0x81   : > { %v4077_v51 = vld [vmem:[%s5121_s0 + $0x2a8] ss:$12 sps:$4 sm:$0xff]  }
  0x87   : > { %1155 = vmatmul.mubr.bf16.gmra.mrb[24].mxu0 %v3993_v52  ;;  %1347 = vmatmul.mubr.bf16.gmra.mrb[24].mxu1 %v3994_v53  ;;  %v4078_v52 = vld [vmem:[%s5121_s0 + $0x210] ss:$12 sps:$4 sm:$0xff]   ;;  %v4079_v53 = vld [vmem:[%s5121_s0 + $0x2c0] ss:$12 sps:$4 sm:$0xff]  }
  0x88   : > { %1162 = vmatprep.mubr.bf16.mxu0 %v3997_v54  ;;  %1354 = vmatprep.mubr.bf16.mxu1 %v3999_v55  ;;  %v4080_v54 = vld [vmem:[%s5121_s0 + $0x22c] ss:$12 sps:$4 sm:$0xff]  }
  0x89   : > { %v4082_v55 = vld [vmem:[%s5121_s0 + $0x2d8] ss:$12 sps:$4 sm:$0xff]  }
  0x8f   : > { %1163 = vmatmul.mubr.bf16.gmra.mrb[28].mxu0 %v4001_v56  ;;  %1355 = vmatmul.mubr.bf16.gmra.mrb[28].mxu1 %v4002_v57  ;;  %v4083_v56 = vld [vmem:[%s5121_s0 + $0x228] ss:$12 sps:$4 sm:$0xff]   ;;  %v4084_v57 = vld [vmem:[%s5121_s0 + $0x2f0] ss:$12 sps:$4 sm:$0xff]  }
  0x90   : > { %1170 = vmatprep.mubr.bf16.mxu0 %v4005_v58  ;;  %3811 = vmatprep.mubr.bf16.mxu1 %v4007_v59 }
  0x97   : > { %1171 = vmatmul.mubr.bf16.gmra.mrb[32].mxu0 %v4008_v60  ;;  %3812 = vmatmul.mubr.bf16.vlgmr.msra.gmra.mrb[32].mxu1 %v4009_v61 }
  0x98   : > { %1178 = vmatprep.mubr.bf16.mxu0 %v4010_v62  ;;  %3815 = vmatprep.mubr.bf16.mxu1 %v4012_v63 }
  0x9f   : > { %1179 = vmatmul.mubr.bf16.gmra.mrb[36].mxu0 %v4013_v0  ;;  %3816 = vmatmul.mubr.bf16.gmra.mrb[36].mxu1 %v4014_v1 }
  0xa0   : > { %1186 = vmatprep.mubr.bf16.mxu0 %v4015_v2  ;;  %3819 = vmatprep.mubr.bf16.mxu1 %v4017_v3 }
  0xa7   : > { %1187 = vmatmul.mubr.bf16.gmra.mrb[40].mxu0 %v4018_v4  ;;  %3820 = vmatmul.mubr.bf16.gmra.mrb[40].mxu1 %v4019_v5 }
  0xa8   : > { %1194 = vmatprep.mubr.bf16.mxu0 %v4020_v6  ;;  %3823 = vmatprep.mubr.bf16.mxu1 %v4022_v7 }
  0xaf   : > { %1195 = vmatmul.mubr.bf16.gmra.mrb[44].mxu0 %v4023_v8  ;;  %3824 = vmatmul.mubr.bf16.gmra.mrb[44].mxu1 %v4024_v9 }
  0xb0   : > { %1202 = vmatprep.mubr.bf16.mxu0 %v4025_v10  ;;  %3827 = vmatprep.mubr.bf16.mxu1 %v4027_v11 }
  0xb7   : > { %1203 = vmatmul.mubr.bf16.gmra.mrb[48].mxu0 %v4028_v12  ;;  %3828 = vmatmul.mubr.bf16.gmra.mrb[48].mxu1 %v4029_v13 }
  0xb8   : > { %1210 = vmatprep.mubr.bf16.mxu0 %v4030_v14  ;;  %3831 = vmatprep.mubr.bf16.mxu1 %v4032_v15 }
  0xbf   : > { %1211 = vmatmul.mubr.bf16.gmra.mrb[52].mxu0 %v4033_v16  ;;  %3832 = vmatmul.mubr.bf16.gmra.mrb[52].mxu1 %v4034_v17 }
  0xc0   : > { %1218 = vmatprep.mubr.bf16.mxu0 %v4035_v18  ;;  %3835 = vmatprep.mubr.bf16.mxu1 %v4037_v19 }
  0xc7   : > { %1219 = vmatmul.mubr.bf16.gmra.mrb[56].mxu0 %v4038_v20  ;;  %3836 = vmatmul.mubr.bf16.gmra.mrb[56].mxu1 %v4039_v21 }
  0xc8   : > { %1226 = vmatprep.mubr.bf16.mxu0 %v4040_v22  ;;  %3839 = vmatprep.mubr.bf16.mxu1 %v4042_v23 }
  0xcf   : > { %1227 = vmatmul.mubr.bf16.gmra.mrb[60].mxu0 %v4043_v24  ;;  %3840 = vmatmul.mubr.bf16.gmra.mrb[60].mxu1 %v4044_v25 }
  0xd0   : > { %1234 = vmatprep.mubr.bf16.mxu0 %v4045_v26  ;;  %3843 = vmatprep.mubr.bf16.mxu1 %v4047_v27 }
  0xd7   : > { %1235 = vmatmul.mubr.bf16.gmra.mrb[64].mxu0 %v4048_v28  ;;  %3844 = vmatmul.mubr.bf16.gmra.mrb[64].mxu1 %v4049_v29 }
  0xd8   : > { %1242 = vmatprep.mubr.bf16.mxu0 %v4050_v30  ;;  %3847 = vmatprep.mubr.bf16.mxu1 %v4052_v31 }
  0xdf   : > { %1243 = vmatmul.mubr.bf16.gmra.mrb[68].mxu0 %v4053_v32  ;;  %3848 = vmatmul.mubr.bf16.gmra.mrb[68].mxu1 %v4054_v33 }
  0xe0   : > { %1250 = vmatprep.mubr.bf16.mxu0 %v4055_v34  ;;  %3851 = vmatprep.mubr.bf16.mxu1 %v4057_v35 }
  0xe7   : > { %1251 = vmatmul.mubr.bf16.gmra.mrb[72].mxu0 %v4058_v36  ;;  %3852 = vmatmul.mubr.bf16.gmra.mrb[72].mxu1 %v4059_v37 }
  0xe8   : > { %1258 = vmatprep.mubr.bf16.mxu0 %v4060_v38  ;;  %3855 = vmatprep.mubr.bf16.mxu1 %v4062_v39 }
  0xef   : > { %1259 = vmatmul.mubr.bf16.gmra.mrb[76].mxu0 %v4063_v40  ;;  %3856 = vmatmul.mubr.bf16.gmra.mrb[76].mxu1 %v4064_v41 }
  0xf0   : > { %1266 = vmatprep.mubr.bf16.mxu0 %v4065_v42  ;;  %3859 = vmatprep.mubr.bf16.mxu1 %v4067_v43 }
  0xf7   : > { %1267 = vmatmul.mubr.bf16.gmra.mrb[80].mxu0 %v4068_v44  ;;  %3860 = vmatmul.mubr.bf16.gmra.mrb[80].mxu1 %v4069_v45 }
  0xf8   : > { %1274 = vmatprep.mubr.bf16.mxu0 %v4070_v46  ;;  %3863 = vmatprep.mubr.bf16.mxu1 %v4072_v47 }
  0xff   : > { %1275 = vmatmul.mubr.bf16.gmra.mrb[84].mxu0 %v4073_v48  ;;  %3864 = vmatmul.mubr.bf16.gmra.mrb[84].mxu1 %v4074_v49 }
 0x100   : > { %1282 = vmatprep.mubr.bf16.mxu0 %v4075_v50  ;;  %3867 = vmatprep.mubr.bf16.mxu1 %v4077_v51 }
 0x107   : > { %1283 = vmatmul.mubr.bf16.gmra.mrb[88].mxu0 %v4078_v52  ;;  %3868 = vmatmul.mubr.bf16.gmra.mrb[88].mxu1 %v4079_v53 }
 0x108   : > { %1290 = vmatprep.mubr.bf16.mxu0 %v4080_v54  ;;  %3871 = vmatprep.mubr.bf16.mxu1 %v4082_v55 }
 0x10f   : > { %1291 = vmatmul.mubr.bf16.gmra.mrb[92].mxu0 %v4083_v56  ;;  %3872 = vmatmul.mubr.bf16.gmra.mrb[92].mxu1 %v4084_v57 }
 0x12a   : > { %v4552_v58 = vpop.f32.mrb[0].mxu0  ;;  %v4554_v59 = vpop.f32.mrb[0].mxu1 }
 0x12b   : > { %v1110_v60 = vpop.f32.mrb[1].mxu0  ;;  %v1302_v61 = vpop.f32.mrb[1].mxu1 }
 0x12c   : > { %v4556_v62 = vpop.f32.mrb[2].mxu0  ;;  %v4558_v63 = vpop.f32.mrb[2].mxu1 }
 0x12d   : > { %v1113_v0 = vpop.f32.mrb[3].mxu0  ;;  %v1305_v1 = vpop.f32.mrb[3].mxu1 }
 0x132   : > { %v1116_v2 = vpop.f32.mrb[4].mxu0  ;;  %v4560_v3 = vpop.f32.mrb[4].mxu1 }
 0x133   : > { %v1118_v4 = vpop.f32.mrb[5].mxu0  ;;  %v1310_v5 = vpop.f32.mrb[5].mxu1 }
 0x134   : > { %v1119_v6 = vpop.f32.mrb[6].mxu0  ;;  %v4562_v7 = vpop.f32.mrb[6].mxu1 }
 0x135   : > { %v1121_v8 = vpop.f32.mrb[7].mxu0  ;;  %v1313_v9 = vpop.f32.mrb[7].mxu1 }
 0x13a   : > { %v4564_v10 = vpop.f32.mrb[8].mxu0  ;;  %v4566_v11 = vpop.f32.mrb[8].mxu1 }
 0x13b   : > { %v1126_v12 = vpop.f32.mrb[9].mxu0  ;;  %v1318_v13 = vpop.f32.mrb[9].mxu1 }
 0x13c   : > { %v4568_v14 = vpop.f32.mrb[10].mxu0  ;;  %v4570_v15 = vpop.f32.mrb[10].mxu1 }
 0x13d   : > { %v1129_v16 = vpop.f32.mrb[11].mxu0  ;;  %v1321_v17 = vpop.f32.mrb[11].mxu1 }
 0x142   : > { %v4572_v18 = vpop.f32.mrb[12].mxu0  ;;  %v4574_v19 = vpop.f32.mrb[12].mxu1 }
 0x143   : > { %v1134_v20 = vpop.f32.mrb[13].mxu0  ;;  %v1326_v21 = vpop.f32.mrb[13].mxu1 }
 0x144   : > { %v4576_v22 = vpop.f32.mrb[14].mxu0  ;;  %v4578_v23 = vpop.f32.mrb[14].mxu1 }
 0x145   : > { %v1137_v24 = vpop.f32.mrb[15].mxu0  ;;  %v1329_v25 = vpop.f32.mrb[15].mxu1 }
 0x14a   : > { %v4580_v26 = vpop.f32.mrb[16].mxu0  ;;  %v4582_v27 = vpop.f32.mrb[16].mxu1 }
 0x14b   : > { %v1142_v28 = vpop.f32.mrb[17].mxu0  ;;  %v1334_v29 = vpop.f32.mrb[17].mxu1 }
 0x14c   : > { %v4584_v30 = vpop.f32.mrb[18].mxu0  ;;  %v4586_v31 = vpop.f32.mrb[18].mxu1 }
 0x14d   : > { %v1145_v32 = vpop.f32.mrb[19].mxu0  ;;  %v1337_v33 = vpop.f32.mrb[19].mxu1 }
 0x152   : > { %v4588_v34 = vpop.f32.mrb[20].mxu0  ;;  %v4590_v35 = vpop.f32.mrb[20].mxu1 }
 0x153   : > { %v1150_v36 = vpop.f32.mrb[21].mxu0  ;;  %v1342_v37 = vpop.f32.mrb[21].mxu1 }
 0x154   : > { %v4592_v38 = vpop.f32.mrb[22].mxu0  ;;  %v4594_v39 = vpop.f32.mrb[22].mxu1 }
 0x155   : > { %v1153_v40 = vpop.f32.mrb[23].mxu0  ;;  %v1345_v41 = vpop.f32.mrb[23].mxu1 }
 0x15a   : > { %v4596_v42 = vpop.f32.mrb[24].mxu0  ;;  %v4598_v43 = vpop.f32.mrb[24].mxu1 }
 0x15b   : > { %v1158_v44 = vpop.f32.mrb[25].mxu0  ;;  %v1350_v45 = vpop.f32.mrb[25].mxu1 }
 0x15c   : > { %v4600_v46 = vpop.f32.mrb[26].mxu0  ;;  %v4602_v47 = vpop.f32.mrb[26].mxu1 }
 0x15d   : > { %v1161_v48 = vpop.f32.mrb[27].mxu0  ;;  %v1353_v49 = vpop.f32.mrb[27].mxu1 }
 0x162   : > { %v4604_v50 = vpop.f32.mrb[28].mxu0  ;;  %v4606_v51 = vpop.f32.mrb[28].mxu1 }
 0x163   : > { %v1166_v52 = vpop.f32.mrb[29].mxu0  ;;  %v1358_v53 = vpop.f32.mrb[29].mxu1 }
 0x164   : > { %v4608_v54 = vpop.f32.mrb[30].mxu0  ;;  %v4610_v55 = vpop.f32.mrb[30].mxu1 }
 0x165   : > { %v1169_v56 = vpop.f32.mrb[31].mxu0  ;;  %v1361_v57 = vpop.f32.mrb[31].mxu1 }
 0x16a   : > { %v4612_v60 = vpop.f32.mrb[32].mxu0  ;;  %v3813_v61 = vpop.f32.mrb[32].mxu1 }
 0x16b   : > { %v1406_v0 = vadd.f32 %v3813_v61, %v1116_v2  ;;  %v1174_v1 = vpop.f32.mrb[33].mxu0  ;;  %v1397_v4 = vpop.f32.mrb[33].mxu1 }
 0x16c   : > { %v1398_v5 = vadd.f32 %v1397_v4, %v4552_v58  ;;  %v4615_v8 = vpop.f32.mrb[34].mxu0  ;;  %v3814_v9 = vpop.f32.mrb[34].mxu1 }
 0x16d   : > { %1656 = vst [vmem:[#allocation2 + $0x10] sm:$0xff] %v1406_v0  ;;  %v1409_v12 = vadd.f32 %v3814_v9, %v1119_v6  ;;  %v1177_v13 = vpop.f32.mrb[35].mxu0  ;;  %v1400_v16 = vpop.f32.mrb[35].mxu1  ;;  %v1793_v58 = vmul.f32 %v1406_v0, %v1406_v0 }
 0x16e   : > { %1654 = vst [vmem:[#allocation2] sm:$0xff] %v1398_v5  ;;  %v1401_v17 = vadd.f32 %v1400_v16, %v4556_v62  ;;  %v1791_v21 = vmul.f32 %v1398_v5, %v1398_v5 }
 0x16f   : > { %1657 = vst [vmem:[#allocation2 + $0x18] sm:$0xff] %v1409_v12  ;;  %v3381_v20 = vpack.c.bf16 %v1409_v12, %v1406_v0  ;;  %v1794_v37 = vmul.f32 %v1409_v12, %v1409_v12 }
 0x170   : > { %1655 = vst [vmem:[#allocation2 + $0x8] sm:$0xff] %v1401_v17  ;;  %v1719_v24 = vadd.f32 %v1401_v17, %v1398_v5  ;;  %v1792_v2 = vmul.f32 %v1401_v17, %v1401_v17  ;;  %v3376_v25 = vpack.c.bf16 %v1401_v17, %v1398_v5 }
 0x171   : > { %3693 = vst [vmem:[%s5125_s4 + $0x8] sm:$0xff] %v3381_v20  }
 0x172   : > { %v1720_v28 = vadd.f32 %v1719_v24, %v1406_v0  ;;  %v1855_v29 = vadd.f32 %v1792_v2, %v1791_v21  ;;  %3377 = vst [vmem:[%s5125_s4] sm:$0xff] %v3376_v25   ;;  %v4624_v6 = vpop.f32.mrb[36].mxu0  ;;  %v3817_v62 = vpop.f32.mrb[36].mxu1 }
 0x173   : > { %v1422_v32 = vadd.f32 %v3817_v62, %v4572_v18  ;;  %v1182_v33 = vpop.f32.mrb[37].mxu0  ;;  %v1413_v36 = vpop.f32.mrb[37].mxu1 }
 0x174   : > { %v1856_v40 = vadd.f32 %v1855_v29, %v1793_v58  ;;  %v1414_v41 = vadd.f32 %v1413_v36, %v4564_v10  ;;  %v1721_v44 = vadd.f32 %v1720_v28, %v1409_v12  ;;  %v4628_v45 = vpop.f32.mrb[38].mxu0  ;;  %v3818_v48 = vpop.f32.mrb[38].mxu1 }
 0x175   : > { %1660 = vst [vmem:[#allocation2 + $0x30] sm:$0xff] %v1422_v32  ;;  %v1425_v49 = vadd.f32 %v3818_v48, %v4576_v22  ;;  %v1185_v52 = vpop.f32.mrb[39].mxu0  ;;  %v1416_v53 = vpop.f32.mrb[39].mxu1  ;;  %v1797_v22 = vmul.f32 %v1422_v32, %v1422_v32 }
 0x176   : > { %1658 = vst [vmem:[#allocation2 + $0x20] sm:$0xff] %v1414_v41  ;;  %v1722_v56 = vadd.f32 %v1721_v44, %v1414_v41  ;;  %v1795_v57 = vmul.f32 %v1414_v41, %v1414_v41  ;;  %v1857_v61 = vadd.f32 %v1856_v40, %v1794_v37  ;;  %v1417_v18 = vadd.f32 %v1416_v53, %v4568_v14 }
 0x177   : > { %1661 = vst [vmem:[#allocation2 + $0x38] sm:$0xff] %v1425_v49  ;;  %v3391_v0 = vpack.c.bf16 %v1425_v49, %v1422_v32  ;;  %v1798_v21 = vmul.f32 %v1425_v49, %v1425_v49 }
 0x178   : > { %v1858_v1 = vadd.f32 %v1857_v61, %v1795_v57  ;;  %1659 = vst [vmem:[#allocation2 + $0x28] sm:$0xff] %v1417_v18  ;;  %v1723_v10 = vadd.f32 %v1722_v56, %v1417_v18  ;;  %v1796_v4 = vmul.f32 %v1417_v18, %v1417_v18  ;;  %v3386_v5 = vpack.c.bf16 %v1417_v18, %v1414_v41 }
 0x179   : > { %3695 = vst [vmem:[%s5125_s4 + $0x18] sm:$0xff] %v3391_v0  }
 0x17a   : > { %v1724_v9 = vadd.f32 %v1723_v10, %v1422_v32  ;;  %v1859_v12 = vadd.f32 %v1858_v1, %v1796_v4  ;;  %3694 = vst [vmem:[%s5125_s4 + $0x10] sm:$0xff] %v3386_v5   ;;  %v4638_v13 = vpop.f32.mrb[40].mxu0  ;;  %v3821_v14 = vpop.f32.mrb[40].mxu1 }
 0x17b   : > { %v1438_v16 = vadd.f32 %v3821_v14, %v4588_v34  ;;  %v1190_v17 = vpop.f32.mrb[41].mxu0  ;;  %v1429_v20 = vpop.f32.mrb[41].mxu1 }
 0x17c   : > { %v1860_v24 = vadd.f32 %v1859_v12, %v1797_v22  ;;  %v1430_v2 = vadd.f32 %v1429_v20, %v4580_v26  ;;  %v1725_v25 = vadd.f32 %v1724_v9, %v1425_v49  ;;  %v4642_v58 = vpop.f32.mrb[42].mxu0  ;;  %v3822_v28 = vpop.f32.mrb[42].mxu1 }
 0x17d   : > { %1664 = vst [vmem:[#allocation2 + $0x50] sm:$0xff] %v1438_v16  ;;  %v1441_v29 = vadd.f32 %v3822_v28, %v4592_v38  ;;  %v1193_v62 = vpop.f32.mrb[43].mxu0  ;;  %v1432_v32 = vpop.f32.mrb[43].mxu1  ;;  %v1801_v38 = vmul.f32 %v1438_v16, %v1438_v16 }
 0x17e   : > { %1662 = vst [vmem:[#allocation2 + $0x40] sm:$0xff] %v1430_v2  ;;  %v1726_v33 = vadd.f32 %v1725_v25, %v1430_v2  ;;  %v1799_v36 = vmul.f32 %v1430_v2, %v1430_v2  ;;  %v1861_v37 = vadd.f32 %v1860_v24, %v1798_v21  ;;  %v1433_v34 = vadd.f32 %v1432_v32, %v4584_v30 }
 0x17f   : > { %1665 = vst [vmem:[#allocation2 + $0x58] sm:$0xff] %v1441_v29  ;;  %v3401_v40 = vpack.c.bf16 %v1441_v29, %v1438_v16  ;;  %v1802_v18 = vmul.f32 %v1441_v29, %v1441_v29 }
 0x180   : > { %v1862_v41 = vadd.f32 %v1861_v37, %v1799_v36  ;;  %1663 = vst [vmem:[#allocation2 + $0x48] sm:$0xff] %v1433_v34  ;;  %v1727_v26 = vadd.f32 %v1726_v33, %v1433_v34  ;;  %v1800_v44 = vmul.f32 %v1433_v34, %v1433_v34  ;;  %v3396_v48 = vpack.c.bf16 %v1433_v34, %v1430_v2 }
 0x181   : > { %3697 = vst [vmem:[%s5125_s4 + $0x28] sm:$0xff] %v3401_v40  }
 0x182   : > { %v1728_v49 = vadd.f32 %v1727_v26, %v1438_v16  ;;  %v1863_v52 = vadd.f32 %v1862_v41, %v1800_v44  ;;  %3696 = vst [vmem:[%s5125_s4 + $0x20] sm:$0xff] %v3396_v48   ;;  %v4652_v53 = vpop.f32.mrb[44].mxu0  ;;  %v3825_v30 = vpop.f32.mrb[44].mxu1 }
 0x183   : > { %v1454_v56 = vadd.f32 %v3825_v30, %v4604_v50  ;;  %v1198_v57 = vpop.f32.mrb[45].mxu0  ;;  %v1445_v61 = vpop.f32.mrb[45].mxu1 }
 0x184   : > { %v1864_v0 = vadd.f32 %v1863_v52, %v1801_v38  ;;  %v1446_v1 = vadd.f32 %v1445_v61, %v4596_v42  ;;  %v1729_v10 = vadd.f32 %v1728_v49, %v1441_v29  ;;  %v4656_v4 = vpop.f32.mrb[46].mxu0  ;;  %v3826_v5 = vpop.f32.mrb[46].mxu1 }
 0x185   : > { %1668 = vst [vmem:[#allocation2 + $0x70] sm:$0xff] %v1454_v56  ;;  %v1457_v22 = vadd.f32 %v3826_v5, %v4608_v54  ;;  %v1201_v9 = vpop.f32.mrb[47].mxu0  ;;  %v1448_v12 = vpop.f32.mrb[47].mxu1  ;;  %v1805_v54 = vmul.f32 %v1454_v56, %v1454_v56 }
 0x186   : > { %1666 = vst [vmem:[#allocation2 + $0x60] sm:$0xff] %v1446_v1  ;;  %v1730_v14 = vadd.f32 %v1729_v10, %v1446_v1  ;;  %v1803_v16 = vmul.f32 %v1446_v1, %v1446_v1  ;;  %v1865_v17 = vadd.f32 %v1864_v0, %v1802_v18  ;;  %v1449_v50 = vadd.f32 %v1448_v12, %v4600_v46 }
 0x187   : > { %1669 = vst [vmem:[#allocation2 + $0x78] sm:$0xff] %v1457_v22  ;;  %v3411_v20 = vpack.c.bf16 %v1457_v22, %v1454_v56  ;;  %v1806_v36 = vmul.f32 %v1457_v22, %v1457_v22 }
 0x188   : > { %v1866_v21 = vadd.f32 %v1865_v17, %v1803_v16  ;;  %1667 = vst [vmem:[#allocation2 + $0x68] sm:$0xff] %v1449_v50  ;;  %v1731_v42 = vadd.f32 %v1730_v14, %v1449_v50  ;;  %v1804_v24 = vmul.f32 %v1449_v50, %v1449_v50  ;;  %v3406_v2 = vpack.c.bf16 %v1449_v50, %v1446_v1 }
 0x189   : > { %3699 = vst [vmem:[%s5125_s4 + $0x38] sm:$0xff] %v3411_v20  }
 0x18a   : > { %v1732_v25 = vadd.f32 %v1731_v42, %v1454_v56  ;;  %v1867_v28 = vadd.f32 %v1866_v21, %v1804_v24  ;;  %3698 = vst [vmem:[%s5125_s4 + $0x30] sm:$0xff] %v3406_v2   ;;  %v4666_v29 = vpop.f32.mrb[48].mxu0  ;;  %v3829_v46 = vpop.f32.mrb[48].mxu1 }
 0x18b   : > { %v1470_v62 = vadd.f32 %v3829_v46, %v4624_v6  ;;  %v1206_v32 = vpop.f32.mrb[49].mxu0  ;;  %v1461_v33 = vpop.f32.mrb[49].mxu1 }
 0x18c   : > { %v1868_v37 = vadd.f32 %v1867_v28, %v1805_v54  ;;  %v1462_v34 = vadd.f32 %v1461_v33, %v4612_v60  ;;  %v1733_v40 = vadd.f32 %v1732_v25, %v1457_v22  ;;  %v4670_v41 = vpop.f32.mrb[50].mxu0  ;;  %v3830_v26 = vpop.f32.mrb[50].mxu1 }
 0x18d   : > { %1672 = vst [vmem:[#allocation2 + $0x90] sm:$0xff] %v1470_v62  ;;  %v1473_v44 = vadd.f32 %v3830_v26, %v4628_v45  ;;  %v1209_v48 = vpop.f32.mrb[51].mxu0  ;;  %v1464_v38 = vpop.f32.mrb[51].mxu1  ;;  %v1809_v45 = vmul.f32 %v1470_v62, %v1470_v62 }
 0x18e   : > { %1670 = vst [vmem:[#allocation2 + $0x80] sm:$0xff] %v1462_v34  ;;  %v1734_v49 = vadd.f32 %v1733_v40, %v1462_v34  ;;  %v1807_v52 = vmul.f32 %v1462_v34, %v1462_v34  ;;  %v1869_v30 = vadd.f32 %v1868_v37, %v1806_v36  ;;  %v1465_v6 = vadd.f32 %v1464_v38, %v4615_v8 }
 0x18f   : > { %1673 = vst [vmem:[#allocation2 + $0x98] sm:$0xff] %v1473_v44  ;;  %v3421_v56 = vpack.c.bf16 %v1473_v44, %v1470_v62  ;;  %v1810_v12 = vmul.f32 %v1473_v44, %v1473_v44 }
 0x190   : > { %v1870_v57 = vadd.f32 %v1869_v30, %v1807_v52  ;;  %1671 = vst [vmem:[#allocation2 + $0x88] sm:$0xff] %v1465_v6  ;;  %v1735_v60 = vadd.f32 %v1734_v49, %v1465_v6  ;;  %v1808_v61 = vmul.f32 %v1465_v6, %v1465_v6  ;;  %v3416_v18 = vpack.c.bf16 %v1465_v6, %v1462_v34 }
 0x191   : > { %3701 = vst [vmem:[%s5125_s4 + $0x48] sm:$0xff] %v3421_v56  }
 0x192   : > { %v1736_v0 = vadd.f32 %v1735_v60, %v1470_v62  ;;  %v1871_v1 = vadd.f32 %v1870_v57, %v1808_v61  ;;  %3700 = vst [vmem:[%s5125_s4 + $0x40] sm:$0xff] %v3416_v18   ;;  %v1212_v10 = vpop.f32.mrb[52].mxu0  ;;  %v3833_v8 = vpop.f32.mrb[52].mxu1 }
 0x193   : > { %v1486_v5 = vadd.f32 %v3833_v8, %v4652_v53  ;;  %v1214_v22 = vpop.f32.mrb[53].mxu0  ;;  %v1477_v9 = vpop.f32.mrb[53].mxu1 }
 0x194   : > { %v1872_v14 = vadd.f32 %v1871_v1, %v1809_v45  ;;  %v1478_v16 = vadd.f32 %v1477_v9, %v4638_v13  ;;  %v1737_v17 = vadd.f32 %v1736_v0, %v1473_v44  ;;  %v1215_v50 = vpop.f32.mrb[54].mxu0  ;;  %v3834_v20 = vpop.f32.mrb[54].mxu1 }
 0x195   : > { %1676 = vst [vmem:[#allocation2 + $0xb0] sm:$0xff] %v1486_v5  ;;  %v1489_v21 = vadd.f32 %v3834_v20, %v4656_v4  ;;  %v1217_v42 = vpop.f32.mrb[55].mxu0  ;;  %v1480_v24 = vpop.f32.mrb[55].mxu1  ;;  %v1813_v4 = vmul.f32 %v1486_v5, %v1486_v5 }
 0x196   : > { %1674 = vst [vmem:[#allocation2 + $0xa0] sm:$0xff] %v1478_v16  ;;  %v1738_v2 = vadd.f32 %v1737_v17, %v1478_v16  ;;  %v1811_v54 = vmul.f32 %v1478_v16, %v1478_v16  ;;  %v1873_v25 = vadd.f32 %v1872_v14, %v1810_v12  ;;  %v1481_v53 = vadd.f32 %v1480_v24, %v4642_v58 }
 0x197   : > { %1677 = vst [vmem:[#allocation2 + $0xb8] sm:$0xff] %v1489_v21  ;;  %v3431_v28 = vpack.c.bf16 %v1489_v21, %v1486_v5  ;;  %v1814_v44 = vmul.f32 %v1489_v21, %v1489_v21 }
 0x198   : > { %v1874_v46 = vadd.f32 %v1873_v25, %v1811_v54  ;;  %1675 = vst [vmem:[#allocation2 + $0xa8] sm:$0xff] %v1481_v53  ;;  %v1739_v62 = vadd.f32 %v1738_v2, %v1481_v53  ;;  %v1812_v13 = vmul.f32 %v1481_v53, %v1481_v53  ;;  %v3426_v32 = vpack.c.bf16 %v1481_v53, %v1478_v16 }
 0x199   : > { %3703 = vst [vmem:[%s5125_s4 + $0x58] sm:$0xff] %v3431_v28  }
 0x19a   : > { %v1740_v33 = vadd.f32 %v1739_v62, %v1486_v5  ;;  %v1875_v36 = vadd.f32 %v1874_v46, %v1812_v13  ;;  %3702 = vst [vmem:[%s5125_s4 + $0x50] sm:$0xff] %v3426_v32   ;;  %v1220_v37 = vpop.f32.mrb[56].mxu0  ;;  %v3837_v58 = vpop.f32.mrb[56].mxu1 }
 0x19b   : > { %v1502_v34 = vadd.f32 %v3837_v58, %v1212_v10  ;;  %v1222_v40 = vpop.f32.mrb[57].mxu0  ;;  %v1493_v26 = vpop.f32.mrb[57].mxu1 }
 0x19c   : > { %v1876_v48 = vadd.f32 %v1875_v36, %v1813_v4  ;;  %v1494_v38 = vadd.f32 %v1493_v26, %v4666_v29  ;;  %v1741_v49 = vadd.f32 %v1740_v33, %v1489_v21  ;;  %v1223_v52 = vpop.f32.mrb[58].mxu0  ;;  %v3838_v30 = vpop.f32.mrb[58].mxu1 }
 0x19d   : > { %1680 = vst [vmem:[#allocation2 + $0xd0] sm:$0xff] %v1502_v34  ;;  %v1505_v6 = vadd.f32 %v3838_v30, %v1215_v50  ;;  %v1225_v56 = vpop.f32.mrb[59].mxu0  ;;  %v1496_v57 = vpop.f32.mrb[59].mxu1  ;;  %v1817_v5 = vmul.f32 %v1502_v34, %v1502_v34 }
 0x19e   : > { %1678 = vst [vmem:[#allocation2 + $0xc0] sm:$0xff] %v1494_v38  ;;  %v1742_v60 = vadd.f32 %v1741_v49, %v1494_v38  ;;  %v1815_v61 = vmul.f32 %v1494_v38, %v1494_v38  ;;  %v1877_v18 = vadd.f32 %v1876_v48, %v1814_v44  ;;  %v1497_v45 = vadd.f32 %v1496_v57, %v4670_v41 }
 0x19f   : > { %1681 = vst [vmem:[#allocation2 + $0xd8] sm:$0xff] %v1505_v6  ;;  %v3441_v0 = vpack.c.bf16 %v1505_v6, %v1502_v34  ;;  %v1818_v50 = vmul.f32 %v1505_v6, %v1505_v6 }
 0x1a0   : > { %v1878_v1 = vadd.f32 %v1877_v18, %v1815_v61  ;;  %1679 = vst [vmem:[#allocation2 + $0xc8] sm:$0xff] %v1497_v45  ;;  %v1743_v10 = vadd.f32 %v1742_v60, %v1497_v45  ;;  %v1816_v8 = vmul.f32 %v1497_v45, %v1497_v45  ;;  %v3436_v29 = vpack.c.bf16 %v1497_v45, %v1494_v38 }
 0x1a1   : > { %3705 = vst [vmem:[%s5125_s4 + $0x68] sm:$0xff] %v3441_v0  }
 0x1a2   : > { %v1744_v22 = vadd.f32 %v1743_v10, %v1502_v34  ;;  %v1879_v9 = vadd.f32 %v1878_v1, %v1816_v8  ;;  %3704 = vst [vmem:[%s5125_s4 + $0x60] sm:$0xff] %v3436_v29   ;;  %v1228_v12 = vpop.f32.mrb[60].mxu0  ;;  %v3841_v41 = vpop.f32.mrb[60].mxu1 }
 0x1a3   : > { %v1518_v14 = vadd.f32 %v3841_v41, %v1228_v12  ;;  %v1230_v16 = vpop.f32.mrb[61].mxu0  ;;  %v1509_v17 = vpop.f32.mrb[61].mxu1 }
 0x1a4   : > { %v1880_v20 = vadd.f32 %v1879_v9, %v1817_v5  ;;  %v1510_v21 = vadd.f32 %v1509_v17, %v1220_v37  ;;  %v1745_v42 = vadd.f32 %v1744_v22, %v1505_v6  ;;  %v1231_v24 = vpop.f32.mrb[62].mxu0  ;;  %v3842_v2 = vpop.f32.mrb[62].mxu1 }
 0x1a5   : > { %1684 = vst [vmem:[#allocation2 + $0xf0] sm:$0xff] %v1518_v14  ;;  %v1521_v54 = vadd.f32 %v3842_v2, %v1231_v24  ;;  %v1233_v25 = vpop.f32.mrb[63].mxu0  ;;  %v1512_v53 = vpop.f32.mrb[63].mxu1  ;;  %v1821_v37 = vmul.f32 %v1518_v14, %v1518_v14 }
 0x1a6   : > { %1682 = vst [vmem:[#allocation2 + $0xe0] sm:$0xff] %v1510_v21  ;;  %v1746_v28 = vadd.f32 %v1745_v42, %v1510_v21  ;;  %v1819_v46 = vmul.f32 %v1510_v21, %v1510_v21  ;;  %v1881_v62 = vadd.f32 %v1880_v20, %v1818_v50  ;;  %v1513_v13 = vadd.f32 %v1512_v53, %v1223_v52 }
 0x1a7   : > { %1685 = vst [vmem:[#allocation2 + $0xf8] sm:$0xff] %v1521_v54  ;;  %v3451_v32 = vpack.c.bf16 %v1521_v54, %v1518_v14  ;;  %v1822_v49 = vmul.f32 %v1521_v54, %v1521_v54 }
 0x1a8   : > { %v1882_v4 = vadd.f32 %v1881_v62, %v1819_v46  ;;  %1683 = vst [vmem:[#allocation2 + $0xe8] sm:$0xff] %v1513_v13  ;;  %v1747_v33 = vadd.f32 %v1746_v28, %v1513_v13  ;;  %v1820_v36 = vmul.f32 %v1513_v13, %v1513_v13  ;;  %v3446_v58 = vpack.c.bf16 %v1513_v13, %v1510_v21 }
 0x1a9   : > { %3707 = vst [vmem:[%s5125_s4 + $0x78] sm:$0xff] %v3451_v32  }
 0x1aa   : > { %v1748_v34 = vadd.f32 %v1747_v33, %v1518_v14  ;;  %v1883_v40 = vadd.f32 %v1882_v4, %v1820_v36  ;;  %3706 = vst [vmem:[%s5125_s4 + $0x70] sm:$0xff] %v3446_v58   ;;  %v1236_v26 = vpop.f32.mrb[64].mxu0  ;;  %v3845_v44 = vpop.f32.mrb[64].mxu1 }
 0x1ab   : > { %v1238_v48 = vpop.f32.mrb[65].mxu0  ;;  %v1525_v38 = vpop.f32.mrb[65].mxu1 }
 0x1ac   : > { %v1884_v52 = vadd.f32 %v1883_v40, %v1821_v37  ;;  %v1526_v30 = vadd.f32 %v1525_v38, %v1236_v26  ;;  %v1749_v6 = vadd.f32 %v1748_v34, %v1521_v54  ;;  %v1239_v56 = vpop.f32.mrb[66].mxu0  ;;  %v3846_v57 = vpop.f32.mrb[66].mxu1 }
 0x1ad   : > { %v1241_v60 = vpop.f32.mrb[67].mxu0  ;;  %v1528_v61 = vpop.f32.mrb[67].mxu1 }
 0x1ae   : > { %1686 = vst [vmem:[#allocation2 + $0x100] sm:$0xff] %v1526_v30  ;;  %v1750_v18 = vadd.f32 %v1749_v6, %v1526_v30  ;;  %v1823_v45 = vmul.f32 %v1526_v30, %v1526_v30  ;;  %v1885_v0 = vadd.f32 %v1884_v52, %v1822_v49  ;;  %v1529_v1 = vadd.f32 %v1528_v61, %v1239_v56 }
 0x1b0   : > { %v1886_v10 = vadd.f32 %v1885_v0, %v1823_v45  ;;  %1687 = vst [vmem:[#allocation2 + $0x108] sm:$0xff] %v1529_v1  ;;  %v1751_v8 = vadd.f32 %v1750_v18, %v1529_v1  ;;  %v1824_v29 = vmul.f32 %v1529_v1, %v1529_v1  ;;  %v3456_v5 = vpack.c.bf16 %v1529_v1, %v1526_v30 }
 0x1b2   : > { %v1887_v22 = vadd.f32 %v1886_v10, %v1824_v29  ;;  %3708 = vst [vmem:[%s5125_s4 + $0x80] sm:$0xff] %v3456_v5   ;;  %v1244_v9 = vpop.f32.mrb[68].mxu0  ;;  %v3849_v12 = vpop.f32.mrb[68].mxu1 }
 0x1b3   : > { %v1534_v41 = vadd.f32 %v3845_v44, %v1244_v9  ;;  %v1246_v14 = vpop.f32.mrb[69].mxu0  ;;  %v1541_v16 = vpop.f32.mrb[69].mxu1 }
 0x1b4   : > { %v1247_v17 = vpop.f32.mrb[70].mxu0  ;;  %v3850_v50 = vpop.f32.mrb[70].mxu1 }
 0x1b5   : > { %1688 = vst [vmem:[#allocation2 + $0x110] sm:$0xff] %v1534_v41  ;;  %v1752_v20 = vadd.f32 %v1751_v8, %v1534_v41  ;;  %v1825_v21 = vmul.f32 %v1534_v41, %v1534_v41  ;;  %v1537_v42 = vadd.f32 %v3846_v57, %v1247_v17  ;;  %v1249_v24 = vpop.f32.mrb[71].mxu0  ;;  %v1544_v2 = vpop.f32.mrb[71].mxu1 }
 0x1b7   : > { %v1888_v54 = vadd.f32 %v1887_v22, %v1825_v21  ;;  %1689 = vst [vmem:[#allocation2 + $0x118] sm:$0xff] %v1537_v42  ;;  %v1753_v25 = vadd.f32 %v1752_v20, %v1537_v42  ;;  %v1826_v53 = vmul.f32 %v1537_v42, %v1537_v42  ;;  %v3461_v28 = vpack.c.bf16 %v1537_v42, %v1534_v41 }
 0x1b9   : > { %v1889_v46 = vadd.f32 %v1888_v54, %v1826_v53  ;;  %3709 = vst [vmem:[%s5125_s4 + $0x88] sm:$0xff] %v3461_v28  }
 0x1ba   : > { %v1252_v62 = vpop.f32.mrb[72].mxu0  ;;  %v4710_v13 = vpop.f32.mrb[72].mxu1 }
 0x1bb   : > { %v1542_v32 = vadd.f32 %v1541_v16, %v1252_v62  ;;  %v1254_v4 = vpop.f32.mrb[73].mxu0  ;;  %v1557_v33 = vpop.f32.mrb[73].mxu1 }
 0x1bc   : > { %v1255_v36 = vpop.f32.mrb[74].mxu0  ;;  %v4712_v58 = vpop.f32.mrb[74].mxu1 }
 0x1bd   : > { %1690 = vst [vmem:[#allocation2 + $0x120] sm:$0xff] %v1542_v32  ;;  %v1754_v37 = vadd.f32 %v1753_v25, %v1542_v32  ;;  %v1827_v34 = vmul.f32 %v1542_v32, %v1542_v32  ;;  %v1545_v40 = vadd.f32 %v1544_v2, %v1255_v36  ;;  %v1257_v26 = vpop.f32.mrb[75].mxu0  ;;  %v1560_v44 = vpop.f32.mrb[75].mxu1 }
 0x1bf   : > { %v1890_v48 = vadd.f32 %v1889_v46, %v1827_v34  ;;  %1691 = vst [vmem:[#allocation2 + $0x128] sm:$0xff] %v1545_v40  ;;  %v1755_v38 = vadd.f32 %v1754_v37, %v1545_v40  ;;  %v1828_v49 = vmul.f32 %v1545_v40, %v1545_v40  ;;  %v3466_v52 = vpack.c.bf16 %v1545_v40, %v1542_v32 }
 0x1c1   : > { %v1891_v30 = vadd.f32 %v1890_v48, %v1828_v49  ;;  %3710 = vst [vmem:[%s5125_s4 + $0x90] sm:$0xff] %v3466_v52  }
 0x1c2   : > { %v1260_v6 = vpop.f32.mrb[76].mxu0  ;;  %v4717_v56 = vpop.f32.mrb[76].mxu1 }
 0x1c3   : > { %v1550_v57 = vadd.f32 %v3849_v12, %v1260_v6  ;;  %v1262_v60 = vpop.f32.mrb[77].mxu0  ;;  %v4719_v61 = vpop.f32.mrb[77].mxu1 }
 0x1c4   : > { %v1263_v18 = vpop.f32.mrb[78].mxu0  ;;  %v4721_v45 = vpop.f32.mrb[78].mxu1 }
 0x1c5   : > { %1692 = vst [vmem:[#allocation2 + $0x130] sm:$0xff] %v1550_v57  ;;  %v1756_v0 = vadd.f32 %v1755_v38, %v1550_v57  ;;  %v1829_v1 = vmul.f32 %v1550_v57, %v1550_v57  ;;  %v1553_v10 = vadd.f32 %v3850_v50, %v1263_v18  ;;  %v1265_v8 = vpop.f32.mrb[79].mxu0  ;;  %v4723_v29 = vpop.f32.mrb[79].mxu1 }
 0x1c7   : > { %v1892_v5 = vadd.f32 %v1891_v30, %v1829_v1  ;;  %1693 = vst [vmem:[#allocation2 + $0x138] sm:$0xff] %v1553_v10  ;;  %v1757_v22 = vadd.f32 %v1756_v0, %v1553_v10  ;;  %v1830_v9 = vmul.f32 %v1553_v10, %v1553_v10  ;;  %v3471_v41 = vpack.c.bf16 %v1553_v10, %v1550_v57 }
 0x1c9   : > { %v1893_v14 = vadd.f32 %v1892_v5, %v1830_v9  ;;  %3711 = vst [vmem:[%s5125_s4 + $0x98] sm:$0xff] %v3471_v41  }
 0x1ca   : > { %v1268_v12 = vpop.f32.mrb[80].mxu0  ;;  %v3861_v16 = vpop.f32.mrb[80].mxu1 }
 0x1cb   : > { %v1558_v17 = vadd.f32 %v1557_v33, %v1268_v12  ;;  %v4729_v20 = vadd.f32 %v3861_v16, %v4560_v3  ;;  %v1270_v50 = vpop.f32.mrb[81].mxu0  ;;  %v1589_v21 = vpop.f32.mrb[81].mxu1 }
 0x1cc   : > { %v4732_v42 = vadd.f32 %v1589_v21, %v4554_v59  ;;  %v1271_v24 = vpop.f32.mrb[82].mxu0  ;;  %v3862_v2 = vpop.f32.mrb[82].mxu1 }
 0x1cd   : > { %1694 = vst [vmem:[#allocation2 + $0x140] sm:$0xff] %v1558_v17  ;;  %v1758_v54 = vadd.f32 %v1757_v22, %v1558_v17  ;;  %v1831_v25 = vmul.f32 %v1558_v17, %v1558_v17  ;;  %1704 = vst [vmem:[#allocation2 + $0x190] sm:$0xff] %v4729_v20  ;;  %v1561_v53 = vadd.f32 %v1560_v44, %v1271_v24  ;;  %v1273_v28 = vpop.f32.mrb[83].mxu0  ;;  %v1592_v46 = vpop.f32.mrb[83].mxu1 }
 0x1ce   : > { %1702 = vst [vmem:[#allocation2 + $0x180] sm:$0xff] %v4732_v42  ;;  %v4737_v3 = vadd.f32 %v3862_v2, %v4562_v7  ;;  %v4740_v62 = vadd.f32 %v1592_v46, %v4558_v63 }
 0x1cf   : > { %v1894_v59 = vadd.f32 %v1893_v14, %v1831_v25  ;;  %1695 = vst [vmem:[#allocation2 + $0x148] sm:$0xff] %v1561_v53  ;;  %v1759_v32 = vadd.f32 %v1758_v54, %v1561_v53  ;;  %v1832_v4 = vmul.f32 %v1561_v53, %v1561_v53  ;;  %v3476_v33 = vpack.c.bf16 %v1561_v53, %v1558_v17 }
 0x1d0   : > { %1705 = vst [vmem:[#allocation2 + $0x198] sm:$0xff] %v4737_v3  ;;  %v3501_v36 = vpack.c.bf16 %v4737_v3, %v4729_v20  ;;  %1703 = vst [vmem:[#allocation2 + $0x188] sm:$0xff] %v4740_v62  ;;  %v3496_v37 = vpack.c.bf16 %v4740_v62, %v4732_v42 }
 0x1d1   : > { %v1895_v7 = vadd.f32 %v1894_v59, %v1832_v4  ;;  %3712 = vst [vmem:[%s5125_s4 + $0xa0] sm:$0xff] %v3476_v33  }
 0x1d2   : > { %3717 = vst [vmem:[%s5125_s4 + $0xc8] sm:$0xff] %v3501_v36   ;;  %3716 = vst [vmem:[%s5125_s4 + $0xc0] sm:$0xff] %v3496_v37   ;;  %v1276_v63 = vpop.f32.mrb[84].mxu0  ;;  %v3865_v34 = vpop.f32.mrb[84].mxu1 }
 0x1d3   : > { %v1566_v40 = vadd.f32 %v4710_v13, %v1276_v63  ;;  %v4759_v26 = vadd.f32 %v3865_v34, %v4574_v19  ;;  %v1278_v44 = vpop.f32.mrb[85].mxu0  ;;  %v1605_v48 = vpop.f32.mrb[85].mxu1 }
 0x1d4   : > { %v4762_v38 = vadd.f32 %v1605_v48, %v4566_v11  ;;  %v1279_v49 = vpop.f32.mrb[86].mxu0  ;;  %v3866_v52 = vpop.f32.mrb[86].mxu1 }
 0x1d5   : > { %1696 = vst [vmem:[#allocation2 + $0x150] sm:$0xff] %v1566_v40  ;;  %v1760_v30 = vadd.f32 %v1759_v32, %v1566_v40  ;;  %v1833_v6 = vmul.f32 %v1566_v40, %v1566_v40  ;;  %1708 = vst [vmem:[#allocation2 + $0x1b0] sm:$0xff] %v4759_v26  ;;  %v1569_v57 = vadd.f32 %v4712_v58, %v1279_v49  ;;  %v1281_v60 = vpop.f32.mrb[87].mxu0  ;;  %v1608_v18 = vpop.f32.mrb[87].mxu1 }
 0x1d6   : > { %1706 = vst [vmem:[#allocation2 + $0x1a0] sm:$0xff] %v4762_v38  ;;  %v4768_v19 = vadd.f32 %v3866_v52, %v4578_v23  ;;  %v4771_v13 = vadd.f32 %v1608_v18, %v4570_v15 }
 0x1d7   : > { %v1896_v11 = vadd.f32 %v1895_v7, %v1833_v6  ;;  %1697 = vst [vmem:[#allocation2 + $0x158] sm:$0xff] %v1569_v57  ;;  %v1761_v0 = vadd.f32 %v1760_v30, %v1569_v57  ;;  %v1834_v1 = vmul.f32 %v1569_v57, %v1569_v57  ;;  %v3481_v10 = vpack.c.bf16 %v1569_v57, %v1566_v40 }
 0x1d8   : > { %1709 = vst [vmem:[#allocation2 + $0x1b8] sm:$0xff] %v4768_v19  ;;  %v3511_v58 = vpack.c.bf16 %v4768_v19, %v4759_v26  ;;  %1707 = vst [vmem:[#allocation2 + $0x1a8] sm:$0xff] %v4771_v13  ;;  %v3506_v8 = vpack.c.bf16 %v4771_v13, %v4762_v38 }
 0x1d9   : > { %v1897_v23 = vadd.f32 %v1896_v11, %v1834_v1  ;;  %3713 = vst [vmem:[%s5125_s4 + $0xa8] sm:$0xff] %v3481_v10  }
 0x1da   : > { %3719 = vst [vmem:[%s5125_s4 + $0xd8] sm:$0xff] %v3511_v58   ;;  %3718 = vst [vmem:[%s5125_s4 + $0xd0] sm:$0xff] %v3506_v8   ;;  %v1284_v15 = vpop.f32.mrb[88].mxu0  ;;  %v3869_v5 = vpop.f32.mrb[88].mxu1  ;;  %v1842_v58 = vmul.f32 %v4737_v3, %v4737_v3 }
 0x1db   : > { %v1574_v22 = vadd.f32 %v4719_v61, %v1284_v15  ;;  %v4790_v9 = vadd.f32 %v3869_v5, %v4590_v35  ;;  %v1286_v41 = vpop.f32.mrb[89].mxu0  ;;  %v1621_v14 = vpop.f32.mrb[89].mxu1  ;;  %v1843_v15 = vmul.f32 %v4762_v38, %v4762_v38 }
 0x1dc   : > { %v4793_v12 = vadd.f32 %v1621_v14, %v4582_v27  ;;  %v1287_v16 = vpop.f32.mrb[90].mxu0  ;;  %v3870_v17 = vpop.f32.mrb[90].mxu1 }
 0x1dd   : > { %1698 = vst [vmem:[#allocation2 + $0x160] sm:$0xff] %v1574_v22  ;;  %v1762_v50 = vadd.f32 %v1761_v0, %v1574_v22  ;;  %v1835_v21 = vmul.f32 %v1574_v22, %v1574_v22  ;;  %1712 = vst [vmem:[#allocation2 + $0x1d0] sm:$0xff] %v4790_v9  ;;  %v1577_v24 = vadd.f32 %v4723_v29, %v1287_v16  ;;  %v1289_v2 = vpop.f32.mrb[91].mxu0  ;;  %v1624_v54 = vpop.f32.mrb[91].mxu1 }
 0x1de   : > { %1710 = vst [vmem:[#allocation2 + $0x1c0] sm:$0xff] %v4793_v12  ;;  %v4799_v35 = vadd.f32 %v3870_v17, %v4594_v39  ;;  %v4802_v61 = vadd.f32 %v1624_v54, %v4586_v31 }
 0x1df   : > { %v1898_v27 = vadd.f32 %v1897_v23, %v1835_v21  ;;  %1699 = vst [vmem:[#allocation2 + $0x168] sm:$0xff] %v1577_v24  ;;  %v1763_v25 = vadd.f32 %v1762_v50, %v1577_v24  ;;  %v1836_v53 = vmul.f32 %v1577_v24, %v1577_v24  ;;  %v3486_v28 = vpack.c.bf16 %v1577_v24, %v1574_v22 }
 0x1e0   : > { %1713 = vst [vmem:[#allocation2 + $0x1d8] sm:$0xff] %v4799_v35  ;;  %v3521_v29 = vpack.c.bf16 %v4799_v35, %v4790_v9  ;;  %1711 = vst [vmem:[#allocation2 + $0x1c8] sm:$0xff] %v4802_v61  ;;  %v3516_v46 = vpack.c.bf16 %v4802_v61, %v4793_v12 }
 0x1e1   : > { %v1899_v39 = vadd.f32 %v1898_v27, %v1836_v53  ;;  %3714 = vst [vmem:[%s5125_s4 + $0xb0] sm:$0xff] %v3486_v28  }
 0x1e2   : > { %3721 = vst [vmem:[%s5125_s4 + $0xe8] sm:$0xff] %v3521_v29   ;;  %3720 = vst [vmem:[%s5125_s4 + $0xe0] sm:$0xff] %v3516_v46   ;;  %v1292_v31 = vpop.f32.mrb[92].mxu0  ;;  %v3873_v59 = vpop.f32.mrb[92].mxu1 }
 0x1e3   : > { %v1582_v32 = vadd.f32 %v4717_v56, %v1292_v31  ;;  %v4821_v4 = vadd.f32 %v3873_v59, %v4606_v51  ;;  %v1294_v33 = vpop.f32.mrb[93].mxu0  ;;  %v1637_v36 = vpop.f32.mrb[93].mxu1 }
 0x1e4   : > { %v1638_v37 = vadd.f32 %v1637_v36, %v4598_v43  ;;  %v1295_v7 = vpop.f32.mrb[94].mxu0  ;;  %v3874_v63 = vpop.f32.mrb[94].mxu1 }
 0x1e5   : > { %1700 = vst [vmem:[#allocation2 + $0x170] sm:$0xff] %v1582_v32  ;;  %v1764_v34 = vadd.f32 %v1763_v25, %v1582_v32  ;;  %v1837_v40 = vmul.f32 %v1582_v32, %v1582_v32  ;;  %1716 = vst [vmem:[#allocation2 + $0x1f0] sm:$0xff] %v4821_v4  ;;  %v1585_v44 = vadd.f32 %v4721_v45, %v1295_v7  ;;  %v1297_v48 = vpop.f32.mrb[95].mxu0  ;;  %v1640_v49 = vpop.f32.mrb[95].mxu1 }
 0x1e6   : > { %1714 = vst [vmem:[#allocation2 + $0x1e0] sm:$0xff] %v1638_v37  ;;  %v1649_v56 = vadd.f32 %v3874_v63, %v4610_v55  ;;  %v1641_v51 = vadd.f32 %v1640_v49, %v4602_v47  ;;  %v1839_v45 = vmul.f32 %v4732_v42, %v4732_v42  ;;  %v1840_v47 = vmul.f32 %v4740_v62, %v4740_v62 }
 0x1e7   : > { %v1900_v52 = vadd.f32 %v1899_v39, %v1837_v40  ;;  %1701 = vst [vmem:[#allocation2 + $0x178] sm:$0xff] %v1585_v44  ;;  %v1765_v30 = vadd.f32 %v1764_v34, %v1585_v44  ;;  %v1838_v43 = vmul.f32 %v1585_v44, %v1585_v44  ;;  %v3491_v6 = vpack.c.bf16 %v1585_v44, %v1582_v32 }
 0x1e8   : > { %1717 = vst [vmem:[#allocation2 + $0x1f8] sm:$0xff] %v1649_v56  ;;  %v3531_v57 = vpack.c.bf16 %v1649_v56, %v4821_v4  ;;  %1715 = vst [vmem:[#allocation2 + $0x1e8] sm:$0xff] %v1641_v51  ;;  %v3526_v60 = vpack.c.bf16 %v1641_v51, %v1638_v37  ;;  %v1852_v59 = vmul.f32 %v1641_v51, %v1641_v51 }
 0x1e9   : > { %v1766_v18 = vadd.f32 %v1765_v30, %v4732_v42  ;;  %v1901_v11 = vadd.f32 %v1900_v52, %v1838_v43  ;;  %3715 = vst [vmem:[%s5125_s4 + $0xb8] sm:$0xff] %v3491_v6   ;;  %v1841_v42 = vmul.f32 %v4729_v20, %v4729_v20  ;;  %v1718_v43 = vld [vmem:[#allocation3] sm:$0x1] }
 0x1ea   : > { %3723 = vst [vmem:[%s5125_s4 + $0xf8] sm:$0xff] %v3531_v57   ;;  %3722 = vst [vmem:[%s5125_s4 + $0xf0] sm:$0xff] %v3526_v60   ;;  %v1790_v60 = vld [vmem:[#allocation4] sm:$0x1] }
 0x1eb   : > { %v1767_v55 = vadd.f32 %v1766_v18, %v4740_v62  ;;  %v1902_v0 = vadd.f32 %v1901_v11, %v1839_v45  ;;  %v1844_v62 = vmul.f32 %v4771_v13, %v4771_v13 }
 0x1ed   : > { %v1768_v1 = vadd.f32 %v1767_v55, %v4729_v20  ;;  %v1903_v10 = vadd.f32 %v1902_v0, %v1840_v47  ;;  %v1845_v20 = vmul.f32 %v4759_v26, %v4759_v26 }
 0x1ef   : > { %v1769_v8 = vadd.f32 %v1768_v1, %v4737_v3  ;;  %v1904_v23 = vadd.f32 %v1903_v10, %v1841_v42  ;;  %v1846_v3 = vmul.f32 %v4768_v19, %v4768_v19 }
 0x1f1   : > { %v1770_v5 = vadd.f32 %v1769_v8, %v4762_v38  ;;  %v1905_v22 = vadd.f32 %v1904_v23, %v1842_v58  ;;  %v1847_v38 = vmul.f32 %v4793_v12, %v4793_v12 }
 0x1f3   : > { %v1771_v41 = vadd.f32 %v1770_v5, %v4771_v13  ;;  %v1906_v14 = vadd.f32 %v1905_v22, %v1843_v15  ;;  %v1848_v13 = vmul.f32 %v4802_v61, %v4802_v61 }
 0x1f5   : > { %v1907_v16 = vadd.f32 %v1906_v14, %v1844_v62  ;;  %v1772_v17 = vadd.f32 %v1771_v41, %v4759_v26  ;;  %v1849_v26 = vmul.f32 %v4790_v9, %v4790_v9 }
 0x1f7   : > { %v1773_v50 = vadd.f32 %v1772_v17, %v4768_v19  ;;  %v1908_v21 = vadd.f32 %v1907_v16, %v1845_v20  ;;  %v1850_v19 = vmul.f32 %v4799_v35, %v4799_v35 }
 0x1f9   : > { %v1774_v24 = vadd.f32 %v1773_v50, %v4793_v12  ;;  %v1909_v2 = vadd.f32 %v1908_v21, %v1846_v3  ;;  %v1851_v12 = vmul.f32 %v1638_v37, %v1638_v37 }
 0x1fb   : > { %v1775_v54 = vadd.f32 %v1774_v24, %v4802_v61  ;;  %v1910_v27 = vadd.f32 %v1909_v2, %v1847_v38  ;;  %v1853_v61 = vmul.f32 %v4821_v4, %v4821_v4 }
 0x1fd   : > { %v1776_v25 = vadd.f32 %v1775_v54, %v4790_v9  ;;  %v1911_v53 = vadd.f32 %v1910_v27, %v1848_v13  ;;  %v1854_v9 = vmul.f32 %v1649_v56, %v1649_v56 }
 0x1ff   : > { %v1777_v28 = vadd.f32 %v1776_v25, %v4799_v35  ;;  %v1912_v29 = vadd.f32 %v1911_v53, %v1849_v26 }
 0x201   : > { %v1778_v46 = vadd.f32 %v1777_v28, %v1638_v37  ;;  %v1913_v39 = vadd.f32 %v1912_v29, %v1850_v19 }
 0x203   : > { %v1779_v31 = vadd.f32 %v1778_v46, %v1641_v51  ;;  %v1914_v32 = vadd.f32 %v1913_v39, %v1851_v12 }
 0x205   : > { %v1780_v33 = vadd.f32 %v1779_v31, %v4821_v4  ;;  %v1915_v36 = vadd.f32 %v1914_v32, %v1852_v59 }
 0x207   : > { %v1781_v7 = vadd.f32 %v1780_v33, %v1649_v56  ;;  %v1916_v63 = vadd.f32 %v1915_v36, %v1853_v61 }
 0x209   : > { %v1782_v34 = vrot.slane %v1781_v7, 4  ;;  %v1917_v40 = vadd.f32 %v1916_v63, %v1854_v9 }
 0x20b   : > { %v1783_v44 = vadd.f32 %v1782_v34, %v1781_v7  ;;  %v1918_v35 = vrot.slane %v1917_v40, 4 }
 0x20d   : > { %v1784_v48 = vrot.slane %v1783_v44, 2  ;;  %v1919_v49 = vadd.f32 %v1918_v35, %v1917_v40 }
 0x20f   : > { %v1785_v37 = vadd.f32 %v1784_v48, %v1783_v44  ;;  %v1920_v52 = vrot.slane %v1919_v49, 2 }
 0x211   : > { %v1786_v30 = vrot.slane %v1785_v37, 1  ;;  %v1921_v51 = vadd.f32 %v1920_v52, %v1919_v49 }
 0x213   : > { %v1787_v6 = vadd.f32 %v1786_v30, %v1785_v37  ;;  %v1922_v57 = vrot.slane %v1921_v51, 1 }
 0x215   : > { %v1788_v45 = vadd.f32 %v1787_v6, %v1718_v43  ;;  %v1923_v4 = vadd.f32 %v1922_v57, %v1921_v51 }
 0x217   : > { %1789 = vst [vmem:[#allocation3] sm:$0x1] %v1788_v45  ;;  %v1924_v18 = vadd.f32 %v1923_v4, %v1790_v60 }
 0x219   : > { %1925 = vst [vmem:[#allocation4] sm:$0x1] %v1924_v18 }
 0x21a PF: > { %p3175_p6 = scmp.ne.s32.totalorder %s4101_s15, 1 }
 0x21b   : > { %v2331_v58 = vlaneseq (!%p3175_p6)  ;;  %v2257_v23 = vld [vmem:[%s5123_s2] sm:$0x1] (!%p3175_p6)  ;;  %v2267_v14 = vld [vmem:[#allocation2 + $0x8] sm:$0xff] (!%p3175_p6)  ;;  %v2268_v20 = vld [vmem:[#allocation2 + $0x10] sm:$0xff] (!%p3175_p6) }
 0x21c   : > { %2249 = sbr.rel (%p3175_p6) target bundleno = 647 (0x287), region = 48  ;;  %v2261_v62 = vld [vmem:[%s5124_s3] sm:$0x1] (!%p3175_p6)  ;;  %v2269_v16 = vld [vmem:[#allocation2 + $0x18] sm:$0xff] (!%p3175_p6)  ;;  %v2271_v21 = vld [vmem:[#allocation2 + $0x28] sm:$0xff] (!%p3175_p6) }
 0x21d   : > { %v2332_v8 = vshrl.u32 (!%p3175_p6), %v2331_v58, 7  ;;  %v2266_v41 = vld [vmem:[#allocation2] sm:$0xff] (!%p3175_p6)  ;;  %v2272_v38 = vld [vmem:[#allocation2 + $0x30] sm:$0xff] (!%p3175_p6)  ;;  %v2273_v24 = vld [vmem:[#allocation2 + $0x38] sm:$0xff] (!%p3175_p6) }
 0x21e   : > { %v2250_v56 = vld [vmem:[#allocation3] sm:$0x1] (!%p3175_p6)  ;;  %v2275_v13 = vld [vmem:[#allocation2 + $0x48] sm:$0xff] (!%p3175_p6)  ;;  %v2276_v54 = vld [vmem:[#allocation2 + $0x50] sm:$0xff] (!%p3175_p6) }
 0x21f   : > { %v2251_v47 = vmul.f32 (!%p3175_p6), 0.001953125, %v2250_v56  ;;  %v2333_v15 = vsub.s32 (!%p3175_p6), 0, %v2332_v8  ;;  %v2270_v17 = vld [vmem:[#allocation2 + $0x20] sm:$0xff] (!%p3175_p6)  ;;  %v2277_v19 = vld [vmem:[#allocation2 + $0x58] sm:$0xff] (!%p3175_p6)  ;;  %v2279_v29 = vld [vmem:[#allocation2 + $0x68] sm:$0xff] (!%p3175_p6) }
 0x220   : > { %v2252_v11 = vld [vmem:[#allocation4] sm:$0x1] (!%p3175_p6) }
 0x221   : > { %v2253_v55 = vmul.f32 (!%p3175_p6), 0.001953125, %v2252_v11  ;;  %v2254_v0 = vmul.f32 (!%p3175_p6), %v2251_v47, %v2251_v47  ;;  %v2274_v2 = vld [vmem:[#allocation2 + $0x40] sm:$0xff] (!%p3175_p6) }
 0x222   : > { %v2278_v28 = vld [vmem:[#allocation2 + $0x60] sm:$0xff] (!%p3175_p6) }
 0x223   : > { %v2255_v42 = vsub.f32 %v2253_v55, %v2254_v0 }
 0x225   : > { %v2256_v1 = vmax.f32 %v2255_v42, 0.0 }
 0x227   : > { %v2258_v10 = vadd.f32 1e-05, %v2256_v1 }
 0x229   : > { %4085 = vrsqrt.f32 %v2258_v10 }
 0x233   : > { %v4086_v5 = vpop.eup %4085 }
 0x234   : > { %v2260_v22 = vmul.f32 %v4086_v5, %v2257_v23 }
 0x236   : > { %v2262_v3 = vmul.f32 %v2260_v22, %v2251_v47  ;;  %v4884_v50 = vrot.slane %v2260_v22, %v2333_v15 }
 0x238   : > { %v2263_v27 = vsub.f32 %v2261_v62, %v2262_v3  ;;  %v2336_v26 = vmul.f32 %v4884_v50, %v2266_v41  ;;  %v2337_v25 = vmul.f32 %v4884_v50, %v2267_v14  ;;  %v2338_v53 = vmul.f32 %v4884_v50, %v2268_v20  ;;  %v2281_v14 = vld [vmem:[#allocation2 + $0x78] sm:$0xff] }
 0x239   : > { %v2339_v12 = vmul.f32 %v4884_v50, %v2269_v16  ;;  %v2340_v46 = vmul.f32 %v4884_v50, %v2270_v17  ;;  %v2341_v39 = vmul.f32 %v4884_v50, %v2271_v21  ;;  %v2342_v31 = vmul.f32 %v4884_v50, %v2272_v38  ;;  %v2282_v21 = vld [vmem:[#allocation2 + $0x80] sm:$0xff] }
 0x23a   : > { %v4893_v59 = vrot.slane %v2263_v27, %v2333_v15  ;;  %v2343_v32 = vmul.f32 %v4884_v50, %v2273_v24  ;;  %v2344_v61 = vmul.f32 %v4884_v50, %v2274_v2  ;;  %v2345_v33 = vmul.f32 %v4884_v50, %v2275_v13  ;;  %v2280_v15 = vld [vmem:[#allocation2 + $0x70] sm:$0xff] }
 0x23b   : > { %v2346_v36 = vmul.f32 %v4884_v50, %v2276_v54  ;;  %v2347_v9 = vmul.f32 %v4884_v50, %v2277_v19  ;;  %v2348_v7 = vmul.f32 %v4884_v50, %v2278_v28  ;;  %v2349_v63 = vmul.f32 %v4884_v50, %v2279_v29  ;;  %v2283_v54 = vld [vmem:[#allocation2 + $0x88] sm:$0xff]  ;;  %v2284_v19 = vld [vmem:[#allocation2 + $0x90] sm:$0xff] }
 0x23c   : > { %v2406_v34 = vadd.f32 %v4893_v59, %v2336_v26  ;;  %v2407_v40 = vadd.f32 %v4893_v59, %v2337_v25  ;;  %v2408_v44 = vadd.f32 %v4893_v59, %v2338_v53  ;;  %v2409_v35 = vadd.f32 %v4893_v59, %v2339_v12 }
 0x23d   : > { %v2410_v48 = vadd.f32 %v4893_v59, %v2340_v46  ;;  %v2411_v49 = vadd.f32 %v4893_v59, %v2341_v39  ;;  %v2412_v37 = vadd.f32 %v4893_v59, %v2342_v31  ;;  %v2413_v52 = vadd.f32 %v4893_v59, %v2343_v32  ;;  %v2285_v39 = vld [vmem:[#allocation2 + $0x98] sm:$0xff] }
 0x23e   : > { %v2470_v30 = vmul.f32 0.2, %v2406_v34  ;;  %v2471_v51 = vmul.f32 0.2, %v2407_v40  ;;  %v2472_v43 = vmul.f32 0.2, %v2408_v44  ;;  %v2414_v6 = vadd.f32 %v4893_v59, %v2344_v61 }
 0x23f   : > { %v2473_v57 = vmul.f32 0.2, %v2409_v35  ;;  %v2474_v60 = vmul.f32 0.2, %v2410_v48  ;;  %v2475_v45 = vmul.f32 0.2, %v2411_v49  ;;  %v2415_v4 = vadd.f32 %v4893_v59, %v2345_v33 }
 0x240   : > { %v2534_v18 = vmax.f32 %v2406_v34, %v2470_v30  ;;  %v2535_v56 = vmax.f32 %v2407_v40, %v2471_v51  ;;  %v2536_v11 = vmax.f32 %v2408_v44, %v2472_v43  ;;  %v2476_v47 = vmul.f32 0.2, %v2412_v37  ;;  %v2286_v34 = vld [vmem:[#allocation2 + $0xa0] sm:$0xff] }
 0x241   : > { %v2537_v55 = vmax.f32 %v2409_v35, %v2473_v57  ;;  %v2538_v0 = vmax.f32 %v2410_v48, %v2474_v60  ;;  %v2539_v42 = vmax.f32 %v2411_v49, %v2475_v45  ;;  %v2477_v1 = vmul.f32 0.2, %v2413_v52  ;;  %v2287_v49 = vld [vmem:[#allocation2 + $0xa8] sm:$0xff] }
 0x242   : > { %v3536_v10 = vpack.c.bf16 %v2535_v56, %v2534_v18  ;;  %v2540_v58 = vmax.f32 %v2412_v37, %v2476_v47  ;;  %v2478_v8 = vmul.f32 0.2, %v2414_v6  ;;  %v2479_v23 = vmul.f32 0.2, %v2415_v4  ;;  %v2288_v37 = vld [vmem:[#allocation2 + $0xb0] sm:$0xff] }
 0x243   : > { %v3541_v5 = vpack.c.bf16 %v2537_v55, %v2536_v11  ;;  %v3546_v22 = vpack.c.bf16 %v2539_v42, %v2538_v0  ;;  %v2541_v62 = vmax.f32 %v2413_v52, %v2477_v1  ;;  %v2416_v41 = vadd.f32 %v4893_v59, %v2346_v36  ;;  %v2290_v55 = vld [vmem:[#allocation2 + $0xc0] sm:$0xff] }
 0x244   : > { %3537 = vst [vmem:[%s5125_s4] sm:$0xff] %v3536_v10   ;;  %v2542_v20 = vmax.f32 %v2414_v6, %v2478_v8  ;;  %v2543_v16 = vmax.f32 %v2415_v4, %v2479_v23  ;;  %v2417_v17 = vadd.f32 %v4893_v59, %v2347_v9  ;;  %v2418_v3 = vadd.f32 %v4893_v59, %v2348_v7  ;;  %v2289_v4 = vld [vmem:[#allocation2 + $0xb8] sm:$0xff] }
 0x245   : > { %3724 = vst [vmem:[%s5125_s4 + $0x8] sm:$0xff] %v3541_v5   ;;  %3725 = vst [vmem:[%s5125_s4 + $0x10] sm:$0xff] %v3546_v22   ;;  %v3551_v38 = vpack.c.bf16 %v2541_v62, %v2540_v58  ;;  %v2480_v24 = vmul.f32 0.2, %v2416_v41  ;;  %v2419_v2 = vadd.f32 %v4893_v59, %v2349_v63  ;;  %v2350_v13 = vmul.f32 %v4884_v50, %v2280_v15  ;;  %v2291_v58 = vld [vmem:[#allocation2 + $0xc8] sm:$0xff]  ;;  %v2292_v22 = vld [vmem:[#allocation2 + $0xd0] sm:$0xff] }
 0x246   : > { %v3556_v27 = vpack.c.bf16 %v2543_v16, %v2542_v20  ;;  %v2481_v26 = vmul.f32 0.2, %v2417_v17  ;;  %v2482_v25 = vmul.f32 0.2, %v2418_v3  ;;  %v2351_v53 = vmul.f32 %v4884_v50, %v2281_v14 }
 0x247   : > { %3726 = vst [vmem:[%s5125_s4 + $0x18] sm:$0xff] %v3551_v38   ;;  %v2544_v28 = vmax.f32 %v2416_v41, %v2480_v24  ;;  %v2483_v29 = vmul.f32 0.2, %v2419_v2  ;;  %v2420_v12 = vadd.f32 %v4893_v59, %v2350_v13  ;;  %v2352_v46 = vmul.f32 %v4884_v50, %v2282_v21  ;;  %v2293_v38 = vld [vmem:[#allocation2 + $0xd8] sm:$0xff]  ;;  %v2294_v24 = vld [vmem:[#allocation2 + $0xe0] sm:$0xff] }
 0x248   : > { %3727 = vst [vmem:[%s5125_s4 + $0x20] sm:$0xff] %v3556_v27   ;;  %v2545_v31 = vmax.f32 %v2417_v17, %v2481_v26  ;;  %v2546_v32 = vmax.f32 %v2418_v3, %v2482_v25  ;;  %v2421_v61 = vadd.f32 %v4893_v59, %v2351_v53  ;;  %v2353_v33 = vmul.f32 %v4884_v50, %v2283_v54  ;;  %v2295_v26 = vld [vmem:[#allocation2 + $0xe8] sm:$0xff] }
 0x249   : > { %v2547_v36 = vmax.f32 %v2419_v2, %v2483_v29  ;;  %v2484_v9 = vmul.f32 0.2, %v2420_v12  ;;  %v2422_v7 = vadd.f32 %v4893_v59, %v2352_v46  ;;  %v2354_v63 = vmul.f32 %v4884_v50, %v2284_v19 }
 0x24a   : > { %v3561_v40 = vpack.c.bf16 %v2545_v31, %v2544_v28  ;;  %v2485_v44 = vmul.f32 0.2, %v2421_v61  ;;  %v2423_v35 = vadd.f32 %v4893_v59, %v2353_v33  ;;  %v2355_v48 = vmul.f32 %v4884_v50, %v2285_v39  ;;  %v2296_v31 = vld [vmem:[#allocation2 + $0xf0] sm:$0xff] }
 0x24b   : > { %v3566_v52 = vpack.c.bf16 %v2547_v36, %v2546_v32  ;;  %v2548_v30 = vmax.f32 %v2420_v12, %v2484_v9  ;;  %v2486_v51 = vmul.f32 0.2, %v2422_v7  ;;  %v2424_v43 = vadd.f32 %v4893_v59, %v2354_v63  ;;  %v2297_v9 = vld [vmem:[#allocation2 + $0xf8] sm:$0xff] }
 0x24c   : > { %3728 = vst [vmem:[%s5125_s4 + $0x28] sm:$0xff] %v3561_v40   ;;  %v2549_v6 = vmax.f32 %v2421_v61, %v2485_v44  ;;  %v2487_v57 = vmul.f32 0.2, %v2423_v35  ;;  %v2425_v60 = vadd.f32 %v4893_v59, %v2355_v48  ;;  %v2356_v45 = vmul.f32 %v4884_v50, %v2286_v34  ;;  %v2298_v44 = vld [vmem:[#allocation2 + $0x100] sm:$0xff] }
 0x24d   : > { %3729 = vst [vmem:[%s5125_s4 + $0x30] sm:$0xff] %v3566_v52   ;;  %v2550_v18 = vmax.f32 %v2422_v7, %v2486_v51  ;;  %v2488_v56 = vmul.f32 0.2, %v2424_v43  ;;  %v2357_v11 = vmul.f32 %v4884_v50, %v2287_v49  ;;  %v2358_v47 = vmul.f32 %v4884_v50, %v2288_v37  ;;  %v2299_v52 = vld [vmem:[#allocation2 + $0x108] sm:$0xff] }
 0x24e   : > { %v3571_v0 = vpack.c.bf16 %v2549_v6, %v2548_v30  ;;  %v2551_v42 = vmax.f32 %v2423_v35, %v2487_v57  ;;  %v2489_v1 = vmul.f32 0.2, %v2425_v60  ;;  %v2426_v10 = vadd.f32 %v4893_v59, %v2356_v45  ;;  %v2300_v57 = vld [vmem:[#allocation2 + $0x110] sm:$0xff] }
 0x24f   : > { %v2552_v8 = vmax.f32 %v2424_v43, %v2488_v56  ;;  %v2427_v23 = vadd.f32 %v4893_v59, %v2357_v11  ;;  %v2359_v15 = vmul.f32 %v4884_v50, %v2289_v4  ;;  %v2428_v5 = vadd.f32 %v4893_v59, %v2358_v47  ;;  %v2301_v56 = vld [vmem:[#allocation2 + $0x118] sm:$0xff] }
 0x250   : > { %3730 = vst [vmem:[%s5125_s4 + $0x38] sm:$0xff] %v3571_v0   ;;  %v3576_v62 = vpack.c.bf16 %v2551_v42, %v2550_v18  ;;  %v2553_v41 = vmax.f32 %v2425_v60, %v2489_v1  ;;  %v2490_v14 = vmul.f32 0.2, %v2426_v10  ;;  %v2360_v20 = vmul.f32 %v4884_v50, %v2290_v55 }
 0x251   : > { %v2491_v16 = vmul.f32 0.2, %v2427_v23  ;;  %v2429_v17 = vadd.f32 %v4893_v59, %v2359_v15  ;;  %v2492_v3 = vmul.f32 0.2, %v2428_v5  ;;  %v2361_v21 = vmul.f32 %v4884_v50, %v2291_v58 }
 0x252   : > { %3731 = vst [vmem:[%s5125_s4 + $0x40] sm:$0xff] %v3576_v62   ;;  %v3581_v2 = vpack.c.bf16 %v2553_v41, %v2552_v8  ;;  %v2554_v13 = vmax.f32 %v2426_v10, %v2490_v14  ;;  %v2430_v54 = vadd.f32 %v4893_v59, %v2360_v20  ;;  %v2362_v27 = vmul.f32 %v4884_v50, %v2292_v22  ;;  %v2302_v8 = vld [vmem:[#allocation2 + $0x120] sm:$0xff]  ;;  %v2303_v62 = vld [vmem:[#allocation2 + $0x128] sm:$0xff]  ;;  %v2304_v41 = vld [vmem:[#allocation2 + $0x130] sm:$0xff] }
 0x253   : > { %v2555_v25 = vmax.f32 %v2427_v23, %v2491_v16  ;;  %v2493_v53 = vmul.f32 0.2, %v2429_v17  ;;  %v2556_v19 = vmax.f32 %v2428_v5, %v2492_v3  ;;  %v2431_v28 = vadd.f32 %v4893_v59, %v2361_v21 }
 0x254   : > { %3732 = vst [vmem:[%s5125_s4 + $0x48] sm:$0xff] %v3581_v2   ;;  %v2494_v29 = vmul.f32 0.2, %v2430_v54  ;;  %v2363_v12 = vmul.f32 %v4884_v50, %v2293_v38  ;;  %v2432_v46 = vadd.f32 %v4893_v59, %v2362_v27  ;;  %v2364_v39 = vmul.f32 %v4884_v50, %v2294_v24  ;;  %v2305_v2 = vld [vmem:[#allocation2 + $0x138] sm:$0xff] }
 0x255   : > { %v3586_v32 = vpack.c.bf16 %v2555_v25, %v2554_v13  ;;  %v2557_v61 = vmax.f32 %v2429_v17, %v2493_v53  ;;  %v2495_v33 = vmul.f32 0.2, %v2431_v28  ;;  %v2365_v36 = vmul.f32 %v4884_v50, %v2295_v26  ;;  %v2306_v25 = vld [vmem:[#allocation2 + $0x140] sm:$0xff] }
 0x256   : > { %v2558_v7 = vmax.f32 %v2430_v54, %v2494_v29  ;;  %v2433_v63 = vadd.f32 %v4893_v59, %v2363_v12  ;;  %v2496_v34 = vmul.f32 0.2, %v2432_v46  ;;  %v2434_v40 = vadd.f32 %v4893_v59, %v2364_v39  ;;  %v2307_v12 = vld [vmem:[#allocation2 + $0x148] sm:$0xff] }
 0x257   : > { %3733 = vst [vmem:[%s5125_s4 + $0x50] sm:$0xff] %v3586_v32   ;;  %v3591_v35 = vpack.c.bf16 %v2557_v61, %v2556_v19  ;;  %v2559_v48 = vmax.f32 %v2431_v28, %v2495_v33  ;;  %v2435_v49 = vadd.f32 %v4893_v59, %v2365_v36  ;;  %v2366_v37 = vmul.f32 %v4884_v50, %v2296_v31  ;;  %v2308_v61 = vld [vmem:[#allocation2 + $0x150] sm:$0xff] }
 0x258   : > { %v2497_v30 = vmul.f32 0.2, %v2433_v63  ;;  %v2560_v51 = vmax.f32 %v2432_v46, %v2496_v34  ;;  %v2498_v43 = vmul.f32 0.2, %v2434_v40  ;;  %v2367_v6 = vmul.f32 %v4884_v50, %v2297_v9 }
 0x259   : > { %3734 = vst [vmem:[%s5125_s4 + $0x58] sm:$0xff] %v3591_v35   ;;  %v3596_v60 = vpack.c.bf16 %v2559_v48, %v2558_v7  ;;  %v2499_v45 = vmul.f32 0.2, %v2435_v49  ;;  %v2436_v4 = vadd.f32 %v4893_v59, %v2366_v37  ;;  %v2368_v18 = vmul.f32 %v4884_v50, %v2298_v44  ;;  %v2309_v35 = vld [vmem:[#allocation2 + $0x158] sm:$0xff]  ;;  %v2310_v48 = vld [vmem:[#allocation2 + $0x160] sm:$0xff] }
 0x25a   : > { %v2561_v11 = vmax.f32 %v2433_v63, %v2497_v30  ;;  %v2562_v47 = vmax.f32 %v2434_v40, %v2498_v43  ;;  %v2437_v55 = vadd.f32 %v4893_v59, %v2367_v6  ;;  %v2369_v0 = vmul.f32 %v4884_v50, %v2299_v52 }
 0x25b   : > { %3735 = vst [vmem:[%s5125_s4 + $0x60] sm:$0xff] %v3596_v60   ;;  %v2563_v42 = vmax.f32 %v2435_v49, %v2499_v45  ;;  %v2500_v1 = vmul.f32 0.2, %v2436_v4  ;;  %v2438_v10 = vadd.f32 %v4893_v59, %v2368_v18  ;;  %v2370_v58 = vmul.f32 %v4884_v50, %v2300_v57 }
 0x25c   : > { %v3601_v23 = vpack.c.bf16 %v2561_v11, %v2560_v51  ;;  %v2501_v15 = vmul.f32 0.2, %v2437_v55  ;;  %v2439_v5 = vadd.f32 %v4893_v59, %v2369_v0  ;;  %v2371_v22 = vmul.f32 %v4884_v50, %v2301_v56  ;;  %v2311_v51 = vld [vmem:[#allocation2 + $0x168] sm:$0xff]  ;;  %v2312_v11 = vld [vmem:[#allocation2 + $0x170] sm:$0xff] }
 0x25d   : > { %v3606_v14 = vpack.c.bf16 %v2563_v42, %v2562_v47  ;;  %v2564_v20 = vmax.f32 %v2436_v4, %v2500_v1  ;;  %v2502_v16 = vmul.f32 0.2, %v2438_v10  ;;  %v2440_v17 = vadd.f32 %v4893_v59, %v2370_v58  ;;  %v2313_v1 = vld [vmem:[#allocation2 + $0x178] sm:$0xff] }
 0x25e   : > { %3736 = vst [vmem:[%s5125_s4 + $0x68] sm:$0xff] %v3601_v23   ;;  %v2565_v3 = vmax.f32 %v2437_v55, %v2501_v15  ;;  %v2503_v21 = vmul.f32 0.2, %v2439_v5  ;;  %v2441_v38 = vadd.f32 %v4893_v59, %v2371_v22  ;;  %v2372_v24 = vmul.f32 %v4884_v50, %v2302_v8  ;;  %v2314_v15 = vld [vmem:[#allocation2 + $0x180] sm:$0xff] }
 0x25f   : > { %3737 = vst [vmem:[%s5125_s4 + $0x70] sm:$0xff] %v3606_v14   ;;  %v2566_v13 = vmax.f32 %v2438_v10, %v2502_v16  ;;  %v2504_v54 = vmul.f32 0.2, %v2440_v17  ;;  %v2373_v27 = vmul.f32 %v4884_v50, %v2303_v62  ;;  %v2374_v26 = vmul.f32 %v4884_v50, %v2304_v41  ;;  %v2315_v14 = vld [vmem:[#allocation2 + $0x188] sm:$0xff] }
 0x260   : > { %v3611_v53 = vpack.c.bf16 %v2565_v3, %v2564_v20  ;;  %v2567_v19 = vmax.f32 %v2439_v5, %v2503_v21  ;;  %v2505_v28 = vmul.f32 0.2, %v2441_v38  ;;  %v2442_v29 = vadd.f32 %v4893_v59, %v2372_v24  ;;  %v2316_v21 = vld [vmem:[#allocation2 + $0x190] sm:$0xff] }
 0x261   : > { %v2568_v46 = vmax.f32 %v2440_v17, %v2504_v54  ;;  %v2443_v39 = vadd.f32 %v4893_v59, %v2373_v27  ;;  %v2375_v31 = vmul.f32 %v4884_v50, %v2305_v2  ;;  %v2444_v32 = vadd.f32 %v4893_v59, %v2374_v26  ;;  %v2317_v54 = vld [vmem:[#allocation2 + $0x198] sm:$0xff] }
 0x262   : > { %3738 = vst [vmem:[%s5125_s4 + $0x78] sm:$0xff] %v3611_v53   ;;  %v3616_v33 = vpack.c.bf16 %v2567_v19, %v2566_v13  ;;  %v2569_v36 = vmax.f32 %v2441_v38, %v2505_v28  ;;  %v2506_v9 = vmul.f32 0.2, %v2442_v29  ;;  %v2376_v7 = vmul.f32 %v4884_v50, %v2306_v25 }
 0x263   : > { %v2507_v63 = vmul.f32 0.2, %v2443_v39  ;;  %v2445_v34 = vadd.f32 %v4893_v59, %v2375_v31  ;;  %v2508_v40 = vmul.f32 0.2, %v2444_v32  ;;  %v2377_v44 = vmul.f32 %v4884_v50, %v2307_v12 }
 0x264   : > { %3739 = vst [vmem:[%s5125_s4 + $0x80] sm:$0xff] %v3616_v33   ;;  %v3621_v49 = vpack.c.bf16 %v2569_v36, %v2568_v46  ;;  %v2570_v37 = vmax.f32 %v2442_v29, %v2506_v9  ;;  %v2446_v52 = vadd.f32 %v4893_v59, %v2376_v7  ;;  %v2378_v30 = vmul.f32 %v4884_v50, %v2308_v61  ;;  %v2318_v46 = vld [vmem:[#allocation2 + $0x1a0] sm:$0xff]  ;;  %v2319_v33 = vld [vmem:[#allocation2 + $0x1a8] sm:$0xff]  ;;  %v2320_v36 = vld [vmem:[#allocation2 + $0x1b0] sm:$0xff] }
 0x265   : > { %v2571_v43 = vmax.f32 %v2443_v39, %v2507_v63  ;;  %v2509_v6 = vmul.f32 0.2, %v2445_v34  ;;  %v2572_v57 = vmax.f32 %v2444_v32, %v2508_v40  ;;  %v2447_v60 = vadd.f32 %v4893_v59, %v2377_v44 }
 0x266   : > { %3740 = vst [vmem:[%s5125_s4 + $0x88] sm:$0xff] %v3621_v49   ;;  %v2510_v45 = vmul.f32 0.2, %v2446_v52  ;;  %v2379_v4 = vmul.f32 %v4884_v50, %v2309_v35  ;;  %v2448_v18 = vadd.f32 %v4893_v59, %v2378_v30  ;;  %v2380_v56 = vmul.f32 %v4884_v50, %v2310_v48  ;;  %v2321_v49 = vld [vmem:[#allocation2 + $0x1b8] sm:$0xff] }
 0x267   : > { %v3626_v47 = vpack.c.bf16 %v2571_v43, %v2570_v37  ;;  %v2573_v55 = vmax.f32 %v2445_v34, %v2509_v6  ;;  %v2511_v0 = vmul.f32 0.2, %v2447_v60  ;;  %v2381_v42 = vmul.f32 %v4884_v50, %v2311_v51  ;;  %v2322_v43 = vld [vmem:[#allocation2 + $0x1c0] sm:$0xff] }
 0x268   : > { %v2574_v10 = vmax.f32 %v2446_v52, %v2510_v45  ;;  %v2449_v58 = vadd.f32 %v4893_v59, %v2379_v4  ;;  %v2512_v8 = vmul.f32 0.2, %v2448_v18  ;;  %v2450_v23 = vadd.f32 %v4893_v59, %v2380_v56  ;;  %v2323_v4 = vld [vmem:[#allocation2 + $0x1c8] sm:$0xff] }
 0x269   : > { %3741 = vst [vmem:[%s5125_s4 + $0x90] sm:$0xff] %v3626_v47   ;;  %v3631_v5 = vpack.c.bf16 %v2573_v55, %v2572_v57  ;;  %v2575_v22 = vmax.f32 %v2447_v60, %v2511_v0  ;;  %v2451_v62 = vadd.f32 %v4893_v59, %v2381_v42  ;;  %v2382_v41 = vmul.f32 %v4884_v50, %v2312_v11  ;;  %v2324_v55 = vld [vmem:[#allocation2 + $0x1d0] sm:$0xff] }
 0x26a   : > { %v2513_v20 = vmul.f32 0.2, %v2449_v58  ;;  %v2576_v16 = vmax.f32 %v2448_v18, %v2512_v8  ;;  %v2514_v17 = vmul.f32 0.2, %v2450_v23  ;;  %v2383_v3 = vmul.f32 %v4884_v50, %v2313_v1 }
 0x26b   : > { %3742 = vst [vmem:[%s5125_s4 + $0x98] sm:$0xff] %v3631_v5   ;;  %v3636_v38 = vpack.c.bf16 %v2575_v22, %v2574_v10  ;;  %v2515_v24 = vmul.f32 0.2, %v2451_v62  ;;  %v2452_v2 = vadd.f32 %v4893_v59, %v2382_v41  ;;  %v2384_v13 = vmul.f32 %v4884_v50, %v2314_v15  ;;  %v2325_v5 = vld [vmem:[#allocation2 + $0x1d8] sm:$0xff]  ;;  %v2326_v22 = vld [vmem:[#allocation2 + $0x1e0] sm:$0xff] }
 0x26c   : > { %v2577_v27 = vmax.f32 %v2449_v58, %v2513_v20  ;;  %v2578_v26 = vmax.f32 %v2450_v23, %v2514_v17  ;;  %v2453_v25 = vadd.f32 %v4893_v59, %v2383_v3  ;;  %v2385_v53 = vmul.f32 %v4884_v50, %v2315_v14 }
 0x26d   : > { %3743 = vst [vmem:[%s5125_s4 + $0xa0] sm:$0xff] %v3636_v38   ;;  %v2579_v19 = vmax.f32 %v2451_v62, %v2515_v24  ;;  %v2516_v28 = vmul.f32 0.2, %v2452_v2  ;;  %v2454_v29 = vadd.f32 %v4893_v59, %v2384_v13  ;;  %v2386_v12 = vmul.f32 %v4884_v50, %v2316_v21 }
 0x26e   : > { %v3641_v39 = vpack.c.bf16 %v2577_v27, %v2576_v16  ;;  %v2517_v31 = vmul.f32 0.2, %v2453_v25  ;;  %v2455_v32 = vadd.f32 %v4893_v59, %v2385_v53  ;;  %v2387_v61 = vmul.f32 %v4884_v50, %v2317_v54  ;;  %v2327_v16 = vld [vmem:[#allocation2 + $0x1e8] sm:$0xff]  ;;  %v2328_v27 = vld [vmem:[#allocation2 + $0x1f0] sm:$0xff] }
 0x26f   : > { %v3646_v9 = vpack.c.bf16 %v2579_v19, %v2578_v26  ;;  %v2580_v7 = vmax.f32 %v2452_v2, %v2516_v28  ;;  %v2518_v63 = vmul.f32 0.2, %v2454_v29  ;;  %v2456_v34 = vadd.f32 %v4893_v59, %v2386_v12  ;;  %v2329_v28 = vld [vmem:[#allocation2 + $0x1f8] sm:$0xff] }
 0x270   : > { %3744 = vst [vmem:[%s5125_s4 + $0xa8] sm:$0xff] %v3641_v39   ;;  %v2581_v40 = vmax.f32 %v2453_v25, %v2517_v31  ;;  %v2519_v44 = vmul.f32 0.2, %v2455_v32  ;;  %v2457_v35 = vadd.f32 %v4893_v59, %v2387_v61  ;;  %v2388_v48 = vmul.f32 %v4884_v50, %v2318_v46 }
 0x271   : > { %3745 = vst [vmem:[%s5125_s4 + $0xb0] sm:$0xff] %v3646_v9   ;;  %v2582_v37 = vmax.f32 %v2454_v29, %v2518_v63  ;;  %v2520_v52 = vmul.f32 0.2, %v2456_v34  ;;  %v2389_v30 = vmul.f32 %v4884_v50, %v2319_v33  ;;  %v2390_v51 = vmul.f32 %v4884_v50, %v2320_v36 }
 0x272   : > { %v3651_v6 = vpack.c.bf16 %v2581_v40, %v2580_v7  ;;  %v2583_v57 = vmax.f32 %v2455_v32, %v2519_v44  ;;  %v2521_v60 = vmul.f32 0.2, %v2457_v35  ;;  %v2458_v45 = vadd.f32 %v4893_v59, %v2388_v48 }
 0x273   : > { %v2584_v18 = vmax.f32 %v2456_v34, %v2520_v52  ;;  %v2459_v56 = vadd.f32 %v4893_v59, %v2389_v30  ;;  %v2391_v11 = vmul.f32 %v4884_v50, %v2321_v49  ;;  %v2460_v47 = vadd.f32 %v4893_v59, %v2390_v51 }
 0x274   : > { %3746 = vst [vmem:[%s5125_s4 + $0xb8] sm:$0xff] %v3651_v6   ;;  %v3656_v0 = vpack.c.bf16 %v2583_v57, %v2582_v37  ;;  %v2585_v42 = vmax.f32 %v2457_v35, %v2521_v60  ;;  %v2522_v1 = vmul.f32 0.2, %v2458_v45  ;;  %v2392_v10 = vmul.f32 %v4884_v50, %v2322_v43 }
 0x275   : > { %v2523_v58 = vmul.f32 0.2, %v2459_v56  ;;  %v2461_v8 = vadd.f32 %v4893_v59, %v2391_v11  ;;  %v2524_v23 = vmul.f32 0.2, %v2460_v47  ;;  %v2393_v15 = vmul.f32 %v4884_v50, %v2323_v4 }
 0x276   : > { %3747 = vst [vmem:[%s5125_s4 + $0xc0] sm:$0xff] %v3656_v0   ;;  %v3661_v62 = vpack.c.bf16 %v2585_v42, %v2584_v18  ;;  %v2586_v41 = vmax.f32 %v2458_v45, %v2522_v1  ;;  %v2462_v14 = vadd.f32 %v4893_v59, %v2392_v10  ;;  %v2394_v20 = vmul.f32 %v4884_v50, %v2324_v55 }
 0x277   : > { %v2587_v17 = vmax.f32 %v2459_v56, %v2523_v58  ;;  %v2525_v3 = vmul.f32 0.2, %v2461_v8  ;;  %v2588_v21 = vmax.f32 %v2460_v47, %v2524_v23  ;;  %v2463_v38 = vadd.f32 %v4893_v59, %v2393_v15 }
 0x278   : > { %3748 = vst [vmem:[%s5125_s4 + $0xc8] sm:$0xff] %v3661_v62   ;;  %v2526_v24 = vmul.f32 0.2, %v2462_v14  ;;  %v2395_v2 = vmul.f32 %v4884_v50, %v2325_v5  ;;  %v2464_v13 = vadd.f32 %v4893_v59, %v2394_v20  ;;  %v2396_v54 = vmul.f32 %v4884_v50, %v2326_v22 }
 0x279   : > { %v3666_v26 = vpack.c.bf16 %v2587_v17, %v2586_v41  ;;  %v2589_v25 = vmax.f32 %v2461_v8, %v2525_v3  ;;  %v2527_v53 = vmul.f32 0.2, %v2463_v38  ;;  %v2397_v19 = vmul.f32 %v4884_v50, %v2327_v16 }
 0x27a   : > { %v2590_v29 = vmax.f32 %v2462_v14, %v2526_v24  ;;  %v2465_v12 = vadd.f32 %v4893_v59, %v2395_v2  ;;  %v2528_v46 = vmul.f32 0.2, %v2464_v13  ;;  %v2466_v39 = vadd.f32 %v4893_v59, %v2396_v54 }
 0x27b   : > { %3749 = vst [vmem:[%s5125_s4 + $0xd0] sm:$0xff] %v3666_v26   ;;  %v3671_v31 = vpack.c.bf16 %v2589_v25, %v2588_v21  ;;  %v2591_v32 = vmax.f32 %v2463_v38, %v2527_v53  ;;  %v2467_v61 = vadd.f32 %v4893_v59, %v2397_v19  ;;  %v2398_v33 = vmul.f32 %v4884_v50, %v2328_v27 }
 0x27c   : > { %v2529_v36 = vmul.f32 0.2, %v2465_v12  ;;  %v2592_v9 = vmax.f32 %v2464_v13, %v2528_v46  ;;  %v2530_v7 = vmul.f32 0.2, %v2466_v39  ;;  %v2399_v63 = vmul.f32 %v4884_v50, %v2329_v28 }
 0x27d   : > { %3750 = vst [vmem:[%s5125_s4 + $0xd8] sm:$0xff] %v3671_v31   ;;  %v3676_v34 = vpack.c.bf16 %v2591_v32, %v2590_v29  ;;  %v2531_v40 = vmul.f32 0.2, %v2467_v61  ;;  %v2468_v44 = vadd.f32 %v4893_v59, %v2398_v33 }
 0x27e   : > { %v2593_v35 = vmax.f32 %v2465_v12, %v2529_v36  ;;  %v2594_v48 = vmax.f32 %v2466_v39, %v2530_v7  ;;  %v2469_v49 = vadd.f32 %v4893_v59, %v2399_v63 }
 0x27f   : > { %3751 = vst [vmem:[%s5125_s4 + $0xe0] sm:$0xff] %v3676_v34   ;;  %v2595_v37 = vmax.f32 %v2467_v61, %v2531_v40  ;;  %v2532_v52 = vmul.f32 0.2, %v2468_v44 }
 0x280   : > { %v3681_v30 = vpack.c.bf16 %v2593_v35, %v2592_v9  ;;  %v2533_v50 = vmul.f32 0.2, %v2469_v49 }
 0x281   : > { %v3686_v51 = vpack.c.bf16 %v2595_v37, %v2594_v48  ;;  %v2596_v43 = vmax.f32 %v2468_v44, %v2532_v52 }
 0x282   : > { %3752 = vst [vmem:[%s5125_s4 + $0xe8] sm:$0xff] %v3681_v30   ;;  %v2597_v6 = vmax.f32 %v2469_v49, %v2533_v50 }
 0x283   : > { %3753 = vst [vmem:[%s5125_s4 + $0xf0] sm:$0xff] %v3686_v51  }
 0x284   : > { %v3691_v59 = vpack.c.bf16 %v2597_v6, %v2596_v43 }
 0x286   : > { %3754 = vst [vmem:[%s5125_s4 + $0xf8] sm:$0xff] %v3691_v59  }
 0x287 PF: > { %s14_s17 = sadd.s32 1, %s4109_s17   ;;  %s5126_s15 = smov %s4105_s16 }
 0x288   : > { %p11_p7 = scmp.ge.s32.totalorder %s14_s17, 4   ;;  %s5127_s16 = smov %s5129_s18 }
 0x28a   :  { %13 = sbr.rel (!%p11_p7) target bundleno = 2 (0x2), region = 80 }

// kernel: discriminator_forward.9
= control target key start
LH: loop header
LB: loop body
LE: loop exit
PB: predicated region body
PF: predicated region fallthrough
CT: control target
= control target key end

     0   :  { %s2145_s15 = smov 0   ;;  %s2147_s16 = smov 0   ;;  %s2571_s0 = inlined_call_operand.vmem [shape: bf16[128,640], index: 0, kind: input, shape index: {}]   ;;  %s2572_s1 = inlined_call_operand.vmem [shape: bf16[640,128], index: 1, kind: input, shape index: {}]   ;;  %s2573_s2 = inlined_call_operand.vmem [shape: f32[1,128], index: 2, kind: input, shape index: {}]   ;;  %s2574_s3 = inlined_call_operand.vmem [shape: f32[1,128], index: 3, kind: input, shape index: {}]   ;;  %s2575_s4 = inlined_call_operand.vmem [shape: bf16[128,128], index: 4, kind: output, shape index: {}]  }
   0x1   :  { %s2149_s17 = smov 0  }
   0x2 LB: > { %s26_s18 = sadd.s32 1, %s2113_s16  ;;  %p1533_p0 = scmp.ge.s32.totalorder %s2117_s17, 1  ;;  %s2117_s17 = sphi %s2149_s17, %s14_s17   ;;  %s2113_s16 = sphi %s2147_s16, %s2577_s16   ;;  %s2109_s15 = sphi %s2145_s15, %s2576_s15  }
   0x3   : > { %p28_p1 = scmp.ge.s32.totalorder %s26_s18, 2  ;;  %p184_p2 = scmp.lt.s32.totalorder %s2117_s17, 3 }
   0x5   : > { %s2579_s18 = smov (%p28_p1, %s26_s18), 0  ;;  %p185_p3 = pnand %p1533_p0, %p184_p2 }
   0x6   : > { %p231_p4 = scmp.eq.s32.totalorder (!%p185_p3), %s2109_s15, 0 }
   0x7   : > { %188 = sbr.rel (%p185_p3) target bundleno = 440 (0x1b8), region = 36 }
   0xe   : > { %236 = sbr.rel (!%p231_p4) target bundleno = 21 (0x15), region = 40  ;;  %v2119_v0 = vmov (%p231_p4), 0.0  }
   0xf   : > { %237 = vst [vmem:[#allocation3] sm:$0x1] (%p231_p4), %v2119_v0  ;;  %238 = vst [vmem:[#allocation4] sm:$0x1] (%p231_p4), %v2119_v0 }
  0x15 PF: > { %p1535_p5 = scmp.ne.s32.totalorder %s2109_s15, 0 }
  0x16   : > { %v1997_v1 = vld [vmem:[%s2572_s1 + $0x40] sm:$0xff] (!%p1535_p5)   ;;  %v2001_v5 = vld [vmem:[%s2572_s1 + $0x48] sm:$0xff] (!%p1535_p5)   ;;  %v2005_v9 = vld [vmem:[%s2572_s1 + $0x50] sm:$0xff] (!%p1535_p5)  }
  0x17   : > { %241 = sbr.rel (%p1535_p5) target bundleno = 385 (0x181), region = 44  ;;  %v1998_v2 = vld [vmem:[%s2572_s1 + $0xc0] sm:$0xff] (!%p1535_p5)   ;;  %1780 = vmatprep.subr.bf16.mxu0 (!%p1535_p5), %v1997_v1  ;;  %v2002_v6 = vld [vmem:[%s2572_s1 + $0xc8] sm:$0xff] (!%p1535_p5)   ;;  %v2006_v10 = vld [vmem:[%s2572_s1 + $0xd0] sm:$0xff] (!%p1535_p5)  }
  0x18   : > { %v1999_v3 = vld [vmem:[%s2572_s1] sm:$0xff] (!%p1535_p5)   ;;  %1844 = vmatprep.subr.bf16.mxu1 (!%p1535_p5), %v1998_v2  ;;  %v2003_v7 = vld [vmem:[%s2572_s1 + $0x8] sm:$0xff] (!%p1535_p5)   ;;  %v2007_v11 = vld [vmem:[%s2572_s1 + $0x10] sm:$0xff] (!%p1535_p5)  }
  0x19   : > { %v2000_v4 = vld [vmem:[%s2572_s1 + $0x80] sm:$0xff] (!%p1535_p5)   ;;  %1781 = vmatpush3.bf16.msra.mxu0 (!%p1535_p5), %v1999_v3  ;;  %v2004_v8 = vld [vmem:[%s2572_s1 + $0x88] sm:$0xff] (!%p1535_p5)   ;;  %v2008_v12 = vld [vmem:[%s2572_s1 + $0x90] sm:$0xff] (!%p1535_p5)  }
  0x1a   : > { %1845 = vmatpush3.bf16.msra.mxu1 (!%p1535_p5), %v2000_v4  ;;  %1782 = vmatprep.subr.bf16.mxu0 (!%p1535_p5), %v2001_v5  ;;  %v2009_v13 = vld [vmem:[%s2572_s1 + $0x58] sm:$0xff] (!%p1535_p5)   ;;  %v2013_v17 = vld [vmem:[%s2572_s1 + $0x60] sm:$0xff] (!%p1535_p5)   ;;  %v2017_v21 = vld [vmem:[%s2572_s1 + $0x68] sm:$0xff] (!%p1535_p5)  }
  0x1b   : > { %1846 = vmatprep.subr.bf16.mxu1 (!%p1535_p5), %v2002_v6  ;;  %v2010_v14 = vld [vmem:[%s2572_s1 + $0xd8] sm:$0xff] (!%p1535_p5)   ;;  %v2014_v18 = vld [vmem:[%s2572_s1 + $0xe0] sm:$0xff] (!%p1535_p5)   ;;  %v2018_v22 = vld [vmem:[%s2572_s1 + $0xe8] sm:$0xff] (!%p1535_p5)  }
  0x1c   : > { %v2011_v15 = vld [vmem:[%s2572_s1 + $0x18] sm:$0xff] (!%p1535_p5)   ;;  %v2015_v19 = vld [vmem:[%s2572_s1 + $0x20] sm:$0xff] (!%p1535_p5)   ;;  %v2019_v23 = vld [vmem:[%s2572_s1 + $0x28] sm:$0xff] (!%p1535_p5)  }
  0x1d   : > { %1783 = vmatpush3.bf16.msra.mxu0 (!%p1535_p5), %v2003_v7  ;;  %v2012_v16 = vld [vmem:[%s2572_s1 + $0x98] sm:$0xff] (!%p1535_p5)   ;;  %v2016_v20 = vld [vmem:[%s2572_s1 + $0xa0] sm:$0xff] (!%p1535_p5)   ;;  %v2020_v24 = vld [vmem:[%s2572_s1 + $0xa8] sm:$0xff] (!%p1535_p5)  }
  0x1e   : > { %1847 = vmatpush3.bf16.msra.mxu1 %v2004_v8  ;;  %1784 = vmatprep.subr.bf16.mxu0 %v2005_v9  ;;  %v2021_v25 = vld [vmem:[%s2572_s1 + $0x70] sm:$0xff]   ;;  %v2025_v29 = vld [vmem:[%s2572_s1 + $0x78] sm:$0xff]   ;;  %v2034_v36 = vld [vmem:[%s2571_s0 + $0xc] ss:$20 sps:$4 sm:$0xff]  }
  0x1f   : > { %1848 = vmatprep.subr.bf16.mxu1 %v2006_v10  ;;  %v2022_v26 = vld [vmem:[%s2572_s1 + $0xf0] sm:$0xff]   ;;  %v2026_v30 = vld [vmem:[%s2572_s1 + $0xf8] sm:$0xff]   ;;  %v2035_v37 = vld [vmem:[%s2572_s1 + $0x100] sm:$0xff]   ;;  %947 = vmatprep.mubr.bf16.mxu1 %v2034_v36 }
  0x20   : > { %v2023_v27 = vld [vmem:[%s2572_s1 + $0x30] sm:$0xff]   ;;  %v2027_v31 = vld [vmem:[%s2572_s1 + $0x38] sm:$0xff]   ;;  %v2036_v38 = vld [vmem:[%s2571_s0 + $0x2c] ss:$20 sps:$4 sm:$0xff]  }
  0x21   : > { %1785 = vmatpush3.bf16.msra.mxu0 %v2007_v11  ;;  %v2024_v28 = vld [vmem:[%s2572_s1 + $0xb0] sm:$0xff]   ;;  %v2028_v32 = vld [vmem:[%s2572_s1 + $0xb8] sm:$0xff]   ;;  %v2042_v40 = vld [vmem:[%s2572_s1 + $0x108] sm:$0xff]  }
  0x22   : > { %1849 = vmatpush3.bf16.msra.mxu1 %v2008_v12  ;;  %1786 = vmatprep.subr.bf16.mxu0 %v2009_v13  ;;  %v2029_v33 = vld [vmem:[%s2571_s0] ss:$20 sps:$4 sm:$0xff]   ;;  %v2031_v34 = vld [vmem:[%s2571_s0 + $0x4] ss:$20 sps:$4 sm:$0xff]   ;;  %v2032_v35 = vld [vmem:[%s2571_s0 + $0x8] ss:$20 sps:$4 sm:$0xff]  }
  0x23   : > { %1850 = vmatprep.subr.bf16.mxu1 %v2010_v14  ;;  %850 = vmatprep.mubr.bf16.mxu0 %v2031_v34  ;;  %v2038_v39 = vld [vmem:[%s2571_s0 + $0x34] ss:$20 sps:$4 sm:$0xff]   ;;  %v2041_v42 = vld [vmem:[%s2571_s0 + $0x30] ss:$20 sps:$4 sm:$0xff]   ;;  %v2056_v46 = vld [vmem:[%s2572_s1 + $0x118] sm:$0xff]  }
  0x24   : > { %v2040_v41 = vld [vmem:[%s2571_s0 + $0x28] ss:$20 sps:$4 sm:$0xff]   ;;  %v2049_v45 = vld [vmem:[%s2572_s1 + $0x110] sm:$0xff]   ;;  %v2048_v48 = vld [vmem:[%s2571_s0 + $0x58] ss:$20 sps:$4 sm:$0xff]  }
  0x25   : > { %1787 = vmatpush3.bf16.msra.mxu0 %v2011_v15  ;;  %v2043_v43 = vld [vmem:[%s2571_s0 + $0x54] ss:$20 sps:$4 sm:$0xff]   ;;  %v2045_v44 = vld [vmem:[%s2571_s0 + $0x5c] ss:$20 sps:$4 sm:$0xff]   ;;  %v2052_v50 = vld [vmem:[%s2571_s0 + $0x84] ss:$20 sps:$4 sm:$0xff]  }
  0x26   : > { %1851 = vmatpush3.bf16.msra.mxu1 %v2012_v16  ;;  %1788 = vmatprep.subr.bf16.mxu0 %v2013_v17  ;;  %v2047_v47 = vld [vmem:[%s2571_s0 + $0x50] ss:$20 sps:$4 sm:$0xff]   ;;  %v2070_v52 = vld [vmem:[%s2572_s1 + $0x128] sm:$0xff]   ;;  %v2055_v54 = vld [vmem:[%s2571_s0 + $0x80] ss:$20 sps:$4 sm:$0xff]  }
  0x27   : > { %1852 = vmatprep.subr.bf16.mxu1 %v2014_v18  ;;  %v2050_v49 = vld [vmem:[%s2571_s0 + $0x7c] ss:$20 sps:$4 sm:$0xff]   ;;  %v2063_v51 = vld [vmem:[%s2572_s1 + $0x120] sm:$0xff]   ;;  %v2054_v53 = vld [vmem:[%s2571_s0 + $0x78] ss:$20 sps:$4 sm:$0xff]  }
  0x28   : > { %v2057_v55 = vld [vmem:[%s2571_s0 + $0xa4] ss:$20 sps:$4 sm:$0xff]   ;;  %v2077_v56 = vld [vmem:[%s2572_s1 + $0x130] sm:$0xff]   ;;  %v2059_v57 = vld [vmem:[%s2571_s0 + $0xac] ss:$20 sps:$4 sm:$0xff]  }
  0x29   : > { %1789 = vmatpush3.bf16.msra.mxu0 %v2015_v19  ;;  %v2084_v58 = vld [vmem:[%s2572_s1 + $0x138] sm:$0xff]   ;;  %v2061_v59 = vld [vmem:[%s2571_s0 + $0xa0] ss:$20 sps:$4 sm:$0xff]   ;;  %v2069_v0 = vld [vmem:[%s2571_s0 + $0xd0] ss:$20 sps:$4 sm:$0xff]  }
  0x2a   : > { %1853 = vmatpush3.bf16.msra.mxu1 %v2016_v20  ;;  %1790 = vmatprep.subr.bf16.mxu0 %v2017_v21  ;;  %v2062_v60 = vld [vmem:[%s2571_s0 + $0xa8] ss:$20 sps:$4 sm:$0xff]   ;;  %v2064_v61 = vld [vmem:[%s2571_s0 + $0xcc] ss:$20 sps:$4 sm:$0xff]   ;;  %v2075_v3 = vld [vmem:[%s2571_s0 + $0xf0] ss:$20 sps:$4 sm:$0xff]  }
  0x2b   : > { %1854 = vmatprep.subr.bf16.mxu1 %v2018_v22  ;;  %v2066_v62 = vld [vmem:[%s2571_s0 + $0xd4] ss:$20 sps:$4 sm:$0xff]   ;;  %v2073_v2 = vld [vmem:[%s2571_s0 + $0xfc] ss:$20 sps:$4 sm:$0xff]   ;;  %v2076_v4 = vld [vmem:[%s2571_s0 + $0xf8] ss:$20 sps:$4 sm:$0xff]  }
  0x2c   : > { %v2068_v63 = vld [vmem:[%s2571_s0 + $0xc8] ss:$20 sps:$4 sm:$0xff]   ;;  %v2080_v6 = vld [vmem:[%s2571_s0 + $0x124] ss:$20 sps:$4 sm:$0xff]   ;;  %v2083_v8 = vld [vmem:[%s2571_s0 + $0x120] ss:$20 sps:$4 sm:$0xff]  }
  0x2d   : > { %1791 = vmatpush3.bf16.msra.mxu0 %v2019_v23  ;;  %v2071_v1 = vld [vmem:[%s2571_s0 + $0xf4] ss:$20 sps:$4 sm:$0xff]   ;;  %v2078_v5 = vld [vmem:[%s2571_s0 + $0x11c] ss:$20 sps:$4 sm:$0xff]   ;;  %v2082_v7 = vld [vmem:[%s2571_s0 + $0x118] ss:$20 sps:$4 sm:$0xff]  }
  0x2e   : > { %1855 = vmatpush3.bf16.msra.mxu1 %v2020_v24  ;;  %1792 = vmatprep.subr.bf16.mxu0 %v2021_v25  ;;  %v2085_v9 = vld [vmem:[%s2571_s0 + $0x10] ss:$20 sps:$4 sm:$0xff]   ;;  %v2087_v11 = vld [vmem:[%s2571_s0 + $0x38] ss:$20 sps:$4 sm:$0xff]   ;;  %v2089_v13 = vld [vmem:[%s2571_s0 + $0x60] ss:$20 sps:$4 sm:$0xff]  }
  0x2f   : > { %1856 = vmatprep.subr.bf16.mxu1 %v2022_v26  ;;  %v2086_v10 = vld [vmem:[%s2571_s0 + $0xb0] ss:$20 sps:$4 sm:$0xff]   ;;  %v2088_v12 = vld [vmem:[%s2571_s0 + $0xd8] ss:$20 sps:$4 sm:$0xff]   ;;  %v2090_v14 = vld [vmem:[%s2571_s0 + $0x100] ss:$20 sps:$4 sm:$0xff]  }
  0x30   : > { %v2091_v15 = vld [vmem:[%s2571_s0 + $0x88] ss:$20 sps:$4 sm:$0xff]  }
  0x31   : > { %1793 = vmatpush3.bf16.msra.mxu0 %v2023_v27  ;;  %v2092_v16 = vld [vmem:[%s2571_s0 + $0x128] ss:$20 sps:$4 sm:$0xff]  }
  0x32   : > { %1857 = vmatpush3.bf16.msra.mxu1 %v2024_v28  ;;  %1794 = vmatprep.subr.bf16.mxu0 %v2025_v29 }
  0x33   : > { %1858 = vmatprep.subr.bf16.mxu1 %v2026_v30 }
  0x35   : > { %1795 = vmatpush3.bf16.msra.mxu0 %v2027_v31 }
  0x36   : > { %1859 = vmatpush3.bf16.msra.mxu1 %v2028_v32  ;;  %1924 = vmatprep.subr.bf16.mxu0 %v2035_v37 }
  0x37   : > { %1956 = vmatprep.subr.bf16.mxu1 %v2035_v37 }
  0x38   : > { %851 = vmatmul.mubr.bf16.vlgmr.msra.gmra.mrb[0].mxu0 %v2029_v33 }
  0x39   : > { %948 = vmatmul.mubr.bf16.vlgmr.msra.gmra.mrb[0].mxu1 %v2032_v35  ;;  %1925 = vmatpush3.bf16.msra.mxu0 %v2035_v37 }
  0x3a   : > { %858 = vmatprep.mubr.bf16.mxu0 %v2036_v38  ;;  %955 = vmatprep.mubr.bf16.mxu1 %v2038_v39 }
  0x3b   : > { %1964 = vmatpush3.bf16.msra.mxu1 %v2035_v37  ;;  %1926 = vmatprep.subr.bf16.mxu0 %v2042_v40 }
  0x3c   : > { %1957 = vmatprep.subr.bf16.mxu1 %v2042_v40 }
  0x3d   : > { %1927 = vmatpush3.bf16.msra.mxu0 %v2042_v40 }
  0x3e   : > { %1928 = vmatprep.subr.bf16.mxu0 %v2049_v45 }
  0x3f   : > { %1965 = vmatpush3.bf16.msra.mxu1 %v2042_v40 }
  0x40   : > { %859 = vmatmul.mubr.bf16.gmra.mrb[4].mxu0 %v2040_v41  ;;  %1958 = vmatprep.subr.bf16.mxu1 %v2049_v45 }
  0x41   : > { %956 = vmatmul.mubr.bf16.gmra.mrb[4].mxu1 %v2041_v42  ;;  %866 = vmatprep.mubr.bf16.mxu0 %v2043_v43 }
  0x42   : > { %963 = vmatprep.mubr.bf16.mxu1 %v2045_v44  ;;  %1929 = vmatpush3.bf16.msra.mxu0 %v2049_v45 }
  0x43   : > { %1930 = vmatprep.subr.bf16.mxu0 %v2056_v46  ;;  %1966 = vmatpush3.bf16.msra.mxu1 %v2049_v45 }
  0x44   : > { %1959 = vmatprep.subr.bf16.mxu1 %v2056_v46 }
  0x46   : > { %1931 = vmatpush3.bf16.msra.mxu0 %v2056_v46 }
  0x47   : > { %1932 = vmatprep.subr.bf16.mxu0 %v2063_v51  ;;  %1967 = vmatpush3.bf16.msra.mxu1 %v2056_v46 }
  0x48   : > { %867 = vmatmul.mubr.bf16.gmra.mrb[8].mxu0 %v2047_v47  ;;  %1960 = vmatprep.subr.bf16.mxu1 %v2063_v51 }
  0x49   : > { %964 = vmatmul.mubr.bf16.gmra.mrb[8].mxu1 %v2048_v48  ;;  %874 = vmatprep.mubr.bf16.mxu0 %v2050_v49 }
  0x4a   : > { %971 = vmatprep.mubr.bf16.mxu1 %v2052_v50  ;;  %1933 = vmatpush3.bf16.msra.mxu0 %v2063_v51 }
  0x4b   : > { %1934 = vmatprep.subr.bf16.mxu0 %v2070_v52  ;;  %1968 = vmatpush3.bf16.msra.mxu1 %v2063_v51 }
  0x4c   : > { %1961 = vmatprep.subr.bf16.mxu1 %v2070_v52 }
  0x4e   : > { %1935 = vmatpush3.bf16.msra.mxu0 %v2070_v52 }
  0x4f   : > { %1936 = vmatprep.subr.bf16.mxu0 %v2077_v56  ;;  %1969 = vmatpush3.bf16.msra.mxu1 %v2070_v52 }
  0x50   : > { %875 = vmatmul.mubr.bf16.gmra.mrb[12].mxu0 %v2054_v53  ;;  %1962 = vmatprep.subr.bf16.mxu1 %v2077_v56 }
  0x51   : > { %972 = vmatmul.mubr.bf16.gmra.mrb[12].mxu1 %v2055_v54  ;;  %882 = vmatprep.mubr.bf16.mxu0 %v2057_v55 }
  0x52   : > { %979 = vmatprep.mubr.bf16.mxu1 %v2059_v57  ;;  %1937 = vmatpush3.bf16.msra.mxu0 %v2077_v56 }
  0x53   : > { %1938 = vmatprep.subr.bf16.mxu0 %v2084_v58  ;;  %1970 = vmatpush3.bf16.msra.mxu1 %v2077_v56 }
  0x54   : > { %1963 = vmatprep.subr.bf16.mxu1 %v2084_v58 }
  0x56   : > { %1939 = vmatpush3.bf16.msra.mxu0 %v2084_v58 }
  0x57   : > { %1971 = vmatpush3.bf16.msra.mxu1 %v2084_v58 }
  0x58   : > { %883 = vmatmul.mubr.bf16.gmra.mrb[16].mxu0 %v2061_v59 }
  0x59   : > { %980 = vmatmul.mubr.bf16.gmra.mrb[16].mxu1 %v2062_v60  ;;  %890 = vmatprep.mubr.bf16.mxu0 %v2064_v61 }
  0x5a   : > { %987 = vmatprep.mubr.bf16.mxu1 %v2066_v62 }
  0x60   : > { %891 = vmatmul.mubr.bf16.gmra.mrb[20].mxu0 %v2068_v63 }
  0x61   : > { %988 = vmatmul.mubr.bf16.gmra.mrb[20].mxu1 %v2069_v0  ;;  %898 = vmatprep.mubr.bf16.mxu0 %v2071_v1 }
  0x62   : > { %995 = vmatprep.mubr.bf16.mxu1 %v2073_v2 }
  0x68   : > { %899 = vmatmul.mubr.bf16.gmra.mrb[24].mxu0 %v2075_v3 }
  0x69   : > { %996 = vmatmul.mubr.bf16.gmra.mrb[24].mxu1 %v2076_v4  ;;  %906 = vmatprep.mubr.bf16.mxu0 %v2078_v5 }
  0x6a   : > { %1003 = vmatprep.mubr.bf16.mxu1 %v2080_v6 }
  0x70   : > { %907 = vmatmul.mubr.bf16.gmra.mrb[28].mxu0 %v2082_v7 }
  0x71   : > { %1004 = vmatmul.mubr.bf16.gmra.mrb[28].mxu1 %v2083_v8  ;;  %1940 = vmatprep.mubr.bf16.mxu0 %v2085_v9 }
  0x72   : > { %1948 = vmatprep.mubr.bf16.mxu1 %v2086_v10 }
  0x78   : > { %1941 = vmatmul.mubr.bf16.vlgmr.msra.gmra.mrb[32].mxu0 %v2087_v11 }
  0x79   : > { %1949 = vmatmul.mubr.bf16.vlgmr.msra.gmra.mrb[32].mxu1 %v2088_v12  ;;  %1944 = vmatprep.mubr.bf16.mxu0 %v2089_v13 }
  0x7a   : > { %1952 = vmatprep.mubr.bf16.mxu1 %v2090_v14 }
  0x80   : > { %1945 = vmatmul.mubr.bf16.gmra.mrb[36].mxu0 %v2091_v15 }
  0x81   : > { %1953 = vmatmul.mubr.bf16.gmra.mrb[36].mxu1 %v2092_v16 }
 0x10b   : > { %v1796_v17 = vpop.f32.mrb[0].mxu0 }
 0x10c   : > { %v1860_v18 = vpop.f32.mrb[0].mxu1  ;;  %v1797_v19 = vpop.f32.mrb[1].mxu0 }
 0x10d   : > { %v1798_v20 = vadd.f32 %v1797_v19, %v1796_v17  ;;  %v1861_v21 = vpop.f32.mrb[1].mxu1  ;;  %v1799_v22 = vpop.f32.mrb[2].mxu0 }
 0x10e   : > { %v1862_v23 = vadd.f32 %v1861_v21, %v1860_v18  ;;  %v1863_v24 = vpop.f32.mrb[2].mxu1  ;;  %v1800_v25 = vpop.f32.mrb[3].mxu0 }
 0x10f   : > { %v1801_v26 = vadd.f32 %v1800_v25, %v1799_v22  ;;  %v1864_v27 = vpop.f32.mrb[3].mxu1 }
 0x110   : > { %v1865_v28 = vadd.f32 %v1864_v27, %v1863_v24  ;;  %v2407_v29 = vadd.f32 %v1862_v23, %v1798_v20 }
 0x112   : > { %v2409_v30 = vadd.f32 %v1865_v28, %v1801_v26 }
 0x113   : > { %v1802_v31 = vpop.f32.mrb[4].mxu0 }
 0x114   : > { %v1866_v32 = vpop.f32.mrb[4].mxu1  ;;  %v1803_v33 = vpop.f32.mrb[5].mxu0 }
 0x115   : > { %v1804_v34 = vadd.f32 %v1803_v33, %v1802_v31  ;;  %v1867_v35 = vpop.f32.mrb[5].mxu1  ;;  %v1805_v36 = vpop.f32.mrb[6].mxu0 }
 0x116   : > { %v1868_v37 = vadd.f32 %v1867_v35, %v1866_v32  ;;  %v1869_v38 = vpop.f32.mrb[6].mxu1  ;;  %v1806_v39 = vpop.f32.mrb[7].mxu0 }
 0x117   : > { %v1807_v40 = vadd.f32 %v1806_v39, %v1805_v36  ;;  %v1870_v41 = vpop.f32.mrb[7].mxu1 }
 0x118   : > { %v1871_v42 = vadd.f32 %v1870_v41, %v1869_v38  ;;  %v2411_v43 = vadd.f32 %v1868_v37, %v1804_v34 }
 0x11a   : > { %v2413_v44 = vadd.f32 %v1871_v42, %v1807_v40 }
 0x11b   : > { %v1808_v45 = vpop.f32.mrb[8].mxu0 }
 0x11c   : > { %v1872_v46 = vpop.f32.mrb[8].mxu1  ;;  %v1809_v47 = vpop.f32.mrb[9].mxu0 }
 0x11d   : > { %v1810_v48 = vadd.f32 %v1809_v47, %v1808_v45  ;;  %v1873_v49 = vpop.f32.mrb[9].mxu1  ;;  %v1811_v50 = vpop.f32.mrb[10].mxu0 }
 0x11e   : > { %v1874_v51 = vadd.f32 %v1873_v49, %v1872_v46  ;;  %v1875_v52 = vpop.f32.mrb[10].mxu1  ;;  %v1812_v53 = vpop.f32.mrb[11].mxu0 }
 0x11f   : > { %v1813_v54 = vadd.f32 %v1812_v53, %v1811_v50  ;;  %v1876_v55 = vpop.f32.mrb[11].mxu1 }
 0x120   : > { %v1877_v56 = vadd.f32 %v1876_v55, %v1875_v52  ;;  %v2415_v57 = vadd.f32 %v1874_v51, %v1810_v48 }
 0x122   : > { %v2417_v58 = vadd.f32 %v1877_v56, %v1813_v54 }
 0x123   : > { %v1814_v59 = vpop.f32.mrb[12].mxu0 }
 0x124   : > { %v1878_v60 = vpop.f32.mrb[12].mxu1  ;;  %v1815_v61 = vpop.f32.mrb[13].mxu0 }
 0x125   : > { %v1816_v62 = vadd.f32 %v1815_v61, %v1814_v59  ;;  %v1879_v63 = vpop.f32.mrb[13].mxu1  ;;  %v1817_v0 = vpop.f32.mrb[14].mxu0 }
 0x126   : > { %v1880_v1 = vadd.f32 %v1879_v63, %v1878_v60  ;;  %v1881_v2 = vpop.f32.mrb[14].mxu1  ;;  %v1818_v3 = vpop.f32.mrb[15].mxu0 }
 0x127   : > { %v1819_v4 = vadd.f32 %v1818_v3, %v1817_v0  ;;  %v1882_v5 = vpop.f32.mrb[15].mxu1 }
 0x128   : > { %v1883_v6 = vadd.f32 %v1882_v5, %v1881_v2  ;;  %v2419_v7 = vadd.f32 %v1880_v1, %v1816_v62 }
 0x12a   : > { %v2421_v8 = vadd.f32 %v1883_v6, %v1819_v4 }
 0x12b   : > { %v1820_v9 = vpop.f32.mrb[16].mxu0 }
 0x12c   : > { %v1884_v10 = vpop.f32.mrb[16].mxu1  ;;  %v1821_v11 = vpop.f32.mrb[17].mxu0 }
 0x12d   : > { %v1822_v12 = vadd.f32 %v1821_v11, %v1820_v9  ;;  %v1885_v13 = vpop.f32.mrb[17].mxu1  ;;  %v1823_v14 = vpop.f32.mrb[18].mxu0 }
 0x12e   : > { %v1886_v15 = vadd.f32 %v1885_v13, %v1884_v10  ;;  %v1887_v16 = vpop.f32.mrb[18].mxu1  ;;  %v1824_v17 = vpop.f32.mrb[19].mxu0 }
 0x12f   : > { %v1825_v18 = vadd.f32 %v1824_v17, %v1823_v14  ;;  %v1888_v19 = vpop.f32.mrb[19].mxu1 }
 0x130   : > { %v1889_v20 = vadd.f32 %v1888_v19, %v1887_v16  ;;  %v982_v21 = vadd.f32 %v1886_v15, %v1822_v12 }
 0x132   : > { %v2423_v22 = vadd.f32 %v1889_v20, %v1825_v18 }
 0x133   : > { %v1826_v23 = vpop.f32.mrb[20].mxu0 }
 0x134   : > { %v1890_v24 = vpop.f32.mrb[20].mxu1  ;;  %v1827_v25 = vpop.f32.mrb[21].mxu0 }
 0x135   : > { %v1828_v26 = vadd.f32 %v1827_v25, %v1826_v23  ;;  %v1891_v27 = vpop.f32.mrb[21].mxu1  ;;  %v1829_v28 = vpop.f32.mrb[22].mxu0 }
 0x136   : > { %v1892_v31 = vadd.f32 %v1891_v27, %v1890_v24  ;;  %v1893_v32 = vpop.f32.mrb[22].mxu1  ;;  %v1830_v33 = vpop.f32.mrb[23].mxu0 }
 0x137   : > { %v1831_v34 = vadd.f32 %v1830_v33, %v1829_v28  ;;  %v1894_v35 = vpop.f32.mrb[23].mxu1 }
 0x138   : > { %v1895_v36 = vadd.f32 %v1894_v35, %v1893_v32  ;;  %v990_v37 = vadd.f32 %v1892_v31, %v1828_v26 }
 0x13a   : > { %v993_v38 = vadd.f32 %v1895_v36, %v1831_v34 }
 0x13b   : > { %v1832_v39 = vpop.f32.mrb[24].mxu0 }
 0x13c   : > { %v1896_v40 = vpop.f32.mrb[24].mxu1  ;;  %v1833_v41 = vpop.f32.mrb[25].mxu0 }
 0x13d   : > { %v1834_v42 = vadd.f32 %v1833_v41, %v1832_v39  ;;  %v1897_v45 = vpop.f32.mrb[25].mxu1  ;;  %v1835_v46 = vpop.f32.mrb[26].mxu0 }
 0x13e   : > { %v1898_v47 = vadd.f32 %v1897_v45, %v1896_v40  ;;  %v1899_v48 = vpop.f32.mrb[26].mxu1  ;;  %v1836_v49 = vpop.f32.mrb[27].mxu0 }
 0x13f   : > { %v1837_v50 = vadd.f32 %v1836_v49, %v1835_v46  ;;  %v1900_v51 = vpop.f32.mrb[27].mxu1 }
 0x140   : > { %v1901_v52 = vadd.f32 %v1900_v51, %v1899_v48  ;;  %v2425_v53 = vadd.f32 %v1898_v47, %v1834_v42 }
 0x142   : > { %v2427_v54 = vadd.f32 %v1901_v52, %v1837_v50 }
 0x143   : > { %v1838_v55 = vpop.f32.mrb[28].mxu0 }
 0x144   : > { %v1902_v56 = vpop.f32.mrb[28].mxu1  ;;  %v1839_v59 = vpop.f32.mrb[29].mxu0 }
 0x145   : > { %v1840_v60 = vadd.f32 %v1839_v59, %v1838_v55  ;;  %v1903_v61 = vpop.f32.mrb[29].mxu1  ;;  %v1841_v62 = vpop.f32.mrb[30].mxu0 }
 0x146   : > { %v1904_v63 = vadd.f32 %v1903_v61, %v1902_v56  ;;  %v1905_v0 = vpop.f32.mrb[30].mxu1  ;;  %v1842_v1 = vpop.f32.mrb[31].mxu0 }
 0x147   : > { %v1843_v2 = vadd.f32 %v1842_v1, %v1841_v62  ;;  %v1906_v3 = vpop.f32.mrb[31].mxu1 }
 0x148   : > { %v1907_v4 = vadd.f32 %v1906_v3, %v1905_v0  ;;  %v1006_v5 = vadd.f32 %v1904_v63, %v1840_v60 }
 0x14a   : > { %v2429_v6 = vadd.f32 %v1907_v4, %v1843_v2 }
 0x14b   : > { %v1942_v9 = vpop.f32.mrb[32].mxu0 }
 0x14c   : > { %v1055_v10 = vadd.f32 %v1942_v9, %v2411_v43  ;;  %v1950_v11 = vpop.f32.mrb[32].mxu1  ;;  %v1046_v12 = vpop.f32.mrb[33].mxu0 }
 0x14d   : > { %v2432_v13 = vadd.f32 %v1950_v11, %v990_v37  ;;  %v1047_v14 = vadd.f32 %v1046_v12, %v2407_v29  ;;  %v1078_v15 = vpop.f32.mrb[33].mxu1  ;;  %v1943_v16 = vpop.f32.mrb[34].mxu0 }
 0x14e   : > { %1113 = vst [vmem:[#allocation2 + $0x10] sm:$0xff] %v1055_v10  ;;  %v2435_v17 = vadd.f32 %v1078_v15, %v982_v21  ;;  %v1058_v18 = vadd.f32 %v1943_v16, %v2413_v44  ;;  %v1951_v19 = vpop.f32.mrb[34].mxu1  ;;  %v1049_v20 = vpop.f32.mrb[35].mxu0  ;;  %v1154_v28 = vmul.f32 %v1055_v10, %v1055_v10 }
 0x14f   : > { %1121 = vst [vmem:[#allocation2 + $0x50] sm:$0xff] %v2432_v13  ;;  %1111 = vst [vmem:[#allocation2] sm:$0xff] %v1047_v14  ;;  %v2439_v23 = vadd.f32 %v1951_v19, %v993_v38  ;;  %v1050_v43 = vadd.f32 %v1049_v20, %v2409_v30  ;;  %v1081_v24 = vpop.f32.mrb[35].mxu1  ;;  %v1152_v21 = vmul.f32 %v1047_v14, %v1047_v14 }
 0x150   : > { %1119 = vst [vmem:[#allocation2 + $0x40] sm:$0xff] %v2435_v17  ;;  %1114 = vst [vmem:[#allocation2 + $0x18] sm:$0xff] %v1058_v18  ;;  %v1694_v29 = vpack.c.bf16 %v1058_v18, %v1055_v10  ;;  %v2444_v25 = vadd.f32 %v1081_v24, %v2423_v22  ;;  %v1155_v34 = vmul.f32 %v1058_v18, %v1058_v18 }
 0x151   : > { %1122 = vst [vmem:[#allocation2 + $0x58] sm:$0xff] %v2439_v23  ;;  %v1714_v44 = vpack.c.bf16 %v2439_v23, %v2432_v13  ;;  %1112 = vst [vmem:[#allocation2 + $0x8] sm:$0xff] %v1050_v43  ;;  %v1128_v26 = vadd.f32 %v1050_v43, %v1047_v14  ;;  %v1153_v27 = vmul.f32 %v1050_v43, %v1050_v43 }
 0x152   : > { %1766 = vst [vmem:[%s2575_s4 + $0x8] sm:$0xff] %v1694_v29   ;;  %v1689_v30 = vpack.c.bf16 %v1050_v43, %v1047_v14  ;;  %1120 = vst [vmem:[#allocation2 + $0x48] sm:$0xff] %v2444_v25  ;;  %v1709_v22 = vpack.c.bf16 %v2444_v25, %v2435_v17  ;;  %v1160_v4 = vmul.f32 %v2435_v17, %v2435_v17 }
 0x153   : > { %1770 = vst [vmem:[%s2575_s4 + $0x28] sm:$0xff] %v1714_v44   ;;  %v1129_v31 = vadd.f32 %v1128_v26, %v1055_v10  ;;  %v1168_v32 = vadd.f32 %v1153_v27, %v1152_v21  ;;  %v1946_v33 = vpop.f32.mrb[36].mxu0  ;;  %v1161_v9 = vmul.f32 %v2444_v25, %v2444_v25  ;;  %v1162_v12 = vmul.f32 %v2432_v13, %v2432_v13 }
 0x154   : > { %1690 = vst [vmem:[%s2575_s4] sm:$0xff] %v1689_v30   ;;  %1769 = vst [vmem:[%s2575_s4 + $0x20] sm:$0xff] %v1709_v22   ;;  %v1071_v35 = vadd.f32 %v1946_v33, %v2419_v7  ;;  %v1954_v36 = vpop.f32.mrb[36].mxu1  ;;  %v1062_v37 = vpop.f32.mrb[37].mxu0  ;;  %v1163_v16 = vmul.f32 %v2439_v23, %v2439_v23 }
 0x155   : > { %v1169_v38 = vadd.f32 %v1168_v32, %v1154_v28  ;;  %v1103_v39 = vadd.f32 %v1954_v36, %v1006_v5  ;;  %v1063_v40 = vadd.f32 %v1062_v37, %v2415_v57  ;;  %v1130_v41 = vadd.f32 %v1129_v31, %v1058_v18  ;;  %v1094_v42 = vpop.f32.mrb[37].mxu1  ;;  %v1947_v45 = vpop.f32.mrb[38].mxu0 }
 0x156   : > { %1117 = vst [vmem:[#allocation2 + $0x30] sm:$0xff] %v1071_v35  ;;  %v1095_v46 = vadd.f32 %v1094_v42, %v2425_v53  ;;  %v1074_v47 = vadd.f32 %v1947_v45, %v2421_v8  ;;  %v1955_v48 = vpop.f32.mrb[38].mxu1  ;;  %v1065_v49 = vpop.f32.mrb[39].mxu0  ;;  %v1158_v0 = vmul.f32 %v1071_v35, %v1071_v35  ;;  %v1151_v42 = vld [vmem:[#allocation4] sm:$0x1] }
 0x157   : > { %1125 = vst [vmem:[#allocation2 + $0x70] sm:$0xff] %v1103_v39  ;;  %1115 = vst [vmem:[#allocation2 + $0x20] sm:$0xff] %v1063_v40  ;;  %v1131_v50 = vadd.f32 %v1130_v41, %v1063_v40  ;;  %v1156_v7 = vmul.f32 %v1063_v40, %v1063_v40  ;;  %v1170_v51 = vadd.f32 %v1169_v38, %v1155_v34  ;;  %v1097_v52 = vpop.f32.mrb[39].mxu1  ;;  %v1127_v38 = vld [vmem:[#allocation3] sm:$0x1] }
 0x158   : > { %1123 = vst [vmem:[#allocation2 + $0x60] sm:$0xff] %v1095_v46  ;;  %1118 = vst [vmem:[#allocation2 + $0x38] sm:$0xff] %v1074_v47  ;;  %v1704_v55 = vpack.c.bf16 %v1074_v47, %v1071_v35  ;;  %v1106_v57 = vadd.f32 %v1955_v48, %v2429_v6  ;;  %v1066_v59 = vadd.f32 %v1065_v49, %v2417_v58 }
 0x159   : > { %v1171_v56 = vadd.f32 %v1170_v51, %v1156_v7  ;;  %v1098_v53 = vadd.f32 %v1097_v52, %v2427_v54  ;;  %v1159_v54 = vmul.f32 %v1074_v47, %v1074_v47  ;;  %v1166_v44 = vmul.f32 %v1103_v39, %v1103_v39 }
 0x15a   : > { %1768 = vst [vmem:[%s2575_s4 + $0x18] sm:$0xff] %v1704_v55   ;;  %1126 = vst [vmem:[#allocation2 + $0x78] sm:$0xff] %v1106_v57  ;;  %v1724_v8 = vpack.c.bf16 %v1106_v57, %v1103_v39  ;;  %v1132_v60 = vadd.f32 %v1131_v50, %v1066_v59  ;;  %v1157_v61 = vmul.f32 %v1066_v59, %v1066_v59 }
 0x15b   : > { %1116 = vst [vmem:[#allocation2 + $0x28] sm:$0xff] %v1066_v59  ;;  %v1699_v62 = vpack.c.bf16 %v1066_v59, %v1063_v40  ;;  %1124 = vst [vmem:[#allocation2 + $0x68] sm:$0xff] %v1098_v53  ;;  %v1719_v63 = vpack.c.bf16 %v1098_v53, %v1095_v46  ;;  %v1165_v29 = vmul.f32 %v1098_v53, %v1098_v53 }
 0x15c   : > { %1772 = vst [vmem:[%s2575_s4 + $0x38] sm:$0xff] %v1724_v8   ;;  %v1133_v58 = vadd.f32 %v1132_v60, %v1071_v35  ;;  %v1172_v1 = vadd.f32 %v1171_v56, %v1157_v61  ;;  %v1167_v27 = vmul.f32 %v1106_v57, %v1106_v57 }
 0x15d   : > { %1767 = vst [vmem:[%s2575_s4 + $0x10] sm:$0xff] %v1699_v62   ;;  %1771 = vst [vmem:[%s2575_s4 + $0x30] sm:$0xff] %v1719_v63  }
 0x15e   : > { %v1134_v2 = vadd.f32 %v1133_v58, %v1074_v47  ;;  %v1173_v3 = vadd.f32 %v1172_v1, %v1158_v0 }
 0x160   : > { %v1135_v5 = vadd.f32 %v1134_v2, %v2435_v17  ;;  %v1174_v6 = vadd.f32 %v1173_v3, %v1159_v54  ;;  %v1164_v17 = vmul.f32 %v1095_v46, %v1095_v46 }
 0x162   : > { %v1175_v10 = vadd.f32 %v1174_v6, %v1160_v4  ;;  %v1136_v11 = vadd.f32 %v1135_v5, %v2444_v25 }
 0x164   : > { %v1137_v14 = vadd.f32 %v1136_v11, %v2432_v13  ;;  %v1176_v15 = vadd.f32 %v1175_v10, %v1161_v9 }
 0x166   : > { %v1138_v18 = vadd.f32 %v1137_v14, %v2439_v23  ;;  %v1177_v19 = vadd.f32 %v1176_v15, %v1162_v12 }
 0x168   : > { %v1139_v20 = vadd.f32 %v1138_v18, %v1095_v46  ;;  %v1178_v43 = vadd.f32 %v1177_v19, %v1163_v16 }
 0x16a   : > { %v1140_v24 = vadd.f32 %v1139_v20, %v1098_v53  ;;  %v1179_v21 = vadd.f32 %v1178_v43, %v1164_v17 }
 0x16c   : > { %v1141_v25 = vadd.f32 %v1140_v24, %v1103_v39  ;;  %v1180_v26 = vadd.f32 %v1179_v21, %v1165_v29 }
 0x16e   : > { %v1142_v30 = vadd.f32 %v1141_v25, %v1106_v57  ;;  %v1181_v22 = vadd.f32 %v1180_v26, %v1166_v44 }
 0x170   : > { %v1143_v13 = vrot.slane %v1142_v30, 4  ;;  %v1182_v28 = vadd.f32 %v1181_v22, %v1167_v27 }
 0x172   : > { %v1144_v31 = vadd.f32 %v1143_v13, %v1142_v30  ;;  %v1183_v32 = vrot.slane %v1182_v28, 4 }
 0x174   : > { %v1145_v33 = vrot.slane %v1144_v31, 2  ;;  %v1184_v34 = vadd.f32 %v1183_v32, %v1182_v28 }
 0x176   : > { %v1146_v23 = vadd.f32 %v1145_v33, %v1144_v31  ;;  %v1185_v35 = vrot.slane %v1184_v34, 2 }
 0x178   : > { %v1147_v36 = vrot.slane %v1146_v23, 1  ;;  %v1186_v37 = vadd.f32 %v1185_v35, %v1184_v34 }
 0x17a   : > { %v1148_v40 = vadd.f32 %v1147_v36, %v1146_v23  ;;  %v1187_v41 = vrot.slane %v1186_v37, 1 }
 0x17c   : > { %v1149_v45 = vadd.f32 %v1148_v40, %v1127_v38  ;;  %v1188_v39 = vadd.f32 %v1187_v41, %v1186_v37 }
 0x17e   : > { %1150 = vst [vmem:[#allocation3] sm:$0x1] %v1149_v45  ;;  %v1189_v46 = vadd.f32 %v1188_v39, %v1151_v42 }
 0x180   : > { %1190 = vst [vmem:[#allocation4] sm:$0x1] %v1189_v46 }
 0x181 PF: > { %p1632_p6 = scmp.ne.s32.totalorder %s2109_s15, 1 }
 0x182   : > { %v1308_v57 = vlaneseq (!%p1632_p6)  ;;  %v1282_v59 = vld [vmem:[%s2573_s2] sm:$0x1] (!%p1632_p6)  ;;  %v1292_v63 = vld [vmem:[#allocation2 + $0x8] sm:$0xff] (!%p1632_p6)  ;;  %v1293_v0 = vld [vmem:[#allocation2 + $0x10] sm:$0xff] (!%p1632_p6) }
 0x183   : > { %1274 = sbr.rel (%p1632_p6) target bundleno = 440 (0x1b8), region = 48  ;;  %v1286_v61 = vld [vmem:[%s2574_s3] sm:$0x1] (!%p1632_p6)  ;;  %v1294_v58 = vld [vmem:[#allocation2 + $0x18] sm:$0xff] (!%p1632_p6)  ;;  %v1296_v3 = vld [vmem:[#allocation2 + $0x28] sm:$0xff] (!%p1632_p6) }
 0x184   : > { %v1309_v56 = vshrl.u32 (!%p1632_p6), %v1308_v57, 7  ;;  %v1291_v62 = vld [vmem:[#allocation2] sm:$0xff] (!%p1632_p6)  ;;  %v1297_v4 = vld [vmem:[#allocation2 + $0x30] sm:$0xff] (!%p1632_p6)  ;;  %v1298_v5 = vld [vmem:[#allocation2 + $0x38] sm:$0xff] (!%p1632_p6) }
 0x185   : > { %v1275_v47 = vld [vmem:[#allocation3] sm:$0x1] (!%p1632_p6)  ;;  %v1300_v9 = vld [vmem:[#allocation2 + $0x48] sm:$0xff] (!%p1632_p6)  ;;  %v1301_v10 = vld [vmem:[#allocation2 + $0x50] sm:$0xff] (!%p1632_p6) }
 0x186   : > { %v1276_v49 = vmul.f32 (!%p1632_p6), 0.0078125, %v1275_v47  ;;  %v1310_v53 = vsub.s32 (!%p1632_p6), 0, %v1309_v56  ;;  %v1295_v1 = vld [vmem:[#allocation2 + $0x20] sm:$0xff] (!%p1632_p6)  ;;  %v1302_v16 = vld [vmem:[#allocation2 + $0x58] sm:$0xff] (!%p1632_p6)  ;;  %v1304_v19 = vld [vmem:[#allocation2 + $0x68] sm:$0xff] (!%p1632_p6) }
 0x187   : > { %v1277_v48 = vld [vmem:[#allocation4] sm:$0x1] (!%p1632_p6) }
 0x188   : > { %v1278_v50 = vmul.f32 (!%p1632_p6), 0.0078125, %v1277_v48  ;;  %v1279_v7 = vmul.f32 (!%p1632_p6), %v1276_v49, %v1276_v49  ;;  %v1299_v6 = vld [vmem:[#allocation2 + $0x40] sm:$0xff] (!%p1632_p6) }
 0x189   : > { %v1303_v18 = vld [vmem:[#allocation2 + $0x60] sm:$0xff] (!%p1632_p6) }
 0x18a   : > { %v1280_v51 = vsub.f32 %v1278_v50, %v1279_v7 }
 0x18c   : > { %v1281_v52 = vmax.f32 %v1280_v51, 0.0 }
 0x18e   : > { %v1283_v55 = vadd.f32 1e-05, %v1281_v52 }
 0x190   : > { %2093 = vrsqrt.f32 %v1283_v55 }
 0x19a   : > { %v2094_v8 = vpop.eup %2093 }
 0x19b   : > { %v1285_v60 = vmul.f32 %v2094_v8, %v1282_v59 }
 0x19d   : > { %v1287_v54 = vmul.f32 %v1285_v60, %v1276_v49  ;;  %v2502_v2 = vrot.slane %v1285_v60, %v1310_v53 }
 0x19f   : > { %v1288_v11 = vsub.f32 %v1286_v61, %v1287_v54  ;;  %v1313_v12 = vmul.f32 %v2502_v2, %v1291_v62  ;;  %v1314_v14 = vmul.f32 %v2502_v2, %v1292_v63  ;;  %v1315_v15 = vmul.f32 %v2502_v2, %v1293_v0  ;;  %v1306_v63 = vld [vmem:[#allocation2 + $0x78] sm:$0xff] }
 0x1a0   : > { %v1316_v17 = vmul.f32 %v2502_v2, %v1294_v58  ;;  %v1317_v20 = vmul.f32 %v2502_v2, %v1295_v1  ;;  %v1318_v43 = vmul.f32 %v2502_v2, %v1296_v3  ;;  %v1319_v24 = vmul.f32 %v2502_v2, %v1297_v4 }
 0x1a1   : > { %v2511_v29 = vrot.slane %v1288_v11, %v1310_v53  ;;  %v1320_v21 = vmul.f32 %v2502_v2, %v1298_v5  ;;  %v1321_v44 = vmul.f32 %v2502_v2, %v1299_v6  ;;  %v1322_v25 = vmul.f32 %v2502_v2, %v1300_v9  ;;  %v1305_v53 = vld [vmem:[#allocation2 + $0x70] sm:$0xff] }
 0x1a2   : > { %v1323_v26 = vmul.f32 %v2502_v2, %v1301_v10  ;;  %v1324_v27 = vmul.f32 %v2502_v2, %v1302_v16  ;;  %v1325_v30 = vmul.f32 %v2502_v2, %v1303_v18  ;;  %v1326_v22 = vmul.f32 %v2502_v2, %v1304_v19 }
 0x1a3   : > { %v1335_v13 = vadd.f32 %v2511_v29, %v1313_v12  ;;  %v1336_v28 = vadd.f32 %v2511_v29, %v1314_v14  ;;  %v1337_v31 = vadd.f32 %v2511_v29, %v1315_v15  ;;  %v1338_v32 = vadd.f32 %v2511_v29, %v1316_v17 }
 0x1a4   : > { %v1339_v33 = vadd.f32 %v2511_v29, %v1317_v20  ;;  %v1340_v34 = vadd.f32 %v2511_v29, %v1318_v43  ;;  %v1341_v23 = vadd.f32 %v2511_v29, %v1319_v24  ;;  %v1342_v35 = vadd.f32 %v2511_v29, %v1320_v21 }
 0x1a5   : > { %v1351_v36 = vmul.f32 0.2, %v1335_v13  ;;  %v1352_v37 = vmul.f32 0.2, %v1336_v28  ;;  %v1353_v38 = vmul.f32 0.2, %v1337_v31  ;;  %v1343_v40 = vadd.f32 %v2511_v29, %v1321_v44 }
 0x1a6   : > { %v1354_v41 = vmul.f32 0.2, %v1338_v32  ;;  %v1355_v42 = vmul.f32 0.2, %v1339_v33  ;;  %v1356_v45 = vmul.f32 0.2, %v1340_v34  ;;  %v1344_v39 = vadd.f32 %v2511_v29, %v1322_v25 }
 0x1a7   : > { %v1367_v46 = vmax.f32 %v1335_v13, %v1351_v36  ;;  %v1368_v47 = vmax.f32 %v1336_v28, %v1352_v37  ;;  %v1369_v48 = vmax.f32 %v1337_v31, %v1353_v38  ;;  %v1357_v49 = vmul.f32 0.2, %v1341_v23 }
 0x1a8   : > { %v1370_v50 = vmax.f32 %v1338_v32, %v1354_v41  ;;  %v1371_v7 = vmax.f32 %v1339_v33, %v1355_v42  ;;  %v1372_v51 = vmax.f32 %v1340_v34, %v1356_v45  ;;  %v1358_v52 = vmul.f32 0.2, %v1342_v35 }
 0x1a9   : > { %v1729_v55 = vpack.c.bf16 %v1368_v47, %v1367_v46  ;;  %v1373_v57 = vmax.f32 %v1341_v23, %v1357_v49  ;;  %v1359_v56 = vmul.f32 0.2, %v1343_v40  ;;  %v1360_v59 = vmul.f32 0.2, %v1344_v39 }
 0x1aa   : > { %v1734_v8 = vpack.c.bf16 %v1370_v50, %v1369_v48  ;;  %v1739_v60 = vpack.c.bf16 %v1372_v51, %v1371_v7  ;;  %v1374_v61 = vmax.f32 %v1342_v35, %v1358_v52  ;;  %v1345_v62 = vadd.f32 %v2511_v29, %v1323_v26 }
 0x1ab   : > { %1730 = vst [vmem:[%s2575_s4] sm:$0xff] %v1729_v55   ;;  %v1375_v0 = vmax.f32 %v1343_v40, %v1359_v56  ;;  %v1376_v58 = vmax.f32 %v1344_v39, %v1360_v59  ;;  %v1346_v1 = vadd.f32 %v2511_v29, %v1324_v27  ;;  %v1347_v54 = vadd.f32 %v2511_v29, %v1325_v30 }
 0x1ac   : > { %1773 = vst [vmem:[%s2575_s4 + $0x8] sm:$0xff] %v1734_v8   ;;  %1774 = vst [vmem:[%s2575_s4 + $0x10] sm:$0xff] %v1739_v60   ;;  %v1744_v3 = vpack.c.bf16 %v1374_v61, %v1373_v57  ;;  %v1361_v4 = vmul.f32 0.2, %v1345_v62  ;;  %v1348_v5 = vadd.f32 %v2511_v29, %v1326_v22  ;;  %v1327_v6 = vmul.f32 %v2502_v2, %v1305_v53 }
 0x1ad   : > { %v1749_v9 = vpack.c.bf16 %v1376_v58, %v1375_v0  ;;  %v1362_v10 = vmul.f32 0.2, %v1346_v1  ;;  %v1363_v11 = vmul.f32 0.2, %v1347_v54  ;;  %v1328_v12 = vmul.f32 %v2502_v2, %v1306_v63 }
 0x1ae   : > { %1775 = vst [vmem:[%s2575_s4 + $0x18] sm:$0xff] %v1744_v3   ;;  %v1377_v14 = vmax.f32 %v1345_v62, %v1361_v4  ;;  %v1364_v15 = vmul.f32 0.2, %v1348_v5  ;;  %v1349_v16 = vadd.f32 %v2511_v29, %v1327_v6 }
 0x1af   : > { %1776 = vst [vmem:[%s2575_s4 + $0x20] sm:$0xff] %v1749_v9   ;;  %v1378_v18 = vmax.f32 %v1346_v1, %v1362_v10  ;;  %v1379_v19 = vmax.f32 %v1347_v54, %v1363_v11  ;;  %v1350_v17 = vadd.f32 %v2511_v29, %v1328_v12 }
 0x1b0   : > { %v1380_v20 = vmax.f32 %v1348_v5, %v1364_v15  ;;  %v1365_v43 = vmul.f32 0.2, %v1349_v16 }
 0x1b1   : > { %v1754_v24 = vpack.c.bf16 %v1378_v18, %v1377_v14  ;;  %v1366_v2 = vmul.f32 0.2, %v1350_v17 }
 0x1b2   : > { %v1759_v21 = vpack.c.bf16 %v1380_v20, %v1379_v19  ;;  %v1381_v44 = vmax.f32 %v1349_v16, %v1365_v43 }
 0x1b3   : > { %1777 = vst [vmem:[%s2575_s4 + $0x28] sm:$0xff] %v1754_v24   ;;  %v1382_v25 = vmax.f32 %v1350_v17, %v1366_v2 }
 0x1b4   : > { %1778 = vst [vmem:[%s2575_s4 + $0x30] sm:$0xff] %v1759_v21  }
 0x1b5   : > { %v1764_v26 = vpack.c.bf16 %v1382_v25, %v1381_v44 }
 0x1b7   : > { %1779 = vst [vmem:[%s2575_s4 + $0x38] sm:$0xff] %v1764_v26  }
 0x1b8 PF: > { %s14_s17 = sadd.s32 1, %s2117_s17   ;;  %s2576_s15 = smov %s2113_s16 }
 0x1b9   : > { %p11_p7 = scmp.ge.s32.totalorder %s14_s17, 4   ;;  %s2577_s16 = smov %s2579_s18 }
 0x1bb   :  { %13 = sbr.rel (!%p11_p7) target bundleno = 2 (0x2), region = 80 }

// kernel: discriminator_forward.11
= control target key start
LH: loop header
LB: loop body
LE: loop exit
PB: predicated region body
PF: predicated region fallthrough
CT: control target
= control target key end

     0   :  { %v643_v36 = vmov 0.0   ;;  %vm644_vm0 = vmmov 0   ;;  %s792_s1 = inlined_call_operand.vmem [shape: bf16[640,128], index: 1, kind: input, shape index: {}]   ;;  %s793_s0 = inlined_call_operand.vmem [shape: bf16[8,640], index: 0, kind: input, shape index: {}]   ;;  %s794_s2 = inlined_call_operand.vmem [shape: f32[8,128], index: 2, kind: output, shape index: {}]  }
   0x1   :  { %v598_v0 = vld [vmem:[%s792_s1 + $0x40] sm:$0xff]   ;;  %v602_v4 = vld [vmem:[%s792_s1 + $0x48] sm:$0xff]   ;;  %v606_v8 = vld [vmem:[%s792_s1 + $0x50] sm:$0xff]  }
   0x2   :  { %v599_v1 = vld [vmem:[%s792_s1 + $0xc0] sm:$0xff]   ;;  %523 = vmatprep.subr.bf16.mxu0 %v598_v0  ;;  %v603_v5 = vld [vmem:[%s792_s1 + $0xc8] sm:$0xff]   ;;  %v607_v9 = vld [vmem:[%s792_s1 + $0xd0] sm:$0xff]  }
   0x3   :  { %v600_v2 = vld [vmem:[%s792_s1] sm:$0xff]   ;;  %545 = vmatprep.subr.bf16.mxu1 %v599_v1  ;;  %v604_v6 = vld [vmem:[%s792_s1 + $0x8] sm:$0xff]   ;;  %v608_v10 = vld [vmem:[%s792_s1 + $0x10] sm:$0xff]  }
   0x4   :  { %v601_v3 = vld [vmem:[%s792_s1 + $0x80] sm:$0xff]   ;;  %524 = vmatpush3.bf16.msra.mxu0 %v600_v2  ;;  %v605_v7 = vld [vmem:[%s792_s1 + $0x88] sm:$0xff]   ;;  %v609_v11 = vld [vmem:[%s792_s1 + $0x90] sm:$0xff]  }
   0x5   :  { %546 = vmatpush3.bf16.msra.mxu1 %v601_v3  ;;  %525 = vmatprep.subr.bf16.mxu0 %v602_v4  ;;  %v610_v12 = vld [vmem:[%s792_s1 + $0x58] sm:$0xff]   ;;  %v614_v16 = vld [vmem:[%s792_s1 + $0x60] sm:$0xff]   ;;  %v618_v20 = vld [vmem:[%s792_s1 + $0x68] sm:$0xff]  }
   0x6   :  { %547 = vmatprep.subr.bf16.mxu1 %v603_v5  ;;  %v611_v13 = vld [vmem:[%s792_s1 + $0xd8] sm:$0xff]   ;;  %v615_v17 = vld [vmem:[%s792_s1 + $0xe0] sm:$0xff]   ;;  %v619_v21 = vld [vmem:[%s792_s1 + $0xe8] sm:$0xff]  }
   0x7   :  { %v612_v14 = vld [vmem:[%s792_s1 + $0x18] sm:$0xff]   ;;  %v616_v18 = vld [vmem:[%s792_s1 + $0x20] sm:$0xff]   ;;  %v620_v22 = vld [vmem:[%s792_s1 + $0x28] sm:$0xff]  }
   0x8   :  { %526 = vmatpush3.bf16.msra.mxu0 %v604_v6  ;;  %v613_v15 = vld [vmem:[%s792_s1 + $0x98] sm:$0xff]   ;;  %v617_v19 = vld [vmem:[%s792_s1 + $0xa0] sm:$0xff]   ;;  %v621_v23 = vld [vmem:[%s792_s1 + $0xa8] sm:$0xff]  }
   0x9   :  { %548 = vmatpush3.bf16.msra.mxu1 %v605_v7  ;;  %527 = vmatprep.subr.bf16.mxu0 %v606_v8  ;;  %v622_v24 = vld [vmem:[%s792_s1 + $0x70] sm:$0xff]   ;;  %v626_v28 = vld [vmem:[%s792_s1 + $0x78] sm:$0xff]   ;;  %v12_v32 = vld [vmem:[%s793_s0] sm:$0xff] }
   0xa   :  { %549 = vmatprep.subr.bf16.mxu1 %v607_v9  ;;  %v623_v25 = vld [vmem:[%s792_s1 + $0xf0] sm:$0xff]   ;;  %v627_v29 = vld [vmem:[%s792_s1 + $0xf8] sm:$0xff]   ;;  %v478_v33 = vcombine.low %v12_v32, %v12_v32  ;;  %v479_v34 = vcombine.high %v12_v32, %v12_v32  ;;  %v13_v35 = vld [vmem:[%s793_s0 + $0x8] sm:$0xff] }
   0xb   :  { %v624_v26 = vld [vmem:[%s792_s1 + $0x30] sm:$0xff]   ;;  %v628_v30 = vld [vmem:[%s792_s1 + $0x38] sm:$0xff]   ;;  %v480_v37 = vcombine.low %v13_v35, %v13_v35  ;;  %v481_v38 = vcombine.high %v13_v35, %v13_v35  ;;  %v635_v39 = vld [vmem:[%s792_s1 + $0x100] sm:$0xff]  }
   0xc   :  { %528 = vmatpush3.bf16.msra.mxu0 %v608_v10  ;;  %v625_v27 = vld [vmem:[%s792_s1 + $0xb0] sm:$0xff]   ;;  %v629_v31 = vld [vmem:[%s792_s1 + $0xb8] sm:$0xff]   ;;  %385 = vmatprep.mubr.bf16.mxu0 %v479_v34  ;;  %v636_v40 = vld [vmem:[%s792_s1 + $0x108] sm:$0xff]  }
   0xd   :  { %550 = vmatpush3.bf16.msra.mxu1 %v609_v11  ;;  %529 = vmatprep.subr.bf16.mxu0 %v610_v12  ;;  %v637_v41 = vld [vmem:[%s792_s1 + $0x110] sm:$0xff]   ;;  %v638_v42 = vld [vmem:[%s792_s1 + $0x118] sm:$0xff]   ;;  %v639_v43 = vld [vmem:[%s792_s1 + $0x120] sm:$0xff]  }
   0xe   :  { %551 = vmatprep.subr.bf16.mxu1 %v611_v13  ;;  %425 = vmatprep.mubr.bf16.mxu1 %v481_v38  ;;  %v640_v44 = vld [vmem:[%s792_s1 + $0x128] sm:$0xff]   ;;  %v641_v45 = vld [vmem:[%s792_s1 + $0x130] sm:$0xff]   ;;  %v642_v46 = vld [vmem:[%s792_s1 + $0x138] sm:$0xff]  }
   0xf   :  { %v632_v47 = vld [vmem:[%s793_s0 + $0x10] ss:$0 sps:$4 sm:$0xff]  }
  0x10   :  { %530 = vmatpush3.bf16.msra.mxu0 %v612_v14 }
  0x11   :  { %552 = vmatpush3.bf16.msra.mxu1 %v613_v15  ;;  %531 = vmatprep.subr.bf16.mxu0 %v614_v16 }
  0x12   :  { %553 = vmatprep.subr.bf16.mxu1 %v615_v17 }
  0x14   :  { %532 = vmatpush3.bf16.msra.mxu0 %v616_v18 }
  0x15   :  { %554 = vmatpush3.bf16.msra.mxu1 %v617_v19  ;;  %533 = vmatprep.subr.bf16.mxu0 %v618_v20 }
  0x16   :  { %555 = vmatprep.subr.bf16.mxu1 %v619_v21 }
  0x18   :  { %534 = vmatpush3.bf16.msra.mxu0 %v620_v22 }
  0x19   :  { %556 = vmatpush3.bf16.msra.mxu1 %v621_v23  ;;  %535 = vmatprep.subr.bf16.mxu0 %v622_v24 }
  0x1a   :  { %557 = vmatprep.subr.bf16.mxu1 %v623_v25 }
  0x1c   :  { %536 = vmatpush3.bf16.msra.mxu0 %v624_v26 }
  0x1d   :  { %558 = vmatpush3.bf16.msra.mxu1 %v625_v27  ;;  %537 = vmatprep.subr.bf16.mxu0 %v626_v28 }
  0x1e   :  { %559 = vmatprep.subr.bf16.mxu1 %v627_v29 }
  0x20   :  { %538 = vmatpush3.bf16.msra.mxu0 %v628_v30 }
  0x21   :  { %560 = vmatpush3.bf16.msra.mxu1 %v629_v31  ;;  %576 = vmatprep.subr.bf16.mxu0 %v643_v36 }
  0x23   :  { %386 = vmatmul.mubr.bf16.vlgmr.msra.gmra.mrb[0].mxu0 %v478_v33 }
  0x24   :  { %426 = vmatmul.mubr.bf16.vlgmr.msra.gmra.mrb[0].mxu1 %v480_v37  ;;  %577 = vmatpush3.bf16.msra.mxu0 %v635_v39 }
  0x25   :  { %578 = vmatprep.subr.bf16.mxu0 %v643_v36  ;;  %592 = vmatprep.mubr.msk.bf16.mxu0 %vm644_vm0, %v643_v36 }
  0x28   :  { %579 = vmatpush3.bf16.msra.mxu0 %v636_v40 }
  0x29   :  { %580 = vmatprep.subr.bf16.mxu0 %v643_v36 }
  0x2c   :  { %581 = vmatpush3.bf16.msra.mxu0 %v637_v41 }
  0x2d   :  { %582 = vmatprep.subr.bf16.mxu0 %v643_v36 }
  0x30   :  { %583 = vmatpush3.bf16.msra.mxu0 %v638_v42 }
  0x31   :  { %584 = vmatprep.subr.bf16.mxu0 %v643_v36 }
  0x34   :  { %585 = vmatpush3.bf16.msra.mxu0 %v639_v43 }
  0x35   :  { %586 = vmatprep.subr.bf16.mxu0 %v643_v36 }
  0x38   :  { %587 = vmatpush3.bf16.msra.mxu0 %v640_v44 }
  0x39   :  { %588 = vmatprep.subr.bf16.mxu0 %v643_v36 }
  0x3c   :  { %589 = vmatpush3.bf16.msra.mxu0 %v641_v45 }
  0x3d   :  { %590 = vmatprep.subr.bf16.mxu0 %v643_v36 }
  0x40   :  { %591 = vmatpush3.bf16.msra.mxu0 %v642_v46 }
  0x43   :  { %593 = vmatmul.mubr.bf16.vlgmr.msra.gmra.mrb[4].mxu0 %v632_v47 }
  0xf6   :  { %v539_v48 = vpop.f32.mrb[0].mxu0 }
  0xf7   :  { %v561_v49 = vpop.f32.mrb[0].mxu1  ;;  %v540_v50 = vpop.f32.mrb[1].mxu0 }
  0xf8   :  { %v541_v51 = vadd.f32 %v540_v50, %v539_v48  ;;  %v562_v52 = vpop.f32.mrb[1].mxu1  ;;  %v542_v53 = vpop.f32.mrb[2].mxu0 }
  0xf9   :  { %v563_v54 = vadd.f32 %v562_v52, %v561_v49  ;;  %v543_v55 = vpop.f32.mrb[3].mxu0  ;;  %v564_v56 = vpop.f32.mrb[2].mxu1 }
  0xfa   :  { %v565_v57 = vpop.f32.mrb[3].mxu1 }
  0xfb   :  { %v428_v58 = vadd.f32 %v563_v54, %v541_v51 }
 0x116   :  { %v467_v59 = vpop.f32.mrb[4].mxu0 }
 0x117   :  { %v468_v60 = vadd.f32 %v467_v59, %v428_v58  ;;  %v594_v61 = vpop.f32.mrb[5].mxu0 }
 0x118   :  { %v470_v62 = vpop.f32.mrb[6].mxu0 }
 0x119   :  { %473 = vst [vmem:[%s794_s2] sm:$0xff] %v468_v60  ;;  %v595_v63 = vpop.f32.mrb[7].mxu0 }

// kernel: discriminator_forward.10
= control target key start
LH: loop header
LB: loop body
LE: loop exit
PB: predicated region body
PF: predicated region fallthrough
CT: control target
= control target key end

     0   :  { %s1825_s15 = smov 0   ;;  %s1827_s16 = smov 0   ;;  %s2145_s0 = inlined_call_operand.vmem [shape: bf16[32,1152], index: 0, kind: input, shape index: {}]   ;;  %s2146_s1 = inlined_call_operand.vmem [shape: bf16[1152,128], index: 1, kind: input, shape index: {}]   ;;  %s2147_s2 = inlined_call_operand.vmem [shape: f32[1,128], index: 2, kind: input, shape index: {}]   ;;  %s2148_s3 = inlined_call_operand.vmem [shape: f32[1,128], index: 3, kind: input, shape index: {}]   ;;  %s2149_s4 = inlined_call_operand.vmem [shape: bf16[32,128], index: 4, kind: output, shape index: {}]  }
   0x1   :  { %s1829_s17 = smov 0  }
   0x2 LB: > { %s26_s18 = sadd.s32 1, %s1793_s16  ;;  %p1371_p0 = scmp.ge.s32.totalorder %s1797_s17, 1  ;;  %s1797_s17 = sphi %s1829_s17, %s14_s17   ;;  %s1793_s16 = sphi %s1827_s16, %s2151_s16   ;;  %s1789_s15 = sphi %s1825_s15, %s2150_s15  }
   0x3   : > { %p28_p1 = scmp.ge.s32.totalorder %s26_s18, 2  ;;  %p184_p2 = scmp.lt.s32.totalorder %s1797_s17, 3 }
   0x5   : > { %s2153_s18 = smov (%p28_p1, %s26_s18), 0  ;;  %p185_p3 = pnand %p1371_p0, %p184_p2 }
   0x6   : > { %p231_p4 = scmp.eq.s32.totalorder (!%p185_p3), %s1789_s15, 0 }
   0x7   : > { %188 = sbr.rel (%p185_p3) target bundleno = 404 (0x194), region = 36 }
   0xe   : > { %236 = sbr.rel (!%p231_p4) target bundleno = 21 (0x15), region = 40  ;;  %v1799_v0 = vmov (%p231_p4), 0.0  }
   0xf   : > { %237 = vst [vmem:[#allocation3] sm:$0x1] (%p231_p4), %v1799_v0  ;;  %238 = vst [vmem:[#allocation4] sm:$0x1] (%p231_p4), %v1799_v0 }
  0x15 PF: > { %p1373_p5 = scmp.ne.s32.totalorder %s1789_s15, 0 }
  0x16   : > { %v1675_v1 = vld [vmem:[%s2146_s1 + $0x40] sm:$0xff] (!%p1373_p5)   ;;  %v1679_v5 = vld [vmem:[%s2146_s1 + $0x48] sm:$0xff] (!%p1373_p5)   ;;  %v1683_v9 = vld [vmem:[%s2146_s1 + $0x50] sm:$0xff] (!%p1373_p5)  }
  0x17   : > { %241 = sbr.rel (%p1373_p5) target bundleno = 360 (0x168), region = 44  ;;  %v1676_v2 = vld [vmem:[%s2146_s1 + $0xc0] sm:$0xff] (!%p1373_p5)   ;;  %1508 = vmatprep.subr.bf16.mxu0 (!%p1373_p5), %v1675_v1  ;;  %v1680_v6 = vld [vmem:[%s2146_s1 + $0xc8] sm:$0xff] (!%p1373_p5)   ;;  %v1684_v10 = vld [vmem:[%s2146_s1 + $0xd0] sm:$0xff] (!%p1373_p5)  }
  0x18   : > { %v1677_v3 = vld [vmem:[%s2146_s1] sm:$0xff] (!%p1373_p5)   ;;  %1536 = vmatprep.subr.bf16.mxu1 (!%p1373_p5), %v1676_v2  ;;  %v1681_v7 = vld [vmem:[%s2146_s1 + $0x8] sm:$0xff] (!%p1373_p5)   ;;  %v1685_v11 = vld [vmem:[%s2146_s1 + $0x10] sm:$0xff] (!%p1373_p5)  }
  0x19   : > { %v1678_v4 = vld [vmem:[%s2146_s1 + $0x80] sm:$0xff] (!%p1373_p5)   ;;  %1509 = vmatpush3.bf16.msra.mxu0 (!%p1373_p5), %v1677_v3  ;;  %v1682_v8 = vld [vmem:[%s2146_s1 + $0x88] sm:$0xff] (!%p1373_p5)   ;;  %v1686_v12 = vld [vmem:[%s2146_s1 + $0x90] sm:$0xff] (!%p1373_p5)  }
  0x1a   : > { %1537 = vmatpush3.bf16.msra.mxu1 (!%p1373_p5), %v1678_v4  ;;  %1510 = vmatprep.subr.bf16.mxu0 (!%p1373_p5), %v1679_v5  ;;  %v1687_v13 = vld [vmem:[%s2146_s1 + $0x58] sm:$0xff] (!%p1373_p5)   ;;  %v1691_v17 = vld [vmem:[%s2146_s1 + $0x60] sm:$0xff] (!%p1373_p5)   ;;  %v1695_v21 = vld [vmem:[%s2146_s1 + $0x68] sm:$0xff] (!%p1373_p5)  }
  0x1b   : > { %1538 = vmatprep.subr.bf16.mxu1 (!%p1373_p5), %v1680_v6  ;;  %v1688_v14 = vld [vmem:[%s2146_s1 + $0xd8] sm:$0xff] (!%p1373_p5)   ;;  %v1692_v18 = vld [vmem:[%s2146_s1 + $0xe0] sm:$0xff] (!%p1373_p5)   ;;  %v1696_v22 = vld [vmem:[%s2146_s1 + $0xe8] sm:$0xff] (!%p1373_p5)  }
  0x1c   : > { %v1689_v15 = vld [vmem:[%s2146_s1 + $0x18] sm:$0xff] (!%p1373_p5)   ;;  %v1693_v19 = vld [vmem:[%s2146_s1 + $0x20] sm:$0xff] (!%p1373_p5)   ;;  %v1697_v23 = vld [vmem:[%s2146_s1 + $0x28] sm:$0xff] (!%p1373_p5)  }
  0x1d   : > { %1511 = vmatpush3.bf16.msra.mxu0 (!%p1373_p5), %v1681_v7  ;;  %v1690_v16 = vld [vmem:[%s2146_s1 + $0x98] sm:$0xff] (!%p1373_p5)   ;;  %v1694_v20 = vld [vmem:[%s2146_s1 + $0xa0] sm:$0xff] (!%p1373_p5)   ;;  %v1698_v24 = vld [vmem:[%s2146_s1 + $0xa8] sm:$0xff] (!%p1373_p5)  }
  0x1e   : > { %1539 = vmatpush3.bf16.msra.mxu1 %v1682_v8  ;;  %1512 = vmatprep.subr.bf16.mxu0 %v1683_v9  ;;  %v1699_v25 = vld [vmem:[%s2146_s1 + $0x70] sm:$0xff]   ;;  %v1703_v29 = vld [vmem:[%s2146_s1 + $0x78] sm:$0xff]   ;;  %v1707_v33 = vld [vmem:[%s2145_s0] ss:$36 sps:$4 sm:$0xff]  }
  0x1f   : > { %1540 = vmatprep.subr.bf16.mxu1 %v1684_v10  ;;  %v1700_v26 = vld [vmem:[%s2146_s1 + $0xf0] sm:$0xff]   ;;  %v1704_v30 = vld [vmem:[%s2146_s1 + $0xf8] sm:$0xff]   ;;  %v1709_v34 = vld [vmem:[%s2145_s0 + $0x4] ss:$36 sps:$4 sm:$0xff]  }
  0x20   : > { %v1701_v27 = vld [vmem:[%s2146_s1 + $0x30] sm:$0xff]   ;;  %v1705_v31 = vld [vmem:[%s2146_s1 + $0x38] sm:$0xff]   ;;  %v1710_v35 = vld [vmem:[%s2145_s0 + $0x8] ss:$36 sps:$4 sm:$0xff]   ;;  %962 = vmatprep.mubr.bf16.mxu0 %v1709_v34 }
  0x21   : > { %1513 = vmatpush3.bf16.msra.mxu0 %v1685_v11  ;;  %v1702_v28 = vld [vmem:[%s2146_s1 + $0xb0] sm:$0xff]   ;;  %v1706_v32 = vld [vmem:[%s2146_s1 + $0xb8] sm:$0xff]   ;;  %v1713_v37 = vld [vmem:[%s2146_s1 + $0x140] sm:$0xff]  }
  0x22   : > { %1541 = vmatpush3.bf16.msra.mxu1 %v1686_v12  ;;  %1514 = vmatprep.subr.bf16.mxu0 %v1687_v13  ;;  %v1712_v36 = vld [vmem:[%s2145_s0 + $0xc] ss:$36 sps:$4 sm:$0xff]   ;;  %v1714_v38 = vld [vmem:[%s2146_s1 + $0x100] sm:$0xff]   ;;  %v1725_v49 = vld [vmem:[%s2146_s1 + $0x158] sm:$0xff]  }
  0x23   : > { %1542 = vmatprep.subr.bf16.mxu1 %v1688_v14  ;;  %1011 = vmatprep.mubr.bf16.mxu1 %v1712_v36  ;;  %v1715_v39 = vld [vmem:[%s2146_s1 + $0x1c0] sm:$0xff]   ;;  %v1717_v41 = vld [vmem:[%s2146_s1 + $0x148] sm:$0xff]   ;;  %v1721_v45 = vld [vmem:[%s2146_s1 + $0x150] sm:$0xff]  }
  0x24   : > { %v1716_v40 = vld [vmem:[%s2146_s1 + $0x180] sm:$0xff]   ;;  %v1718_v42 = vld [vmem:[%s2146_s1 + $0x108] sm:$0xff]   ;;  %v1722_v46 = vld [vmem:[%s2146_s1 + $0x110] sm:$0xff]  }
  0x25   : > { %1515 = vmatpush3.bf16.msra.mxu0 %v1689_v15  ;;  %v1719_v43 = vld [vmem:[%s2146_s1 + $0x1c8] sm:$0xff]   ;;  %v1723_v47 = vld [vmem:[%s2146_s1 + $0x1d0] sm:$0xff]   ;;  %v1726_v50 = vld [vmem:[%s2146_s1 + $0x118] sm:$0xff]  }
  0x26   : > { %1543 = vmatpush3.bf16.msra.mxu1 %v1690_v16  ;;  %1516 = vmatprep.subr.bf16.mxu0 %v1691_v17  ;;  %v1720_v44 = vld [vmem:[%s2146_s1 + $0x188] sm:$0xff]   ;;  %v1724_v48 = vld [vmem:[%s2146_s1 + $0x190] sm:$0xff]   ;;  %v1727_v51 = vld [vmem:[%s2146_s1 + $0x1d8] sm:$0xff]  }
  0x27   : > { %1544 = vmatprep.subr.bf16.mxu1 %v1692_v18  ;;  %v1728_v52 = vld [vmem:[%s2146_s1 + $0x198] sm:$0xff]   ;;  %v1729_v53 = vld [vmem:[%s2146_s1 + $0x160] sm:$0xff]   ;;  %v1733_v57 = vld [vmem:[%s2146_s1 + $0x168] sm:$0xff]  }
  0x28   : > { %v1730_v54 = vld [vmem:[%s2146_s1 + $0x120] sm:$0xff]   ;;  %v1734_v58 = vld [vmem:[%s2145_s0 + $0x4c] ss:$36 sps:$4 sm:$0xff]   ;;  %v1736_v59 = vld [vmem:[%s2145_s0 + $0x54] ss:$36 sps:$4 sm:$0xff]  }
  0x29   : > { %1517 = vmatpush3.bf16.msra.mxu0 %v1693_v19  ;;  %v1731_v55 = vld [vmem:[%s2146_s1 + $0x1e0] sm:$0xff]   ;;  %v1738_v60 = vld [vmem:[%s2146_s1 + $0x128] sm:$0xff]   ;;  %v1740_v62 = vld [vmem:[%s2145_s0 + $0x50] ss:$36 sps:$4 sm:$0xff]  }
  0x2a   : > { %1545 = vmatpush3.bf16.msra.mxu1 %v1694_v20  ;;  %1518 = vmatprep.subr.bf16.mxu0 %v1695_v21  ;;  %v1732_v56 = vld [vmem:[%s2146_s1 + $0x1a0] sm:$0xff]   ;;  %v1739_v61 = vld [vmem:[%s2145_s0 + $0x48] ss:$36 sps:$4 sm:$0xff]   ;;  %v1743_v1 = vld [vmem:[%s2146_s1 + $0x170] sm:$0xff]  }
  0x2b   : > { %1546 = vmatprep.subr.bf16.mxu1 %v1696_v22  ;;  %v1741_v63 = vld [vmem:[%s2146_s1 + $0x1e8] sm:$0xff]   ;;  %v1744_v2 = vld [vmem:[%s2146_s1 + $0x130] sm:$0xff]   ;;  %v1747_v5 = vld [vmem:[%s2146_s1 + $0x178] sm:$0xff]  }
  0x2c   : > { %v1742_v0 = vld [vmem:[%s2146_s1 + $0x1a8] sm:$0xff]   ;;  %v1745_v3 = vld [vmem:[%s2146_s1 + $0x1f0] sm:$0xff]   ;;  %v1748_v6 = vld [vmem:[%s2146_s1 + $0x138] sm:$0xff]  }
  0x2d   : > { %1519 = vmatpush3.bf16.msra.mxu0 %v1697_v23  ;;  %v1746_v4 = vld [vmem:[%s2146_s1 + $0x1b0] sm:$0xff]   ;;  %v1749_v7 = vld [vmem:[%s2146_s1 + $0x1f8] sm:$0xff]   ;;  %v1754_v11 = vld [vmem:[%s2146_s1 + $0x200] sm:$0xff]  }
  0x2e   : > { %1547 = vmatpush3.bf16.msra.mxu1 %v1698_v24  ;;  %1520 = vmatprep.subr.bf16.mxu0 %v1699_v25  ;;  %v1750_v8 = vld [vmem:[%s2145_s0 + $0x10] ss:$36 sps:$4 sm:$0xff]   ;;  %v1753_v10 = vld [vmem:[%s2146_s1 + $0x1b8] sm:$0xff]   ;;  %v1758_v14 = vld [vmem:[%s2146_s1 + $0x208] sm:$0xff]  }
  0x2f   : > { %1548 = vmatprep.subr.bf16.mxu1 %v1700_v26  ;;  %v1752_v9 = vld [vmem:[%s2145_s0 + $0x14] ss:$36 sps:$4 sm:$0xff]   ;;  %v1757_v13 = vld [vmem:[%s2145_s0 + $0x1c] ss:$36 sps:$4 sm:$0xff]   ;;  %v1763_v18 = vld [vmem:[%s2145_s0 + $0x64] ss:$36 sps:$4 sm:$0xff]  }
  0x30   : > { %v1755_v12 = vld [vmem:[%s2145_s0 + $0x18] ss:$36 sps:$4 sm:$0xff]   ;;  %v1762_v17 = vld [vmem:[%s2146_s1 + $0x210] sm:$0xff]   ;;  %v1765_v19 = vld [vmem:[%s2145_s0 + $0x60] ss:$36 sps:$4 sm:$0xff]  }
  0x31   : > { %1521 = vmatpush3.bf16.msra.mxu0 %v1701_v27  ;;  %v1759_v15 = vld [vmem:[%s2145_s0 + $0x5c] ss:$36 sps:$4 sm:$0xff]   ;;  %v1768_v23 = vld [vmem:[%s2146_s1 + $0x228] sm:$0xff]   ;;  %v1769_v24 = vld [vmem:[%s2146_s1 + $0x230] sm:$0xff]  }
  0x32   : > { %1549 = vmatpush3.bf16.msra.mxu1 %v1702_v28  ;;  %1522 = vmatprep.subr.bf16.mxu0 %v1703_v29  ;;  %v1761_v16 = vld [vmem:[%s2145_s0 + $0x58] ss:$36 sps:$4 sm:$0xff]   ;;  %v1767_v21 = vld [vmem:[%s2146_s1 + $0x220] sm:$0xff]   ;;  %v1772_v26 = vld [vmem:[%s2145_s0 + $0x68] ss:$36 sps:$4 sm:$0xff]  }
  0x33   : > { %1550 = vmatprep.subr.bf16.mxu1 %v1704_v30  ;;  %v1766_v20 = vld [vmem:[%s2146_s1 + $0x218] sm:$0xff]   ;;  %v1771_v22 = vld [vmem:[%s2145_s0 + $0x20] ss:$36 sps:$4 sm:$0xff]  }
  0x34   : > { %v1770_v25 = vld [vmem:[%s2146_s1 + $0x238] sm:$0xff]  }
  0x35   : > { %1523 = vmatpush3.bf16.msra.mxu0 %v1705_v31 }
  0x36   : > { %1551 = vmatpush3.bf16.msra.mxu1 %v1706_v32  ;;  %1564 = vmatprep.subr.bf16.mxu0 %v1713_v37 }
  0x37   : > { %1592 = vmatprep.subr.bf16.mxu1 %v1715_v39 }
  0x38   : > { %963 = vmatmul.mubr.bf16.vlgmr.msra.gmra.mrb[0].mxu0 %v1707_v33 }
  0x39   : > { %1012 = vmatmul.mubr.bf16.vlgmr.msra.gmra.mrb[0].mxu1 %v1710_v35  ;;  %1565 = vmatpush3.bf16.msra.mxu0 %v1714_v38 }
  0x3a   : > { %1593 = vmatpush3.bf16.msra.mxu1 %v1716_v40  ;;  %1566 = vmatprep.subr.bf16.mxu0 %v1717_v41 }
  0x3b   : > { %1594 = vmatprep.subr.bf16.mxu1 %v1719_v43  ;;  %970 = vmatprep.mubr.bf16.mxu0 %v1734_v58 }
  0x3c   : > { %1019 = vmatprep.mubr.bf16.mxu1 %v1736_v59 }
  0x3d   : > { %1567 = vmatpush3.bf16.msra.mxu0 %v1718_v42 }
  0x3e   : > { %1595 = vmatpush3.bf16.msra.mxu1 %v1720_v44  ;;  %1568 = vmatprep.subr.bf16.mxu0 %v1721_v45 }
  0x3f   : > { %1596 = vmatprep.subr.bf16.mxu1 %v1723_v47 }
  0x40   : > { %971 = vmatmul.mubr.bf16.gmra.mrb[4].mxu0 %v1739_v61 }
  0x41   : > { %1569 = vmatpush3.bf16.msra.mxu0 %v1722_v46  ;;  %1020 = vmatmul.mubr.bf16.gmra.mrb[4].mxu1 %v1740_v62 }
  0x42   : > { %1597 = vmatpush3.bf16.msra.mxu1 %v1724_v48  ;;  %1570 = vmatprep.subr.bf16.mxu0 %v1725_v49 }
  0x43   : > { %1598 = vmatprep.subr.bf16.mxu1 %v1727_v51  ;;  %1060 = vmatprep.mubr.bf16.mxu0 %v1752_v9 }
  0x44   : > { %1109 = vmatprep.mubr.bf16.mxu1 %v1757_v13 }
  0x45   : > { %1571 = vmatpush3.bf16.msra.mxu0 %v1726_v50 }
  0x46   : > { %1599 = vmatpush3.bf16.msra.mxu1 %v1728_v52  ;;  %1572 = vmatprep.subr.bf16.mxu0 %v1729_v53 }
  0x47   : > { %1600 = vmatprep.subr.bf16.mxu1 %v1731_v55 }
  0x49   : > { %1573 = vmatpush3.bf16.msra.mxu0 %v1730_v54 }
  0x4a   : > { %1601 = vmatpush3.bf16.msra.mxu1 %v1732_v56  ;;  %1574 = vmatprep.subr.bf16.mxu0 %v1733_v57 }
  0x4b   : > { %1602 = vmatprep.subr.bf16.mxu1 %v1741_v63 }
  0x4d   : > { %1575 = vmatpush3.bf16.msra.mxu0 %v1738_v60 }
  0x4e   : > { %1603 = vmatpush3.bf16.msra.mxu1 %v1742_v0  ;;  %1576 = vmatprep.subr.bf16.mxu0 %v1743_v1 }
  0x4f   : > { %1604 = vmatprep.subr.bf16.mxu1 %v1745_v3 }
  0x51   : > { %1577 = vmatpush3.bf16.msra.mxu0 %v1744_v2 }
  0x52   : > { %1605 = vmatpush3.bf16.msra.mxu1 %v1746_v4  ;;  %1578 = vmatprep.subr.bf16.mxu0 %v1747_v5 }
  0x53   : > { %1606 = vmatprep.subr.bf16.mxu1 %v1749_v7 }
  0x55   : > { %1579 = vmatpush3.bf16.msra.mxu0 %v1748_v6 }
  0x56   : > { %1607 = vmatpush3.bf16.msra.mxu1 %v1753_v10  ;;  %1630 = vmatprep.subr.bf16.mxu0 %v1754_v11 }
  0x58   : > { %1061 = vmatmul.mubr.bf16.vlgmr.msra.gmra.mrb[8].mxu0 %v1750_v8 }
  0x59   : > { %1631 = vmatpush3.bf16.msra.mxu0 %v1754_v11  ;;  %1110 = vmatmul.mubr.bf16.vlgmr.msra.gmra.mrb[8].mxu1 %v1755_v12 }
  0x5a   : > { %1632 = vmatprep.subr.bf16.mxu0 %v1758_v14  ;;  %1068 = vmatprep.mubr.bf16.mxu0 %v1759_v15 }
  0x5b   : > { %1117 = vmatprep.mubr.bf16.mxu1 %v1763_v18 }
  0x5d   : > { %1633 = vmatpush3.bf16.msra.mxu0 %v1758_v14 }
  0x5e   : > { %1634 = vmatprep.subr.bf16.mxu0 %v1762_v17 }
  0x60   : > { %1069 = vmatmul.mubr.bf16.gmra.mrb[12].mxu0 %v1761_v16 }
  0x61   : > { %1635 = vmatpush3.bf16.msra.mxu0 %v1762_v17  ;;  %1118 = vmatmul.mubr.bf16.gmra.mrb[12].mxu1 %v1765_v19 }
  0x62   : > { %1636 = vmatprep.subr.bf16.mxu0 %v1766_v20  ;;  %1646 = vmatprep.mubr.bf16.mxu0 %v1771_v22 }
  0x65   : > { %1637 = vmatpush3.bf16.msra.mxu0 %v1766_v20 }
  0x66   : > { %1638 = vmatprep.subr.bf16.mxu0 %v1767_v21 }
  0x69   : > { %1639 = vmatpush3.bf16.msra.mxu0 %v1767_v21 }
  0x6a   : > { %1640 = vmatprep.subr.bf16.mxu0 %v1768_v23 }
  0x6d   : > { %1641 = vmatpush3.bf16.msra.mxu0 %v1768_v23 }
  0x6e   : > { %1642 = vmatprep.subr.bf16.mxu0 %v1769_v24 }
  0x71   : > { %1643 = vmatpush3.bf16.msra.mxu0 %v1769_v24 }
  0x72   : > { %1644 = vmatprep.subr.bf16.mxu0 %v1770_v25 }
  0x75   : > { %1645 = vmatpush3.bf16.msra.mxu0 %v1770_v25 }
  0x78   : > { %1647 = vmatmul.mubr.bf16.vlgmr.msra.gmra.mrb[16].mxu0 %v1772_v26 }
 0x10b   : > { %v1524_v27 = vpop.f32.mrb[0].mxu0 }
 0x10c   : > { %v1552_v28 = vpop.f32.mrb[0].mxu1  ;;  %v1525_v29 = vpop.f32.mrb[1].mxu0 }
 0x10d   : > { %v1526_v30 = vadd.f32 %v1525_v29, %v1524_v27  ;;  %v1553_v31 = vpop.f32.mrb[1].mxu1  ;;  %v1527_v32 = vpop.f32.mrb[2].mxu0 }
 0x10e   : > { %v1554_v33 = vadd.f32 %v1553_v31, %v1552_v28  ;;  %v1555_v34 = vpop.f32.mrb[2].mxu1  ;;  %v1528_v35 = vpop.f32.mrb[3].mxu0 }
 0x10f   : > { %v1529_v36 = vadd.f32 %v1528_v35, %v1527_v32  ;;  %v1556_v37 = vpop.f32.mrb[3].mxu1 }
 0x110   : > { %v1014_v38 = vadd.f32 %v1554_v33, %v1526_v30  ;;  %v1557_v39 = vadd.f32 %v1556_v37, %v1555_v34 }
 0x112   : > { %v1017_v40 = vadd.f32 %v1557_v39, %v1529_v36 }
 0x113   : > { %v1530_v41 = vpop.f32.mrb[4].mxu0 }
 0x114   : > { %v1558_v42 = vpop.f32.mrb[4].mxu1  ;;  %v1531_v43 = vpop.f32.mrb[5].mxu0 }
 0x115   : > { %v1559_v44 = vpop.f32.mrb[5].mxu1  ;;  %v1532_v45 = vadd.f32 %v1531_v43, %v1530_v41  ;;  %v1533_v47 = vpop.f32.mrb[6].mxu0 }
 0x116   : > { %v1560_v46 = vadd.f32 %v1559_v44, %v1558_v42  ;;  %v1561_v48 = vpop.f32.mrb[6].mxu1  ;;  %v1534_v49 = vpop.f32.mrb[7].mxu0 }
 0x117   : > { %v1562_v50 = vpop.f32.mrb[7].mxu1  ;;  %v1535_v52 = vadd.f32 %v1534_v49, %v1533_v47 }
 0x118   : > { %v1022_v51 = vadd.f32 %v1560_v46, %v1532_v45  ;;  %v1563_v53 = vadd.f32 %v1562_v50, %v1561_v48 }
 0x11a   : > { %v1025_v54 = vadd.f32 %v1563_v53, %v1535_v52  ;;  %v1181_v52 = vld [vmem:[#allocation3] sm:$0x1] }
 0x12b   : > { %v1580_v55 = vpop.f32.mrb[8].mxu0 }
 0x12c   : > { %v1581_v56 = vpop.f32.mrb[9].mxu0  ;;  %v1608_v59 = vpop.f32.mrb[8].mxu1 }
 0x12d   : > { %v1582_v57 = vadd.f32 %v1581_v56, %v1580_v55  ;;  %v1583_v58 = vpop.f32.mrb[10].mxu0  ;;  %v1609_v63 = vpop.f32.mrb[9].mxu1  ;;  %v1193_v55 = vld [vmem:[#allocation4] sm:$0x1] }
 0x12e   : > { %v1584_v60 = vpop.f32.mrb[11].mxu0  ;;  %v1610_v0 = vadd.f32 %v1609_v63, %v1608_v59  ;;  %v1611_v1 = vpop.f32.mrb[10].mxu1 }
 0x12f   : > { %v1063_v61 = vadd.f32 %v1582_v57, %v1014_v38  ;;  %v1585_v62 = vadd.f32 %v1584_v60, %v1583_v58  ;;  %v1612_v3 = vpop.f32.mrb[11].mxu1 }
 0x130   : > { %v1613_v4 = vadd.f32 %v1612_v3, %v1611_v1 }
 0x131   : > { %v1066_v2 = vadd.f32 %v1585_v62, %v1017_v40  ;;  %v1112_v5 = vadd.f32 %v1610_v0, %v1063_v61 }
 0x133   : > { %v1586_v6 = vpop.f32.mrb[12].mxu0  ;;  %v1115_v8 = vadd.f32 %v1613_v4, %v1066_v2 }
 0x134   : > { %v1587_v7 = vpop.f32.mrb[13].mxu0  ;;  %v1614_v11 = vpop.f32.mrb[12].mxu1 }
 0x135   : > { %v1588_v9 = vadd.f32 %v1587_v7, %v1586_v6  ;;  %v1589_v10 = vpop.f32.mrb[14].mxu0  ;;  %v1615_v15 = vpop.f32.mrb[13].mxu1 }
 0x136   : > { %v1590_v12 = vpop.f32.mrb[15].mxu0  ;;  %v1616_v16 = vadd.f32 %v1615_v15, %v1614_v11  ;;  %v1617_v17 = vpop.f32.mrb[14].mxu1 }
 0x137   : > { %v1071_v13 = vadd.f32 %v1588_v9, %v1022_v51  ;;  %v1591_v14 = vadd.f32 %v1590_v12, %v1589_v10  ;;  %v1618_v19 = vpop.f32.mrb[15].mxu1 }
 0x138   : > { %v1619_v20 = vadd.f32 %v1618_v19, %v1617_v17 }
 0x139   : > { %v1074_v18 = vadd.f32 %v1591_v14, %v1025_v54  ;;  %v1120_v21 = vadd.f32 %v1616_v16, %v1071_v13 }
 0x13b   : > { %v1123_v22 = vadd.f32 %v1619_v20, %v1074_v18 }
 0x14b   : > { %v1648_v23 = vpop.f32.mrb[16].mxu0 }
 0x14c   : > { %v1169_v24 = vadd.f32 %v1648_v23, %v1120_v21  ;;  %v1160_v25 = vpop.f32.mrb[17].mxu0 }
 0x14d   : > { %v1161_v26 = vadd.f32 %v1160_v25, %v1112_v5  ;;  %v1649_v27 = vpop.f32.mrb[18].mxu0 }
 0x14e   : > { %1179 = vst [vmem:[#allocation2 + $0x10] sm:$0xff] %v1169_v24  ;;  %v1172_v28 = vadd.f32 %v1649_v27, %v1123_v22  ;;  %v1163_v29 = vpop.f32.mrb[19].mxu0  ;;  %v1196_v36 = vmul.f32 %v1169_v24, %v1169_v24 }
 0x14f   : > { %1177 = vst [vmem:[#allocation2] sm:$0xff] %v1161_v26  ;;  %v1164_v30 = vadd.f32 %v1163_v29, %v1115_v8  ;;  %v1194_v32 = vmul.f32 %v1161_v26, %v1161_v26 }
 0x150   : > { %1180 = vst [vmem:[#allocation2 + $0x18] sm:$0xff] %v1172_v28  ;;  %v1494_v31 = vpack.c.bf16 %v1172_v28, %v1169_v24  ;;  %v1197_v39 = vmul.f32 %v1172_v28, %v1172_v28 }
 0x151   : > { %1178 = vst [vmem:[#allocation2 + $0x8] sm:$0xff] %v1164_v30  ;;  %v1182_v33 = vadd.f32 %v1164_v30, %v1161_v26  ;;  %v1195_v34 = vmul.f32 %v1164_v30, %v1164_v30  ;;  %v1489_v35 = vpack.c.bf16 %v1164_v30, %v1161_v26 }
 0x152   : > { %1506 = vst [vmem:[%s2149_s4 + $0x8] sm:$0xff] %v1494_v31  }
 0x153   : > { %v1183_v37 = vadd.f32 %v1182_v33, %v1169_v24  ;;  %v1198_v38 = vadd.f32 %v1195_v34, %v1194_v32  ;;  %1490 = vst [vmem:[%s2149_s4] sm:$0xff] %v1489_v35  }
 0x155   : > { %v1184_v40 = vadd.f32 %v1183_v37, %v1172_v28  ;;  %v1199_v41 = vadd.f32 %v1198_v38, %v1196_v36 }
 0x157   : > { %v1185_v42 = vrot.slane %v1184_v40, 4  ;;  %v1200_v43 = vadd.f32 %v1199_v41, %v1197_v39 }
 0x159   : > { %v1186_v44 = vadd.f32 %v1185_v42, %v1184_v40  ;;  %v1201_v45 = vrot.slane %v1200_v43, 4 }
 0x15b   : > { %v1187_v46 = vrot.slane %v1186_v44, 2  ;;  %v1202_v47 = vadd.f32 %v1201_v45, %v1200_v43 }
 0x15d   : > { %v1188_v48 = vadd.f32 %v1187_v46, %v1186_v44  ;;  %v1203_v49 = vrot.slane %v1202_v47, 2 }
 0x15f   : > { %v1189_v50 = vrot.slane %v1188_v48, 1  ;;  %v1204_v51 = vadd.f32 %v1203_v49, %v1202_v47 }
 0x161   : > { %v1190_v53 = vadd.f32 %v1189_v50, %v1188_v48  ;;  %v1205_v54 = vrot.slane %v1204_v51, 1 }
 0x163   : > { %v1191_v56 = vadd.f32 %v1190_v53, %v1181_v52  ;;  %v1206_v57 = vadd.f32 %v1205_v54, %v1204_v51 }
 0x165   : > { %1192 = vst [vmem:[#allocation3] sm:$0x1] %v1191_v56  ;;  %v1207_v58 = vadd.f32 %v1206_v57, %v1193_v55 }
 0x167   : > { %1208 = vst [vmem:[#allocation4] sm:$0x1] %v1207_v58 }
 0x168 PF: > { %p1468_p6 = scmp.ne.s32.totalorder %s1789_s15, 1 }
 0x169   : > { %v1254_v3 = vlaneseq (!%p1468_p6)  ;;  %v1240_v5 = vld [vmem:[%s2147_s2] sm:$0x1] (!%p1468_p6)  ;;  %v1250_v11 = vld [vmem:[#allocation2 + $0x8] sm:$0xff] (!%p1468_p6)  ;;  %v1251_v12 = vld [vmem:[#allocation2 + $0x10] sm:$0xff] (!%p1468_p6) }
 0x16a   : > { %1232 = sbr.rel (%p1468_p6) target bundleno = 404 (0x194), region = 48  ;;  %v1244_v9 = vld [vmem:[%s2148_s3] sm:$0x1] (!%p1468_p6)  ;;  %v1252_v15 = vld [vmem:[#allocation2 + $0x18] sm:$0xff] (!%p1468_p6) }
 0x16b   : > { %v1255_v4 = vshrl.u32 (!%p1468_p6), %v1254_v3, 7  ;;  %v1249_v10 = vld [vmem:[#allocation2] sm:$0xff] (!%p1468_p6) }
 0x16c   : > { %v1233_v59 = vld [vmem:[#allocation3] sm:$0x1] (!%p1468_p6) }
 0x16d   : > { %v1234_v61 = vmul.f32 (!%p1468_p6), 0.03125, %v1233_v59  ;;  %v1256_v6 = vsub.s32 (!%p1468_p6), 0, %v1255_v4 }
 0x16e   : > { %v1235_v60 = vld [vmem:[#allocation4] sm:$0x1] (!%p1468_p6) }
 0x16f   : > { %v1236_v62 = vmul.f32 (!%p1468_p6), 0.03125, %v1235_v60  ;;  %v1237_v63 = vmul.f32 (!%p1468_p6), %v1234_v61, %v1234_v61 }
 0x171   : > { %v1238_v0 = vsub.f32 %v1236_v62, %v1237_v63 }
 0x173   : > { %v1239_v1 = vmax.f32 %v1238_v0, 0.0 }
 0x175   : > { %v1241_v2 = vadd.f32 1e-05, %v1239_v1 }
 0x177   : > { %1773 = vrsqrt.f32 %v1241_v2 }
 0x181   : > { %v1774_v7 = vpop.eup %1773 }
 0x182   : > { %v1243_v8 = vmul.f32 %v1774_v7, %v1240_v5 }
 0x184   : > { %v1245_v13 = vmul.f32 %v1243_v8, %v1234_v61  ;;  %v1257_v14 = vrot.slane %v1243_v8, %v1256_v6 }
 0x186   : > { %v1246_v16 = vsub.f32 %v1244_v9, %v1245_v13  ;;  %v1259_v17 = vmul.f32 %v1257_v14, %v1249_v10  ;;  %v1260_v18 = vmul.f32 %v1257_v14, %v1250_v11  ;;  %v1261_v19 = vmul.f32 %v1257_v14, %v1251_v12 }
 0x187   : > { %v1262_v20 = vmul.f32 %v1257_v14, %v1252_v15 }
 0x188   : > { %v1267_v21 = vrot.slane %v1246_v16, %v1256_v6 }
 0x18a   : > { %v1269_v22 = vadd.f32 %v1267_v21, %v1259_v17  ;;  %v1270_v23 = vadd.f32 %v1267_v21, %v1260_v18  ;;  %v1271_v24 = vadd.f32 %v1267_v21, %v1261_v19  ;;  %v1272_v25 = vadd.f32 %v1267_v21, %v1262_v20 }
 0x18c   : > { %v1273_v26 = vmul.f32 0.2, %v1269_v22  ;;  %v1274_v27 = vmul.f32 0.2, %v1270_v23  ;;  %v1275_v28 = vmul.f32 0.2, %v1271_v24 }
 0x18d   : > { %v1276_v29 = vmul.f32 0.2, %v1272_v25 }
 0x18e   : > { %v1277_v30 = vmax.f32 %v1269_v22, %v1273_v26  ;;  %v1278_v31 = vmax.f32 %v1270_v23, %v1274_v27  ;;  %v1279_v32 = vmax.f32 %v1271_v24, %v1275_v28 }
 0x18f   : > { %v1280_v33 = vmax.f32 %v1272_v25, %v1276_v29 }
 0x190   : > { %v1499_v34 = vpack.c.bf16 %v1278_v31, %v1277_v30 }
 0x191   : > { %v1504_v35 = vpack.c.bf16 %v1280_v33, %v1279_v32 }
 0x192   : > { %1500 = vst [vmem:[%s2149_s4] sm:$0xff] %v1499_v34  }
 0x193   : > { %1507 = vst [vmem:[%s2149_s4 + $0x8] sm:$0xff] %v1504_v35  }
 0x194 PF: > { %s14_s17 = sadd.s32 1, %s1797_s17   ;;  %s2150_s15 = smov %s1793_s16 }
 0x195   : > { %p11_p7 = scmp.ge.s32.totalorder %s14_s17, 4   ;;  %s2151_s16 = smov %s2153_s18 }
 0x197   :  { %13 = sbr.rel (!%p11_p7) target bundleno = 2 (0x2), region = 80 }

</bundles_post_ra>
